<compile_context>
chip_gen: v7x
topology: tpu7x:2x2x1
jax: 0.10.0
libtpu: 0.0.40
codegen_flags: <defaults>
</compile_context>

<pallas_src>
import math

import jax
import jax.numpy as jnp
from jax import lax
from jax.experimental import pallas as pl
from jax.experimental.pallas import tpu as pltpu


# ---------------------------------------------------------------------------
# tiling helpers
# ---------------------------------------------------------------------------
def _pick_bt(batch, max_bt=8):
    """Largest images-per-grid-step dividing `batch` that keeps >=2 grid steps
    (so the batch axis can still be split across v7x's two TensorCores)."""
    best = 1
    for bt in range(1, max_bt + 1):
        if batch % bt == 0 and batch // bt >= 2:
            best = bt
    return best


def _mlp_batch_tiles(batch):
    """(padded_batch, batch_tile) for the MLP head.  bf16 feat keeps a 256-row
    tile comfortably inside every generation's scoped VMEM."""
    if batch <= 256:
        b_pad = ((batch + 7) // 8) * 8
        return b_pad, b_pad
    b_pad = ((batch + 255) // 256) * 256
    return b_pad, 256


# ---------------------------------------------------------------------------
# conv1 wrapper-side im2col with rows grouped by 2x2-pool parity
# ---------------------------------------------------------------------------
def _im2col_pool_order(x_nhwc):
    """3x3 'same' im2col with rows grouped by 2x2-pool parity.

    (B, H, W, C) -> (B, 4, (H//2)*(W//2), 9*C) bf16 where
      block p = 2*hbit + wbit, row = h2*(W//2) + w2  <->  pixel (2*h2+hbit, 2*w2+wbit)
      col     = (dh*3 + dw)*C + c
    """
    B, H, W, C = x_nhwc.shape
    xp = jnp.pad(x_nhwc, ((0, 0), (1, 1), (1, 1), (0, 0)))
    taps = [xp[:, dh:dh + H, dw:dw + W, :] for dh in range(3) for dw in range(3)]
    t = jnp.concatenate(taps, axis=-1)                      # (B, H, W, 9C)
    t = t.reshape(B, H // 2, 2, W // 2, 2, 9 * C)           # (B, h2, hbit, w2, wbit, k)
    t = jnp.transpose(t, (0, 2, 4, 1, 3, 5))                # (B, hbit, wbit, h2, w2, k)
    return t.reshape(B, 4, (H // 2) * (W // 2), 9 * C).astype(jnp.bfloat16)


# ---------------------------------------------------------------------------
# fused conv1 + pool + conv2 + pool kernel (intermediates stay in VMEM)
# ---------------------------------------------------------------------------
def _make_conv_fused_kernel(bt):
    n_pool1 = 16 * 16      # conv1 pooled pixels per image
    Hc, Wc = 16, 16        # conv2 input spatial (== conv1 pooled map)
    Cin2, Cout2 = 32, 64
    W_OFF = 8              # sublane-aligned column offset of the halo interior

    def kernel(p_ref, w1_ref, b1_ref, w2_ref, b2_ref, feat_ref, a1pad, hscr):
        # p_ref : (bt, 4, 256, 27) bf16 conv1 im2col patches, parity-ordered
        # w1_ref: (27, 32) bf16   b1_ref: (1, 32) f32
        # w2_ref: (288, 64) bf16  b2_ref: (1, 64) f32
        # feat_ref: (bt, 64, 64) bf16, rows=(h2,w2), lanes=c
        # a1pad : VMEM (bt, 18, 32, 32) f32  zero-haloed conv1 output
        # hscr  : VMEM (bt*8, 16, 64) f32    conv2 h-pooled rows

        # ---- conv1 + 2x2 max-pool: one M=bt*1024 matmul, parity running max
        p = p_ref[...].reshape(bt * 4 * n_pool1, 27)
        y1 = jnp.dot(p, w1_ref[...], preferred_element_type=jnp.float32)
        y1 = y1.reshape(bt, 4, n_pool1, 32)
        m = jnp.maximum(jnp.maximum(y1[:, 0], y1[:, 1]),
                        jnp.maximum(y1[:, 2], y1[:, 3]))
        # bias + relu commute with the max-pool (per-channel, monotone)
        a1 = jnp.maximum(m + b1_ref[...], 0.0)               # (bt, 256, 32)

        # ---- conv2 'same' padding folded into the kernel: zero-halo scratch.
        # Interior at rows 1:17, cols 8:24 -> the write is sublane-aligned.
        a1pad[...] = jnp.zeros(a1pad.shape, a1pad.dtype)
        a1pad[:, 1:17, W_OFF:W_OFF + Wc, :] = a1.reshape(bt, Hc, Wc, Cin2)

        # ---- conv2: in-kernel im2col (9 taps -> one K=288 MXU pass)
        taps = []
        for dh in range(3):
            for dw in range(3):
                c0 = W_OFF - 1 + dw
                t = a1pad[:, dh:dh + Hc, c0:c0 + Wc, :]       # (bt,16,16,32)
                taps.append(t.reshape(bt * Hc * Wc, Cin2).astype(jnp.bfloat16))
        patch = jnp.concatenate(taps, axis=-1)                # (bt*256, 288)
        y2 = jnp.dot(patch, w2_ref[...],
                     preferred_element_type=jnp.float32)      # (bt*256, 64)

        # ---- 2x2 max-pool + bias + relu; h-pairs are aligned slab halves,
        # w-pairs via stride-2 sublane reads of a small scratch.
        v = y2.reshape(bt * 8, 2 * Wc, Cout2)
        hscr[...] = jnp.maximum(v[:, :Wc, :], v[:, Wc:, :])
        pooled = jnp.maximum(hscr[:, pl.ds(0, 8, 2), :],
                             hscr[:, pl.ds(1, 8, 2), :])      # (bt*8, 8, 64)
        out = jnp.maximum(pooled + b2_ref[...], 0.0)
        feat_ref[...] = out.reshape(bt, 64, 64).astype(feat_ref.dtype)

    return kernel


def conv_fused(patches, w1k, b1, w2k, b2):
    """patches: (B, 4, 256, 27) bf16 -> feat (B, 64, 64) bf16 (rows=(h2,w2))."""
    B = patches.shape[0]
    bt = _pick_bt(B)
    kernel = _make_conv_fused_kernel(bt)

    # explicit VMEM budget from lane-padded block bytes (+ headroom for
    # compiler temporaries); stays well under v7x's 64 MiB physical VMEM.
    lane = 128
    blk_in = bt * 4 * 256 * lane * 2          # bf16 patch block
    blk_out = bt * 64 * lane * 2              # bf16 feat block
    scratch = bt * 18 * 32 * lane * 4 + bt * 8 * 16 * lane * 4
    vmem = 2 * (blk_in + blk_out) + scratch + bt * (2 << 20) + (8 << 20)

    return pl.pallas_call(
        kernel,
        out_shape=jax.ShapeDtypeStruct((B, 64, 64), jnp.bfloat16),
        grid_spec=pltpu.PrefetchScalarGridSpec(
            num_scalar_prefetch=0,
            grid=(B // bt,),
            in_specs=[
                pl.BlockSpec((bt, 4, 256, 27), lambda i: (i, 0, 0, 0)),
                pl.BlockSpec((27, 32), lambda i: (0, 0)),
                pl.BlockSpec((1, 32), lambda i: (0, 0)),
                pl.BlockSpec((288, 64), lambda i: (0, 0)),
                pl.BlockSpec((1, 64), lambda i: (0, 0)),
            ],
            out_specs=pl.BlockSpec((bt, 64, 64), lambda i: (i, 0, 0)),
            scratch_shapes=[
                pltpu.VMEM((bt, 18, 32, 32), jnp.float32),   # haloed conv1 out
                pltpu.VMEM((bt * 8, 16, 64), jnp.float32),   # conv2 h-pool rows
            ],
        ),
        compiler_params=pltpu.CompilerParams(
            dimension_semantics=("parallel",),
            vmem_limit_bytes=int(vmem)),
    )(patches, w1k, b1, w2k, b2)


# ---------------------------------------------------------------------------
# fc1 + ReLU + fc2 + log_softmax fused kernel (batch-tiled, resident weights)
# ---------------------------------------------------------------------------
def _mlp_kernel(x_ref, w1_ref, b1_ref, w2_ref, b2_ref, o_ref):
    h = jnp.dot(x_ref[...], w1_ref[...],
                preferred_element_type=jnp.float32) + b1_ref[...]
    h = jnp.maximum(h, 0.0)
    logits = jnp.dot(h.astype(jnp.bfloat16), w2_ref[...],
                     preferred_element_type=jnp.float32) + b2_ref[...]
    m = jnp.max(logits, axis=-1, keepdims=True)
    s = logits - m
    lse = jnp.log(jnp.sum(jnp.exp(s), axis=-1, keepdims=True))
    o_ref[...] = (s - lse).astype(o_ref.dtype)


def mlp_head(feat, w1, b1, w2, b2):
    B, D = feat.shape
    H1 = w1.shape[1]
    K = w2.shape[1]
    b_pad, bm = _mlp_batch_tiles(B)
    if b_pad != B:
        feat = jnp.pad(feat, ((0, b_pad - B), (0, 0)))
    vmem = 2 * (bm * D * 2 + D * H1 * 2 + H1 * 128 * 2 + bm * 128 * 4) + (8 << 20)
    out = pl.pallas_call(
        _mlp_kernel,
        out_shape=jax.ShapeDtypeStruct((b_pad, K), jnp.float32),
        grid_spec=pltpu.PrefetchScalarGridSpec(
            num_scalar_prefetch=0,
            grid=(b_pad // bm,),
            in_specs=[
                pl.BlockSpec((bm, D), lambda i: (i, 0)),
                # constant index_maps: fc weights stay VMEM-resident across
                # batch tiles (no re-DMA of the 2 MiB bf16 w_fc1 per tile).
                pl.BlockSpec((D, H1), lambda i: (0, 0)),
                pl.BlockSpec((1, H1), lambda i: (0, 0)),
                pl.BlockSpec((H1, K), lambda i: (0, 0)),
                pl.BlockSpec((1, K), lambda i: (0, 0)),
            ],
            out_specs=pl.BlockSpec((bm, K), lambda i: (i, 0)),
        ),
        compiler_params=pltpu.CompilerParams(
            dimension_semantics=("parallel",),
            vmem_limit_bytes=int(vmem)),
    )(feat, w1, b1, w2, b2)
    return out[:B]


# ---------------------------------------------------------------------------
# Full CIFARNet forward
# ---------------------------------------------------------------------------
def cifarnet_forward(x_nchw, params):
    B = x_nchw.shape[0]
    # NCHW -> NHWC (channels-last, C on the lane axis)
    x = jnp.transpose(x_nchw, (0, 2, 3, 1)).astype(jnp.float32)

    # conv1 + relu + pool + conv2 + relu + pool, all in one kernel
    p1 = _im2col_pool_order(x)                            # (B, 4, 256, 27) bf16
    feat = conv_fused(p1, params["w1k"], params["b1"],
                      params["w2k"], params["b2"])        # (B, 64, 64) bf16

    # NHWC flatten; w_fc1 rows were pre-permuted to (h, w, c) order so no
    # runtime (0, 3, 1, 2) transpose is needed; the reshape is layout-free.
    feat = feat.reshape(B, 64 * 8 * 8)
    return mlp_head(feat, params["w_fc1"], params["b_fc1"],
                    params["w_fc2"], params["b_fc2"])


# ---------------------------------------------------------------------------
# Deterministic synthetic parameters (shapes per CIFARNet.__init__)
# ---------------------------------------------------------------------------
def init_params(key):
    ks = jax.random.split(key, 8)

    def nrm(k, shape, fan_in):
        return jax.random.normal(k, shape, jnp.float32) / math.sqrt(fan_in)

    return {
        "w_conv1": nrm(ks[0], (3, 3, 3, 32), 27),            # HWIO
        "b_conv1": nrm(ks[1], (32,), 27),
        "w_conv2": nrm(ks[2], (3, 3, 32, 64), 288),           # HWIO
        "b_conv2": nrm(ks[3], (64,), 288),
        "w_fc1": nrm(ks[4], (64 * 8 * 8, 256), 64 * 8 * 8),   # rows in (C,H,W) order
        "b_fc1": nrm(ks[5], (256,), 64 * 8 * 8),
        "w_fc2": nrm(ks[6], (256, 10), 256),
        "b_fc2": nrm(ks[7], (10,), 256),
    }


def prepare_params(raw):
    """One-time layout/dtype prep: bf16 MXU operands, K-packed conv weights,
    fc1 rows permuted from PyTorch's (C, H, W) flatten order to (H, W, C)."""
    w_fc1_hwc = (raw["w_fc1"].reshape(64, 8, 8, 256)
                 .transpose(1, 2, 0, 3).reshape(64 * 8 * 8, 256))
    return {
        "w1k": raw["w_conv1"].reshape(27, 32).astype(jnp.bfloat16),
        "b1": raw["b_conv1"].reshape(1, 32).astype(jnp.float32),
        "w2k": raw["w_conv2"].reshape(288, 64).astype(jnp.bfloat16),
        "b2": raw["b_conv2"].reshape(1, 64).astype(jnp.float32),
        "w_fc1": w_fc1_hwc.astype(jnp.bfloat16),
        "b_fc1": raw["b_fc1"].reshape(1, 256).astype(jnp.float32),
        "w_fc2": raw["w_fc2"].astype(jnp.bfloat16),
        "b_fc2": raw["b_fc2"].reshape(1, 10).astype(jnp.float32),
    }


# ---------------------------------------------------------------------------
# Pure-JAX (f32, HIGHEST) reference for sanity checking
# ---------------------------------------------------------------------------
def reference_forward(x_nchw, raw):
    x = jnp.transpose(x_nchw, (0, 2, 3, 1)).astype(jnp.float32)
    dn = ("NHWC", "HWIO", "NHWC")

    def block(x, w, b):
        y = lax.conv_general_dilated(x, w, (1, 1), "SAME",
                                     dimension_numbers=dn,
                                     precision=lax.Precision.HIGHEST) + b
        y = jnp.maximum(y, 0.0)
        return lax.reduce_window(y, -jnp.inf, lax.max,
                                 (1, 2, 2, 1), (1, 2, 2, 1), "VALID")

    x = block(x, raw["w_conv1"], raw["b_conv1"])
    x = block(x, raw["w_conv2"], raw["b_conv2"])
    B = x.shape[0]
    feat = jnp.transpose(x, (0, 3, 1, 2)).reshape(B, 64 * 8 * 8)
    h = jnp.maximum(feat @ raw["w_fc1"] + raw["b_fc1"], 0.0)
    logits = h @ raw["w_fc2"] + raw["b_fc2"]
    return jax.nn.log_softmax(logits, axis=1)


if __name__ == "__main__":
    key = jax.random.PRNGKey(0)
    k_param, k_x = jax.random.split(key)
    raw = init_params(k_param)
    params = prepare_params(raw)

    # fc1 expects 64*8*8 features => spatial must be 32x32; batch=4 exercises
    # both the multi-image-per-step path (bt=2) and a 2-step "parallel" grid.
    x = jax.random.normal(k_x, (4, 3, 32, 32), jnp.float32)

    out = jax.jit(cifarnet_forward)(x, params)
    out = jax.block_until_ready(out)

    assert out.shape == (4, 10), out.shape
    assert bool(jnp.all(jnp.isfinite(out)))
    # log_softmax rows should sum (in prob space) to ~1
    assert bool(jnp.allclose(jnp.sum(jnp.exp(out), axis=1), 1.0, atol=1e-3))

    ref = reference_forward(x, raw)
    err = float(jnp.max(jnp.abs(out - ref)))
    # bf16 MXU operands with f32 accumulation: expect ~1e-2 absolute error.
    assert err < 7.5e-2, ("mismatch vs f32 reference, max abs err", err)

    print("KERNEL_OK")
</pallas_src>

<mosaic_0001>
module attributes {stable_mosaic.version = 11 : i64} {
  func.func @kernel(%arg0: i32, %arg1: memref<2x4x256x27xbf16, #tpu.memory_space<vmem>>, %arg2: memref<27x32xbf16, #tpu.memory_space<vmem>>, %arg3: memref<1x32xf32, #tpu.memory_space<vmem>>, %arg4: memref<288x64xbf16, #tpu.memory_space<vmem>>, %arg5: memref<1x64xf32, #tpu.memory_space<vmem>>, %arg6: memref<2x64x64xbf16, #tpu.memory_space<vmem>>, %arg7: memref<2x18x32x32xf32, #tpu.memory_space<vmem>>, %arg8: memref<16x16x64xf32, #tpu.memory_space<vmem>>) attributes {dimension_semantics = [#tpu.dimension_semantics<parallel>], iteration_bounds = array<i64: 2>, scalar_prefetch = 0 : i64, scratch_operands = 2 : i64, tpu.core_type = #tpu.core_type<tc>, window_params = [{transform_indices = @transform_0, window_bounds = array<i64: 2, 4, 256, 27>}, {pipeline_mode = #tpu.pipeline_mode<synchronous>, transform_indices = @transform_1, window_bounds = array<i64: 27, 32>}, {pipeline_mode = #tpu.pipeline_mode<synchronous>, transform_indices = @transform_2, window_bounds = array<i64: 1, 32>}, {pipeline_mode = #tpu.pipeline_mode<synchronous>, transform_indices = @transform_3, window_bounds = array<i64: 288, 64>}, {pipeline_mode = #tpu.pipeline_mode<synchronous>, transform_indices = @transform_4, window_bounds = array<i64: 1, 64>}, {transform_indices = @transform_5, window_bounds = array<i64: 2, 64, 64>}]} {
    %c0 = arith.constant 0 : index
    %c0_0 = arith.constant 0 : index
    %c0_1 = arith.constant 0 : index
    %c0_2 = arith.constant 0 : index
    %0 = vector.load %arg1[%c0, %c0_0, %c0_1, %c0_2] : memref<2x4x256x27xbf16, #tpu.memory_space<vmem>>, vector<2x4x256x27xbf16>
    %1 = vector.shape_cast %0 : vector<2x4x256x27xbf16> to vector<2048x27xbf16>
    %c0_3 = arith.constant 0 : index
    %c0_4 = arith.constant 0 : index
    %2 = vector.load %arg2[%c0_3, %c0_4] : memref<27x32xbf16, #tpu.memory_space<vmem>>, vector<27x32xbf16>
    %cst = arith.constant dense<0.000000e+00> : vector<2048x32xf32>
    %3 = tpu.matmul %1, %2, %cst {dimension_numbers = #tpu.dot_dimension_numbers<[1], [0], [0], [1], [0, 0, 1, 1], [], []>} : vector<2048x27xbf16>, vector<27x32xbf16>, vector<2048x32xf32> -> vector<2048x32xf32>
    %4 = vector.shape_cast %3 : vector<2048x32xf32> to vector<2x4x256x32xf32>
    %5 = vector.extract_strided_slice %4 {offsets = [0, 0, 0, 0], sizes = [2, 1, 256, 32], strides = [1, 1, 1, 1]} : vector<2x4x256x32xf32> to vector<2x1x256x32xf32>
    %6 = vector.shape_cast %5 : vector<2x1x256x32xf32> to vector<2x256x32xf32>
    %7 = vector.extract_strided_slice %4 {offsets = [0, 1, 0, 0], sizes = [2, 1, 256, 32], strides = [1, 1, 1, 1]} : vector<2x4x256x32xf32> to vector<2x1x256x32xf32>
    %8 = vector.shape_cast %7 : vector<2x1x256x32xf32> to vector<2x256x32xf32>
    %9 = arith.maximumf %6, %8 : vector<2x256x32xf32>
    %10 = vector.extract_strided_slice %4 {offsets = [0, 2, 0, 0], sizes = [2, 1, 256, 32], strides = [1, 1, 1, 1]} : vector<2x4x256x32xf32> to vector<2x1x256x32xf32>
    %11 = vector.shape_cast %10 : vector<2x1x256x32xf32> to vector<2x256x32xf32>
    %12 = vector.extract_strided_slice %4 {offsets = [0, 3, 0, 0], sizes = [2, 1, 256, 32], strides = [1, 1, 1, 1]} : vector<2x4x256x32xf32> to vector<2x1x256x32xf32>
    %13 = vector.shape_cast %12 : vector<2x1x256x32xf32> to vector<2x256x32xf32>
    %14 = arith.maximumf %11, %13 : vector<2x256x32xf32>
    %15 = arith.maximumf %9, %14 : vector<2x256x32xf32>
    %c0_5 = arith.constant 0 : index
    %c0_6 = arith.constant 0 : index
    %16 = vector.load %arg3[%c0_5, %c0_6] : memref<1x32xf32, #tpu.memory_space<vmem>>, vector<1x32xf32>
    %17 = vector.shape_cast %16 : vector<1x32xf32> to vector<1x1x32xf32>
    %18 = vector.broadcast %17 : vector<1x1x32xf32> to vector<2x256x32xf32>
    %19 = arith.addf %15, %18 : vector<2x256x32xf32>
    %cst_7 = arith.constant 0.000000e+00 : f32
    %20 = vector.broadcast %cst_7 : f32 to vector<2x256x32xf32>
    %21 = arith.maximumf %19, %20 : vector<2x256x32xf32>
    %cst_8 = arith.constant 0.000000e+00 : f32
    %22 = vector.broadcast %cst_8 : f32 to vector<2x18x32x32xf32>
    %c0_9 = arith.constant 0 : index
    %c0_10 = arith.constant 0 : index
    %c0_11 = arith.constant 0 : index
    %c0_12 = arith.constant 0 : index
    %23 = vector.load %arg7[%c0_9, %c0_10, %c0_11, %c0_12] : memref<2x18x32x32xf32, #tpu.memory_space<vmem>>, vector<2x18x32x32xf32>
    tpu.vector_store %arg7[%c0_9, %c0_10, %c0_11, %c0_12], %22 {strides = array<i32>} : memref<2x18x32x32xf32, #tpu.memory_space<vmem>>, vector<2x18x32x32xf32>,
    %24 = vector.shape_cast %21 : vector<2x256x32xf32> to vector<2x16x16x32xf32>
    %c0_13 = arith.constant 0 : index
    %c1 = arith.constant 1 : index
    %c8 = arith.constant 8 : index
    %c0_14 = arith.constant 0 : index
    %25 = vector.load %arg7[%c0_13, %c1, %c8, %c0_14] : memref<2x18x32x32xf32, #tpu.memory_space<vmem>>, vector<2x16x16x32xf32>
    tpu.vector_store %arg7[%c0_13, %c1, %c8, %c0_14], %24 {strides = array<i32>} : memref<2x18x32x32xf32, #tpu.memory_space<vmem>>, vector<2x16x16x32xf32>,
    %c0_15 = arith.constant 0 : index
    %c0_16 = arith.constant 0 : index
    %c7 = arith.constant 7 : index
    %c0_17 = arith.constant 0 : index
    %26 = vector.load %arg7[%c0_15, %c0_16, %c7, %c0_17] : memref<2x18x32x32xf32, #tpu.memory_space<vmem>>, vector<2x16x16x32xf32>
    %27 = vector.shape_cast %26 : vector<2x16x16x32xf32> to vector<512x32xf32>
    %28 = arith.truncf %27 : vector<512x32xf32> to vector<512x32xbf16>
    %c0_18 = arith.constant 0 : index
    %c0_19 = arith.constant 0 : index
    %c8_20 = arith.constant 8 : index
    %c0_21 = arith.constant 0 : index
    %29 = vector.load %arg7[%c0_18, %c0_19, %c8_20, %c0_21] : memref<2x18x32x32xf32, #tpu.memory_space<vmem>>, vector<2x16x16x32xf32>
    %30 = vector.shape_cast %29 : vector<2x16x16x32xf32> to vector<512x32xf32>
    %31 = arith.truncf %30 : vector<512x32xf32> to vector<512x32xbf16>
    %c0_22 = arith.constant 0 : index
    %c0_23 = arith.constant 0 : index
    %c9 = arith.constant 9 : index
    %c0_24 = arith.constant 0 : index
    %32 = vector.load %arg7[%c0_22, %c0_23, %c9, %c0_24] : memref<2x18x32x32xf32, #tpu.memory_space<vmem>>, vector<2x16x16x32xf32>
    %33 = vector.shape_cast %32 : vector<2x16x16x32xf32> to vector<512x32xf32>
    %34 = arith.truncf %33 : vector<512x32xf32> to vector<512x32xbf16>
    %c0_25 = arith.constant 0 : index
    %c1_26 = arith.constant 1 : index
    %c7_27 = arith.constant 7 : index
    %c0_28 = arith.constant 0 : index
    %35 = vector.load %arg7[%c0_25, %c1_26, %c7_27, %c0_28] : memref<2x18x32x32xf32, #tpu.memory_space<vmem>>, vector<2x16x16x32xf32>
    %36 = vector.shape_cast %35 : vector<2x16x16x32xf32> to vector<512x32xf32>
    %37 = arith.truncf %36 : vector<512x32xf32> to vector<512x32xbf16>
    %c0_29 = arith.constant 0 : index
    %c1_30 = arith.constant 1 : index
    %c8_31 = arith.constant 8 : index
    %c0_32 = arith.constant 0 : index
    %38 = vector.load %arg7[%c0_29, %c1_30, %c8_31, %c0_32] : memref<2x18x32x32xf32, #tpu.memory_space<vmem>>, vector<2x16x16x32xf32>
    %39 = vector.shape_cast %38 : vector<2x16x16x32xf32> to vector<512x32xf32>
    %40 = arith.truncf %39 : vector<512x32xf32> to vector<512x32xbf16>
    %c0_33 = arith.constant 0 : index
    %c1_34 = arith.constant 1 : index
    %c9_35 = arith.constant 9 : index
    %c0_36 = arith.constant 0 : index
    %41 = vector.load %arg7[%c0_33, %c1_34, %c9_35, %c0_36] : memref<2x18x32x32xf32, #tpu.memory_space<vmem>>, vector<2x16x16x32xf32>
    %42 = vector.shape_cast %41 : vector<2x16x16x32xf32> to vector<512x32xf32>
    %43 = arith.truncf %42 : vector<512x32xf32> to vector<512x32xbf16>
    %c0_37 = arith.constant 0 : index
    %c2 = arith.constant 2 : index
    %c7_38 = arith.constant 7 : index
    %c0_39 = arith.constant 0 : index
    %44 = vector.load %arg7[%c0_37, %c2, %c7_38, %c0_39] : memref<2x18x32x32xf32, #tpu.memory_space<vmem>>, vector<2x16x16x32xf32>
    %45 = vector.shape_cast %44 : vector<2x16x16x32xf32> to vector<512x32xf32>
    %46 = arith.truncf %45 : vector<512x32xf32> to vector<512x32xbf16>
    %c0_40 = arith.constant 0 : index
    %c2_41 = arith.constant 2 : index
    %c8_42 = arith.constant 8 : index
    %c0_43 = arith.constant 0 : index
    %47 = vector.load %arg7[%c0_40, %c2_41, %c8_42, %c0_43] : memref<2x18x32x32xf32, #tpu.memory_space<vmem>>, vector<2x16x16x32xf32>
    %48 = vector.shape_cast %47 : vector<2x16x16x32xf32> to vector<512x32xf32>
    %49 = arith.truncf %48 : vector<512x32xf32> to vector<512x32xbf16>
    %c0_44 = arith.constant 0 : index
    %c2_45 = arith.constant 2 : index
    %c9_46 = arith.constant 9 : index
    %c0_47 = arith.constant 0 : index
    %50 = vector.load %arg7[%c0_44, %c2_45, %c9_46, %c0_47] : memref<2x18x32x32xf32, #tpu.memory_space<vmem>>, vector<2x16x16x32xf32>
    %51 = vector.shape_cast %50 : vector<2x16x16x32xf32> to vector<512x32xf32>
    %52 = arith.truncf %51 : vector<512x32xf32> to vector<512x32xbf16>
    %53 = tpu.concatenate %28, %31, %34, %37, %40, %43, %46, %49, %52 in 1 : vector<512x32xbf16>, vector<512x32xbf16>, vector<512x32xbf16>, vector<512x32xbf16>, vector<512x32xbf16>, vector<512x32xbf16>, vector<512x32xbf16>, vector<512x32xbf16>, vector<512x32xbf16> -> vector<512x288xbf16>
    %c0_48 = arith.constant 0 : index
    %c0_49 = arith.constant 0 : index
    %54 = vector.load %arg4[%c0_48, %c0_49] : memref<288x64xbf16, #tpu.memory_space<vmem>>, vector<288x64xbf16>
    %cst_50 = arith.constant dense<0.000000e+00> : vector<512x64xf32>
    %55 = tpu.matmul %53, %54, %cst_50 {dimension_numbers = #tpu.dot_dimension_numbers<[1], [0], [0], [1], [0, 0, 1, 1], [], []>} : vector<512x288xbf16>, vector<288x64xbf16>, vector<512x64xf32> -> vector<512x64xf32>
    %56 = vector.shape_cast %55 : vector<512x64xf32> to vector<16x32x64xf32>
    %57 = vector.extract_strided_slice %56 {offsets = [0, 0, 0], sizes = [16, 16, 64], strides = [1, 1, 1]} : vector<16x32x64xf32> to vector<16x16x64xf32>
    %58 = vector.extract_strided_slice %56 {offsets = [0, 16, 0], sizes = [16, 16, 64], strides = [1, 1, 1]} : vector<16x32x64xf32> to vector<16x16x64xf32>
    %59 = arith.maximumf %57, %58 : vector<16x16x64xf32>
    %c0_51 = arith.constant 0 : index
    %c0_52 = arith.constant 0 : index
    %c0_53 = arith.constant 0 : index
    %60 = vector.load %arg8[%c0_51, %c0_52, %c0_53] : memref<16x16x64xf32, #tpu.memory_space<vmem>>, vector<16x16x64xf32>
    tpu.vector_store %arg8[%c0_51, %c0_52, %c0_53], %59 {strides = array<i32>} : memref<16x16x64xf32, #tpu.memory_space<vmem>>, vector<16x16x64xf32>,
    %c0_54 = arith.constant 0 : index
    %c0_55 = arith.constant 0 : index
    %c0_56 = arith.constant 0 : index
    %61 = tpu.strided_load %arg8[%c0_54, %c0_55, %c0_56] {strides = array<i32: 1, 2, 1>} : memref<16x16x64xf32, #tpu.memory_space<vmem>>, vector<16x8x64xf32>
    %c0_57 = arith.constant 0 : index
    %c1_58 = arith.constant 1 : index
    %c0_59 = arith.constant 0 : index
    %62 = tpu.strided_load %arg8[%c0_57, %c1_58, %c0_59] {strides = array<i32: 1, 2, 1>} : memref<16x16x64xf32, #tpu.memory_space<vmem>>, vector<16x8x64xf32>
    %63 = arith.maximumf %61, %62 : vector<16x8x64xf32>
    %c0_60 = arith.constant 0 : index
    %c0_61 = arith.constant 0 : index
    %64 = vector.load %arg5[%c0_60, %c0_61] : memref<1x64xf32, #tpu.memory_space<vmem>>, vector<1x64xf32>
    %65 = vector.shape_cast %64 : vector<1x64xf32> to vector<1x1x64xf32>
    %66 = vector.broadcast %65 : vector<1x1x64xf32> to vector<16x8x64xf32>
    %67 = arith.addf %63, %66 : vector<16x8x64xf32>
    %cst_62 = arith.constant 0.000000e+00 : f32
    %68 = vector.broadcast %cst_62 : f32 to vector<16x8x64xf32>
    %69 = arith.maximumf %67, %68 : vector<16x8x64xf32>
    %70 = vector.shape_cast %69 : vector<16x8x64xf32> to vector<2x64x64xf32>
    %71 = arith.truncf %70 : vector<2x64x64xf32> to vector<2x64x64xbf16>
    %c0_63 = arith.constant 0 : index
    %c0_64 = arith.constant 0 : index
    %c0_65 = arith.constant 0 : index
    %72 = vector.load %arg6[%c0_63, %c0_64, %c0_65] : memref<2x64x64xbf16, #tpu.memory_space<vmem>>, vector<2x64x64xbf16>
    tpu.vector_store %arg6[%c0_63, %c0_64, %c0_65], %71 {strides = array<i32>} : memref<2x64x64xbf16, #tpu.memory_space<vmem>>, vector<2x64x64xbf16>,
    return
  }
  func.func @transform_0(%arg0: i32) -> (i32, i32, i32, i32) {
    %c0_i32 = arith.constant 0 : i32
    %c0_i32_0 = arith.constant 0 : i32
    %c0_i32_1 = arith.constant 0 : i32
    %c0_i32_2 = arith.constant 0 : i32
    return %arg0, %c0_i32, %c0_i32_0, %c0_i32_1 : i32, i32, i32, i32
  }
  func.func @transform_1(%arg0: i32) -> (i32, i32) {
    %c0_i32 = arith.constant 0 : i32
    %c0_i32_0 = arith.constant 0 : i32
    %c0_i32_1 = arith.constant 0 : i32
    return %c0_i32, %c0_i32_0 : i32, i32
  }
  func.func @transform_2(%arg0: i32) -> (i32, i32) {
    %c0_i32 = arith.constant 0 : i32
    %c0_i32_0 = arith.constant 0 : i32
    %c0_i32_1 = arith.constant 0 : i32
    return %c0_i32, %c0_i32_0 : i32, i32
  }
  func.func @transform_3(%arg0: i32) -> (i32, i32) {
    %c0_i32 = arith.constant 0 : i32
    %c0_i32_0 = arith.constant 0 : i32
    %c0_i32_1 = arith.constant 0 : i32
    return %c0_i32, %c0_i32_0 : i32, i32
  }
  func.func @transform_4(%arg0: i32) -> (i32, i32) {
    %c0_i32 = arith.constant 0 : i32
    %c0_i32_0 = arith.constant 0 : i32
    %c0_i32_1 = arith.constant 0 : i32
    return %c0_i32, %c0_i32_0 : i32, i32
  }
  func.func @transform_5(%arg0: i32) -> (i32, i32, i32) {
    %c0_i32 = arith.constant 0 : i32
    %c0_i32_0 = arith.constant 0 : i32
    %c0_i32_1 = arith.constant 0 : i32
    return %arg0, %c0_i32, %c0_i32_0 : i32, i32, i32
  }
}

module attributes {stable_mosaic.version = 11 : i64} {
  func.func @_mlp_kernel(%arg0: i32, %arg1: memref<8x4096xbf16, #tpu.memory_space<vmem>>, %arg2: memref<4096x256xbf16, #tpu.memory_space<vmem>>, %arg3: memref<1x256xf32, #tpu.memory_space<vmem>>, %arg4: memref<256x10xbf16, #tpu.memory_space<vmem>>, %arg5: memref<1x10xf32, #tpu.memory_space<vmem>>, %arg6: memref<8x10xf32, #tpu.memory_space<vmem>>) attributes {dimension_semantics = [#tpu.dimension_semantics<parallel>], iteration_bounds = array<i64: 1>, scalar_prefetch = 0 : i64, scratch_operands = 0 : i64, tpu.core_type = #tpu.core_type<tc>, window_params = [{transform_indices = @transform_0, window_bounds = array<i64: 8, 4096>}, {pipeline_mode = #tpu.pipeline_mode<synchronous>, transform_indices = @transform_1, window_bounds = array<i64: 4096, 256>}, {pipeline_mode = #tpu.pipeline_mode<synchronous>, transform_indices = @transform_2, window_bounds = array<i64: 1, 256>}, {pipeline_mode = #tpu.pipeline_mode<synchronous>, transform_indices = @transform_3, window_bounds = array<i64: 256, 10>}, {pipeline_mode = #tpu.pipeline_mode<synchronous>, transform_indices = @transform_4, window_bounds = array<i64: 1, 10>}, {transform_indices = @transform_5, window_bounds = array<i64: 8, 10>}]} {
    %c0 = arith.constant 0 : index
    %c0_0 = arith.constant 0 : index
    %0 = vector.load %arg1[%c0, %c0_0] : memref<8x4096xbf16, #tpu.memory_space<vmem>>, vector<8x4096xbf16>
    %c0_1 = arith.constant 0 : index
    %c0_2 = arith.constant 0 : index
    %1 = vector.load %arg2[%c0_1, %c0_2] : memref<4096x256xbf16, #tpu.memory_space<vmem>>, vector<4096x256xbf16>
    %cst = arith.constant dense<0.000000e+00> : vector<8x256xf32>
    %2 = tpu.matmul %0, %1, %cst {dimension_numbers = #tpu.dot_dimension_numbers<[1], [0], [0], [1], [0, 0, 1, 1], [], []>} : vector<8x4096xbf16>, vector<4096x256xbf16>, vector<8x256xf32> -> vector<8x256xf32>
    %c0_3 = arith.constant 0 : index
    %c0_4 = arith.constant 0 : index
    %3 = vector.load %arg3[%c0_3, %c0_4] : memref<1x256xf32, #tpu.memory_space<vmem>>, vector<1x256xf32>
    %4 = vector.broadcast %3 : vector<1x256xf32> to vector<8x256xf32>
    %5 = arith.addf %2, %4 : vector<8x256xf32>
    %cst_5 = arith.constant 0.000000e+00 : f32
    %6 = vector.broadcast %cst_5 : f32 to vector<8x256xf32>
    %7 = arith.maximumf %5, %6 : vector<8x256xf32>
    %8 = arith.truncf %7 : vector<8x256xf32> to vector<8x256xbf16>
    %c0_6 = arith.constant 0 : index
    %c0_7 = arith.constant 0 : index
    %9 = vector.load %arg4[%c0_6, %c0_7] : memref<256x10xbf16, #tpu.memory_space<vmem>>, vector<256x10xbf16>
    %cst_8 = arith.constant dense<0.000000e+00> : vector<8x10xf32>
    %10 = tpu.matmul %8, %9, %cst_8 {dimension_numbers = #tpu.dot_dimension_numbers<[1], [0], [0], [1], [0, 0, 1, 1], [], []>} : vector<8x256xbf16>, vector<256x10xbf16>, vector<8x10xf32> -> vector<8x10xf32>
    %c0_9 = arith.constant 0 : index
    %c0_10 = arith.constant 0 : index
    %11 = vector.load %arg5[%c0_9, %c0_10] : memref<1x10xf32, #tpu.memory_space<vmem>>, vector<1x10xf32>
    %12 = vector.broadcast %11 : vector<1x10xf32> to vector<8x10xf32>
    %13 = arith.addf %10, %12 : vector<8x10xf32>
    %cst_11 = arith.constant dense<0xFF800000> : vector<8xf32>
    %14 = vector.multi_reduction <maximumf>, %13, %cst_11 [1] : vector<8x10xf32> to vector<8xf32>
    %15 = vector.shape_cast %14 : vector<8xf32> to vector<8x1xf32>
    %16 = vector.broadcast %15 : vector<8x1xf32> to vector<8x10xf32>
    %17 = arith.subf %13, %16 : vector<8x10xf32>
    %18 = math.exp %17 : vector<8x10xf32>
    %cst_12 = arith.constant dense<0.000000e+00> : vector<8xf32>
    %19 = vector.multi_reduction <add>, %18, %cst_12 [1] : vector<8x10xf32> to vector<8xf32>
    %20 = vector.shape_cast %19 : vector<8xf32> to vector<8x1xf32>
    %21 = math.log %20 : vector<8x1xf32>
    %22 = vector.broadcast %21 : vector<8x1xf32> to vector<8x10xf32>
    %23 = arith.subf %17, %22 : vector<8x10xf32>
    %c0_13 = arith.constant 0 : index
    %c0_14 = arith.constant 0 : index
    %24 = vector.load %arg6[%c0_13, %c0_14] : memref<8x10xf32, #tpu.memory_space<vmem>>, vector<8x10xf32>
    tpu.vector_store %arg6[%c0_13, %c0_14], %23 {strides = array<i32>} : memref<8x10xf32, #tpu.memory_space<vmem>>, vector<8x10xf32>,
    return
  }
  func.func @transform_0(%arg0: i32) -> (i32, i32) {
    %c0_i32 = arith.constant 0 : i32
    %c0_i32_0 = arith.constant 0 : i32
    return %arg0, %c0_i32 : i32, i32
  }
  func.func @transform_1(%arg0: i32) -> (i32, i32) {
    %c0_i32 = arith.constant 0 : i32
    %c0_i32_0 = arith.constant 0 : i32
    %c0_i32_1 = arith.constant 0 : i32
    return %c0_i32, %c0_i32_0 : i32, i32
  }
  func.func @transform_2(%arg0: i32) -> (i32, i32) {
    %c0_i32 = arith.constant 0 : i32
    %c0_i32_0 = arith.constant 0 : i32
    %c0_i32_1 = arith.constant 0 : i32
    return %c0_i32, %c0_i32_0 : i32, i32
  }
  func.func @transform_3(%arg0: i32) -> (i32, i32) {
    %c0_i32 = arith.constant 0 : i32
    %c0_i32_0 = arith.constant 0 : i32
    %c0_i32_1 = arith.constant 0 : i32
    return %c0_i32, %c0_i32_0 : i32, i32
  }
  func.func @transform_4(%arg0: i32) -> (i32, i32) {
    %c0_i32 = arith.constant 0 : i32
    %c0_i32_0 = arith.constant 0 : i32
    %c0_i32_1 = arith.constant 0 : i32
    return %c0_i32, %c0_i32_0 : i32, i32
  }
  func.func @transform_5(%arg0: i32) -> (i32, i32) {
    %c0_i32 = arith.constant 0 : i32
    %c0_i32_0 = arith.constant 0 : i32
    return %arg0, %c0_i32 : i32, i32
  }
}

</mosaic_0001>

<bundles_post_ra>
// kernel: cifarnet_forward.3
= control target key start
LH: loop header
LB: loop body
LE: loop exit
PB: predicated region body
PF: predicated region fallthrough
CT: control target
= control target key end

     0   :  { %vm4068_vm0 = vcmask 80896   ;;  %s7307_s1 = inlined_call_operand.vmem [shape: bf16[4096,256], index: 1, kind: input, shape index: {}]   ;;  %s7308_s0 = inlined_call_operand.vmem [shape: bf16[8,4096], index: 0, kind: input, shape index: {}]   ;;  %s7309_s3 = inlined_call_operand.vmem [shape: bf16[256,10], index: 3, kind: input, shape index: {}]   ;;  %s7310_s2 = inlined_call_operand.vmem [shape: f32[1,256], index: 2, kind: input, shape index: {}]   ;;  %s7311_s4 = inlined_call_operand.vmem [shape: f32[1,10], index: 4, kind: input, shape index: {}]   ;;  %s7312_s5 = inlined_call_operand.vmem [shape: f32[8,10], index: 5, kind: output, shape index: {}]  }
   0x1   :  { %v4729_v0 = vld [vmem:[%s7307_s1 + $0x4] ss:$8 sps:$4 sm:$0xff]   ;;  %v4733_v2 = vld [vmem:[%s7307_s1] ss:$8 sps:$4 sm:$0xff]   ;;  %v4735_v4 = vld [vmem:[%s7307_s1 + $0x14] ss:$8 sps:$4 sm:$0xff]  }
   0x2   :  { %v4731_v1 = vld [vmem:[%s7307_s1 + $0x804] ss:$8 sps:$4 sm:$0xff]   ;;  %3233 = vmatprep.subr.bf16.mxu1 %v4729_v0  ;;  %v4734_v3 = vld [vmem:[%s7307_s1 + $0x800] ss:$8 sps:$4 sm:$0xff]   ;;  %v4737_v5 = vld [vmem:[%s7307_s1 + $0x814] ss:$8 sps:$4 sm:$0xff]  }
   0x3   :  { %3561 = vmatprep.subr.bf16.mxu0 %v4731_v1  ;;  %3234 = vmatpush1.bf16.msra.mxu1 %v4733_v2  ;;  %v4739_v6 = vld [vmem:[%s7307_s1 + $0x10] ss:$8 sps:$4 sm:$0xff]   ;;  %v4741_v8 = vld [vmem:[%s7307_s1 + $0x24] ss:$8 sps:$4 sm:$0xff]   ;;  %v4745_v10 = vld [vmem:[%s7307_s1 + $0x20] ss:$8 sps:$4 sm:$0xff]  }
   0x4   :  { %3562 = vmatpush1.bf16.msra.mxu0 %v4734_v3  ;;  %3235 = vmatprep.subr.bf16.mxu1 %v4735_v4  ;;  %v4740_v7 = vld [vmem:[%s7307_s1 + $0x810] ss:$8 sps:$4 sm:$0xff]   ;;  %v4743_v9 = vld [vmem:[%s7307_s1 + $0x824] ss:$8 sps:$4 sm:$0xff]   ;;  %v4746_v11 = vld [vmem:[%s7307_s1 + $0x820] ss:$8 sps:$4 sm:$0xff]  }
   0x5   :  { %3563 = vmatprep.subr.bf16.mxu0 %v4737_v5  ;;  %v4747_v12 = vld [vmem:[%s7307_s1 + $0x34] ss:$8 sps:$4 sm:$0xff]   ;;  %v4751_v14 = vld [vmem:[%s7307_s1 + $0x30] ss:$8 sps:$4 sm:$0xff]   ;;  %v4753_v16 = vld [vmem:[%s7307_s1 + $0x44] ss:$8 sps:$4 sm:$0xff]  }
   0x6   :  { %v4749_v13 = vld [vmem:[%s7307_s1 + $0x834] ss:$8 sps:$4 sm:$0xff]   ;;  %v4752_v15 = vld [vmem:[%s7307_s1 + $0x830] ss:$8 sps:$4 sm:$0xff]   ;;  %v4755_v17 = vld [vmem:[%s7307_s1 + $0x844] ss:$8 sps:$4 sm:$0xff]  }
   0x7   :  { %3236 = vmatpush1.bf16.msra.mxu1 %v4739_v6  ;;  %v4757_v18 = vld [vmem:[%s7307_s1 + $0x40] ss:$8 sps:$4 sm:$0xff]   ;;  %v4759_v20 = vld [vmem:[%s7307_s1 + $0x54] ss:$8 sps:$4 sm:$0xff]   ;;  %v4763_v22 = vld [vmem:[%s7307_s1 + $0x50] ss:$8 sps:$4 sm:$0xff]  }
   0x8   :  { %3564 = vmatpush1.bf16.msra.mxu0 %v4740_v7  ;;  %3237 = vmatprep.subr.bf16.mxu1 %v4741_v8  ;;  %v4758_v19 = vld [vmem:[%s7307_s1 + $0x840] ss:$8 sps:$4 sm:$0xff]   ;;  %v4761_v21 = vld [vmem:[%s7307_s1 + $0x854] ss:$8 sps:$4 sm:$0xff]   ;;  %v4764_v23 = vld [vmem:[%s7307_s1 + $0x850] ss:$8 sps:$4 sm:$0xff]  }
   0x9   :  { %3565 = vmatprep.subr.bf16.mxu0 %v4743_v9  ;;  %v4765_v24 = vld [vmem:[%s7307_s1 + $0x64] ss:$8 sps:$4 sm:$0xff]   ;;  %v4769_v26 = vld [vmem:[%s7307_s1 + $0x60] ss:$8 sps:$4 sm:$0xff]   ;;  %v4771_v28 = vld [vmem:[%s7307_s1 + $0x74] ss:$8 sps:$4 sm:$0xff]  }
   0xa   :  { %v4767_v25 = vld [vmem:[%s7307_s1 + $0x864] ss:$8 sps:$4 sm:$0xff]   ;;  %v4770_v27 = vld [vmem:[%s7307_s1 + $0x860] ss:$8 sps:$4 sm:$0xff]   ;;  %v4773_v29 = vld [vmem:[%s7307_s1 + $0x874] ss:$8 sps:$4 sm:$0xff]  }
   0xb   :  { %3238 = vmatpush1.bf16.msra.mxu1 %v4745_v10  ;;  %v4775_v30 = vld [vmem:[%s7307_s1 + $0x70] ss:$8 sps:$4 sm:$0xff]   ;;  %v4777_v32 = vld [vmem:[%s7307_s1 + $0x84] ss:$8 sps:$4 sm:$0xff]   ;;  %v4781_v34 = vld [vmem:[%s7307_s1 + $0x80] ss:$8 sps:$4 sm:$0xff]  }
   0xc   :  { %3566 = vmatpush1.bf16.msra.mxu0 %v4746_v11  ;;  %3239 = vmatprep.subr.bf16.mxu1 %v4747_v12  ;;  %v4776_v31 = vld [vmem:[%s7307_s1 + $0x870] ss:$8 sps:$4 sm:$0xff]   ;;  %v4779_v33 = vld [vmem:[%s7307_s1 + $0x884] ss:$8 sps:$4 sm:$0xff]   ;;  %v4782_v35 = vld [vmem:[%s7307_s1 + $0x880] ss:$8 sps:$4 sm:$0xff]  }
   0xd   :  { %3567 = vmatprep.subr.bf16.mxu0 %v4749_v13  ;;  %v4783_v36 = vld [vmem:[%s7307_s1 + $0x94] ss:$8 sps:$4 sm:$0xff]   ;;  %v4787_v38 = vld [vmem:[%s7307_s1 + $0x90] ss:$8 sps:$4 sm:$0xff]   ;;  %v4789_v40 = vld [vmem:[%s7307_s1 + $0xa4] ss:$8 sps:$4 sm:$0xff]  }
   0xe   :  { %v4785_v37 = vld [vmem:[%s7307_s1 + $0x894] ss:$8 sps:$4 sm:$0xff]   ;;  %v4788_v39 = vld [vmem:[%s7307_s1 + $0x890] ss:$8 sps:$4 sm:$0xff]   ;;  %v4791_v41 = vld [vmem:[%s7307_s1 + $0x8a4] ss:$8 sps:$4 sm:$0xff]  }
   0xf   :  { %3240 = vmatpush1.bf16.msra.mxu1 %v4751_v14  ;;  %v4793_v42 = vld [vmem:[%s7307_s1 + $0xa0] ss:$8 sps:$4 sm:$0xff]   ;;  %v4795_v44 = vld [vmem:[%s7307_s1 + $0xb4] ss:$8 sps:$4 sm:$0xff]   ;;  %v4799_v47 = vld [vmem:[%s7307_s1 + $0xb0] ss:$8 sps:$4 sm:$0xff]  }
  0x10   :  { %3568 = vmatpush1.bf16.msra.mxu0 %v4752_v15  ;;  %3241 = vmatprep.subr.bf16.mxu1 %v4753_v16  ;;  %v4794_v43 = vld [vmem:[%s7307_s1 + $0x8a0] ss:$8 sps:$4 sm:$0xff]   ;;  %v4797_v45 = vld [vmem:[%s7307_s1 + $0x8b4] ss:$8 sps:$4 sm:$0xff]   ;;  %v4800_v49 = vld [vmem:[%s7307_s1 + $0x8b0] ss:$8 sps:$4 sm:$0xff]  }
  0x11   :  { %3569 = vmatprep.subr.bf16.mxu0 %v4755_v17  ;;  %v21_v46 = vld [vmem:[%s7308_s0] sm:$0xff]  ;;  %v4807_v56 = vld [vmem:[%s7307_s1 + $0xd4] ss:$8 sps:$4 sm:$0xff]   ;;  %v4811_v58 = vld [vmem:[%s7307_s1 + $0xd0] ss:$8 sps:$4 sm:$0xff]  }
  0x12   :  { %v4087_v48 = vcombine.high %v21_v46, %v21_v46  ;;  %v29_v50 = vld [vmem:[%s7308_s0 + $0x40] sm:$0xff]  ;;  %v4809_v57 = vld [vmem:[%s7307_s1 + $0x8d4] ss:$8 sps:$4 sm:$0xff]   ;;  %v4812_v59 = vld [vmem:[%s7307_s1 + $0x8d0] ss:$8 sps:$4 sm:$0xff]   ;;  %v4086_v6 = vcombine.low %v21_v46, %v21_v46 }
  0x13   :  { %3242 = vmatpush1.bf16.msra.mxu1 %v4757_v18  ;;  %v4801_v51 = vld [vmem:[%s7307_s1 + $0xc4] ss:$8 sps:$4 sm:$0xff]   ;;  %v4103_v53 = vcombine.high %v29_v50, %v29_v50  ;;  %v4805_v54 = vld [vmem:[%s7307_s1 + $0xc0] ss:$8 sps:$4 sm:$0xff]   ;;  %v4819_v0 = vld [vmem:[%s7307_s1 + $0xf4] ss:$8 sps:$4 sm:$0xff]   ;;  %v4102_v7 = vcombine.low %v29_v50, %v29_v50 }
  0x14   :  { %3570 = vmatpush1.bf16.msra.mxu0 %v4758_v19  ;;  %3243 = vmatprep.subr.bf16.mxu1 %v4759_v20  ;;  %v4803_v52 = vld [vmem:[%s7307_s1 + $0x8c4] ss:$8 sps:$4 sm:$0xff]   ;;  %v4806_v55 = vld [vmem:[%s7307_s1 + $0x8c0] ss:$8 sps:$4 sm:$0xff]   ;;  %v4821_v1 = vld [vmem:[%s7307_s1 + $0x8f4] ss:$8 sps:$4 sm:$0xff]  }
  0x15   :  { %3571 = vmatprep.subr.bf16.mxu0 %v4761_v21  ;;  %3265 = vmatprep.mubr.bf16.mxu1 %v4087_v48  ;;  %v4813_v60 = vld [vmem:[%s7307_s1 + $0xe4] ss:$8 sps:$4 sm:$0xff]   ;;  %v4817_v62 = vld [vmem:[%s7307_s1 + $0xe0] ss:$8 sps:$4 sm:$0xff]   ;;  %v4823_v2 = vld [vmem:[%s7307_s1 + $0xf0] ss:$8 sps:$4 sm:$0xff]  }
  0x16   :  { %3593 = vmatprep.mubr.bf16.mxu0 %v4103_v53  ;;  %v4815_v61 = vld [vmem:[%s7307_s1 + $0x8e4] ss:$8 sps:$4 sm:$0xff]   ;;  %v4818_v63 = vld [vmem:[%s7307_s1 + $0x8e0] ss:$8 sps:$4 sm:$0xff]   ;;  %v4824_v3 = vld [vmem:[%s7307_s1 + $0x8f0] ss:$8 sps:$4 sm:$0xff]  }
  0x17   :  { %3244 = vmatpush1.bf16.msra.mxu1 %v4763_v22  ;;  %v4829_v4 = vld [vmem:[%s7307_s1 + $0x104] ss:$8 sps:$4 sm:$0xff]   ;;  %v4827_v8 = vld [vmem:[%s7307_s1 + $0x100] ss:$8 sps:$4 sm:$0xff]   ;;  %v4837_v10 = vld [vmem:[%s7307_s1 + $0x114] ss:$8 sps:$4 sm:$0xff]  }
  0x18   :  { %3572 = vmatpush1.bf16.msra.mxu0 %v4764_v23  ;;  %3245 = vmatprep.subr.bf16.mxu1 %v4765_v24  ;;  %v4834_v5 = vld [vmem:[%s7307_s1 + $0x904] ss:$8 sps:$4 sm:$0xff]   ;;  %v4832_v9 = vld [vmem:[%s7307_s1 + $0x900] ss:$8 sps:$4 sm:$0xff]   ;;  %v4840_v11 = vld [vmem:[%s7307_s1 + $0x914] ss:$8 sps:$4 sm:$0xff]  }
  0x19   :  { %3573 = vmatprep.subr.bf16.mxu0 %v4767_v25  ;;  %v4835_v12 = vld [vmem:[%s7307_s1 + $0x110] ss:$8 sps:$4 sm:$0xff]   ;;  %v4843_v14 = vld [vmem:[%s7307_s1 + $0x124] ss:$8 sps:$4 sm:$0xff]   ;;  %v4841_v16 = vld [vmem:[%s7307_s1 + $0x120] ss:$8 sps:$4 sm:$0xff]  }
  0x1a   :  { %v4838_v13 = vld [vmem:[%s7307_s1 + $0x910] ss:$8 sps:$4 sm:$0xff]   ;;  %v4846_v15 = vld [vmem:[%s7307_s1 + $0x924] ss:$8 sps:$4 sm:$0xff]   ;;  %v4844_v17 = vld [vmem:[%s7307_s1 + $0x920] ss:$8 sps:$4 sm:$0xff]  }
  0x1b   :  { %3246 = vmatpush1.bf16.msra.mxu1 %v4769_v26  ;;  %v4849_v18 = vld [vmem:[%s7307_s1 + $0x134] ss:$8 sps:$4 sm:$0xff]   ;;  %v4847_v20 = vld [vmem:[%s7307_s1 + $0x130] ss:$8 sps:$4 sm:$0xff]   ;;  %v4855_v22 = vld [vmem:[%s7307_s1 + $0x144] ss:$8 sps:$4 sm:$0xff]  }
  0x1c   :  { %3574 = vmatpush1.bf16.msra.mxu0 %v4770_v27  ;;  %3247 = vmatprep.subr.bf16.mxu1 %v4771_v28  ;;  %v4852_v19 = vld [vmem:[%s7307_s1 + $0x934] ss:$8 sps:$4 sm:$0xff]   ;;  %v4850_v21 = vld [vmem:[%s7307_s1 + $0x930] ss:$8 sps:$4 sm:$0xff]   ;;  %v4858_v23 = vld [vmem:[%s7307_s1 + $0x944] ss:$8 sps:$4 sm:$0xff]  }
  0x1d   :  { %3575 = vmatprep.subr.bf16.mxu0 %v4773_v29  ;;  %v4853_v24 = vld [vmem:[%s7307_s1 + $0x140] ss:$8 sps:$4 sm:$0xff]   ;;  %v4861_v26 = vld [vmem:[%s7307_s1 + $0x154] ss:$8 sps:$4 sm:$0xff]   ;;  %v4859_v28 = vld [vmem:[%s7307_s1 + $0x150] ss:$8 sps:$4 sm:$0xff]  }
  0x1e   :  { %v4856_v25 = vld [vmem:[%s7307_s1 + $0x940] ss:$8 sps:$4 sm:$0xff]   ;;  %v4864_v27 = vld [vmem:[%s7307_s1 + $0x954] ss:$8 sps:$4 sm:$0xff]   ;;  %v4862_v29 = vld [vmem:[%s7307_s1 + $0x950] ss:$8 sps:$4 sm:$0xff]  }
  0x1f   :  { %3248 = vmatpush1.bf16.msra.mxu1 %v4775_v30  ;;  %v4867_v30 = vld [vmem:[%s7307_s1 + $0x164] ss:$8 sps:$4 sm:$0xff]   ;;  %v4885_v46 = vld [vmem:[%s7307_s1 + $0x194] ss:$8 sps:$4 sm:$0xff]   ;;  %v4883_v48 = vld [vmem:[%s7307_s1 + $0x190] ss:$8 sps:$4 sm:$0xff]  }
  0x20   :  { %3576 = vmatpush1.bf16.msra.mxu0 %v4776_v31  ;;  %3249 = vmatprep.subr.bf16.mxu1 %v4777_v32  ;;  %v4870_v31 = vld [vmem:[%s7307_s1 + $0x964] ss:$8 sps:$4 sm:$0xff]   ;;  %v4892_v53 = vld [vmem:[%s7307_s1 + $0x9a0] ss:$8 sps:$4 sm:$0xff]  }
  0x21   :  { %3577 = vmatprep.subr.bf16.mxu0 %v4779_v33  ;;  %v5858_v32 = vld [vmem:[%s7308_s0 + $0x8] sm:$0xff] }
  0x22   :  { %v4865_v33 = vld [vmem:[%s7307_s1 + $0x160] ss:$8 sps:$4 sm:$0xff]   ;;  %v4891_v50 = vld [vmem:[%s7307_s1 + $0x1a4] ss:$8 sps:$4 sm:$0xff]  }
  0x23   :  { %3250 = vmatpush1.bf16.msra.mxu1 %v4781_v34  ;;  %v4868_v34 = vld [vmem:[%s7307_s1 + $0x960] ss:$8 sps:$4 sm:$0xff]  }
  0x24   :  { %3578 = vmatpush1.bf16.msra.mxu0 %v4782_v35  ;;  %3251 = vmatprep.subr.bf16.mxu1 %v4783_v36  ;;  %v4089_v35 = vcombine.high %v5858_v32, %v5858_v32  ;;  %v5871_v36 = vld [vmem:[%s7308_s0 + $0x48] sm:$0xff] }
  0x25   :  { %3579 = vmatprep.subr.bf16.mxu0 %v4785_v37  ;;  %v4873_v37 = vld [vmem:[%s7307_s1 + $0x174] ss:$8 sps:$4 sm:$0xff]  }
  0x27   :  { %3252 = vmatpush1.bf16.msra.mxu1 %v4787_v38  ;;  %v4105_v38 = vcombine.high %v5871_v36, %v5871_v36 }
  0x28   :  { %3580 = vmatpush1.bf16.msra.mxu0 %v4788_v39  ;;  %3253 = vmatprep.subr.bf16.mxu1 %v4789_v40  ;;  %v4876_v39 = vld [vmem:[%s7307_s1 + $0x974] ss:$8 sps:$4 sm:$0xff]   ;;  %v4871_v40 = vld [vmem:[%s7307_s1 + $0x170] ss:$8 sps:$4 sm:$0xff]  }
  0x29   :  { %3581 = vmatprep.subr.bf16.mxu0 %v4791_v41  ;;  %v4874_v41 = vld [vmem:[%s7307_s1 + $0x970] ss:$8 sps:$4 sm:$0xff]  }
  0x2b   :  { %3254 = vmatpush1.bf16.msra.mxu1 %v4793_v42  ;;  %v4879_v42 = vld [vmem:[%s7307_s1 + $0x184] ss:$8 sps:$4 sm:$0xff]  }
  0x2c   :  { %3582 = vmatpush1.bf16.msra.mxu0 %v4794_v43  ;;  %3255 = vmatprep.subr.bf16.mxu1 %v4795_v44  ;;  %v4882_v43 = vld [vmem:[%s7307_s1 + $0x984] ss:$8 sps:$4 sm:$0xff]   ;;  %v4877_v44 = vld [vmem:[%s7307_s1 + $0x180] ss:$8 sps:$4 sm:$0xff]  }
  0x2d   :  { %3583 = vmatprep.subr.bf16.mxu0 %v4797_v45  ;;  %v4880_v45 = vld [vmem:[%s7307_s1 + $0x980] ss:$8 sps:$4 sm:$0xff]  }
  0x2f   :  { %3256 = vmatpush1.bf16.msra.mxu1 %v4799_v47  ;;  %v4888_v47 = vld [vmem:[%s7307_s1 + $0x994] ss:$8 sps:$4 sm:$0xff]  }
  0x30   :  { %3584 = vmatpush1.bf16.msra.mxu0 %v4800_v49  ;;  %3257 = vmatprep.subr.bf16.mxu1 %v4801_v51  ;;  %v4886_v49 = vld [vmem:[%s7307_s1 + $0x990] ss:$8 sps:$4 sm:$0xff]   ;;  %v4894_v51 = vld [vmem:[%s7307_s1 + $0x9a4] ss:$8 sps:$4 sm:$0xff]  }
  0x31   :  { %3585 = vmatprep.subr.bf16.mxu0 %v4803_v52  ;;  %v4889_v52 = vld [vmem:[%s7307_s1 + $0x1a0] ss:$8 sps:$4 sm:$0xff]  }
  0x33   :  { %3258 = vmatpush1.bf16.msra.mxu1 %v4805_v54  ;;  %v4897_v54 = vld [vmem:[%s7307_s1 + $0x1b4] ss:$8 sps:$4 sm:$0xff]  }
  0x34   :  { %3586 = vmatpush1.bf16.msra.mxu0 %v4806_v55  ;;  %3259 = vmatprep.subr.bf16.mxu1 %v4807_v56  ;;  %v4900_v55 = vld [vmem:[%s7307_s1 + $0x9b4] ss:$8 sps:$4 sm:$0xff]   ;;  %v4895_v56 = vld [vmem:[%s7307_s1 + $0x1b0] ss:$8 sps:$4 sm:$0xff]  }
  0x35   :  { %3587 = vmatprep.subr.bf16.mxu0 %v4809_v57  ;;  %v4898_v57 = vld [vmem:[%s7307_s1 + $0x9b0] ss:$8 sps:$4 sm:$0xff]  }
  0x37   :  { %3260 = vmatpush1.bf16.msra.mxu1 %v4811_v58  ;;  %v4903_v58 = vld [vmem:[%s7307_s1 + $0x1c4] ss:$8 sps:$4 sm:$0xff]  }
  0x38   :  { %3588 = vmatpush1.bf16.msra.mxu0 %v4812_v59  ;;  %3261 = vmatprep.subr.bf16.mxu1 %v4813_v60  ;;  %v4906_v59 = vld [vmem:[%s7307_s1 + $0x9c4] ss:$8 sps:$4 sm:$0xff]   ;;  %v4901_v60 = vld [vmem:[%s7307_s1 + $0x1c0] ss:$8 sps:$4 sm:$0xff]  }
  0x39   :  { %3589 = vmatprep.subr.bf16.mxu0 %v4815_v61  ;;  %v4904_v61 = vld [vmem:[%s7307_s1 + $0x9c0] ss:$8 sps:$4 sm:$0xff]  }
  0x3b   :  { %3262 = vmatpush1.bf16.msra.mxu1 %v4817_v62  ;;  %v4909_v62 = vld [vmem:[%s7307_s1 + $0x1d4] ss:$8 sps:$4 sm:$0xff]  }
  0x3c   :  { %3590 = vmatpush1.bf16.msra.mxu0 %v4818_v63  ;;  %3263 = vmatprep.subr.bf16.mxu1 %v4819_v0  ;;  %v4912_v63 = vld [vmem:[%s7307_s1 + $0x9d4] ss:$8 sps:$4 sm:$0xff]   ;;  %v4907_v0 = vld [vmem:[%s7307_s1 + $0x1d0] ss:$8 sps:$4 sm:$0xff]  }
  0x3d   :  { %3591 = vmatprep.subr.bf16.mxu0 %v4821_v1  ;;  %v4910_v1 = vld [vmem:[%s7307_s1 + $0x9d0] ss:$8 sps:$4 sm:$0xff]  }
  0x3f   :  { %3264 = vmatpush1.bf16.msra.mxu1 %v4823_v2  ;;  %v4915_v2 = vld [vmem:[%s7307_s1 + $0x1e4] ss:$8 sps:$4 sm:$0xff]  }
  0x40   :  { %3592 = vmatpush1.bf16.msra.mxu0 %v4824_v3  ;;  %3274 = vmatprep.subr.bf16.mxu1 %v4829_v4  ;;  %v4918_v3 = vld [vmem:[%s7307_s1 + $0x9e4] ss:$8 sps:$4 sm:$0xff]   ;;  %v4913_v4 = vld [vmem:[%s7307_s1 + $0x1e0] ss:$8 sps:$4 sm:$0xff]  }
  0x41   :  { %3602 = vmatprep.subr.bf16.mxu0 %v4834_v5  ;;  %v4916_v5 = vld [vmem:[%s7307_s1 + $0x9e0] ss:$8 sps:$4 sm:$0xff]  }
  0x42   :  { %3266 = vmatmul.mubr.bf16.vlgmr.msra.gmra.mrb[0].mxu1 %v4086_v6  ;;  %v4921_v6 = vld [vmem:[%s7307_s1 + $0x1f4] ss:$8 sps:$4 sm:$0xff]  }
  0x43   :  { %3594 = vmatmul.mubr.bf16.vlgmr.msra.gmra.mrb[0].mxu0 %v4102_v7  ;;  %3275 = vmatpush1.bf16.msra.mxu1 %v4827_v8  ;;  %v4924_v7 = vld [vmem:[%s7307_s1 + $0x9f4] ss:$8 sps:$4 sm:$0xff]   ;;  %v4919_v8 = vld [vmem:[%s7307_s1 + $0x1f0] ss:$8 sps:$4 sm:$0xff]  }
  0x44   :  { %3603 = vmatpush1.bf16.msra.mxu0 %v4832_v9  ;;  %3276 = vmatprep.subr.bf16.mxu1 %v4837_v10  ;;  %v4922_v9 = vld [vmem:[%s7307_s1 + $0x9f0] ss:$8 sps:$4 sm:$0xff]   ;;  %v4929_v10 = vld [vmem:[%s7307_s1 + $0x204] ss:$8 sps:$4 sm:$0xff]  }
  0x45   :  { %3604 = vmatprep.subr.bf16.mxu0 %v4840_v11  ;;  %3306 = vmatprep.mubr.bf16.mxu1 %v4089_v35  ;;  %v4934_v11 = vld [vmem:[%s7307_s1 + $0xa04] ss:$8 sps:$4 sm:$0xff]   ;;  %v4956_v35 = vld [vmem:[%s7307_s1 + $0xa40] ss:$8 sps:$4 sm:$0xff]  }
  0x46   :  { %3634 = vmatprep.mubr.bf16.mxu0 %v4105_v38  ;;  %v4959_v38 = vld [vmem:[%s7307_s1 + $0x250] ss:$8 sps:$4 sm:$0xff]  }
  0x47   :  { %3277 = vmatpush1.bf16.msra.mxu1 %v4835_v12  ;;  %v4088_v12 = vcombine.low %v5858_v32, %v5858_v32  ;;  %v4955_v32 = vld [vmem:[%s7307_s1 + $0x244] ss:$8 sps:$4 sm:$0xff]  }
  0x48   :  { %3605 = vmatpush1.bf16.msra.mxu0 %v4838_v13  ;;  %3278 = vmatprep.subr.bf16.mxu1 %v4843_v14  ;;  %v4927_v13 = vld [vmem:[%s7307_s1 + $0x200] ss:$8 sps:$4 sm:$0xff]   ;;  %v4104_v14 = vcombine.low %v5871_v36, %v5871_v36  ;;  %v4961_v36 = vld [vmem:[%s7307_s1 + $0x254] ss:$8 sps:$4 sm:$0xff]  }
  0x49   :  { %3606 = vmatprep.subr.bf16.mxu0 %v4846_v15  ;;  %v4932_v15 = vld [vmem:[%s7307_s1 + $0xa00] ss:$8 sps:$4 sm:$0xff]  }
  0x4b   :  { %3279 = vmatpush1.bf16.msra.mxu1 %v4841_v16  ;;  %v4937_v16 = vld [vmem:[%s7307_s1 + $0x214] ss:$8 sps:$4 sm:$0xff]  }
  0x4c   :  { %3607 = vmatpush1.bf16.msra.mxu0 %v4844_v17  ;;  %3280 = vmatprep.subr.bf16.mxu1 %v4849_v18  ;;  %v4940_v17 = vld [vmem:[%s7307_s1 + $0xa14] ss:$8 sps:$4 sm:$0xff]  }
  0x4d   :  { %3608 = vmatprep.subr.bf16.mxu0 %v4852_v19  ;;  %v6008_v18 = vld [vmem:[%s7308_s0 + $0x10] sm:$0xff] }
  0x4e   :  { %v4091_v19 = vcombine.high %v6008_v18, %v6008_v18 }
  0x4f   :  { %3281 = vmatpush1.bf16.msra.mxu1 %v4847_v20  ;;  %v6015_v20 = vld [vmem:[%s7308_s0 + $0x50] sm:$0xff] }
  0x50   :  { %3609 = vmatpush1.bf16.msra.mxu0 %v4850_v21  ;;  %3282 = vmatprep.subr.bf16.mxu1 %v4855_v22  ;;  %v4935_v21 = vld [vmem:[%s7307_s1 + $0x210] ss:$8 sps:$4 sm:$0xff]  }
  0x51   :  { %3610 = vmatprep.subr.bf16.mxu0 %v4858_v23  ;;  %v4938_v22 = vld [vmem:[%s7307_s1 + $0xa10] ss:$8 sps:$4 sm:$0xff]   ;;  %v4107_v23 = vcombine.high %v6015_v20, %v6015_v20 }
  0x53   :  { %3283 = vmatpush1.bf16.msra.mxu1 %v4853_v24  ;;  %v4943_v24 = vld [vmem:[%s7307_s1 + $0x224] ss:$8 sps:$4 sm:$0xff]  }
  0x54   :  { %3611 = vmatpush1.bf16.msra.mxu0 %v4856_v25  ;;  %3284 = vmatprep.subr.bf16.mxu1 %v4861_v26  ;;  %v4946_v25 = vld [vmem:[%s7307_s1 + $0xa24] ss:$8 sps:$4 sm:$0xff]   ;;  %v4941_v26 = vld [vmem:[%s7307_s1 + $0x220] ss:$8 sps:$4 sm:$0xff]  }
  0x55   :  { %3612 = vmatprep.subr.bf16.mxu0 %v4864_v27  ;;  %v4944_v27 = vld [vmem:[%s7307_s1 + $0xa20] ss:$8 sps:$4 sm:$0xff]  }
  0x57   :  { %3285 = vmatpush1.bf16.msra.mxu1 %v4859_v28  ;;  %v4949_v28 = vld [vmem:[%s7307_s1 + $0x234] ss:$8 sps:$4 sm:$0xff]  }
  0x58   :  { %3613 = vmatpush1.bf16.msra.mxu0 %v4862_v29  ;;  %3286 = vmatprep.subr.bf16.mxu1 %v4867_v30  ;;  %v4952_v29 = vld [vmem:[%s7307_s1 + $0xa34] ss:$8 sps:$4 sm:$0xff]   ;;  %v4947_v30 = vld [vmem:[%s7307_s1 + $0x230] ss:$8 sps:$4 sm:$0xff]  }
  0x59   :  { %3614 = vmatprep.subr.bf16.mxu0 %v4870_v31  ;;  %v4950_v31 = vld [vmem:[%s7307_s1 + $0xa30] ss:$8 sps:$4 sm:$0xff]  }
  0x5b   :  { %3287 = vmatpush1.bf16.msra.mxu1 %v4865_v33  ;;  %v4958_v33 = vld [vmem:[%s7307_s1 + $0xa44] ss:$8 sps:$4 sm:$0xff]  }
  0x5c   :  { %3615 = vmatpush1.bf16.msra.mxu0 %v4868_v34  ;;  %3288 = vmatprep.subr.bf16.mxu1 %v4873_v37  ;;  %v4953_v34 = vld [vmem:[%s7307_s1 + $0x240] ss:$8 sps:$4 sm:$0xff]   ;;  %v4964_v37 = vld [vmem:[%s7307_s1 + $0xa54] ss:$8 sps:$4 sm:$0xff]  }
  0x5d   :  { %3616 = vmatprep.subr.bf16.mxu0 %v4876_v39  ;;  %v4962_v39 = vld [vmem:[%s7307_s1 + $0xa50] ss:$8 sps:$4 sm:$0xff]  }
  0x5f   :  { %3289 = vmatpush1.bf16.msra.mxu1 %v4871_v40  ;;  %v4967_v40 = vld [vmem:[%s7307_s1 + $0x264] ss:$8 sps:$4 sm:$0xff]  }
  0x60   :  { %3617 = vmatpush1.bf16.msra.mxu0 %v4874_v41  ;;  %3290 = vmatprep.subr.bf16.mxu1 %v4879_v42  ;;  %v4970_v41 = vld [vmem:[%s7307_s1 + $0xa64] ss:$8 sps:$4 sm:$0xff]   ;;  %v4965_v42 = vld [vmem:[%s7307_s1 + $0x260] ss:$8 sps:$4 sm:$0xff]  }
  0x61   :  { %3618 = vmatprep.subr.bf16.mxu0 %v4882_v43  ;;  %v4968_v43 = vld [vmem:[%s7307_s1 + $0xa60] ss:$8 sps:$4 sm:$0xff]  }
  0x63   :  { %3291 = vmatpush1.bf16.msra.mxu1 %v4877_v44  ;;  %v4973_v44 = vld [vmem:[%s7307_s1 + $0x274] ss:$8 sps:$4 sm:$0xff]  }
  0x64   :  { %3619 = vmatpush1.bf16.msra.mxu0 %v4880_v45  ;;  %3292 = vmatprep.subr.bf16.mxu1 %v4885_v46  ;;  %v4976_v45 = vld [vmem:[%s7307_s1 + $0xa74] ss:$8 sps:$4 sm:$0xff]   ;;  %v4971_v46 = vld [vmem:[%s7307_s1 + $0x270] ss:$8 sps:$4 sm:$0xff]  }
  0x65   :  { %3620 = vmatprep.subr.bf16.mxu0 %v4888_v47  ;;  %v4974_v47 = vld [vmem:[%s7307_s1 + $0xa70] ss:$8 sps:$4 sm:$0xff]  }
  0x67   :  { %3293 = vmatpush1.bf16.msra.mxu1 %v4883_v48  ;;  %v4979_v48 = vld [vmem:[%s7307_s1 + $0x284] ss:$8 sps:$4 sm:$0xff]  }
  0x68   :  { %3621 = vmatpush1.bf16.msra.mxu0 %v4886_v49  ;;  %3294 = vmatprep.subr.bf16.mxu1 %v4891_v50  ;;  %v4982_v49 = vld [vmem:[%s7307_s1 + $0xa84] ss:$8 sps:$4 sm:$0xff]   ;;  %v4977_v50 = vld [vmem:[%s7307_s1 + $0x280] ss:$8 sps:$4 sm:$0xff]  }
  0x69   :  { %3622 = vmatprep.subr.bf16.mxu0 %v4894_v51  ;;  %v4980_v51 = vld [vmem:[%s7307_s1 + $0xa80] ss:$8 sps:$4 sm:$0xff]  }
  0x6b   :  { %3295 = vmatpush1.bf16.msra.mxu1 %v4889_v52  ;;  %v4985_v52 = vld [vmem:[%s7307_s1 + $0x294] ss:$8 sps:$4 sm:$0xff]  }
  0x6c   :  { %3623 = vmatpush1.bf16.msra.mxu0 %v4892_v53  ;;  %3296 = vmatprep.subr.bf16.mxu1 %v4897_v54  ;;  %v4988_v53 = vld [vmem:[%s7307_s1 + $0xa94] ss:$8 sps:$4 sm:$0xff]   ;;  %v4983_v54 = vld [vmem:[%s7307_s1 + $0x290] ss:$8 sps:$4 sm:$0xff]  }
  0x6d   :  { %3624 = vmatprep.subr.bf16.mxu0 %v4900_v55  ;;  %v4986_v55 = vld [vmem:[%s7307_s1 + $0xa90] ss:$8 sps:$4 sm:$0xff]  }
  0x6f   :  { %3297 = vmatpush1.bf16.msra.mxu1 %v4895_v56  ;;  %v4991_v56 = vld [vmem:[%s7307_s1 + $0x2a4] ss:$8 sps:$4 sm:$0xff]  }
  0x70   :  { %3625 = vmatpush1.bf16.msra.mxu0 %v4898_v57  ;;  %3298 = vmatprep.subr.bf16.mxu1 %v4903_v58  ;;  %v4994_v57 = vld [vmem:[%s7307_s1 + $0xaa4] ss:$8 sps:$4 sm:$0xff]   ;;  %v4989_v58 = vld [vmem:[%s7307_s1 + $0x2a0] ss:$8 sps:$4 sm:$0xff]  }
  0x71   :  { %3626 = vmatprep.subr.bf16.mxu0 %v4906_v59  ;;  %v4992_v59 = vld [vmem:[%s7307_s1 + $0xaa0] ss:$8 sps:$4 sm:$0xff]  }
  0x73   :  { %3299 = vmatpush1.bf16.msra.mxu1 %v4901_v60  ;;  %v4997_v60 = vld [vmem:[%s7307_s1 + $0x2b4] ss:$8 sps:$4 sm:$0xff]  }
  0x74   :  { %3627 = vmatpush1.bf16.msra.mxu0 %v4904_v61  ;;  %3300 = vmatprep.subr.bf16.mxu1 %v4909_v62  ;;  %v5000_v61 = vld [vmem:[%s7307_s1 + $0xab4] ss:$8 sps:$4 sm:$0xff]   ;;  %v4995_v62 = vld [vmem:[%s7307_s1 + $0x2b0] ss:$8 sps:$4 sm:$0xff]  }
  0x75   :  { %3628 = vmatprep.subr.bf16.mxu0 %v4912_v63  ;;  %v4998_v63 = vld [vmem:[%s7307_s1 + $0xab0] ss:$8 sps:$4 sm:$0xff]  }
  0x77   :  { %3301 = vmatpush1.bf16.msra.mxu1 %v4907_v0  ;;  %v5003_v0 = vld [vmem:[%s7307_s1 + $0x2c4] ss:$8 sps:$4 sm:$0xff]  }
  0x78   :  { %3629 = vmatpush1.bf16.msra.mxu0 %v4910_v1  ;;  %3302 = vmatprep.subr.bf16.mxu1 %v4915_v2  ;;  %v5006_v1 = vld [vmem:[%s7307_s1 + $0xac4] ss:$8 sps:$4 sm:$0xff]   ;;  %v5001_v2 = vld [vmem:[%s7307_s1 + $0x2c0] ss:$8 sps:$4 sm:$0xff]  }
  0x79   :  { %3630 = vmatprep.subr.bf16.mxu0 %v4918_v3  ;;  %v5004_v3 = vld [vmem:[%s7307_s1 + $0xac0] ss:$8 sps:$4 sm:$0xff]  }
  0x7b   :  { %3303 = vmatpush1.bf16.msra.mxu1 %v4913_v4  ;;  %v5009_v4 = vld [vmem:[%s7307_s1 + $0x2d4] ss:$8 sps:$4 sm:$0xff]  }
  0x7c   :  { %3631 = vmatpush1.bf16.msra.mxu0 %v4916_v5  ;;  %3304 = vmatprep.subr.bf16.mxu1 %v4921_v6  ;;  %v5012_v5 = vld [vmem:[%s7307_s1 + $0xad4] ss:$8 sps:$4 sm:$0xff]   ;;  %v5007_v6 = vld [vmem:[%s7307_s1 + $0x2d0] ss:$8 sps:$4 sm:$0xff]  }
  0x7d   :  { %3632 = vmatprep.subr.bf16.mxu0 %v4924_v7  ;;  %v5010_v7 = vld [vmem:[%s7307_s1 + $0xad0] ss:$8 sps:$4 sm:$0xff]  }
  0x7f   :  { %3305 = vmatpush1.bf16.msra.mxu1 %v4919_v8  ;;  %v5015_v8 = vld [vmem:[%s7307_s1 + $0x2e4] ss:$8 sps:$4 sm:$0xff]  }
  0x80   :  { %3633 = vmatpush1.bf16.msra.mxu0 %v4922_v9  ;;  %3315 = vmatprep.subr.bf16.mxu1 %v4929_v10  ;;  %v5018_v9 = vld [vmem:[%s7307_s1 + $0xae4] ss:$8 sps:$4 sm:$0xff]   ;;  %v5013_v10 = vld [vmem:[%s7307_s1 + $0x2e0] ss:$8 sps:$4 sm:$0xff]  }
  0x81   :  { %3643 = vmatprep.subr.bf16.mxu0 %v4934_v11  ;;  %v5016_v11 = vld [vmem:[%s7307_s1 + $0xae0] ss:$8 sps:$4 sm:$0xff]  }
  0x82   :  { %3307 = vmatmul.mubr.bf16.vlgmr.msra.gmra.mrb[0].mxu1 %v4088_v12  ;;  %v5021_v12 = vld [vmem:[%s7307_s1 + $0x2f4] ss:$8 sps:$4 sm:$0xff]  }
  0x83   :  { %3635 = vmatmul.mubr.bf16.vlgmr.msra.gmra.mrb[0].mxu0 %v4104_v14  ;;  %3316 = vmatpush1.bf16.msra.mxu1 %v4927_v13  ;;  %v5024_v13 = vld [vmem:[%s7307_s1 + $0xaf4] ss:$8 sps:$4 sm:$0xff]   ;;  %v5019_v14 = vld [vmem:[%s7307_s1 + $0x2f0] ss:$8 sps:$4 sm:$0xff]  }
  0x84   :  { %3644 = vmatpush1.bf16.msra.mxu0 %v4932_v15  ;;  %3317 = vmatprep.subr.bf16.mxu1 %v4937_v16  ;;  %v5022_v15 = vld [vmem:[%s7307_s1 + $0xaf0] ss:$8 sps:$4 sm:$0xff]   ;;  %v5029_v16 = vld [vmem:[%s7307_s1 + $0x304] ss:$8 sps:$4 sm:$0xff]  }
  0x85   :  { %3645 = vmatprep.subr.bf16.mxu0 %v4940_v17  ;;  %3347 = vmatprep.mubr.bf16.mxu1 %v4091_v19  ;;  %v5034_v17 = vld [vmem:[%s7307_s1 + $0xb04] ss:$8 sps:$4 sm:$0xff]   ;;  %v5027_v19 = vld [vmem:[%s7307_s1 + $0x300] ss:$8 sps:$4 sm:$0xff]  }
  0x86   :  { %3675 = vmatprep.mubr.bf16.mxu0 %v4107_v23  ;;  %v4106_v23 = vcombine.low %v6015_v20, %v6015_v20 }
  0x87   :  { %3318 = vmatpush1.bf16.msra.mxu1 %v4935_v21  ;;  %v5032_v21 = vld [vmem:[%s7307_s1 + $0xb00] ss:$8 sps:$4 sm:$0xff]  }
  0x88   :  { %3646 = vmatpush1.bf16.msra.mxu0 %v4938_v22  ;;  %3319 = vmatprep.subr.bf16.mxu1 %v4943_v24  ;;  %v4090_v22 = vcombine.low %v6008_v18, %v6008_v18  ;;  %v6212_v24 = vld [vmem:[%s7308_s0 + $0x18] sm:$0xff] }
  0x89   :  { %3647 = vmatprep.subr.bf16.mxu0 %v4946_v25  ;;  %v6217_v25 = vld [vmem:[%s7308_s0 + $0x58] sm:$0xff]  ;;  %v4093_v20 = vcombine.high %v6212_v24, %v6212_v24 }
  0x8a   :  { %v5040_v18 = vld [vmem:[%s7307_s1 + $0xb14] ss:$8 sps:$4 sm:$0xff]  }
  0x8b   :  { %3320 = vmatpush1.bf16.msra.mxu1 %v4941_v26  ;;  %v5037_v26 = vld [vmem:[%s7307_s1 + $0x314] ss:$8 sps:$4 sm:$0xff]  }
  0x8c   :  { %3648 = vmatpush1.bf16.msra.mxu0 %v4944_v27  ;;  %3321 = vmatprep.subr.bf16.mxu1 %v4949_v28  ;;  %v4109_v27 = vcombine.high %v6217_v25, %v6217_v25  ;;  %v5035_v28 = vld [vmem:[%s7307_s1 + $0x310] ss:$8 sps:$4 sm:$0xff]  }
  0x8d   :  { %3649 = vmatprep.subr.bf16.mxu0 %v4952_v29  ;;  %v5038_v29 = vld [vmem:[%s7307_s1 + $0xb10] ss:$8 sps:$4 sm:$0xff]  }
  0x8f   :  { %3322 = vmatpush1.bf16.msra.mxu1 %v4947_v30  ;;  %v5043_v30 = vld [vmem:[%s7307_s1 + $0x324] ss:$8 sps:$4 sm:$0xff]  }
  0x90   :  { %3650 = vmatpush1.bf16.msra.mxu0 %v4950_v31  ;;  %3323 = vmatprep.subr.bf16.mxu1 %v4955_v32  ;;  %v5046_v31 = vld [vmem:[%s7307_s1 + $0xb24] ss:$8 sps:$4 sm:$0xff]   ;;  %v5041_v32 = vld [vmem:[%s7307_s1 + $0x320] ss:$8 sps:$4 sm:$0xff]  }
  0x91   :  { %3651 = vmatprep.subr.bf16.mxu0 %v4958_v33  ;;  %v5044_v33 = vld [vmem:[%s7307_s1 + $0xb20] ss:$8 sps:$4 sm:$0xff]  }
  0x93   :  { %3324 = vmatpush1.bf16.msra.mxu1 %v4953_v34  ;;  %v5049_v34 = vld [vmem:[%s7307_s1 + $0x334] ss:$8 sps:$4 sm:$0xff]  }
  0x94   :  { %3652 = vmatpush1.bf16.msra.mxu0 %v4956_v35  ;;  %3325 = vmatprep.subr.bf16.mxu1 %v4961_v36  ;;  %v5052_v35 = vld [vmem:[%s7307_s1 + $0xb34] ss:$8 sps:$4 sm:$0xff]   ;;  %v5047_v36 = vld [vmem:[%s7307_s1 + $0x330] ss:$8 sps:$4 sm:$0xff]  }
  0x95   :  { %3653 = vmatprep.subr.bf16.mxu0 %v4964_v37  ;;  %v5050_v37 = vld [vmem:[%s7307_s1 + $0xb30] ss:$8 sps:$4 sm:$0xff]  }
  0x97   :  { %3326 = vmatpush1.bf16.msra.mxu1 %v4959_v38  ;;  %v5055_v38 = vld [vmem:[%s7307_s1 + $0x344] ss:$8 sps:$4 sm:$0xff]  }
  0x98   :  { %3654 = vmatpush1.bf16.msra.mxu0 %v4962_v39  ;;  %3327 = vmatprep.subr.bf16.mxu1 %v4967_v40  ;;  %v5058_v39 = vld [vmem:[%s7307_s1 + $0xb44] ss:$8 sps:$4 sm:$0xff]   ;;  %v5053_v40 = vld [vmem:[%s7307_s1 + $0x340] ss:$8 sps:$4 sm:$0xff]  }
  0x99   :  { %3655 = vmatprep.subr.bf16.mxu0 %v4970_v41  ;;  %v5056_v41 = vld [vmem:[%s7307_s1 + $0xb40] ss:$8 sps:$4 sm:$0xff]  }
  0x9b   :  { %3328 = vmatpush1.bf16.msra.mxu1 %v4965_v42  ;;  %v5061_v42 = vld [vmem:[%s7307_s1 + $0x354] ss:$8 sps:$4 sm:$0xff]  }
  0x9c   :  { %3656 = vmatpush1.bf16.msra.mxu0 %v4968_v43  ;;  %3329 = vmatprep.subr.bf16.mxu1 %v4973_v44  ;;  %v5064_v43 = vld [vmem:[%s7307_s1 + $0xb54] ss:$8 sps:$4 sm:$0xff]   ;;  %v5059_v44 = vld [vmem:[%s7307_s1 + $0x350] ss:$8 sps:$4 sm:$0xff]  }
  0x9d   :  { %3657 = vmatprep.subr.bf16.mxu0 %v4976_v45  ;;  %v5062_v45 = vld [vmem:[%s7307_s1 + $0xb50] ss:$8 sps:$4 sm:$0xff]  }
  0x9f   :  { %3330 = vmatpush1.bf16.msra.mxu1 %v4971_v46  ;;  %v5067_v46 = vld [vmem:[%s7307_s1 + $0x364] ss:$8 sps:$4 sm:$0xff]  }
  0xa0   :  { %3658 = vmatpush1.bf16.msra.mxu0 %v4974_v47  ;;  %3331 = vmatprep.subr.bf16.mxu1 %v4979_v48  ;;  %v5070_v47 = vld [vmem:[%s7307_s1 + $0xb64] ss:$8 sps:$4 sm:$0xff]   ;;  %v5065_v48 = vld [vmem:[%s7307_s1 + $0x360] ss:$8 sps:$4 sm:$0xff]  }
  0xa1   :  { %3659 = vmatprep.subr.bf16.mxu0 %v4982_v49  ;;  %v5068_v49 = vld [vmem:[%s7307_s1 + $0xb60] ss:$8 sps:$4 sm:$0xff]  }
  0xa3   :  { %3332 = vmatpush1.bf16.msra.mxu1 %v4977_v50  ;;  %v5073_v50 = vld [vmem:[%s7307_s1 + $0x374] ss:$8 sps:$4 sm:$0xff]  }
  0xa4   :  { %3660 = vmatpush1.bf16.msra.mxu0 %v4980_v51  ;;  %3333 = vmatprep.subr.bf16.mxu1 %v4985_v52  ;;  %v5076_v51 = vld [vmem:[%s7307_s1 + $0xb74] ss:$8 sps:$4 sm:$0xff]   ;;  %v5071_v52 = vld [vmem:[%s7307_s1 + $0x370] ss:$8 sps:$4 sm:$0xff]  }
  0xa5   :  { %3661 = vmatprep.subr.bf16.mxu0 %v4988_v53  ;;  %v5074_v53 = vld [vmem:[%s7307_s1 + $0xb70] ss:$8 sps:$4 sm:$0xff]  }
  0xa7   :  { %3334 = vmatpush1.bf16.msra.mxu1 %v4983_v54  ;;  %v5079_v54 = vld [vmem:[%s7307_s1 + $0x384] ss:$8 sps:$4 sm:$0xff]  }
  0xa8   :  { %3662 = vmatpush1.bf16.msra.mxu0 %v4986_v55  ;;  %3335 = vmatprep.subr.bf16.mxu1 %v4991_v56  ;;  %v5082_v55 = vld [vmem:[%s7307_s1 + $0xb84] ss:$8 sps:$4 sm:$0xff]   ;;  %v5077_v56 = vld [vmem:[%s7307_s1 + $0x380] ss:$8 sps:$4 sm:$0xff]  }
  0xa9   :  { %3663 = vmatprep.subr.bf16.mxu0 %v4994_v57  ;;  %v5080_v57 = vld [vmem:[%s7307_s1 + $0xb80] ss:$8 sps:$4 sm:$0xff]  }
  0xab   :  { %3336 = vmatpush1.bf16.msra.mxu1 %v4989_v58  ;;  %v5085_v58 = vld [vmem:[%s7307_s1 + $0x394] ss:$8 sps:$4 sm:$0xff]  }
  0xac   :  { %3664 = vmatpush1.bf16.msra.mxu0 %v4992_v59  ;;  %3337 = vmatprep.subr.bf16.mxu1 %v4997_v60  ;;  %v5088_v59 = vld [vmem:[%s7307_s1 + $0xb94] ss:$8 sps:$4 sm:$0xff]   ;;  %v5083_v60 = vld [vmem:[%s7307_s1 + $0x390] ss:$8 sps:$4 sm:$0xff]  }
  0xad   :  { %3665 = vmatprep.subr.bf16.mxu0 %v5000_v61  ;;  %v5086_v61 = vld [vmem:[%s7307_s1 + $0xb90] ss:$8 sps:$4 sm:$0xff]  }
  0xaf   :  { %3338 = vmatpush1.bf16.msra.mxu1 %v4995_v62  ;;  %v5091_v62 = vld [vmem:[%s7307_s1 + $0x3a4] ss:$8 sps:$4 sm:$0xff]  }
  0xb0   :  { %3666 = vmatpush1.bf16.msra.mxu0 %v4998_v63  ;;  %3339 = vmatprep.subr.bf16.mxu1 %v5003_v0  ;;  %v5094_v63 = vld [vmem:[%s7307_s1 + $0xba4] ss:$8 sps:$4 sm:$0xff]   ;;  %v5089_v0 = vld [vmem:[%s7307_s1 + $0x3a0] ss:$8 sps:$4 sm:$0xff]  }
  0xb1   :  { %3667 = vmatprep.subr.bf16.mxu0 %v5006_v1  ;;  %v5092_v1 = vld [vmem:[%s7307_s1 + $0xba0] ss:$8 sps:$4 sm:$0xff]  }
  0xb3   :  { %3340 = vmatpush1.bf16.msra.mxu1 %v5001_v2  ;;  %v5097_v2 = vld [vmem:[%s7307_s1 + $0x3b4] ss:$8 sps:$4 sm:$0xff]  }
  0xb4   :  { %3668 = vmatpush1.bf16.msra.mxu0 %v5004_v3  ;;  %3341 = vmatprep.subr.bf16.mxu1 %v5009_v4  ;;  %v5100_v3 = vld [vmem:[%s7307_s1 + $0xbb4] ss:$8 sps:$4 sm:$0xff]   ;;  %v5095_v4 = vld [vmem:[%s7307_s1 + $0x3b0] ss:$8 sps:$4 sm:$0xff]  }
  0xb5   :  { %3669 = vmatprep.subr.bf16.mxu0 %v5012_v5  ;;  %v5098_v5 = vld [vmem:[%s7307_s1 + $0xbb0] ss:$8 sps:$4 sm:$0xff]  }
  0xb7   :  { %3342 = vmatpush1.bf16.msra.mxu1 %v5007_v6  ;;  %v5103_v6 = vld [vmem:[%s7307_s1 + $0x3c4] ss:$8 sps:$4 sm:$0xff]  }
  0xb8   :  { %3670 = vmatpush1.bf16.msra.mxu0 %v5010_v7  ;;  %3343 = vmatprep.subr.bf16.mxu1 %v5015_v8  ;;  %v5106_v7 = vld [vmem:[%s7307_s1 + $0xbc4] ss:$8 sps:$4 sm:$0xff]   ;;  %v5101_v8 = vld [vmem:[%s7307_s1 + $0x3c0] ss:$8 sps:$4 sm:$0xff]  }
  0xb9   :  { %3671 = vmatprep.subr.bf16.mxu0 %v5018_v9  ;;  %v5104_v9 = vld [vmem:[%s7307_s1 + $0xbc0] ss:$8 sps:$4 sm:$0xff]  }
  0xbb   :  { %3344 = vmatpush1.bf16.msra.mxu1 %v5013_v10  ;;  %v5109_v10 = vld [vmem:[%s7307_s1 + $0x3d4] ss:$8 sps:$4 sm:$0xff]  }
  0xbc   :  { %3672 = vmatpush1.bf16.msra.mxu0 %v5016_v11  ;;  %3345 = vmatprep.subr.bf16.mxu1 %v5021_v12  ;;  %v5112_v11 = vld [vmem:[%s7307_s1 + $0xbd4] ss:$8 sps:$4 sm:$0xff]   ;;  %v5107_v12 = vld [vmem:[%s7307_s1 + $0x3d0] ss:$8 sps:$4 sm:$0xff]  }
  0xbd   :  { %3673 = vmatprep.subr.bf16.mxu0 %v5024_v13  ;;  %v5110_v13 = vld [vmem:[%s7307_s1 + $0xbd0] ss:$8 sps:$4 sm:$0xff]  }
  0xbf   :  { %3346 = vmatpush1.bf16.msra.mxu1 %v5019_v14  ;;  %v5115_v14 = vld [vmem:[%s7307_s1 + $0x3e4] ss:$8 sps:$4 sm:$0xff]  }
  0xc0   :  { %3674 = vmatpush1.bf16.msra.mxu0 %v5022_v15  ;;  %3356 = vmatprep.subr.bf16.mxu1 %v5029_v16  ;;  %v5118_v15 = vld [vmem:[%s7307_s1 + $0xbe4] ss:$8 sps:$4 sm:$0xff]   ;;  %v5113_v16 = vld [vmem:[%s7307_s1 + $0x3e0] ss:$8 sps:$4 sm:$0xff]  }
  0xc1   :  { %3684 = vmatprep.subr.bf16.mxu0 %v5034_v17  ;;  %v5116_v17 = vld [vmem:[%s7307_s1 + $0xbe0] ss:$8 sps:$4 sm:$0xff]  }
  0xc2   :  { %3348 = vmatmul.mubr.bf16.vlgmr.msra.gmra.mrb[0].mxu1 %v4090_v22  ;;  %v5119_v22 = vld [vmem:[%s7307_s1 + $0x3f0] ss:$8 sps:$4 sm:$0xff]  }
  0xc3   :  { %3676 = vmatmul.mubr.bf16.vlgmr.msra.gmra.mrb[0].mxu0 %v4106_v23  ;;  %3357 = vmatpush1.bf16.msra.mxu1 %v5027_v19  ;;  %v5121_v19 = vld [vmem:[%s7307_s1 + $0x3f4] ss:$8 sps:$4 sm:$0xff]   ;;  %v5122_v23 = vld [vmem:[%s7307_s1 + $0xbf0] ss:$8 sps:$4 sm:$0xff]  }
  0xc4   :  { %3685 = vmatpush1.bf16.msra.mxu0 %v5032_v21  ;;  %3358 = vmatprep.subr.bf16.mxu1 %v5037_v26  ;;  %v5124_v21 = vld [vmem:[%s7307_s1 + $0xbf4] ss:$8 sps:$4 sm:$0xff]   ;;  %v5129_v26 = vld [vmem:[%s7307_s1 + $0x404] ss:$8 sps:$4 sm:$0xff]  }
  0xc5   :  { %3686 = vmatprep.subr.bf16.mxu0 %v5040_v18  ;;  %3388 = vmatprep.mubr.bf16.mxu1 %v4093_v20  ;;  %v5134_v18 = vld [vmem:[%s7307_s1 + $0xc04] ss:$8 sps:$4 sm:$0xff]  }
  0xc6   :  { %3716 = vmatprep.mubr.bf16.mxu0 %v4109_v27  ;;  %v6412_v20 = vld [vmem:[%s7308_s0 + $0x20] sm:$0xff]  ;;  %v4092_v27 = vcombine.low %v6212_v24, %v6212_v24  ;;  %v5137_v24 = vld [vmem:[%s7307_s1 + $0x414] ss:$8 sps:$4 sm:$0xff]  }
  0xc7   :  { %3359 = vmatpush1.bf16.msra.mxu1 %v5035_v28  ;;  %v4108_v28 = vcombine.low %v6217_v25, %v6217_v25  ;;  %v5140_v25 = vld [vmem:[%s7307_s1 + $0xc14] ss:$8 sps:$4 sm:$0xff]  }
  0xc8   :  { %3687 = vmatpush1.bf16.msra.mxu0 %v5038_v29  ;;  %3360 = vmatprep.subr.bf16.mxu1 %v5043_v30  ;;  %v6421_v29 = vld [vmem:[%s7308_s0 + $0x60] sm:$0xff] }
  0xc9   :  { %3688 = vmatprep.subr.bf16.mxu0 %v5046_v31  ;;  %v5127_v30 = vld [vmem:[%s7307_s1 + $0x400] ss:$8 sps:$4 sm:$0xff]  }
  0xca   :  { %v5132_v31 = vld [vmem:[%s7307_s1 + $0xc00] ss:$8 sps:$4 sm:$0xff]  }
  0xcb   :  { %3361 = vmatpush1.bf16.msra.mxu1 %v5041_v32  ;;  %v4095_v32 = vcombine.high %v6412_v20, %v6412_v20 }
  0xcc   :  { %3689 = vmatpush1.bf16.msra.mxu0 %v5044_v33  ;;  %3362 = vmatprep.subr.bf16.mxu1 %v5049_v34  ;;  %v4111_v33 = vcombine.high %v6421_v29, %v6421_v29  ;;  %v5135_v34 = vld [vmem:[%s7307_s1 + $0x410] ss:$8 sps:$4 sm:$0xff]  }
  0xcd   :  { %3690 = vmatprep.subr.bf16.mxu0 %v5052_v35  ;;  %v5138_v35 = vld [vmem:[%s7307_s1 + $0xc10] ss:$8 sps:$4 sm:$0xff]  }
  0xcf   :  { %3363 = vmatpush1.bf16.msra.mxu1 %v5047_v36  ;;  %v5143_v36 = vld [vmem:[%s7307_s1 + $0x424] ss:$8 sps:$4 sm:$0xff]  }
  0xd0   :  { %3691 = vmatpush1.bf16.msra.mxu0 %v5050_v37  ;;  %3364 = vmatprep.subr.bf16.mxu1 %v5055_v38  ;;  %v5146_v37 = vld [vmem:[%s7307_s1 + $0xc24] ss:$8 sps:$4 sm:$0xff]   ;;  %v5141_v38 = vld [vmem:[%s7307_s1 + $0x420] ss:$8 sps:$4 sm:$0xff]  }
  0xd1   :  { %3692 = vmatprep.subr.bf16.mxu0 %v5058_v39  ;;  %v5144_v39 = vld [vmem:[%s7307_s1 + $0xc20] ss:$8 sps:$4 sm:$0xff]  }
  0xd3   :  { %3365 = vmatpush1.bf16.msra.mxu1 %v5053_v40  ;;  %v5149_v40 = vld [vmem:[%s7307_s1 + $0x434] ss:$8 sps:$4 sm:$0xff]  }
  0xd4   :  { %3693 = vmatpush1.bf16.msra.mxu0 %v5056_v41  ;;  %3366 = vmatprep.subr.bf16.mxu1 %v5061_v42  ;;  %v5152_v41 = vld [vmem:[%s7307_s1 + $0xc34] ss:$8 sps:$4 sm:$0xff]   ;;  %v5147_v42 = vld [vmem:[%s7307_s1 + $0x430] ss:$8 sps:$4 sm:$0xff]  }
  0xd5   :  { %3694 = vmatprep.subr.bf16.mxu0 %v5064_v43  ;;  %v5150_v43 = vld [vmem:[%s7307_s1 + $0xc30] ss:$8 sps:$4 sm:$0xff]  }
  0xd7   :  { %3367 = vmatpush1.bf16.msra.mxu1 %v5059_v44  ;;  %v5155_v44 = vld [vmem:[%s7307_s1 + $0x444] ss:$8 sps:$4 sm:$0xff]  }
  0xd8   :  { %3695 = vmatpush1.bf16.msra.mxu0 %v5062_v45  ;;  %3368 = vmatprep.subr.bf16.mxu1 %v5067_v46  ;;  %v5158_v45 = vld [vmem:[%s7307_s1 + $0xc44] ss:$8 sps:$4 sm:$0xff]   ;;  %v5153_v46 = vld [vmem:[%s7307_s1 + $0x440] ss:$8 sps:$4 sm:$0xff]  }
  0xd9   :  { %3696 = vmatprep.subr.bf16.mxu0 %v5070_v47  ;;  %v5156_v47 = vld [vmem:[%s7307_s1 + $0xc40] ss:$8 sps:$4 sm:$0xff]  }
  0xdb   :  { %3369 = vmatpush1.bf16.msra.mxu1 %v5065_v48  ;;  %v5161_v48 = vld [vmem:[%s7307_s1 + $0x454] ss:$8 sps:$4 sm:$0xff]  }
  0xdc   :  { %3697 = vmatpush1.bf16.msra.mxu0 %v5068_v49  ;;  %3370 = vmatprep.subr.bf16.mxu1 %v5073_v50  ;;  %v5164_v49 = vld [vmem:[%s7307_s1 + $0xc54] ss:$8 sps:$4 sm:$0xff]   ;;  %v5159_v50 = vld [vmem:[%s7307_s1 + $0x450] ss:$8 sps:$4 sm:$0xff]  }
  0xdd   :  { %3698 = vmatprep.subr.bf16.mxu0 %v5076_v51  ;;  %v5162_v51 = vld [vmem:[%s7307_s1 + $0xc50] ss:$8 sps:$4 sm:$0xff]  }
  0xdf   :  { %3371 = vmatpush1.bf16.msra.mxu1 %v5071_v52  ;;  %v5167_v52 = vld [vmem:[%s7307_s1 + $0x464] ss:$8 sps:$4 sm:$0xff]  }
  0xe0   :  { %3699 = vmatpush1.bf16.msra.mxu0 %v5074_v53  ;;  %3372 = vmatprep.subr.bf16.mxu1 %v5079_v54  ;;  %v5170_v53 = vld [vmem:[%s7307_s1 + $0xc64] ss:$8 sps:$4 sm:$0xff]   ;;  %v5165_v54 = vld [vmem:[%s7307_s1 + $0x460] ss:$8 sps:$4 sm:$0xff]  }
  0xe1   :  { %3700 = vmatprep.subr.bf16.mxu0 %v5082_v55  ;;  %v5168_v55 = vld [vmem:[%s7307_s1 + $0xc60] ss:$8 sps:$4 sm:$0xff]  }
  0xe3   :  { %3373 = vmatpush1.bf16.msra.mxu1 %v5077_v56  ;;  %v5173_v56 = vld [vmem:[%s7307_s1 + $0x474] ss:$8 sps:$4 sm:$0xff]  }
  0xe4   :  { %3701 = vmatpush1.bf16.msra.mxu0 %v5080_v57  ;;  %3374 = vmatprep.subr.bf16.mxu1 %v5085_v58  ;;  %v5176_v57 = vld [vmem:[%s7307_s1 + $0xc74] ss:$8 sps:$4 sm:$0xff]   ;;  %v5171_v58 = vld [vmem:[%s7307_s1 + $0x470] ss:$8 sps:$4 sm:$0xff]  }
  0xe5   :  { %3702 = vmatprep.subr.bf16.mxu0 %v5088_v59  ;;  %v5174_v59 = vld [vmem:[%s7307_s1 + $0xc70] ss:$8 sps:$4 sm:$0xff]  }
  0xe7   :  { %3375 = vmatpush1.bf16.msra.mxu1 %v5083_v60  ;;  %v5179_v60 = vld [vmem:[%s7307_s1 + $0x484] ss:$8 sps:$4 sm:$0xff]  }
  0xe8   :  { %3703 = vmatpush1.bf16.msra.mxu0 %v5086_v61  ;;  %3376 = vmatprep.subr.bf16.mxu1 %v5091_v62  ;;  %v5182_v61 = vld [vmem:[%s7307_s1 + $0xc84] ss:$8 sps:$4 sm:$0xff]   ;;  %v5177_v62 = vld [vmem:[%s7307_s1 + $0x480] ss:$8 sps:$4 sm:$0xff]  }
  0xe9   :  { %3704 = vmatprep.subr.bf16.mxu0 %v5094_v63  ;;  %v5180_v63 = vld [vmem:[%s7307_s1 + $0xc80] ss:$8 sps:$4 sm:$0xff]  }
  0xeb   :  { %3377 = vmatpush1.bf16.msra.mxu1 %v5089_v0  ;;  %v5185_v0 = vld [vmem:[%s7307_s1 + $0x494] ss:$8 sps:$4 sm:$0xff]  }
  0xec   :  { %3705 = vmatpush1.bf16.msra.mxu0 %v5092_v1  ;;  %3378 = vmatprep.subr.bf16.mxu1 %v5097_v2  ;;  %v5188_v1 = vld [vmem:[%s7307_s1 + $0xc94] ss:$8 sps:$4 sm:$0xff]   ;;  %v5183_v2 = vld [vmem:[%s7307_s1 + $0x490] ss:$8 sps:$4 sm:$0xff]  }
  0xed   :  { %3706 = vmatprep.subr.bf16.mxu0 %v5100_v3  ;;  %v5186_v3 = vld [vmem:[%s7307_s1 + $0xc90] ss:$8 sps:$4 sm:$0xff]  }
  0xef   :  { %3379 = vmatpush1.bf16.msra.mxu1 %v5095_v4  ;;  %v5191_v4 = vld [vmem:[%s7307_s1 + $0x4a4] ss:$8 sps:$4 sm:$0xff]  }
  0xf0   :  { %3707 = vmatpush1.bf16.msra.mxu0 %v5098_v5  ;;  %3380 = vmatprep.subr.bf16.mxu1 %v5103_v6  ;;  %v5194_v5 = vld [vmem:[%s7307_s1 + $0xca4] ss:$8 sps:$4 sm:$0xff]   ;;  %v5189_v6 = vld [vmem:[%s7307_s1 + $0x4a0] ss:$8 sps:$4 sm:$0xff]  }
  0xf1   :  { %3708 = vmatprep.subr.bf16.mxu0 %v5106_v7  ;;  %v5192_v7 = vld [vmem:[%s7307_s1 + $0xca0] ss:$8 sps:$4 sm:$0xff]  }
  0xf3   :  { %3381 = vmatpush1.bf16.msra.mxu1 %v5101_v8  ;;  %v5197_v8 = vld [vmem:[%s7307_s1 + $0x4b4] ss:$8 sps:$4 sm:$0xff]  }
  0xf4   :  { %3709 = vmatpush1.bf16.msra.mxu0 %v5104_v9  ;;  %3382 = vmatprep.subr.bf16.mxu1 %v5109_v10  ;;  %v5200_v9 = vld [vmem:[%s7307_s1 + $0xcb4] ss:$8 sps:$4 sm:$0xff]   ;;  %v5195_v10 = vld [vmem:[%s7307_s1 + $0x4b0] ss:$8 sps:$4 sm:$0xff]  }
  0xf5   :  { %3710 = vmatprep.subr.bf16.mxu0 %v5112_v11  ;;  %v5198_v11 = vld [vmem:[%s7307_s1 + $0xcb0] ss:$8 sps:$4 sm:$0xff]  }
  0xf7   :  { %3383 = vmatpush1.bf16.msra.mxu1 %v5107_v12  ;;  %v5203_v12 = vld [vmem:[%s7307_s1 + $0x4c4] ss:$8 sps:$4 sm:$0xff]  }
  0xf8   :  { %3711 = vmatpush1.bf16.msra.mxu0 %v5110_v13  ;;  %3384 = vmatprep.subr.bf16.mxu1 %v5115_v14  ;;  %v5206_v13 = vld [vmem:[%s7307_s1 + $0xcc4] ss:$8 sps:$4 sm:$0xff]   ;;  %v5201_v14 = vld [vmem:[%s7307_s1 + $0x4c0] ss:$8 sps:$4 sm:$0xff]  }
  0xf9   :  { %3712 = vmatprep.subr.bf16.mxu0 %v5118_v15  ;;  %v5204_v15 = vld [vmem:[%s7307_s1 + $0xcc0] ss:$8 sps:$4 sm:$0xff]  }
  0xfb   :  { %3385 = vmatpush1.bf16.msra.mxu1 %v5113_v16  ;;  %v5209_v16 = vld [vmem:[%s7307_s1 + $0x4d4] ss:$8 sps:$4 sm:$0xff]  }
  0xfc   :  { %3713 = vmatpush1.bf16.msra.mxu0 %v5116_v17  ;;  %3386 = vmatprep.subr.bf16.mxu1 %v5121_v19  ;;  %v5212_v17 = vld [vmem:[%s7307_s1 + $0xcd4] ss:$8 sps:$4 sm:$0xff]   ;;  %v5207_v19 = vld [vmem:[%s7307_s1 + $0x4d0] ss:$8 sps:$4 sm:$0xff]  }
  0xfd   :  { %3714 = vmatprep.subr.bf16.mxu0 %v5124_v21  ;;  %v5210_v21 = vld [vmem:[%s7307_s1 + $0xcd0] ss:$8 sps:$4 sm:$0xff]  }
  0xff   :  { %3387 = vmatpush1.bf16.msra.mxu1 %v5119_v22  ;;  %v5215_v22 = vld [vmem:[%s7307_s1 + $0x4e4] ss:$8 sps:$4 sm:$0xff]  }
 0x100   :  { %3715 = vmatpush1.bf16.msra.mxu0 %v5122_v23  ;;  %3397 = vmatprep.subr.bf16.mxu1 %v5129_v26  ;;  %v5218_v23 = vld [vmem:[%s7307_s1 + $0xce4] ss:$8 sps:$4 sm:$0xff]   ;;  %v5213_v26 = vld [vmem:[%s7307_s1 + $0x4e0] ss:$8 sps:$4 sm:$0xff]  }
 0x101   :  { %3725 = vmatprep.subr.bf16.mxu0 %v5134_v18  ;;  %v5216_v18 = vld [vmem:[%s7307_s1 + $0xce0] ss:$8 sps:$4 sm:$0xff]  }
 0x102   :  { %3389 = vmatmul.mubr.bf16.vlgmr.msra.gmra.mrb[0].mxu1 %v4092_v27  ;;  %v5221_v27 = vld [vmem:[%s7307_s1 + $0x4f4] ss:$8 sps:$4 sm:$0xff]  }
 0x103   :  { %3717 = vmatmul.mubr.bf16.vlgmr.msra.gmra.mrb[0].mxu0 %v4108_v28  ;;  %3398 = vmatpush1.bf16.msra.mxu1 %v5127_v30  ;;  %v5224_v28 = vld [vmem:[%s7307_s1 + $0xcf4] ss:$8 sps:$4 sm:$0xff]   ;;  %v5219_v30 = vld [vmem:[%s7307_s1 + $0x4f0] ss:$8 sps:$4 sm:$0xff]  }
 0x104   :  { %3726 = vmatpush1.bf16.msra.mxu0 %v5132_v31  ;;  %3399 = vmatprep.subr.bf16.mxu1 %v5137_v24  ;;  %v5222_v31 = vld [vmem:[%s7307_s1 + $0xcf0] ss:$8 sps:$4 sm:$0xff]   ;;  %v5229_v24 = vld [vmem:[%s7307_s1 + $0x504] ss:$8 sps:$4 sm:$0xff]  }
 0x105   :  { %3727 = vmatprep.subr.bf16.mxu0 %v5140_v25  ;;  %3429 = vmatprep.mubr.bf16.mxu1 %v4095_v32  ;;  %v5234_v25 = vld [vmem:[%s7307_s1 + $0xd04] ss:$8 sps:$4 sm:$0xff]  }
 0x106   :  { %3757 = vmatprep.mubr.bf16.mxu0 %v4111_v33  ;;  %v6622_v32 = vld [vmem:[%s7308_s0 + $0x28] sm:$0xff] }
 0x107   :  { %3400 = vmatpush1.bf16.msra.mxu1 %v5135_v34  ;;  %v6627_v33 = vld [vmem:[%s7308_s0 + $0x68] sm:$0xff]  ;;  %v4094_v34 = vcombine.low %v6412_v20, %v6412_v20  ;;  %v5240_v20 = vld [vmem:[%s7307_s1 + $0xd14] ss:$8 sps:$4 sm:$0xff]  }
 0x108   :  { %3728 = vmatpush1.bf16.msra.mxu0 %v5138_v35  ;;  %3401 = vmatprep.subr.bf16.mxu1 %v5143_v36  ;;  %v4110_v35 = vcombine.low %v6421_v29, %v6421_v29  ;;  %v5227_v36 = vld [vmem:[%s7307_s1 + $0x500] ss:$8 sps:$4 sm:$0xff]   ;;  %v4097_v29 = vcombine.high %v6622_v32, %v6622_v32 }
 0x109   :  { %3729 = vmatprep.subr.bf16.mxu0 %v5146_v37  ;;  %v5232_v37 = vld [vmem:[%s7307_s1 + $0xd00] ss:$8 sps:$4 sm:$0xff]  }
 0x10b   :  { %3402 = vmatpush1.bf16.msra.mxu1 %v5141_v38  ;;  %v5237_v38 = vld [vmem:[%s7307_s1 + $0x514] ss:$8 sps:$4 sm:$0xff]  }
 0x10c   :  { %3730 = vmatpush1.bf16.msra.mxu0 %v5144_v39  ;;  %3403 = vmatprep.subr.bf16.mxu1 %v5149_v40  ;;  %v4113_v39 = vcombine.high %v6627_v33, %v6627_v33  ;;  %v5235_v40 = vld [vmem:[%s7307_s1 + $0x510] ss:$8 sps:$4 sm:$0xff]  }
 0x10d   :  { %3731 = vmatprep.subr.bf16.mxu0 %v5152_v41  ;;  %v5238_v41 = vld [vmem:[%s7307_s1 + $0xd10] ss:$8 sps:$4 sm:$0xff]  }
 0x10f   :  { %3404 = vmatpush1.bf16.msra.mxu1 %v5147_v42  ;;  %v5243_v42 = vld [vmem:[%s7307_s1 + $0x524] ss:$8 sps:$4 sm:$0xff]  }
 0x110   :  { %3732 = vmatpush1.bf16.msra.mxu0 %v5150_v43  ;;  %3405 = vmatprep.subr.bf16.mxu1 %v5155_v44  ;;  %v5246_v43 = vld [vmem:[%s7307_s1 + $0xd24] ss:$8 sps:$4 sm:$0xff]   ;;  %v5241_v44 = vld [vmem:[%s7307_s1 + $0x520] ss:$8 sps:$4 sm:$0xff]  }
 0x111   :  { %3733 = vmatprep.subr.bf16.mxu0 %v5158_v45  ;;  %v5244_v45 = vld [vmem:[%s7307_s1 + $0xd20] ss:$8 sps:$4 sm:$0xff]  }
 0x113   :  { %3406 = vmatpush1.bf16.msra.mxu1 %v5153_v46  ;;  %v5249_v46 = vld [vmem:[%s7307_s1 + $0x534] ss:$8 sps:$4 sm:$0xff]  }
 0x114   :  { %3734 = vmatpush1.bf16.msra.mxu0 %v5156_v47  ;;  %3407 = vmatprep.subr.bf16.mxu1 %v5161_v48  ;;  %v5252_v47 = vld [vmem:[%s7307_s1 + $0xd34] ss:$8 sps:$4 sm:$0xff]   ;;  %v5247_v48 = vld [vmem:[%s7307_s1 + $0x530] ss:$8 sps:$4 sm:$0xff]  }
 0x115   :  { %3735 = vmatprep.subr.bf16.mxu0 %v5164_v49  ;;  %v5250_v49 = vld [vmem:[%s7307_s1 + $0xd30] ss:$8 sps:$4 sm:$0xff]  }
 0x117   :  { %3408 = vmatpush1.bf16.msra.mxu1 %v5159_v50  ;;  %v5255_v50 = vld [vmem:[%s7307_s1 + $0x544] ss:$8 sps:$4 sm:$0xff]  }
 0x118   :  { %3736 = vmatpush1.bf16.msra.mxu0 %v5162_v51  ;;  %3409 = vmatprep.subr.bf16.mxu1 %v5167_v52  ;;  %v5258_v51 = vld [vmem:[%s7307_s1 + $0xd44] ss:$8 sps:$4 sm:$0xff]   ;;  %v5253_v52 = vld [vmem:[%s7307_s1 + $0x540] ss:$8 sps:$4 sm:$0xff]  }
 0x119   :  { %3737 = vmatprep.subr.bf16.mxu0 %v5170_v53  ;;  %v5256_v53 = vld [vmem:[%s7307_s1 + $0xd40] ss:$8 sps:$4 sm:$0xff]  }
 0x11b   :  { %3410 = vmatpush1.bf16.msra.mxu1 %v5165_v54  ;;  %v5261_v54 = vld [vmem:[%s7307_s1 + $0x554] ss:$8 sps:$4 sm:$0xff]  }
 0x11c   :  { %3738 = vmatpush1.bf16.msra.mxu0 %v5168_v55  ;;  %3411 = vmatprep.subr.bf16.mxu1 %v5173_v56  ;;  %v5264_v55 = vld [vmem:[%s7307_s1 + $0xd54] ss:$8 sps:$4 sm:$0xff]   ;;  %v5259_v56 = vld [vmem:[%s7307_s1 + $0x550] ss:$8 sps:$4 sm:$0xff]  }
 0x11d   :  { %3739 = vmatprep.subr.bf16.mxu0 %v5176_v57  ;;  %v5262_v57 = vld [vmem:[%s7307_s1 + $0xd50] ss:$8 sps:$4 sm:$0xff]  }
 0x11f   :  { %3412 = vmatpush1.bf16.msra.mxu1 %v5171_v58  ;;  %v5267_v58 = vld [vmem:[%s7307_s1 + $0x564] ss:$8 sps:$4 sm:$0xff]  }
 0x120   :  { %3740 = vmatpush1.bf16.msra.mxu0 %v5174_v59  ;;  %3413 = vmatprep.subr.bf16.mxu1 %v5179_v60  ;;  %v5270_v59 = vld [vmem:[%s7307_s1 + $0xd64] ss:$8 sps:$4 sm:$0xff]   ;;  %v5265_v60 = vld [vmem:[%s7307_s1 + $0x560] ss:$8 sps:$4 sm:$0xff]  }
 0x121   :  { %3741 = vmatprep.subr.bf16.mxu0 %v5182_v61  ;;  %v5268_v61 = vld [vmem:[%s7307_s1 + $0xd60] ss:$8 sps:$4 sm:$0xff]  }
 0x123   :  { %3414 = vmatpush1.bf16.msra.mxu1 %v5177_v62  ;;  %v5273_v62 = vld [vmem:[%s7307_s1 + $0x574] ss:$8 sps:$4 sm:$0xff]  }
 0x124   :  { %3742 = vmatpush1.bf16.msra.mxu0 %v5180_v63  ;;  %3415 = vmatprep.subr.bf16.mxu1 %v5185_v0  ;;  %v5276_v63 = vld [vmem:[%s7307_s1 + $0xd74] ss:$8 sps:$4 sm:$0xff]   ;;  %v5271_v0 = vld [vmem:[%s7307_s1 + $0x570] ss:$8 sps:$4 sm:$0xff]  }
 0x125   :  { %3743 = vmatprep.subr.bf16.mxu0 %v5188_v1  ;;  %v5274_v1 = vld [vmem:[%s7307_s1 + $0xd70] ss:$8 sps:$4 sm:$0xff]  }
 0x127   :  { %3416 = vmatpush1.bf16.msra.mxu1 %v5183_v2  ;;  %v5279_v2 = vld [vmem:[%s7307_s1 + $0x584] ss:$8 sps:$4 sm:$0xff]  }
 0x128   :  { %3744 = vmatpush1.bf16.msra.mxu0 %v5186_v3  ;;  %3417 = vmatprep.subr.bf16.mxu1 %v5191_v4  ;;  %v5282_v3 = vld [vmem:[%s7307_s1 + $0xd84] ss:$8 sps:$4 sm:$0xff]   ;;  %v5277_v4 = vld [vmem:[%s7307_s1 + $0x580] ss:$8 sps:$4 sm:$0xff]  }
 0x129   :  { %3745 = vmatprep.subr.bf16.mxu0 %v5194_v5  ;;  %v5280_v5 = vld [vmem:[%s7307_s1 + $0xd80] ss:$8 sps:$4 sm:$0xff]  }
 0x12b   :  { %3418 = vmatpush1.bf16.msra.mxu1 %v5189_v6  ;;  %v5285_v6 = vld [vmem:[%s7307_s1 + $0x594] ss:$8 sps:$4 sm:$0xff]  }
 0x12c   :  { %3746 = vmatpush1.bf16.msra.mxu0 %v5192_v7  ;;  %3419 = vmatprep.subr.bf16.mxu1 %v5197_v8  ;;  %v5288_v7 = vld [vmem:[%s7307_s1 + $0xd94] ss:$8 sps:$4 sm:$0xff]   ;;  %v5283_v8 = vld [vmem:[%s7307_s1 + $0x590] ss:$8 sps:$4 sm:$0xff]  }
 0x12d   :  { %3747 = vmatprep.subr.bf16.mxu0 %v5200_v9  ;;  %v5286_v9 = vld [vmem:[%s7307_s1 + $0xd90] ss:$8 sps:$4 sm:$0xff]  }
 0x12f   :  { %3420 = vmatpush1.bf16.msra.mxu1 %v5195_v10  ;;  %v5291_v10 = vld [vmem:[%s7307_s1 + $0x5a4] ss:$8 sps:$4 sm:$0xff]  }
 0x130   :  { %3748 = vmatpush1.bf16.msra.mxu0 %v5198_v11  ;;  %3421 = vmatprep.subr.bf16.mxu1 %v5203_v12  ;;  %v5294_v11 = vld [vmem:[%s7307_s1 + $0xda4] ss:$8 sps:$4 sm:$0xff]   ;;  %v5289_v12 = vld [vmem:[%s7307_s1 + $0x5a0] ss:$8 sps:$4 sm:$0xff]  }
 0x131   :  { %3749 = vmatprep.subr.bf16.mxu0 %v5206_v13  ;;  %v5292_v13 = vld [vmem:[%s7307_s1 + $0xda0] ss:$8 sps:$4 sm:$0xff]  }
 0x133   :  { %3422 = vmatpush1.bf16.msra.mxu1 %v5201_v14  ;;  %v5297_v14 = vld [vmem:[%s7307_s1 + $0x5b4] ss:$8 sps:$4 sm:$0xff]  }
 0x134   :  { %3750 = vmatpush1.bf16.msra.mxu0 %v5204_v15  ;;  %3423 = vmatprep.subr.bf16.mxu1 %v5209_v16  ;;  %v5300_v15 = vld [vmem:[%s7307_s1 + $0xdb4] ss:$8 sps:$4 sm:$0xff]   ;;  %v5295_v16 = vld [vmem:[%s7307_s1 + $0x5b0] ss:$8 sps:$4 sm:$0xff]  }
 0x135   :  { %3751 = vmatprep.subr.bf16.mxu0 %v5212_v17  ;;  %v5298_v17 = vld [vmem:[%s7307_s1 + $0xdb0] ss:$8 sps:$4 sm:$0xff]  }
 0x137   :  { %3424 = vmatpush1.bf16.msra.mxu1 %v5207_v19  ;;  %v5303_v19 = vld [vmem:[%s7307_s1 + $0x5c4] ss:$8 sps:$4 sm:$0xff]  }
 0x138   :  { %3752 = vmatpush1.bf16.msra.mxu0 %v5210_v21  ;;  %3425 = vmatprep.subr.bf16.mxu1 %v5215_v22  ;;  %v5306_v21 = vld [vmem:[%s7307_s1 + $0xdc4] ss:$8 sps:$4 sm:$0xff]   ;;  %v5301_v22 = vld [vmem:[%s7307_s1 + $0x5c0] ss:$8 sps:$4 sm:$0xff]  }
 0x139   :  { %3753 = vmatprep.subr.bf16.mxu0 %v5218_v23  ;;  %v5304_v23 = vld [vmem:[%s7307_s1 + $0xdc0] ss:$8 sps:$4 sm:$0xff]  }
 0x13b   :  { %3426 = vmatpush1.bf16.msra.mxu1 %v5213_v26  ;;  %v5309_v26 = vld [vmem:[%s7307_s1 + $0x5d4] ss:$8 sps:$4 sm:$0xff]  }
 0x13c   :  { %3754 = vmatpush1.bf16.msra.mxu0 %v5216_v18  ;;  %3427 = vmatprep.subr.bf16.mxu1 %v5221_v27  ;;  %v5312_v18 = vld [vmem:[%s7307_s1 + $0xdd4] ss:$8 sps:$4 sm:$0xff]   ;;  %v5307_v27 = vld [vmem:[%s7307_s1 + $0x5d0] ss:$8 sps:$4 sm:$0xff]  }
 0x13d   :  { %3755 = vmatprep.subr.bf16.mxu0 %v5224_v28  ;;  %v5310_v28 = vld [vmem:[%s7307_s1 + $0xdd0] ss:$8 sps:$4 sm:$0xff]  }
 0x13f   :  { %3428 = vmatpush1.bf16.msra.mxu1 %v5219_v30  ;;  %v5315_v30 = vld [vmem:[%s7307_s1 + $0x5e4] ss:$8 sps:$4 sm:$0xff]  }
 0x140   :  { %3756 = vmatpush1.bf16.msra.mxu0 %v5222_v31  ;;  %3438 = vmatprep.subr.bf16.mxu1 %v5229_v24  ;;  %v5318_v31 = vld [vmem:[%s7307_s1 + $0xde4] ss:$8 sps:$4 sm:$0xff]   ;;  %v5313_v24 = vld [vmem:[%s7307_s1 + $0x5e0] ss:$8 sps:$4 sm:$0xff]  }
 0x141   :  { %3766 = vmatprep.subr.bf16.mxu0 %v5234_v25  ;;  %v5316_v25 = vld [vmem:[%s7307_s1 + $0xde0] ss:$8 sps:$4 sm:$0xff]  }
 0x142   :  { %3430 = vmatmul.mubr.bf16.vlgmr.msra.gmra.mrb[0].mxu1 %v4094_v34  ;;  %v5321_v34 = vld [vmem:[%s7307_s1 + $0x5f4] ss:$8 sps:$4 sm:$0xff]  }
 0x143   :  { %3758 = vmatmul.mubr.bf16.vlgmr.msra.gmra.mrb[0].mxu0 %v4110_v35  ;;  %3439 = vmatpush1.bf16.msra.mxu1 %v5227_v36  ;;  %v5324_v35 = vld [vmem:[%s7307_s1 + $0xdf4] ss:$8 sps:$4 sm:$0xff]   ;;  %v5319_v36 = vld [vmem:[%s7307_s1 + $0x5f0] ss:$8 sps:$4 sm:$0xff]  }
 0x144   :  { %3767 = vmatpush1.bf16.msra.mxu0 %v5232_v37  ;;  %3440 = vmatprep.subr.bf16.mxu1 %v5237_v38  ;;  %v5322_v37 = vld [vmem:[%s7307_s1 + $0xdf0] ss:$8 sps:$4 sm:$0xff]   ;;  %v5329_v38 = vld [vmem:[%s7307_s1 + $0x604] ss:$8 sps:$4 sm:$0xff]  }
 0x145   :  { %3768 = vmatprep.subr.bf16.mxu0 %v5240_v20  ;;  %3470 = vmatprep.mubr.bf16.mxu1 %v4097_v29  ;;  %v5334_v20 = vld [vmem:[%s7307_s1 + $0xe04] ss:$8 sps:$4 sm:$0xff]   ;;  %v4096_v29 = vcombine.low %v6622_v32, %v6622_v32  ;;  %v5332_v32 = vld [vmem:[%s7307_s1 + $0xe00] ss:$8 sps:$4 sm:$0xff]  }
 0x146   :  { %3798 = vmatprep.mubr.bf16.mxu0 %v4113_v39  ;;  %v4112_v39 = vcombine.low %v6627_v33, %v6627_v33  ;;  %v5337_v33 = vld [vmem:[%s7307_s1 + $0x614] ss:$8 sps:$4 sm:$0xff]  }
 0x147   :  { %3441 = vmatpush1.bf16.msra.mxu1 %v5235_v40  ;;  %v6836_v40 = vld [vmem:[%s7308_s0 + $0x30] sm:$0xff] }
 0x148   :  { %3769 = vmatpush1.bf16.msra.mxu0 %v5238_v41  ;;  %3442 = vmatprep.subr.bf16.mxu1 %v5243_v42  ;;  %v6841_v41 = vld [vmem:[%s7308_s0 + $0x70] sm:$0xff]  ;;  %v5327_v42 = vld [vmem:[%s7307_s1 + $0x600] ss:$8 sps:$4 sm:$0xff]  }
 0x149   :  { %3770 = vmatprep.subr.bf16.mxu0 %v5246_v43  ;;  %v5340_v43 = vld [vmem:[%s7307_s1 + $0xe14] ss:$8 sps:$4 sm:$0xff]  }
 0x14b   :  { %3443 = vmatpush1.bf16.msra.mxu1 %v5241_v44  ;;  %v4099_v44 = vcombine.high %v6836_v40, %v6836_v40 }
 0x14c   :  { %3771 = vmatpush1.bf16.msra.mxu0 %v5244_v45  ;;  %3444 = vmatprep.subr.bf16.mxu1 %v5249_v46  ;;  %v4115_v45 = vcombine.high %v6841_v41, %v6841_v41  ;;  %v5335_v46 = vld [vmem:[%s7307_s1 + $0x610] ss:$8 sps:$4 sm:$0xff]  }
 0x14d   :  { %3772 = vmatprep.subr.bf16.mxu0 %v5252_v47  ;;  %v5338_v47 = vld [vmem:[%s7307_s1 + $0xe10] ss:$8 sps:$4 sm:$0xff]  }
 0x14f   :  { %3445 = vmatpush1.bf16.msra.mxu1 %v5247_v48  ;;  %v5343_v48 = vld [vmem:[%s7307_s1 + $0x624] ss:$8 sps:$4 sm:$0xff]  }
 0x150   :  { %3773 = vmatpush1.bf16.msra.mxu0 %v5250_v49  ;;  %3446 = vmatprep.subr.bf16.mxu1 %v5255_v50  ;;  %v5346_v49 = vld [vmem:[%s7307_s1 + $0xe24] ss:$8 sps:$4 sm:$0xff]   ;;  %v5341_v50 = vld [vmem:[%s7307_s1 + $0x620] ss:$8 sps:$4 sm:$0xff]  }
 0x151   :  { %3774 = vmatprep.subr.bf16.mxu0 %v5258_v51  ;;  %v5344_v51 = vld [vmem:[%s7307_s1 + $0xe20] ss:$8 sps:$4 sm:$0xff]  }
 0x153   :  { %3447 = vmatpush1.bf16.msra.mxu1 %v5253_v52  ;;  %v5349_v52 = vld [vmem:[%s7307_s1 + $0x634] ss:$8 sps:$4 sm:$0xff]  }
 0x154   :  { %3775 = vmatpush1.bf16.msra.mxu0 %v5256_v53  ;;  %3448 = vmatprep.subr.bf16.mxu1 %v5261_v54  ;;  %v5352_v53 = vld [vmem:[%s7307_s1 + $0xe34] ss:$8 sps:$4 sm:$0xff]   ;;  %v5347_v54 = vld [vmem:[%s7307_s1 + $0x630] ss:$8 sps:$4 sm:$0xff]  }
 0x155   :  { %3776 = vmatprep.subr.bf16.mxu0 %v5264_v55  ;;  %v5350_v55 = vld [vmem:[%s7307_s1 + $0xe30] ss:$8 sps:$4 sm:$0xff]  }
 0x157   :  { %3449 = vmatpush1.bf16.msra.mxu1 %v5259_v56  ;;  %v5355_v56 = vld [vmem:[%s7307_s1 + $0x644] ss:$8 sps:$4 sm:$0xff]  }
 0x158   :  { %3777 = vmatpush1.bf16.msra.mxu0 %v5262_v57  ;;  %3450 = vmatprep.subr.bf16.mxu1 %v5267_v58  ;;  %v5358_v57 = vld [vmem:[%s7307_s1 + $0xe44] ss:$8 sps:$4 sm:$0xff]   ;;  %v5353_v58 = vld [vmem:[%s7307_s1 + $0x640] ss:$8 sps:$4 sm:$0xff]  }
 0x159   :  { %3778 = vmatprep.subr.bf16.mxu0 %v5270_v59  ;;  %v5356_v59 = vld [vmem:[%s7307_s1 + $0xe40] ss:$8 sps:$4 sm:$0xff]  }
 0x15b   :  { %3451 = vmatpush1.bf16.msra.mxu1 %v5265_v60  ;;  %v5361_v60 = vld [vmem:[%s7307_s1 + $0x654] ss:$8 sps:$4 sm:$0xff]  }
 0x15c   :  { %3779 = vmatpush1.bf16.msra.mxu0 %v5268_v61  ;;  %3452 = vmatprep.subr.bf16.mxu1 %v5273_v62  ;;  %v5364_v61 = vld [vmem:[%s7307_s1 + $0xe54] ss:$8 sps:$4 sm:$0xff]   ;;  %v5359_v62 = vld [vmem:[%s7307_s1 + $0x650] ss:$8 sps:$4 sm:$0xff]  }
 0x15d   :  { %3780 = vmatprep.subr.bf16.mxu0 %v5276_v63  ;;  %v5362_v63 = vld [vmem:[%s7307_s1 + $0xe50] ss:$8 sps:$4 sm:$0xff]  }
 0x15f   :  { %3453 = vmatpush1.bf16.msra.mxu1 %v5271_v0  ;;  %v5367_v0 = vld [vmem:[%s7307_s1 + $0x664] ss:$8 sps:$4 sm:$0xff]  }
 0x160   :  { %3781 = vmatpush1.bf16.msra.mxu0 %v5274_v1  ;;  %3454 = vmatprep.subr.bf16.mxu1 %v5279_v2  ;;  %v5370_v1 = vld [vmem:[%s7307_s1 + $0xe64] ss:$8 sps:$4 sm:$0xff]   ;;  %v5365_v2 = vld [vmem:[%s7307_s1 + $0x660] ss:$8 sps:$4 sm:$0xff]  }
 0x161   :  { %3782 = vmatprep.subr.bf16.mxu0 %v5282_v3  ;;  %v5368_v3 = vld [vmem:[%s7307_s1 + $0xe60] ss:$8 sps:$4 sm:$0xff]  }
 0x163   :  { %3455 = vmatpush1.bf16.msra.mxu1 %v5277_v4  ;;  %v5373_v4 = vld [vmem:[%s7307_s1 + $0x674] ss:$8 sps:$4 sm:$0xff]  }
 0x164   :  { %3783 = vmatpush1.bf16.msra.mxu0 %v5280_v5  ;;  %3456 = vmatprep.subr.bf16.mxu1 %v5285_v6  ;;  %v5376_v5 = vld [vmem:[%s7307_s1 + $0xe74] ss:$8 sps:$4 sm:$0xff]   ;;  %v5371_v6 = vld [vmem:[%s7307_s1 + $0x670] ss:$8 sps:$4 sm:$0xff]  }
 0x165   :  { %3784 = vmatprep.subr.bf16.mxu0 %v5288_v7  ;;  %v5374_v7 = vld [vmem:[%s7307_s1 + $0xe70] ss:$8 sps:$4 sm:$0xff]  }
 0x167   :  { %3457 = vmatpush1.bf16.msra.mxu1 %v5283_v8  ;;  %v5379_v8 = vld [vmem:[%s7307_s1 + $0x684] ss:$8 sps:$4 sm:$0xff]  }
 0x168   :  { %3785 = vmatpush1.bf16.msra.mxu0 %v5286_v9  ;;  %3458 = vmatprep.subr.bf16.mxu1 %v5291_v10  ;;  %v5382_v9 = vld [vmem:[%s7307_s1 + $0xe84] ss:$8 sps:$4 sm:$0xff]   ;;  %v5377_v10 = vld [vmem:[%s7307_s1 + $0x680] ss:$8 sps:$4 sm:$0xff]  }
 0x169   :  { %3786 = vmatprep.subr.bf16.mxu0 %v5294_v11  ;;  %v5380_v11 = vld [vmem:[%s7307_s1 + $0xe80] ss:$8 sps:$4 sm:$0xff]  }
 0x16b   :  { %3459 = vmatpush1.bf16.msra.mxu1 %v5289_v12  ;;  %v5385_v12 = vld [vmem:[%s7307_s1 + $0x694] ss:$8 sps:$4 sm:$0xff]  }
 0x16c   :  { %3787 = vmatpush1.bf16.msra.mxu0 %v5292_v13  ;;  %3460 = vmatprep.subr.bf16.mxu1 %v5297_v14  ;;  %v5388_v13 = vld [vmem:[%s7307_s1 + $0xe94] ss:$8 sps:$4 sm:$0xff]   ;;  %v5383_v14 = vld [vmem:[%s7307_s1 + $0x690] ss:$8 sps:$4 sm:$0xff]  }
 0x16d   :  { %3788 = vmatprep.subr.bf16.mxu0 %v5300_v15  ;;  %v5386_v15 = vld [vmem:[%s7307_s1 + $0xe90] ss:$8 sps:$4 sm:$0xff]  }
 0x16f   :  { %3461 = vmatpush1.bf16.msra.mxu1 %v5295_v16  ;;  %v5391_v16 = vld [vmem:[%s7307_s1 + $0x6a4] ss:$8 sps:$4 sm:$0xff]  }
 0x170   :  { %3789 = vmatpush1.bf16.msra.mxu0 %v5298_v17  ;;  %3462 = vmatprep.subr.bf16.mxu1 %v5303_v19  ;;  %v5394_v17 = vld [vmem:[%s7307_s1 + $0xea4] ss:$8 sps:$4 sm:$0xff]   ;;  %v5389_v19 = vld [vmem:[%s7307_s1 + $0x6a0] ss:$8 sps:$4 sm:$0xff]  }
 0x171   :  { %3790 = vmatprep.subr.bf16.mxu0 %v5306_v21  ;;  %v5392_v21 = vld [vmem:[%s7307_s1 + $0xea0] ss:$8 sps:$4 sm:$0xff]  }
 0x173   :  { %3463 = vmatpush1.bf16.msra.mxu1 %v5301_v22  ;;  %v5397_v22 = vld [vmem:[%s7307_s1 + $0x6b4] ss:$8 sps:$4 sm:$0xff]  }
 0x174   :  { %3791 = vmatpush1.bf16.msra.mxu0 %v5304_v23  ;;  %3464 = vmatprep.subr.bf16.mxu1 %v5309_v26  ;;  %v5400_v23 = vld [vmem:[%s7307_s1 + $0xeb4] ss:$8 sps:$4 sm:$0xff]   ;;  %v5395_v26 = vld [vmem:[%s7307_s1 + $0x6b0] ss:$8 sps:$4 sm:$0xff]  }
 0x175   :  { %3792 = vmatprep.subr.bf16.mxu0 %v5312_v18  ;;  %v5398_v18 = vld [vmem:[%s7307_s1 + $0xeb0] ss:$8 sps:$4 sm:$0xff]  }
 0x177   :  { %3465 = vmatpush1.bf16.msra.mxu1 %v5307_v27  ;;  %v5403_v27 = vld [vmem:[%s7307_s1 + $0x6c4] ss:$8 sps:$4 sm:$0xff]  }
 0x178   :  { %3793 = vmatpush1.bf16.msra.mxu0 %v5310_v28  ;;  %3466 = vmatprep.subr.bf16.mxu1 %v5315_v30  ;;  %v5406_v28 = vld [vmem:[%s7307_s1 + $0xec4] ss:$8 sps:$4 sm:$0xff]   ;;  %v5401_v30 = vld [vmem:[%s7307_s1 + $0x6c0] ss:$8 sps:$4 sm:$0xff]  }
 0x179   :  { %3794 = vmatprep.subr.bf16.mxu0 %v5318_v31  ;;  %v5404_v31 = vld [vmem:[%s7307_s1 + $0xec0] ss:$8 sps:$4 sm:$0xff]  }
 0x17b   :  { %3467 = vmatpush1.bf16.msra.mxu1 %v5313_v24  ;;  %v5409_v24 = vld [vmem:[%s7307_s1 + $0x6d4] ss:$8 sps:$4 sm:$0xff]  }
 0x17c   :  { %3795 = vmatpush1.bf16.msra.mxu0 %v5316_v25  ;;  %3468 = vmatprep.subr.bf16.mxu1 %v5321_v34  ;;  %v5412_v25 = vld [vmem:[%s7307_s1 + $0xed4] ss:$8 sps:$4 sm:$0xff]   ;;  %v5407_v34 = vld [vmem:[%s7307_s1 + $0x6d0] ss:$8 sps:$4 sm:$0xff]  }
 0x17d   :  { %3796 = vmatprep.subr.bf16.mxu0 %v5324_v35  ;;  %v5410_v35 = vld [vmem:[%s7307_s1 + $0xed0] ss:$8 sps:$4 sm:$0xff]  }
 0x17f   :  { %3469 = vmatpush1.bf16.msra.mxu1 %v5319_v36  ;;  %v5415_v36 = vld [vmem:[%s7307_s1 + $0x6e4] ss:$8 sps:$4 sm:$0xff]  }
 0x180   :  { %3797 = vmatpush1.bf16.msra.mxu0 %v5322_v37  ;;  %3479 = vmatprep.subr.bf16.mxu1 %v5329_v38  ;;  %v5418_v37 = vld [vmem:[%s7307_s1 + $0xee4] ss:$8 sps:$4 sm:$0xff]   ;;  %v5413_v38 = vld [vmem:[%s7307_s1 + $0x6e0] ss:$8 sps:$4 sm:$0xff]  }
 0x181   :  { %3807 = vmatprep.subr.bf16.mxu0 %v5334_v20  ;;  %v5416_v20 = vld [vmem:[%s7307_s1 + $0xee0] ss:$8 sps:$4 sm:$0xff]  }
 0x182   :  { %3471 = vmatmul.mubr.bf16.vlgmr.msra.gmra.mrb[0].mxu1 %v4096_v29  ;;  %v5421_v29 = vld [vmem:[%s7307_s1 + $0x6f4] ss:$8 sps:$4 sm:$0xff]  }
 0x183   :  { %3799 = vmatmul.mubr.bf16.vlgmr.msra.gmra.mrb[0].mxu0 %v4112_v39  ;;  %3480 = vmatpush1.bf16.msra.mxu1 %v5327_v42  ;;  %v5424_v39 = vld [vmem:[%s7307_s1 + $0xef4] ss:$8 sps:$4 sm:$0xff]   ;;  %v5419_v42 = vld [vmem:[%s7307_s1 + $0x6f0] ss:$8 sps:$4 sm:$0xff]  }
 0x184   :  { %3808 = vmatpush1.bf16.msra.mxu0 %v5332_v32  ;;  %3481 = vmatprep.subr.bf16.mxu1 %v5337_v33  ;;  %v5422_v32 = vld [vmem:[%s7307_s1 + $0xef0] ss:$8 sps:$4 sm:$0xff]   ;;  %v5429_v33 = vld [vmem:[%s7307_s1 + $0x704] ss:$8 sps:$4 sm:$0xff]  }
 0x185   :  { %3809 = vmatprep.subr.bf16.mxu0 %v5340_v43  ;;  %3511 = vmatprep.mubr.bf16.mxu1 %v4099_v44  ;;  %v5434_v43 = vld [vmem:[%s7307_s1 + $0xf04] ss:$8 sps:$4 sm:$0xff]   ;;  %v4098_v44 = vcombine.low %v6836_v40, %v6836_v40  ;;  %v5432_v40 = vld [vmem:[%s7307_s1 + $0xf00] ss:$8 sps:$4 sm:$0xff]  }
 0x186   :  { %3839 = vmatprep.mubr.bf16.mxu0 %v4115_v45  ;;  %v4114_v45 = vcombine.low %v6841_v41, %v6841_v41  ;;  %v5437_v41 = vld [vmem:[%s7307_s1 + $0x714] ss:$8 sps:$4 sm:$0xff]  }
 0x187   :  { %3482 = vmatpush1.bf16.msra.mxu1 %v5335_v46  ;;  %v7046_v46 = vld [vmem:[%s7308_s0 + $0x38] sm:$0xff] }
 0x188   :  { %3810 = vmatpush1.bf16.msra.mxu0 %v5338_v47  ;;  %3483 = vmatprep.subr.bf16.mxu1 %v5343_v48  ;;  %v7051_v47 = vld [vmem:[%s7308_s0 + $0x78] sm:$0xff]  ;;  %v5427_v48 = vld [vmem:[%s7307_s1 + $0x700] ss:$8 sps:$4 sm:$0xff]  }
 0x189   :  { %3811 = vmatprep.subr.bf16.mxu0 %v5346_v49  ;;  %v5440_v49 = vld [vmem:[%s7307_s1 + $0xf14] ss:$8 sps:$4 sm:$0xff]  }
 0x18b   :  { %3484 = vmatpush1.bf16.msra.mxu1 %v5341_v50  ;;  %v4101_v50 = vcombine.high %v7046_v46, %v7046_v46 }
 0x18c   :  { %3812 = vmatpush1.bf16.msra.mxu0 %v5344_v51  ;;  %3485 = vmatprep.subr.bf16.mxu1 %v5349_v52  ;;  %v4117_v51 = vcombine.high %v7051_v47, %v7051_v47  ;;  %v5435_v52 = vld [vmem:[%s7307_s1 + $0x710] ss:$8 sps:$4 sm:$0xff]  }
 0x18d   :  { %3813 = vmatprep.subr.bf16.mxu0 %v5352_v53  ;;  %v5438_v53 = vld [vmem:[%s7307_s1 + $0xf10] ss:$8 sps:$4 sm:$0xff]  }
 0x18f   :  { %3486 = vmatpush1.bf16.msra.mxu1 %v5347_v54  ;;  %v5443_v54 = vld [vmem:[%s7307_s1 + $0x724] ss:$8 sps:$4 sm:$0xff]  }
 0x190   :  { %3814 = vmatpush1.bf16.msra.mxu0 %v5350_v55  ;;  %3487 = vmatprep.subr.bf16.mxu1 %v5355_v56  ;;  %v5446_v55 = vld [vmem:[%s7307_s1 + $0xf24] ss:$8 sps:$4 sm:$0xff]   ;;  %v5441_v56 = vld [vmem:[%s7307_s1 + $0x720] ss:$8 sps:$4 sm:$0xff]  }
 0x191   :  { %3815 = vmatprep.subr.bf16.mxu0 %v5358_v57  ;;  %v5444_v57 = vld [vmem:[%s7307_s1 + $0xf20] ss:$8 sps:$4 sm:$0xff]  }
 0x193   :  { %3488 = vmatpush1.bf16.msra.mxu1 %v5353_v58  ;;  %v5449_v58 = vld [vmem:[%s7307_s1 + $0x734] ss:$8 sps:$4 sm:$0xff]  }
 0x194   :  { %3816 = vmatpush1.bf16.msra.mxu0 %v5356_v59  ;;  %3489 = vmatprep.subr.bf16.mxu1 %v5361_v60  ;;  %v5452_v59 = vld [vmem:[%s7307_s1 + $0xf34] ss:$8 sps:$4 sm:$0xff]   ;;  %v5447_v60 = vld [vmem:[%s7307_s1 + $0x730] ss:$8 sps:$4 sm:$0xff]  }
 0x195   :  { %3817 = vmatprep.subr.bf16.mxu0 %v5364_v61  ;;  %v5450_v61 = vld [vmem:[%s7307_s1 + $0xf30] ss:$8 sps:$4 sm:$0xff]  }
 0x197   :  { %3490 = vmatpush1.bf16.msra.mxu1 %v5359_v62  ;;  %v5455_v62 = vld [vmem:[%s7307_s1 + $0x744] ss:$8 sps:$4 sm:$0xff]  }
 0x198   :  { %3818 = vmatpush1.bf16.msra.mxu0 %v5362_v63  ;;  %3491 = vmatprep.subr.bf16.mxu1 %v5367_v0  ;;  %v5458_v63 = vld [vmem:[%s7307_s1 + $0xf44] ss:$8 sps:$4 sm:$0xff]   ;;  %v5453_v0 = vld [vmem:[%s7307_s1 + $0x740] ss:$8 sps:$4 sm:$0xff]  }
 0x199   :  { %3819 = vmatprep.subr.bf16.mxu0 %v5370_v1  ;;  %v5456_v1 = vld [vmem:[%s7307_s1 + $0xf40] ss:$8 sps:$4 sm:$0xff]  }
 0x19b   :  { %3492 = vmatpush1.bf16.msra.mxu1 %v5365_v2  ;;  %v5461_v2 = vld [vmem:[%s7307_s1 + $0x754] ss:$8 sps:$4 sm:$0xff]  }
 0x19c   :  { %3820 = vmatpush1.bf16.msra.mxu0 %v5368_v3  ;;  %3493 = vmatprep.subr.bf16.mxu1 %v5373_v4  ;;  %v5464_v3 = vld [vmem:[%s7307_s1 + $0xf54] ss:$8 sps:$4 sm:$0xff]   ;;  %v5459_v4 = vld [vmem:[%s7307_s1 + $0x750] ss:$8 sps:$4 sm:$0xff]  }
 0x19d   :  { %3821 = vmatprep.subr.bf16.mxu0 %v5376_v5  ;;  %v5462_v5 = vld [vmem:[%s7307_s1 + $0xf50] ss:$8 sps:$4 sm:$0xff]  }
 0x19f   :  { %3494 = vmatpush1.bf16.msra.mxu1 %v5371_v6  ;;  %v5467_v6 = vld [vmem:[%s7307_s1 + $0x764] ss:$8 sps:$4 sm:$0xff]  }
 0x1a0   :  { %3822 = vmatpush1.bf16.msra.mxu0 %v5374_v7  ;;  %3495 = vmatprep.subr.bf16.mxu1 %v5379_v8  ;;  %v5470_v7 = vld [vmem:[%s7307_s1 + $0xf64] ss:$8 sps:$4 sm:$0xff]   ;;  %v5465_v8 = vld [vmem:[%s7307_s1 + $0x760] ss:$8 sps:$4 sm:$0xff]  }
 0x1a1   :  { %3823 = vmatprep.subr.bf16.mxu0 %v5382_v9  ;;  %v5468_v9 = vld [vmem:[%s7307_s1 + $0xf60] ss:$8 sps:$4 sm:$0xff]  }
 0x1a3   :  { %3496 = vmatpush1.bf16.msra.mxu1 %v5377_v10  ;;  %v5473_v10 = vld [vmem:[%s7307_s1 + $0x774] ss:$8 sps:$4 sm:$0xff]  }
 0x1a4   :  { %3824 = vmatpush1.bf16.msra.mxu0 %v5380_v11  ;;  %3497 = vmatprep.subr.bf16.mxu1 %v5385_v12  ;;  %v5476_v11 = vld [vmem:[%s7307_s1 + $0xf74] ss:$8 sps:$4 sm:$0xff]   ;;  %v5471_v12 = vld [vmem:[%s7307_s1 + $0x770] ss:$8 sps:$4 sm:$0xff]  }
 0x1a5   :  { %3825 = vmatprep.subr.bf16.mxu0 %v5388_v13  ;;  %v5474_v13 = vld [vmem:[%s7307_s1 + $0xf70] ss:$8 sps:$4 sm:$0xff]  }
 0x1a7   :  { %3498 = vmatpush1.bf16.msra.mxu1 %v5383_v14  ;;  %v5479_v14 = vld [vmem:[%s7307_s1 + $0x784] ss:$8 sps:$4 sm:$0xff]  }
 0x1a8   :  { %3826 = vmatpush1.bf16.msra.mxu0 %v5386_v15  ;;  %3499 = vmatprep.subr.bf16.mxu1 %v5391_v16  ;;  %v5482_v15 = vld [vmem:[%s7307_s1 + $0xf84] ss:$8 sps:$4 sm:$0xff]   ;;  %v5477_v16 = vld [vmem:[%s7307_s1 + $0x780] ss:$8 sps:$4 sm:$0xff]  }
 0x1a9   :  { %3827 = vmatprep.subr.bf16.mxu0 %v5394_v17  ;;  %v5480_v17 = vld [vmem:[%s7307_s1 + $0xf80] ss:$8 sps:$4 sm:$0xff]  }
 0x1ab   :  { %3500 = vmatpush1.bf16.msra.mxu1 %v5389_v19  ;;  %v5485_v19 = vld [vmem:[%s7307_s1 + $0x794] ss:$8 sps:$4 sm:$0xff]  }
 0x1ac   :  { %3828 = vmatpush1.bf16.msra.mxu0 %v5392_v21  ;;  %3501 = vmatprep.subr.bf16.mxu1 %v5397_v22  ;;  %v5488_v21 = vld [vmem:[%s7307_s1 + $0xf94] ss:$8 sps:$4 sm:$0xff]   ;;  %v5483_v22 = vld [vmem:[%s7307_s1 + $0x790] ss:$8 sps:$4 sm:$0xff]  }
 0x1ad   :  { %3829 = vmatprep.subr.bf16.mxu0 %v5400_v23  ;;  %v5486_v23 = vld [vmem:[%s7307_s1 + $0xf90] ss:$8 sps:$4 sm:$0xff]  }
 0x1af   :  { %3502 = vmatpush1.bf16.msra.mxu1 %v5395_v26  ;;  %v5491_v26 = vld [vmem:[%s7307_s1 + $0x7a4] ss:$8 sps:$4 sm:$0xff]  }
 0x1b0   :  { %3830 = vmatpush1.bf16.msra.mxu0 %v5398_v18  ;;  %3503 = vmatprep.subr.bf16.mxu1 %v5403_v27  ;;  %v5494_v18 = vld [vmem:[%s7307_s1 + $0xfa4] ss:$8 sps:$4 sm:$0xff]   ;;  %v5489_v27 = vld [vmem:[%s7307_s1 + $0x7a0] ss:$8 sps:$4 sm:$0xff]  }
 0x1b1   :  { %3831 = vmatprep.subr.bf16.mxu0 %v5406_v28  ;;  %v5492_v28 = vld [vmem:[%s7307_s1 + $0xfa0] ss:$8 sps:$4 sm:$0xff]  }
 0x1b3   :  { %3504 = vmatpush1.bf16.msra.mxu1 %v5401_v30  ;;  %v5497_v30 = vld [vmem:[%s7307_s1 + $0x7b4] ss:$8 sps:$4 sm:$0xff]  }
 0x1b4   :  { %3832 = vmatpush1.bf16.msra.mxu0 %v5404_v31  ;;  %3505 = vmatprep.subr.bf16.mxu1 %v5409_v24  ;;  %v5500_v31 = vld [vmem:[%s7307_s1 + $0xfb4] ss:$8 sps:$4 sm:$0xff]   ;;  %v5495_v24 = vld [vmem:[%s7307_s1 + $0x7b0] ss:$8 sps:$4 sm:$0xff]  }
 0x1b5   :  { %3833 = vmatprep.subr.bf16.mxu0 %v5412_v25  ;;  %v5498_v25 = vld [vmem:[%s7307_s1 + $0xfb0] ss:$8 sps:$4 sm:$0xff]  }
 0x1b7   :  { %3506 = vmatpush1.bf16.msra.mxu1 %v5407_v34  ;;  %v5503_v34 = vld [vmem:[%s7307_s1 + $0x7c4] ss:$8 sps:$4 sm:$0xff]  }
 0x1b8   :  { %3834 = vmatpush1.bf16.msra.mxu0 %v5410_v35  ;;  %3507 = vmatprep.subr.bf16.mxu1 %v5415_v36  ;;  %v5506_v35 = vld [vmem:[%s7307_s1 + $0xfc4] ss:$8 sps:$4 sm:$0xff]   ;;  %v5501_v36 = vld [vmem:[%s7307_s1 + $0x7c0] ss:$8 sps:$4 sm:$0xff]  }
 0x1b9   :  { %3835 = vmatprep.subr.bf16.mxu0 %v5418_v37  ;;  %v5504_v37 = vld [vmem:[%s7307_s1 + $0xfc0] ss:$8 sps:$4 sm:$0xff]  }
 0x1bb   :  { %3508 = vmatpush1.bf16.msra.mxu1 %v5413_v38  ;;  %v5509_v38 = vld [vmem:[%s7307_s1 + $0x7d4] ss:$8 sps:$4 sm:$0xff]  }
 0x1bc   :  { %3836 = vmatpush1.bf16.msra.mxu0 %v5416_v20  ;;  %3509 = vmatprep.subr.bf16.mxu1 %v5421_v29  ;;  %v5512_v20 = vld [vmem:[%s7307_s1 + $0xfd4] ss:$8 sps:$4 sm:$0xff]   ;;  %v5507_v29 = vld [vmem:[%s7307_s1 + $0x7d0] ss:$8 sps:$4 sm:$0xff]  }
 0x1bd   :  { %3837 = vmatprep.subr.bf16.mxu0 %v5424_v39  ;;  %v5510_v39 = vld [vmem:[%s7307_s1 + $0xfd0] ss:$8 sps:$4 sm:$0xff]  }
 0x1bf   :  { %3510 = vmatpush1.bf16.msra.mxu1 %v5419_v42  ;;  %v5515_v42 = vld [vmem:[%s7307_s1 + $0x7e4] ss:$8 sps:$4 sm:$0xff]  }
 0x1c0   :  { %3838 = vmatpush1.bf16.msra.mxu0 %v5422_v32  ;;  %3520 = vmatprep.subr.bf16.mxu1 %v5429_v33  ;;  %v5518_v32 = vld [vmem:[%s7307_s1 + $0xfe4] ss:$8 sps:$4 sm:$0xff]   ;;  %v5513_v33 = vld [vmem:[%s7307_s1 + $0x7e0] ss:$8 sps:$4 sm:$0xff]  }
 0x1c1   :  { %3848 = vmatprep.subr.bf16.mxu0 %v5434_v43  ;;  %v5516_v43 = vld [vmem:[%s7307_s1 + $0xfe0] ss:$8 sps:$4 sm:$0xff]  }
 0x1c2   :  { %3512 = vmatmul.mubr.bf16.vlgmr.msra.gmra.mrb[0].mxu1 %v4098_v44  ;;  %v5521_v44 = vld [vmem:[%s7307_s1 + $0x7f4] ss:$8 sps:$4 sm:$0xff]  }
 0x1c3   :  { %3840 = vmatmul.mubr.bf16.vlgmr.msra.gmra.mrb[0].mxu0 %v4114_v45  ;;  %3521 = vmatpush1.bf16.msra.mxu1 %v5427_v48  ;;  %v5524_v45 = vld [vmem:[%s7307_s1 + $0xff4] ss:$8 sps:$4 sm:$0xff]   ;;  %v5519_v48 = vld [vmem:[%s7307_s1 + $0x7f0] ss:$8 sps:$4 sm:$0xff]  }
 0x1c4   :  { %3849 = vmatpush1.bf16.msra.mxu0 %v5432_v40  ;;  %3522 = vmatprep.subr.bf16.mxu1 %v5437_v41  ;;  %v5522_v40 = vld [vmem:[%s7307_s1 + $0xff0] ss:$8 sps:$4 sm:$0xff]   ;;  %v5529_v41 = vld [vmem:[%s7309_s3 + $0x40] sm:$0xff]  }
 0x1c5   :  { %3850 = vmatprep.subr.bf16.mxu0 %v5440_v49  ;;  %3552 = vmatprep.mubr.bf16.mxu1 %v4101_v50  ;;  %v4100_v49 = vcombine.low %v7046_v46, %v7046_v46  ;;  %v4116_v50 = vcombine.low %v7051_v47, %v7051_v47  ;;  %v5532_v46 = vld [vmem:[%s7309_s3 + $0x8] sm:$0xff]   ;;  %v5533_v47 = vld [vmem:[%s7309_s3 + $0x50] sm:$0xff]  }
 0x1c6   :  { %3880 = vmatprep.mubr.bf16.mxu0 %v4117_v51  ;;  %v5530_v51 = vld [vmem:[%s7309_s3] sm:$0xff]  }
 0x1c7   :  { %3523 = vmatpush1.bf16.msra.mxu1 %v5435_v52  ;;  %v5531_v52 = vld [vmem:[%s7309_s3 + $0x48] sm:$0xff]  }
 0x1c8   :  { %3851 = vmatpush1.bf16.msra.mxu0 %v5438_v53  ;;  %3524 = vmatprep.subr.bf16.mxu1 %v5443_v54  ;;  %v5534_v53 = vld [vmem:[%s7309_s3 + $0x10] sm:$0xff]   ;;  %v5535_v54 = vld [vmem:[%s7309_s3 + $0x58] sm:$0xff]  }
 0x1c9   :  { %3852 = vmatprep.subr.bf16.mxu0 %v5446_v55  ;;  %v5536_v55 = vld [vmem:[%s7309_s3 + $0x18] sm:$0xff]  }
 0x1cb   :  { %3525 = vmatpush1.bf16.msra.mxu1 %v5441_v56  ;;  %v5537_v56 = vld [vmem:[%s7309_s3 + $0x60] sm:$0xff]  }
 0x1cc   :  { %3853 = vmatpush1.bf16.msra.mxu0 %v5444_v57  ;;  %3526 = vmatprep.subr.bf16.mxu1 %v5449_v58  ;;  %v5538_v57 = vld [vmem:[%s7309_s3 + $0x20] sm:$0xff]   ;;  %v5539_v58 = vld [vmem:[%s7309_s3 + $0x68] sm:$0xff]  }
 0x1cd   :  { %3854 = vmatprep.subr.bf16.mxu0 %v5452_v59  ;;  %v5540_v59 = vld [vmem:[%s7309_s3 + $0x28] sm:$0xff]  }
 0x1cf   :  { %3527 = vmatpush1.bf16.msra.mxu1 %v5447_v60  ;;  %v5541_v60 = vld [vmem:[%s7309_s3 + $0x70] sm:$0xff]  }
 0x1d0   :  { %3855 = vmatpush1.bf16.msra.mxu0 %v5450_v61  ;;  %3528 = vmatprep.subr.bf16.mxu1 %v5455_v62  ;;  %v5542_v61 = vld [vmem:[%s7309_s3 + $0x30] sm:$0xff]   ;;  %v5543_v62 = vld [vmem:[%s7309_s3 + $0x78] sm:$0xff]  }
 0x1d1   :  { %3856 = vmatprep.subr.bf16.mxu0 %v5458_v63  ;;  %v5544_v63 = vld [vmem:[%s7309_s3 + $0x38] sm:$0xff]  }
 0x1d3   :  { %3529 = vmatpush1.bf16.msra.mxu1 %v5453_v0  ;;  %v551_v0 = vlaneseq }
 0x1d4   :  { %3857 = vmatpush1.bf16.msra.mxu0 %v5456_v1  ;;  %3530 = vmatprep.subr.bf16.mxu1 %v5461_v2 }
 0x1d5   :  { %3858 = vmatprep.subr.bf16.mxu0 %v5464_v3  ;;  %v552_v1 = vshrl.u32 %v551_v0, 7  ;;  %v549_v3 = vld [vmem:[%s7310_s2] sm:$0x3] }
 0x1d7   :  { %3531 = vmatpush1.bf16.msra.mxu1 %v5459_v4  ;;  %v553_v2 = vsub.s32 0, %v552_v1  ;;  %v557_v4 = vsub.s32 1, %v552_v1 }
 0x1d8   :  { %3859 = vmatpush1.bf16.msra.mxu0 %v5462_v5  ;;  %3532 = vmatprep.subr.bf16.mxu1 %v5467_v6 }
 0x1d9   :  { %3860 = vmatprep.subr.bf16.mxu0 %v5470_v7  ;;  %v554_v5 = vrot.slane %v549_v3, %v553_v2  ;;  %v558_v6 = vrot.slane %v549_v3, %v557_v4 }
 0x1db   :  { %3533 = vmatpush1.bf16.msra.mxu1 %v5465_v8 }
 0x1dc   :  { %3861 = vmatpush1.bf16.msra.mxu0 %v5468_v9  ;;  %3534 = vmatprep.subr.bf16.mxu1 %v5473_v10 }
 0x1dd   :  { %3862 = vmatprep.subr.bf16.mxu0 %v5476_v11 }
 0x1df   :  { %3535 = vmatpush1.bf16.msra.mxu1 %v5471_v12 }
 0x1e0   :  { %3863 = vmatpush1.bf16.msra.mxu0 %v5474_v13  ;;  %3536 = vmatprep.subr.bf16.mxu1 %v5479_v14 }
 0x1e1   :  { %3864 = vmatprep.subr.bf16.mxu0 %v5482_v15 }
 0x1e3   :  { %3537 = vmatpush1.bf16.msra.mxu1 %v5477_v16 }
 0x1e4   :  { %3865 = vmatpush1.bf16.msra.mxu0 %v5480_v17  ;;  %3538 = vmatprep.subr.bf16.mxu1 %v5485_v19 }
 0x1e5   :  { %3866 = vmatprep.subr.bf16.mxu0 %v5488_v21 }
 0x1e7   :  { %3539 = vmatpush1.bf16.msra.mxu1 %v5483_v22 }
 0x1e8   :  { %3867 = vmatpush1.bf16.msra.mxu0 %v5486_v23  ;;  %3540 = vmatprep.subr.bf16.mxu1 %v5491_v26 }
 0x1e9   :  { %3868 = vmatprep.subr.bf16.mxu0 %v5494_v18 }
 0x1eb   :  { %3541 = vmatpush1.bf16.msra.mxu1 %v5489_v27 }
 0x1ec   :  { %3869 = vmatpush1.bf16.msra.mxu0 %v5492_v28  ;;  %3542 = vmatprep.subr.bf16.mxu1 %v5497_v30  ;;  %v4630_v28 = vld [vmem:[%s7311_s4] ss:$0 sm:$0xff] }
 0x1ed   :  { %3870 = vmatprep.subr.bf16.mxu0 %v5500_v31 }
 0x1ef   :  { %3543 = vmatpush1.bf16.msra.mxu1 %v5495_v24 }
 0x1f0   :  { %3871 = vmatpush1.bf16.msra.mxu0 %v5498_v25  ;;  %3544 = vmatprep.subr.bf16.mxu1 %v5503_v34 }
 0x1f1   :  { %3872 = vmatprep.subr.bf16.mxu0 %v5506_v35 }
 0x1f3   :  { %3545 = vmatpush1.bf16.msra.mxu1 %v5501_v36 }
 0x1f4   :  { %3873 = vmatpush1.bf16.msra.mxu0 %v5504_v37  ;;  %3546 = vmatprep.subr.bf16.mxu1 %v5509_v38 }
 0x1f5   :  { %3874 = vmatprep.subr.bf16.mxu0 %v5512_v20 }
 0x1f7   :  { %3547 = vmatpush1.bf16.msra.mxu1 %v5507_v29 }
 0x1f8   :  { %3875 = vmatpush1.bf16.msra.mxu0 %v5510_v39  ;;  %3548 = vmatprep.subr.bf16.mxu1 %v5515_v42 }
 0x1f9   :  { %3876 = vmatprep.subr.bf16.mxu0 %v5518_v32 }
 0x1fb   :  { %3549 = vmatpush1.bf16.msra.mxu1 %v5513_v33 }
 0x1fc   :  { %3877 = vmatpush1.bf16.msra.mxu0 %v5516_v43  ;;  %3550 = vmatprep.subr.bf16.mxu1 %v5521_v44 }
 0x1fd   :  { %3878 = vmatprep.subr.bf16.mxu0 %v5524_v45 }
 0x1ff   :  { %3551 = vmatpush1.bf16.msra.mxu1 %v5519_v48 }
 0x200   :  { %3879 = vmatpush1.bf16.msra.mxu0 %v5522_v40  ;;  %4647 = vmatprep.subr.bf16.mxu1 %v5529_v41 }
 0x202   :  { %3553 = vmatmul.mubr.bf16.vlgmr.msra.gmra.mrb[0].mxu1 %v4100_v49 }
 0x203   :  { %3881 = vmatmul.mubr.bf16.vlgmr.msra.gmra.mrb[0].mxu0 %v4116_v50  ;;  %4648 = vmatpush3.bf16.msra.mxu1 %v5530_v51 }
 0x204   :  { %4649 = vmatprep.subr.bf16.mxu1 %v5531_v52 }
 0x207   :  { %4650 = vmatpush3.bf16.msra.mxu1 %v5532_v46 }
 0x208   :  { %4651 = vmatprep.subr.bf16.mxu1 %v5533_v47 }
 0x20b   :  { %4652 = vmatpush3.bf16.msra.mxu1 %v5534_v53 }
 0x20c   :  { %4653 = vmatprep.subr.bf16.mxu1 %v5535_v54 }
 0x20f   :  { %4654 = vmatpush3.bf16.msra.mxu1 %v5536_v55 }
 0x210   :  { %4655 = vmatprep.subr.bf16.mxu1 %v5537_v56 }
 0x213   :  { %4656 = vmatpush3.bf16.msra.mxu1 %v5538_v57 }
 0x214   :  { %4657 = vmatprep.subr.bf16.mxu1 %v5539_v58 }
 0x217   :  { %4658 = vmatpush3.bf16.msra.mxu1 %v5540_v59 }
 0x218   :  { %4659 = vmatprep.subr.bf16.mxu1 %v5541_v60 }
 0x21b   :  { %4660 = vmatpush3.bf16.msra.mxu1 %v5542_v61 }
 0x21c   :  { %4661 = vmatprep.subr.bf16.mxu1 %v5543_v62 }
 0x21f   :  { %4662 = vmatpush3.bf16.msra.mxu1 %v5544_v63 }
 0x2d5   :  { %v3554_v7 = vpop.f32.mrb[0].mxu1 }
 0x2d6   :  { %v3882_v8 = vpop.f32.mrb[0].mxu0  ;;  %v4669_v9 = vadd.f32 %v3554_v7, %v554_v5  ;;  %v3556_v10 = vpop.f32.mrb[1].mxu1 }
 0x2d7   :  { %v3884_v11 = vpop.f32.mrb[1].mxu0  ;;  %v4671_v12 = vadd.f32 %v3556_v10, %v558_v6  ;;  %v3558_v13 = vpop.f32.mrb[2].mxu1 }
 0x2d8   :  { %v3886_v14 = vpop.f32.mrb[2].mxu0  ;;  %v4670_v15 = vadd.f32 %v4669_v9, %v3882_v8  ;;  %v3559_v16 = vpop.f32.mrb[3].mxu1 }
 0x2d9   :  { %v3887_v17 = vpop.f32.mrb[3].mxu0  ;;  %v4672_v19 = vadd.f32 %v4671_v12, %v3884_v11 }
 0x2da   :  { %v3889_v21 = vmax.f32 %v4670_v15, 0.0 }
 0x2db   :  { %v3890_v22 = vmax.f32 %v4672_v19, 0.0 }
 0x2dc   :  { %v3891_v26 = vpack.c.bf16 %v3889_v21, %v3889_v21 }
 0x2dd   :  { %v3892_v23 = vpack.c.bf16 %v3890_v22, %v3890_v22 }
 0x2df   :  { %4060 = vmatprep.mubr.bf16.mxu1 %v3892_v23 }
 0x2e0   :  { %4061 = vmatmul.mubr.bf16.vlgmr.msra.gmra.mrb[4].mxu1 %v3891_v26 }
 0x3b3   :  { %v4663_v18 = vpop.f32.mrb[4].mxu1 }
 0x3b4   :  { %v4664_v27 = vpop.f32.mrb[5].mxu1 }
 0x3b5   :  { %v4665_v30 = vadd.f32 %v4664_v27, %v4663_v18  ;;  %v4666_v31 = vpop.f32.mrb[6].mxu1 }
 0x3b6   :  { %v4667_v24 = vpop.f32.mrb[7].mxu1 }
 0x3b7   :  { %v4063_v25 = vadd.f32 %v4665_v30, %v4630_v28 }
 0x3b9   :  { %v4069_v34 = vsel %vm4068_vm0, %v4063_v25, -inf }
 0x3ba   :  { %4070 = vmax.xlane.f32.xlu0 %v4069_v34 }
 0x447   :  { %v4071_v35 = vpop.xlane.xlu0 %4070 }
 0x448   :  { %v4072_v36 = vsub.f32 %v4063_v25, %v4071_v35 }
 0x44a   :  { %v4073_v37 = vmul.f32 1.442695, %v4072_v36 }
 0x44c   :  { %5545 = vpow2.f32 %v4073_v37 }
 0x456   :  { %v5546_v38 = vpop.eup %5545 }
 0x457   :  { %v4075_v20 = vsel %vm4068_vm0, %v5546_v38, 0.0 }
 0x458   :  { %4076 = vadd.xlane.f32.xlu0 %v4075_v20 }
 0x4e5   :  { %v4077_v29 = vpop.xlane.xlu0 %4076 }
 0x4e6   :  { %5547 = vlog2.f32 %v4077_v29 }
 0x4f0   :  { %v5548_v39 = vpop.eup %5547 }
 0x4f1   :  { %v4079_v42 = vmul.f32 0.6931472, %v5548_v39 }
 0x4f3   :  { %v4080_v32 = vsub.f32 %v4072_v36, %v4079_v42 }
 0x4f5   :  { %4081 = vst.msk [vmem:[%s7312_s5] sm:$0xff] %vm4068_vm0, %v4080_v32 }

// kernel: cifarnet_forward.2
= control target key start
LH: loop header
LB: loop body
LE: loop exit
PB: predicated region body
PF: predicated region fallthrough
CT: control target
= control target key end

     0   :  { %s7285_s18 = smov 0   ;;  %s9971_s0 = inlined_call_operand.vmem [shape: bf16[4,4,256,27], index: 0, kind: input, shape index: {}]   ;;  %s9972_s1 = inlined_call_operand.vmem [shape: bf16[27,32], index: 1, kind: input, shape index: {}]   ;;  %s9973_s2 = inlined_call_operand.vmem [shape: f32[1,32], index: 2, kind: input, shape index: {}]   ;;  %s9974_s3 = inlined_call_operand.vmem [shape: bf16[288,64], index: 3, kind: input, shape index: {}]   ;;  %s9975_s4 = inlined_call_operand.vmem [shape: f32[1,64], index: 4, kind: input, shape index: {}]   ;;  %s9976_s5 = inlined_call_operand.vmem [shape: bf16[4,64,64], index: 5, kind: output, shape index: {}]  }
   0x1 LB: > { %s6225_s19 = sadd.s32 4294967295, %s7247_s18   ;;  %p6229_p0 = scmp.ge.s32.totalorder %s7247_s18, 1  ;;  %s7247_s18 = sphi %s7285_s18, %s15_s18  }
   0x2   : > { %p189_p1 = scmp.lt.s32.totalorder %s7247_s18, 3 }
   0x4   : > { %p190_p2 = pnand %p6229_p0, %p189_p1 }
   0x6   : > { %193 = sbr.rel (%p190_p2) target bundleno = 1309 (0x51d), region = 40 }
   0xd   : > { %v7092_v0 = vld [vmem:[%s9972_s1] sm:$0xff]   ;;  %vm1530_vm0 = vcmask 1044480   ;;  %v7093_v1 = vld [vmem:[%s9972_s1 + $0x8] sm:$0x3f]   ;;  %vm1531_vm1 = vcmask 1045504   ;;  %s6230_s24 = sshll.u32 %s6225_s19, 1 }
   0xe   : > { %6746 = vmatprep.subr.bf16.mxu0 %v7092_v0  ;;  %7074 = vmatprep.subr.bf16.mxu1 %v7092_v0  ;;  %v7249_v2 = vmov 65535   ;;  %p220_p3 = scmp.lt.s32.totalorder %s6230_s24, 3  ;;  %vm1145_vm2 = vcmask 220160   ;;  %vm2921_vm3 = vcmask 261120   ;;  %s7251_s29 = smov 64   ;;  %vm4733_vm4 = vcmask 785408  }
   0xf   : > { %6747 = vmatpush3.bf16.msra.mxu0 %v7092_v0  ;;  %v1532_v3 = vsel %vm1530_vm0, 4294967295, %v7249_v2  ;;  %7076 = vmatpush3.bf16.msra.mxu1 %v7092_v0  ;;  %s7252_s30 = smov 32   ;;  %s7253_s6 = smov 96   ;;  %vm4668_vm5 = vcmask 523264   ;;  %vm6150_vm6 = vcmask 519168  }
  0x10   : > { %v1533_v4 = vsel %vm1531_vm1, %v1532_v3, 0  ;;  %s10351_s24 = smov (!%p220_p3, %s6230_s24), 3 }
  0x11   : > { %v1535_v5 = vand.u32 %v7093_v1, %v1533_v4  ;;  %s6564_s25 = sshll.u32 %s10351_s24, 9 }
  0x12   : > { %s7305_s28 = scalar_lea.vmem %s9971_s0, %s6564_s25 }
  0x13   : > { %6748 = vmatprep.subr.bf16.mxu0 %v1535_v5  ;;  %7075 = vmatprep.subr.bf16.mxu1 %v1535_v5  ;;  %v7094_v6 = vld [vmem:[%s7305_s28] sm:$0xff]   ;;  %v7095_v7 = vld [vmem:[%s7305_s28 + $0x8] sm:$0xff]   ;;  %v7096_v8 = vld [vmem:[%s7305_s28 + $0x10] sm:$0xff]  }
  0x14   : > { %6749 = vmatpush3.bf16.msra.mxu0 %v1535_v5  ;;  %7077 = vmatpush3.bf16.msra.mxu1 %v1535_v5  ;;  %v7097_v9 = vld [vmem:[%s7305_s28 + $0x18] sm:$0xff]   ;;  %v7098_v10 = vld [vmem:[%s7305_s28 + $0x20] sm:$0xff]   ;;  %v7099_v11 = vld [vmem:[%s7305_s28 + $0x28] sm:$0xff]  }
  0x15   : > { %6750 = vmatprep.mubr.msk.bf16.mxu0 %vm1145_vm2, %v7094_v6  ;;  %v7100_v12 = vld [vmem:[%s7305_s28 + $0x30] sm:$0xff]   ;;  %v7101_v13 = vld [vmem:[%s7305_s28 + $0x38] sm:$0xff]   ;;  %v7102_v14 = vld [vmem:[%s7305_s28 + $0x40] sm:$0xff]  }
  0x16   : > { %v7103_v15 = vld [vmem:[%s7305_s28 + $0x48] sm:$0xff]   ;;  %v7104_v16 = vld [vmem:[%s7305_s28 + $0x50] sm:$0xff]   ;;  %v7105_v17 = vld [vmem:[%s7305_s28 + $0x58] sm:$0xff]  }
  0x17   : > { %6751 = vmatmul.mubr.msk.bf16.vlgmr.msra.gmra.mrb[0].mxu0 %vm1145_vm2, %v7095_v7  ;;  %v7106_v18 = vld [vmem:[%s7305_s28 + $0x60] sm:$0xff]   ;;  %v7107_v19 = vld [vmem:[%s7305_s28 + $0x68] sm:$0xff]   ;;  %v7108_v20 = vld [vmem:[%s7305_s28 + $0x70] sm:$0xff]  }
  0x18   : > { %6754 = vmatprep.mubr.msk.bf16.mxu0 %vm1145_vm2, %v7096_v8  ;;  %v7109_v21 = vld [vmem:[%s7305_s28 + $0x78] sm:$0xff]   ;;  %v7110_v22 = vld [vmem:[%s7305_s28 + $0x80] sm:$0xff]   ;;  %v7111_v23 = vld [vmem:[%s7305_s28 + $0x88] sm:$0xff]  }
  0x19   : > { %v7112_v24 = vld [vmem:[%s7305_s28 + $0x90] sm:$0xff]   ;;  %v7113_v25 = vld [vmem:[%s7305_s28 + $0x98] sm:$0xff]   ;;  %v7114_v26 = vld [vmem:[%s7305_s28 + $0xa0] sm:$0xff]  }
  0x1a   : > { %v7115_v27 = vld [vmem:[%s7305_s28 + $0xa8] sm:$0xff]   ;;  %v7116_v28 = vld [vmem:[%s7305_s28 + $0xb0] sm:$0xff]   ;;  %v7117_v29 = vld [vmem:[%s7305_s28 + $0xb8] sm:$0xff]  }
  0x1b   : > { %v7118_v30 = vld [vmem:[%s7305_s28 + $0xc0] sm:$0xff]   ;;  %v7119_v31 = vld [vmem:[%s7305_s28 + $0xc8] sm:$0xff]   ;;  %v7120_v32 = vld [vmem:[%s7305_s28 + $0xd0] sm:$0xff]  }
  0x1c   : > { %v7121_v33 = vld [vmem:[%s7305_s28 + $0xd8] sm:$0xff]   ;;  %v7122_v34 = vld [vmem:[%s7305_s28 + $0xe0] sm:$0xff]   ;;  %v7123_v35 = vld [vmem:[%s7305_s28 + $0xe8] sm:$0xff]  }
  0x1d   : > { %v7124_v36 = vld [vmem:[%s7305_s28 + $0xf0] sm:$0xff]   ;;  %v7125_v37 = vld [vmem:[%s7305_s28 + $0xf8] sm:$0xff]   ;;  %v7126_v38 = vld [vmem:[%s7305_s28 + $0x100] sm:$0xff]  }
  0x1e   : > { %v7127_v39 = vld [vmem:[%s7305_s28 + $0x108] sm:$0xff]   ;;  %v7128_v40 = vld [vmem:[%s7305_s28 + $0x110] sm:$0xff]   ;;  %v7129_v41 = vld [vmem:[%s7305_s28 + $0x118] sm:$0xff]  }
  0x1f   : > { %6755 = vmatmul.mubr.msk.bf16.gmra.mrb[4].mxu0 %vm1145_vm2, %v7097_v9  ;;  %v7130_v42 = vld [vmem:[%s7305_s28 + $0x120] sm:$0xff]   ;;  %v7131_v43 = vld [vmem:[%s7305_s28 + $0x128] sm:$0xff]   ;;  %v7132_v44 = vld [vmem:[%s7305_s28 + $0x130] sm:$0xff]  }
  0x20   : > { %6758 = vmatprep.mubr.msk.bf16.mxu0 %vm1145_vm2, %v7098_v10  ;;  %v7133_v45 = vld [vmem:[%s7305_s28 + $0x138] sm:$0xff]   ;;  %v7134_v46 = vld [vmem:[%s7305_s28 + $0x140] sm:$0xff]   ;;  %v7135_v47 = vld [vmem:[%s7305_s28 + $0x148] sm:$0xff]  }
  0x21   : > { %v7136_v48 = vld [vmem:[%s7305_s28 + $0x150] sm:$0xff]   ;;  %v7137_v49 = vld [vmem:[%s7305_s28 + $0x158] sm:$0xff]   ;;  %v7138_v50 = vld [vmem:[%s7305_s28 + $0x160] sm:$0xff]  }
  0x22   : > { %v7139_v51 = vld [vmem:[%s7305_s28 + $0x168] sm:$0xff]   ;;  %v7140_v52 = vld [vmem:[%s7305_s28 + $0x170] sm:$0xff]   ;;  %v7141_v53 = vld [vmem:[%s7305_s28 + $0x178] sm:$0xff]  }
  0x23   : > { %v7142_v54 = vld [vmem:[%s7305_s28 + $0x180] sm:$0xff]   ;;  %v7143_v55 = vld [vmem:[%s7305_s28 + $0x188] sm:$0xff]   ;;  %v7144_v56 = vld [vmem:[%s7305_s28 + $0x190] sm:$0xff]  }
  0x24   : > { %v7145_v57 = vld [vmem:[%s7305_s28 + $0x198] sm:$0xff]   ;;  %v7146_v58 = vld [vmem:[%s7305_s28 + $0x1a0] sm:$0xff]   ;;  %v7147_v59 = vld [vmem:[%s7305_s28 + $0x1a8] sm:$0xff]  }
  0x25   : > { %v7148_v60 = vld [vmem:[%s7305_s28 + $0x1b0] sm:$0xff]   ;;  %v7149_v63 = vld [vmem:[%s7305_s28 + $0x1b8] sm:$0xff]   ;;  %v7150_v1 = vld [vmem:[%s7305_s28 + $0x1c0] sm:$0xff]  }
  0x26   : > { %v7151_v5 = vld [vmem:[%s7305_s28 + $0x1c8] sm:$0xff]   ;;  %v7152_v7 = vld [vmem:[%s7305_s28 + $0x1d0] sm:$0xff]  }
  0x27   : > { %6759 = vmatmul.mubr.msk.bf16.gmra.mrb[8].mxu0 %vm1145_vm2, %v7099_v11  ;;  %v7153_v11 = vld [vmem:[%s7305_s28 + $0x1d8] sm:$0xff]  }
  0x28   : > { %6762 = vmatprep.mubr.msk.bf16.mxu0 %vm1145_vm2, %v7100_v12 }
  0x2f   : > { %6763 = vmatmul.mubr.msk.bf16.gmra.mrb[12].mxu0 %vm1145_vm2, %v7101_v13  ;;  %v7154_v13 = vld [vmem:[%s7305_s28 + $0x1e0] sm:$0xff]  }
  0x30   : > { %6766 = vmatprep.mubr.msk.bf16.mxu0 %vm1145_vm2, %v7102_v14 }
  0x37   : > { %6767 = vmatmul.mubr.msk.bf16.gmra.mrb[16].mxu0 %vm1145_vm2, %v7103_v15 }
  0x38   : > { %6770 = vmatprep.mubr.msk.bf16.mxu0 %vm1145_vm2, %v7104_v16 }
  0x3f   : > { %6771 = vmatmul.mubr.msk.bf16.gmra.mrb[20].mxu0 %vm1145_vm2, %v7105_v17  ;;  %v7155_v17 = vld [vmem:[%s7305_s28 + $0x1e8] sm:$0xff]  }
  0x40   : > { %6774 = vmatprep.mubr.msk.bf16.mxu0 %vm1145_vm2, %v7106_v18 }
  0x47   : > { %6775 = vmatmul.mubr.msk.bf16.gmra.mrb[24].mxu0 %vm1145_vm2, %v7107_v19  ;;  %v7156_v19 = vld [vmem:[%s7305_s28 + $0x1f0] sm:$0xff]  }
  0x48   : > { %6778 = vmatprep.mubr.msk.bf16.mxu0 %vm1145_vm2, %v7108_v20 }
  0x4f   : > { %6779 = vmatmul.mubr.msk.bf16.gmra.mrb[28].mxu0 %vm1145_vm2, %v7109_v21 }
  0x50   : > { %6782 = vmatprep.mubr.msk.bf16.mxu0 %vm1145_vm2, %v7110_v22 }
  0x57   : > { %6783 = vmatmul.mubr.msk.bf16.gmra.mrb[32].mxu0 %vm1145_vm2, %v7111_v23  ;;  %v7157_v23 = vld [vmem:[%s7305_s28 + $0x1f8] sm:$0xff]  }
  0x58   : > { %6786 = vmatprep.mubr.msk.bf16.mxu0 %vm1145_vm2, %v7112_v24 }
  0x5f   : > { %6787 = vmatmul.mubr.msk.bf16.gmra.mrb[36].mxu0 %vm1145_vm2, %v7113_v25  ;;  %v7158_v25 = vld [vmem:[%s7305_s28 + $0x200] sm:$0xff]  }
  0x60   : > { %6790 = vmatprep.mubr.msk.bf16.mxu0 %vm1145_vm2, %v7114_v26 }
  0x67   : > { %6791 = vmatmul.mubr.msk.bf16.gmra.mrb[40].mxu0 %vm1145_vm2, %v7115_v27  ;;  %v7190_v27 = vld [vmem:[%s7305_s28 + $0x380] sm:$0xff]  }
  0x68   : > { %6794 = vmatprep.mubr.msk.bf16.mxu0 %vm1145_vm2, %v7116_v28  ;;  %6974 = vmatprep.mubr.msk.bf16.mxu1 %vm1145_vm2, %v7190_v27 }
  0x6f   : > { %6795 = vmatmul.mubr.msk.bf16.gmra.mrb[44].mxu0 %vm1145_vm2, %v7117_v29  ;;  %v7191_v29 = vld [vmem:[%s7305_s28 + $0x388] sm:$0xff]  }
  0x70   : > { %6798 = vmatprep.mubr.msk.bf16.mxu0 %vm1145_vm2, %v7118_v30  ;;  %6975 = vmatmul.mubr.msk.bf16.vlgmr.msra.gmra.mrb[0].mxu1 %vm1145_vm2, %v7191_v29 }
  0x77   : > { %6799 = vmatmul.mubr.msk.bf16.gmra.mrb[48].mxu0 %vm1145_vm2, %v7119_v31  ;;  %v7159_v31 = vld [vmem:[%s7305_s28 + $0x208] sm:$0xff]  }
  0x78   : > { %6802 = vmatprep.mubr.msk.bf16.mxu0 %vm1145_vm2, %v7120_v32 }
  0x7f   : > { %6803 = vmatmul.mubr.msk.bf16.gmra.mrb[52].mxu0 %vm1145_vm2, %v7121_v33  ;;  %v7160_v33 = vld [vmem:[%s7305_s28 + $0x210] sm:$0xff]  }
  0x80   : > { %6806 = vmatprep.mubr.msk.bf16.mxu0 %vm1145_vm2, %v7122_v34 }
  0x87   : > { %6807 = vmatmul.mubr.msk.bf16.gmra.mrb[56].mxu0 %vm1145_vm2, %v7123_v35 }
  0x88   : > { %6810 = vmatprep.mubr.msk.bf16.mxu0 %vm1145_vm2, %v7124_v36 }
  0x8f   : > { %6811 = vmatmul.mubr.msk.bf16.gmra.mrb[60].mxu0 %vm1145_vm2, %v7125_v37  ;;  %v7161_v37 = vld [vmem:[%s7305_s28 + $0x218] sm:$0xff]  }
  0x90   : > { %6814 = vmatprep.mubr.msk.bf16.mxu0 %vm1145_vm2, %v7126_v38 }
  0x97   : > { %6815 = vmatmul.mubr.msk.bf16.gmra.mrb[64].mxu0 %vm1145_vm2, %v7127_v39  ;;  %v7162_v39 = vld [vmem:[%s7305_s28 + $0x220] sm:$0xff]  }
  0x98   : > { %6818 = vmatprep.mubr.msk.bf16.mxu0 %vm1145_vm2, %v7128_v40  ;;  %v7195_v40 = vld [vmem:[%s7305_s28 + $0x390] sm:$0xff]  }
  0x99   : > { %6978 = vmatprep.mubr.msk.bf16.mxu1 %vm1145_vm2, %v7195_v40  ;;  %v7207_v40 = vld [vmem:[%s7305_s28 + $0x3c0] sm:$0xff]  }
  0x9f   : > { %6819 = vmatmul.mubr.msk.bf16.gmra.mrb[68].mxu0 %vm1145_vm2, %v7129_v41 }
  0xa0   : > { %6822 = vmatprep.mubr.msk.bf16.mxu0 %vm1145_vm2, %v7130_v42  ;;  %v7197_v42 = vld [vmem:[%s7305_s28 + $0x398] sm:$0xff]  }
  0xa1   : > { %6979 = vmatmul.mubr.msk.bf16.gmra.mrb[4].mxu1 %vm1145_vm2, %v7197_v42 }
  0xa7   : > { %6823 = vmatmul.mubr.msk.bf16.gmra.mrb[72].mxu0 %vm1145_vm2, %v7131_v43 }
  0xa8   : > { %6826 = vmatprep.mubr.msk.bf16.mxu0 %vm1145_vm2, %v7132_v44 }
  0xaf   : > { %6827 = vmatmul.mubr.msk.bf16.gmra.mrb[76].mxu0 %vm1145_vm2, %v7133_v45  ;;  %v7163_v45 = vld [vmem:[%s7305_s28 + $0x228] sm:$0xff]  }
  0xb0   : > { %6830 = vmatprep.mubr.msk.bf16.mxu0 %vm1145_vm2, %v7134_v46 }
  0xb7   : > { %6831 = vmatmul.mubr.msk.bf16.gmra.mrb[80].mxu0 %vm1145_vm2, %v7135_v47  ;;  %v7164_v47 = vld [vmem:[%s7305_s28 + $0x230] sm:$0xff]  }
  0xb8   : > { %6834 = vmatprep.mubr.msk.bf16.mxu0 %vm1145_vm2, %v7136_v48  ;;  %v7199_v48 = vld [vmem:[%s7305_s28 + $0x3a0] sm:$0xff]  }
  0xb9   : > { %6982 = vmatprep.mubr.msk.bf16.mxu1 %vm1145_vm2, %v7199_v48 }
  0xbf   : > { %6835 = vmatmul.mubr.msk.bf16.gmra.mrb[84].mxu0 %vm1145_vm2, %v7137_v49 }
  0xc0   : > { %6838 = vmatprep.mubr.msk.bf16.mxu0 %vm1145_vm2, %v7138_v50  ;;  %v7201_v50 = vld [vmem:[%s7305_s28 + $0x3a8] sm:$0xff]  }
  0xc1   : > { %6983 = vmatmul.mubr.msk.bf16.gmra.mrb[8].mxu1 %vm1145_vm2, %v7201_v50 }
  0xc7   : > { %6839 = vmatmul.mubr.msk.bf16.gmra.mrb[88].mxu0 %vm1145_vm2, %v7139_v51  ;;  %v7250_v51 = vmov 0.0  }
  0xc8   : > { %6842 = vmatprep.mubr.msk.bf16.mxu0 %vm1145_vm2, %v7140_v52  ;;  %2931 = vst.msk [vmem:[#allocation2 + $0x48] sm:$0xff] %vm2921_vm3, %v7250_v51  ;;  %2922 = vst.msk [vmem:[#allocation2] sm:$0xff] %vm2921_vm3, %v7250_v51 }
  0xc9   : > { %2923 = vst.msk [vmem:[#allocation2 + $0x8] sm:$0xff] %vm2921_vm3, %v7250_v51  ;;  %2924 = vst.msk [vmem:[#allocation2 + $0x10] sm:$0xff] %vm2921_vm3, %v7250_v51 }
  0xca   : > { %2925 = vst.msk [vmem:[#allocation2 + $0x18] sm:$0xff] %vm2921_vm3, %v7250_v51  ;;  %2926 = vst.msk [vmem:[#allocation2 + $0x20] sm:$0xff] %vm2921_vm3, %v7250_v51 }
  0xcb   : > { %2927 = vst.msk [vmem:[#allocation2 + $0x28] sm:$0xff] %vm2921_vm3, %v7250_v51  ;;  %2928 = vst.msk [vmem:[#allocation2 + $0x30] sm:$0xff] %vm2921_vm3, %v7250_v51 }
  0xcc   : > { %2929 = vst.msk [vmem:[#allocation2 + $0x38] sm:$0xff] %vm2921_vm3, %v7250_v51  ;;  %2930 = vst.msk [vmem:[#allocation2 + $0x40] sm:$0xff] %vm2921_vm3, %v7250_v51 }
  0xcd   : > { %2932 = vst.msk [vmem:[#allocation2 + $0x50] sm:$0xff] %vm2921_vm3, %v7250_v51  ;;  %2933 = vst.msk [vmem:[#allocation2 + $0x58] sm:$0xff] %vm2921_vm3, %v7250_v51 }
  0xce   : > { %2934 = vst.msk [vmem:[#allocation2 + $0x60] sm:$0xff] %vm2921_vm3, %v7250_v51  ;;  %2935 = vst.msk [vmem:[#allocation2 + $0x68] sm:$0xff] %vm2921_vm3, %v7250_v51 }
  0xcf   : > { %6843 = vmatmul.mubr.msk.bf16.gmra.mrb[92].mxu0 %vm1145_vm2, %v7141_v53  ;;  %2936 = vst.msk [vmem:[#allocation2 + $0x70] sm:$0xff] %vm2921_vm3, %v7250_v51  ;;  %2937 = vst.msk [vmem:[#allocation2 + $0x78] sm:$0xff] %vm2921_vm3, %v7250_v51  ;;  %v7177_v53 = vld [vmem:[%s7305_s28 + $0x298] sm:$0xff]  }
  0xd0   : > { %6846 = vmatprep.mubr.msk.bf16.mxu0 %vm1145_vm2, %v7142_v54  ;;  %2938 = vst.msk [vmem:[#allocation2 + $0x80] sm:$0xff] %vm2921_vm3, %v7250_v51  ;;  %2939 = vst.msk [vmem:[#allocation2 + $0x88] sm:$0xff] %vm2921_vm3, %v7250_v51 }
  0xd1   : > { %2940 = vst.msk [vmem:[#allocation2 + $0x90] sm:$0xff] %vm2921_vm3, %v7250_v51  ;;  %2941 = vst.msk [vmem:[#allocation2 + $0x98] sm:$0xff] %vm2921_vm3, %v7250_v51 }
  0xd2   : > { %2942 = vst.msk [vmem:[#allocation2 + $0xa0] sm:$0xff] %vm2921_vm3, %v7250_v51  ;;  %2943 = vst.msk [vmem:[#allocation2 + $0xa8] sm:$0xff] %vm2921_vm3, %v7250_v51 }
  0xd3   : > { %2944 = vst.msk [vmem:[#allocation2 + $0xb0] sm:$0xff] %vm2921_vm3, %v7250_v51  ;;  %2945 = vst.msk [vmem:[#allocation2 + $0xb8] sm:$0xff] %vm2921_vm3, %v7250_v51 }
  0xd4   : > { %2946 = vst.msk [vmem:[#allocation2 + $0xc0] sm:$0xff] %vm2921_vm3, %v7250_v51  ;;  %2947 = vst.msk [vmem:[#allocation2 + $0xc8] sm:$0xff] %vm2921_vm3, %v7250_v51 }
  0xd5   : > { %2948 = vst.msk [vmem:[#allocation2 + $0xd0] sm:$0xff] %vm2921_vm3, %v7250_v51  ;;  %2949 = vst.msk [vmem:[#allocation2 + $0xd8] sm:$0xff] %vm2921_vm3, %v7250_v51 }
  0xd6   : > { %2950 = vst.msk [vmem:[#allocation2 + $0xe0] sm:$0xff] %vm2921_vm3, %v7250_v51  ;;  %2951 = vst.msk [vmem:[#allocation2 + $0xe8] sm:$0xff] %vm2921_vm3, %v7250_v51 }
  0xd7   : > { %6847 = vmatmul.mubr.msk.bf16.gmra.mrb[96].mxu0 %vm1145_vm2, %v7143_v55  ;;  %2952 = vst.msk [vmem:[#allocation2 + $0xf0] sm:$0xff] %vm2921_vm3, %v7250_v51  ;;  %2953 = vst.msk [vmem:[#allocation2 + $0xf8] sm:$0xff] %vm2921_vm3, %v7250_v51  ;;  %v7165_v55 = vld [vmem:[%s7305_s28 + $0x238] sm:$0xff]  }
  0xd8   : > { %6850 = vmatprep.mubr.msk.bf16.mxu0 %vm1145_vm2, %v7144_v56  ;;  %2954 = vst.msk [vmem:[#allocation2 + $0x100] sm:$0xff] %vm2921_vm3, %v7250_v51  ;;  %2955 = vst.msk [vmem:[#allocation2 + $0x108] sm:$0xff] %vm2921_vm3, %v7250_v51 }
  0xd9   : > { %2956 = vst.msk [vmem:[#allocation2 + $0x110] sm:$0xff] %vm2921_vm3, %v7250_v51  ;;  %2957 = vst.msk [vmem:[#allocation2 + $0x118] sm:$0xff] %vm2921_vm3, %v7250_v51 }
  0xda   : > { %2958 = vst.msk [vmem:[#allocation2 + $0x120] sm:$0xff] %vm2921_vm3, %v7250_v51  ;;  %2959 = vst.msk [vmem:[#allocation2 + $0x128] sm:$0xff] %vm2921_vm3, %v7250_v51 }
  0xdb   : > { %2960 = vst.msk [vmem:[#allocation2 + $0x130] sm:$0xff] %vm2921_vm3, %v7250_v51  ;;  %2961 = vst.msk [vmem:[#allocation2 + $0x138] sm:$0xff] %vm2921_vm3, %v7250_v51 }
  0xdc   : > { %2962 = vst.msk [vmem:[#allocation2 + $0x140] sm:$0xff] %vm2921_vm3, %v7250_v51  ;;  %2963 = vst.msk [vmem:[#allocation2 + $0x148] sm:$0xff] %vm2921_vm3, %v7250_v51 }
  0xdd   : > { %2964 = vst.msk [vmem:[#allocation2 + $0x150] sm:$0xff] %vm2921_vm3, %v7250_v51  ;;  %2965 = vst.msk [vmem:[#allocation2 + $0x158] sm:$0xff] %vm2921_vm3, %v7250_v51 }
  0xde   : > { %2966 = vst.msk [vmem:[#allocation2 + $0x160] sm:$0xff] %vm2921_vm3, %v7250_v51  ;;  %2967 = vst.msk [vmem:[#allocation2 + $0x168] sm:$0xff] %vm2921_vm3, %v7250_v51 }
  0xdf   : > { %6851 = vmatmul.mubr.msk.bf16.gmra.mrb[100].mxu0 %vm1145_vm2, %v7145_v57  ;;  %2968 = vst.msk [vmem:[#allocation2 + $0x170] sm:$0xff] %vm2921_vm3, %v7250_v51  ;;  %2969 = vst.msk [vmem:[#allocation2 + $0x178] sm:$0xff] %vm2921_vm3, %v7250_v51 }
  0xe0   : > { %6854 = vmatprep.mubr.msk.bf16.mxu0 %vm1145_vm2, %v7146_v58  ;;  %2970 = vst.msk [vmem:[#allocation2 + $0x180] sm:$0xff] %vm2921_vm3, %v7250_v51  ;;  %2971 = vst.msk [vmem:[#allocation2 + $0x188] sm:$0xff] %vm2921_vm3, %v7250_v51  ;;  %v7166_v58 = vld [vmem:[%s7305_s28 + $0x240] sm:$0xff]  }
  0xe1   : > { %2972 = vst.msk [vmem:[#allocation2 + $0x190] sm:$0xff] %vm2921_vm3, %v7250_v51  ;;  %2973 = vst.msk [vmem:[#allocation2 + $0x198] sm:$0xff] %vm2921_vm3, %v7250_v51 }
  0xe2   : > { %2974 = vst.msk [vmem:[#allocation2 + $0x1a0] sm:$0xff] %vm2921_vm3, %v7250_v51  ;;  %2975 = vst.msk [vmem:[#allocation2 + $0x1a8] sm:$0xff] %vm2921_vm3, %v7250_v51 }
  0xe3   : > { %2976 = vst.msk [vmem:[#allocation2 + $0x1b0] sm:$0xff] %vm2921_vm3, %v7250_v51  ;;  %2977 = vst.msk [vmem:[#allocation2 + $0x1b8] sm:$0xff] %vm2921_vm3, %v7250_v51 }
  0xe4   : > { %2978 = vst.msk [vmem:[#allocation2 + $0x1c0] sm:$0xff] %vm2921_vm3, %v7250_v51  ;;  %2979 = vst.msk [vmem:[#allocation2 + $0x1c8] sm:$0xff] %vm2921_vm3, %v7250_v51 }
  0xe5   : > { %2980 = vst.msk [vmem:[#allocation2 + $0x1d0] sm:$0xff] %vm2921_vm3, %v7250_v51  ;;  %2981 = vst.msk [vmem:[#allocation2 + $0x1d8] sm:$0xff] %vm2921_vm3, %v7250_v51 }
  0xe6   : > { %2982 = vst.msk [vmem:[#allocation2 + $0x1e0] sm:$0xff] %vm2921_vm3, %v7250_v51  ;;  %2983 = vst.msk [vmem:[#allocation2 + $0x1e8] sm:$0xff] %vm2921_vm3, %v7250_v51 }
  0xe7   : > { %6855 = vmatmul.mubr.msk.bf16.gmra.mrb[104].mxu0 %vm1145_vm2, %v7147_v59  ;;  %2984 = vst.msk [vmem:[#allocation2 + $0x1f0] sm:$0xff] %vm2921_vm3, %v7250_v51  ;;  %2985 = vst.msk [vmem:[#allocation2 + $0x1f8] sm:$0xff] %vm2921_vm3, %v7250_v51  ;;  %v7203_v59 = vld [vmem:[%s7305_s28 + $0x3b0] sm:$0xff]  }
  0xe8   : > { %6858 = vmatprep.mubr.msk.bf16.mxu0 %vm1145_vm2, %v7148_v60  ;;  %2986 = vst.msk [vmem:[#allocation2 + $0x200] sm:$0xff] %vm2921_vm3, %v7250_v51  ;;  %2987 = vst.msk [vmem:[#allocation2 + $0x208] sm:$0xff] %vm2921_vm3, %v7250_v51  ;;  %6986 = vmatprep.mubr.msk.bf16.mxu1 %vm1145_vm2, %v7203_v59  ;;  %v7178_v60 = vld [vmem:[%s7305_s28 + $0x2a0] sm:$0xff]  }
  0xe9   : > { %2988 = vst.msk [vmem:[#allocation2 + $0x210] sm:$0xff] %vm2921_vm3, %v7250_v51  ;;  %2989 = vst.msk [vmem:[#allocation2 + $0x218] sm:$0xff] %vm2921_vm3, %v7250_v51 }
  0xea   : > { %v7417_v61 = vpop.f32.mrb[0].mxu0  ;;  %2990 = vst.msk [vmem:[#allocation2 + $0x220] sm:$0xff] %vm2921_vm3, %v7250_v51  ;;  %2991 = vst.msk [vmem:[#allocation2 + $0x228] sm:$0xff] %vm2921_vm3, %v7250_v51 }
  0xeb   : > { %v7419_v62 = vpop.f32.mrb[1].mxu0  ;;  %2992 = vst.msk [vmem:[#allocation2 + $0x230] sm:$0xff] %vm2921_vm3, %v7250_v51  ;;  %2993 = vst.msk [vmem:[#allocation2 + $0x238] sm:$0xff] %vm2921_vm3, %v7250_v51 }
  0xec   : > { %v7422_v0 = vpop.f32.mrb[2].mxu0  ;;  %2994 = vst.msk [vmem:[#allocation2 + $0x240] sm:$0xff] %vm2921_vm3, %v7250_v51  ;;  %2995 = vst.msk [vmem:[#allocation2 + $0x248] sm:$0xff] %vm2921_vm3, %v7250_v51 }
  0xed   : > { %v7425_v2 = vpop.f32.mrb[3].mxu0  ;;  %2996 = vst.msk [vmem:[#allocation2 + $0x250] sm:$0xff] %vm2921_vm3, %v7250_v51  ;;  %2997 = vst.msk [vmem:[#allocation2 + $0x258] sm:$0xff] %vm2921_vm3, %v7250_v51 }
  0xee   : > { %2998 = vst.msk [vmem:[#allocation2 + $0x260] sm:$0xff] %vm2921_vm3, %v7250_v51  ;;  %2999 = vst.msk [vmem:[#allocation2 + $0x268] sm:$0xff] %vm2921_vm3, %v7250_v51 }
  0xef   : > { %6859 = vmatmul.mubr.msk.bf16.gmra.mrb[108].mxu0 %vm1145_vm2, %v7149_v63  ;;  %3000 = vst.msk [vmem:[#allocation2 + $0x270] sm:$0xff] %vm2921_vm3, %v7250_v51  ;;  %3001 = vst.msk [vmem:[#allocation2 + $0x278] sm:$0xff] %vm2921_vm3, %v7250_v51 }
  0xf0   : > { %6862 = vmatprep.mubr.msk.bf16.mxu0 %vm1145_vm2, %v7150_v1  ;;  %3002 = vst.msk [vmem:[#allocation2 + $0x280] sm:$0xff] %vm2921_vm3, %v7250_v51  ;;  %3003 = vst.msk [vmem:[#allocation2 + $0x288] sm:$0xff] %vm2921_vm3, %v7250_v51  ;;  %v7205_v1 = vld [vmem:[%s7305_s28 + $0x3b8] sm:$0xff]  }
  0xf1   : > { %3004 = vst.msk [vmem:[#allocation2 + $0x290] sm:$0xff] %vm2921_vm3, %v7250_v51  ;;  %3005 = vst.msk [vmem:[#allocation2 + $0x298] sm:$0xff] %vm2921_vm3, %v7250_v51  ;;  %6987 = vmatmul.mubr.msk.bf16.gmra.mrb[12].mxu1 %vm1145_vm2, %v7205_v1  ;;  %v3738_v50 = vld [vmem:[#allocation2 + $0x227] sm:$0xff] }
  0xf2   : > { %v7429_v3 = vpop.f32.mrb[4].mxu0  ;;  %3006 = vst.msk [vmem:[#allocation2 + $0x2a0] sm:$0xff] %vm2921_vm3, %v7250_v51  ;;  %3007 = vst.msk [vmem:[#allocation2 + $0x2a8] sm:$0xff] %vm2921_vm3, %v7250_v51  ;;  %6990 = vmatprep.mubr.msk.bf16.mxu1 %vm1145_vm2, %v7207_v40  ;;  %v7209_v1 = vld [vmem:[%s7305_s28 + $0x3c8] sm:$0xff]  }
  0xf3   : > { %v7431_v4 = vpop.f32.mrb[5].mxu0  ;;  %3008 = vst.msk [vmem:[#allocation2 + $0x2b0] sm:$0xff] %vm2921_vm3, %v7250_v51  ;;  %3009 = vst.msk [vmem:[#allocation2 + $0x2b8] sm:$0xff] %vm2921_vm3, %v7250_v51  ;;  %v3259_v42 = vld [vmem:[#allocation2 + $0x248] sm:$0xff] }
  0xf4   : > { %v7434_v6 = vpop.f32.mrb[6].mxu0  ;;  %3010 = vst.msk [vmem:[#allocation2 + $0x2c0] sm:$0xff] %vm2921_vm3, %v7250_v51  ;;  %3011 = vst.msk [vmem:[#allocation2 + $0x2c8] sm:$0xff] %vm2921_vm3, %v7250_v51  ;;  %v3260_v48 = vld [vmem:[#allocation2 + $0x250] sm:$0xff] }
  0xf5   : > { %v7437_v8 = vpop.f32.mrb[7].mxu0  ;;  %3012 = vst.msk [vmem:[#allocation2 + $0x2d0] sm:$0xff] %vm2921_vm3, %v7250_v51  ;;  %3013 = vst.msk [vmem:[#allocation2 + $0x2d8] sm:$0xff] %vm2921_vm3, %v7250_v51 }
  0xf6   : > { %3014 = vst.msk [vmem:[#allocation2 + $0x2e0] sm:$0xff] %vm2921_vm3, %v7250_v51  ;;  %3015 = vst.msk [vmem:[#allocation2 + $0x2e8] sm:$0xff] %vm2921_vm3, %v7250_v51 }
  0xf7   : > { %6863 = vmatmul.mubr.msk.bf16.gmra.mrb[112].mxu0 %vm1145_vm2, %v7151_v5  ;;  %3016 = vst.msk [vmem:[#allocation2 + $0x2f0] sm:$0xff] %vm2921_vm3, %v7250_v51  ;;  %3017 = vst.msk [vmem:[#allocation2 + $0x2f8] sm:$0xff] %vm2921_vm3, %v7250_v51  ;;  %v7175_v5 = vld [vmem:[%s7305_s28 + $0x288] sm:$0xff]  }
  0xf8   : > { %6866 = vmatprep.mubr.msk.bf16.mxu0 %vm1145_vm2, %v7152_v7  ;;  %3018 = vst.msk [vmem:[#allocation2 + $0x300] sm:$0xff] %vm2921_vm3, %v7250_v51  ;;  %3019 = vst.msk [vmem:[#allocation2 + $0x308] sm:$0xff] %vm2921_vm3, %v7250_v51  ;;  %v3323_v7 = vld [vmem:[#allocation2 + $0x9] sm:$0xff] }
  0xf9   : > { %3020 = vst.msk [vmem:[#allocation2 + $0x310] sm:$0xff] %vm2921_vm3, %v7250_v51  ;;  %3021 = vst.msk [vmem:[#allocation2 + $0x318] sm:$0xff] %vm2921_vm3, %v7250_v51  ;;  %6991 = vmatmul.mubr.msk.bf16.gmra.mrb[16].mxu1 %vm1145_vm2, %v7209_v1 }
  0xfa   : > { %v7441_v9 = vpop.f32.mrb[8].mxu0  ;;  %3022 = vst.msk [vmem:[#allocation2 + $0x320] sm:$0xff] %vm2921_vm3, %v7250_v51  ;;  %3023 = vst.msk [vmem:[#allocation2 + $0x328] sm:$0xff] %vm2921_vm3, %v7250_v51 }
  0xfb   : > { %v7443_v10 = vpop.f32.mrb[9].mxu0  ;;  %3024 = vst.msk [vmem:[#allocation2 + $0x330] sm:$0xff] %vm2921_vm3, %v7250_v51  ;;  %3025 = vst.msk [vmem:[#allocation2 + $0x338] sm:$0xff] %vm2921_vm3, %v7250_v51 }
  0xfc   : > { %v7446_v12 = vpop.f32.mrb[10].mxu0  ;;  %3026 = vst.msk [vmem:[#allocation2 + $0x340] sm:$0xff] %vm2921_vm3, %v7250_v51  ;;  %3027 = vst.msk [vmem:[#allocation2 + $0x348] sm:$0xff] %vm2921_vm3, %v7250_v51 }
  0xfd   : > { %v7449_v14 = vpop.f32.mrb[11].mxu0  ;;  %3028 = vst.msk [vmem:[#allocation2 + $0x350] sm:$0xff] %vm2921_vm3, %v7250_v51  ;;  %3029 = vst.msk [vmem:[#allocation2 + $0x358] sm:$0xff] %vm2921_vm3, %v7250_v51 }
  0xfe   : > { %3030 = vst.msk [vmem:[#allocation2 + $0x360] sm:$0xff] %vm2921_vm3, %v7250_v51  ;;  %3031 = vst.msk [vmem:[#allocation2 + $0x368] sm:$0xff] %vm2921_vm3, %v7250_v51 }
  0xff   : > { %6867 = vmatmul.mubr.msk.bf16.gmra.mrb[116].mxu0 %vm1145_vm2, %v7153_v11  ;;  %3032 = vst.msk [vmem:[#allocation2 + $0x370] sm:$0xff] %vm2921_vm3, %v7250_v51  ;;  %3033 = vst.msk [vmem:[#allocation2 + $0x378] sm:$0xff] %vm2921_vm3, %v7250_v51  ;;  %v3324_v11 = vld [vmem:[#allocation2 + $0x11] sm:$0xff] }
 0x100   : > { %6870 = vmatprep.mubr.msk.bf16.mxu0 %vm1145_vm2, %v7154_v13  ;;  %3034 = vst.msk [vmem:[#allocation2 + $0x380] sm:$0xff] %vm2921_vm3, %v7250_v51  ;;  %3035 = vst.msk [vmem:[#allocation2 + $0x388] sm:$0xff] %vm2921_vm3, %v7250_v51  ;;  %v3227_v13 = vld [vmem:[#allocation2 + $0x8] sm:$0xff] }
 0x101   : > { %3036 = vst.msk [vmem:[#allocation2 + $0x390] sm:$0xff] %vm2921_vm3, %v7250_v51  ;;  %3037 = vst.msk [vmem:[#allocation2 + $0x398] sm:$0xff] %vm2921_vm3, %v7250_v51 }
 0x102   : > { %v7453_v15 = vpop.f32.mrb[12].mxu0  ;;  %3038 = vst.msk [vmem:[#allocation2 + $0x3a0] sm:$0xff] %vm2921_vm3, %v7250_v51  ;;  %3039 = vst.msk [vmem:[#allocation2 + $0x3a8] sm:$0xff] %vm2921_vm3, %v7250_v51 }
 0x103   : > { %v7455_v16 = vpop.f32.mrb[13].mxu0  ;;  %3040 = vst.msk [vmem:[#allocation2 + $0x3b0] sm:$0xff] %vm2921_vm3, %v7250_v51  ;;  %3041 = vst.msk [vmem:[#allocation2 + $0x3b8] sm:$0xff] %vm2921_vm3, %v7250_v51 }
 0x104   : > { %v7458_v18 = vpop.f32.mrb[14].mxu0  ;;  %3042 = vst.msk [vmem:[#allocation2 + $0x3c0] sm:$0xff] %vm2921_vm3, %v7250_v51  ;;  %3043 = vst.msk [vmem:[#allocation2 + $0x3c8] sm:$0xff] %vm2921_vm3, %v7250_v51 }
 0x105   : > { %v7461_v20 = vpop.f32.mrb[15].mxu0  ;;  %3044 = vst.msk [vmem:[#allocation2 + $0x3d0] sm:$0xff] %vm2921_vm3, %v7250_v51  ;;  %3045 = vst.msk [vmem:[#allocation2 + $0x3d8] sm:$0xff] %vm2921_vm3, %v7250_v51 }
 0x106   : > { %3046 = vst.msk [vmem:[#allocation2 + $0x3e0] sm:$0xff] %vm2921_vm3, %v7250_v51  ;;  %3047 = vst.msk [vmem:[#allocation2 + $0x3e8] sm:$0xff] %vm2921_vm3, %v7250_v51 }
 0x107   : > { %6871 = vmatmul.mubr.msk.bf16.gmra.mrb[120].mxu0 %vm1145_vm2, %v7155_v17  ;;  %3048 = vst.msk [vmem:[#allocation2 + $0x3f0] sm:$0xff] %vm2921_vm3, %v7250_v51  ;;  %3049 = vst.msk [vmem:[#allocation2 + $0x3f8] sm:$0xff] %vm2921_vm3, %v7250_v51  ;;  %v3387_v17 = vpack.c.bf16 %v3324_v11, %v3323_v7  ;;  %v3355_v7 = vld [vmem:[#allocation2 + $0x249] sm:$0xff]  ;;  %v3356_v11 = vld [vmem:[#allocation2 + $0x251] sm:$0xff] }
 0x108   : > { %6874 = vmatprep.mubr.msk.bf16.mxu0 %vm1145_vm2, %v7156_v19  ;;  %3050 = vst.msk [vmem:[#allocation2 + $0x400] sm:$0xff] %vm2921_vm3, %v7250_v51  ;;  %3051 = vst.msk [vmem:[#allocation2 + $0x408] sm:$0xff] %vm2921_vm3, %v7250_v51  ;;  %v3228_v19 = vld [vmem:[#allocation2 + $0x10] sm:$0xff] }
 0x109   : > { %3052 = vst.msk [vmem:[#allocation2 + $0x410] sm:$0xff] %vm2921_vm3, %v7250_v51  ;;  %3053 = vst.msk [vmem:[#allocation2 + $0x418] sm:$0xff] %vm2921_vm3, %v7250_v51  ;;  %4124 = vrot.lane.b32.xlu1 %v3387_v17, %s7251_s29  ;;  %v3403_v17 = vpack.c.bf16 %v3356_v11, %v3355_v7  ;;  %v7213_v7 = vld [vmem:[%s7305_s28 + $0x3d8] sm:$0xff]  }
 0x10a   : > { %v7465_v21 = vpop.f32.mrb[16].mxu0  ;;  %3054 = vst.msk [vmem:[#allocation2 + $0x420] sm:$0xff] %vm2921_vm3, %v7250_v51  ;;  %3055 = vst.msk [vmem:[#allocation2 + $0x428] sm:$0xff] %vm2921_vm3, %v7250_v51 }
 0x10b   : > { %10041 = vst [vmem:[#allocation4_spill] sm:$0xff] %v7465_v21  ;;  %v7467_v22 = vpop.f32.mrb[17].mxu0  ;;  %3056 = vst.msk [vmem:[#allocation2 + $0x430] sm:$0xff] %vm2921_vm3, %v7250_v51 }
 0x10c   : > { %10042 = vst [vmem:[#allocation5_spill] sm:$0xff] %v7467_v22  ;;  %v7470_v24 = vpop.f32.mrb[18].mxu0  ;;  %3057 = vst.msk [vmem:[#allocation2 + $0x438] sm:$0xff] %vm2921_vm3, %v7250_v51  ;;  %v7232_v22 = vld [vmem:[%s9974_s3 + $0x50] sm:$0xff]  }
 0x10d   : > { %10043 = vst [vmem:[#allocation6_spill] sm:$0xff] %v7470_v24  ;;  %v7473_v26 = vpop.f32.mrb[19].mxu0  ;;  %3058 = vst.msk [vmem:[#allocation2 + $0x440] sm:$0xff] %vm2921_vm3, %v7250_v51  ;;  %v7193_v24 = vld [vmem:[%s7305_s28 + $0x308] sm:$0xff]  }
 0x10e   : > { %10044 = vst [vmem:[#allocation7_spill] sm:$0xff] %v7473_v26  ;;  %3059 = vst.msk [vmem:[#allocation2 + $0x448] sm:$0xff] %vm2921_vm3, %v7250_v51 }
 0x10f   : > { %6875 = vmatmul.mubr.msk.bf16.gmra.mrb[124].mxu0 %vm1145_vm2, %v7157_v23  ;;  %3060 = vst.msk [vmem:[#allocation2 + $0x450] sm:$0xff] %vm2921_vm3, %v7250_v51  ;;  %3061 = vst.msk [vmem:[#allocation2 + $0x458] sm:$0xff] %vm2921_vm3, %v7250_v51 }
 0x110   : > { %6878 = vmatprep.mubr.msk.bf16.mxu0 %vm1145_vm2, %v7158_v25  ;;  %3062 = vst.msk [vmem:[#allocation2 + $0x460] sm:$0xff] %vm2921_vm3, %v7250_v51  ;;  %3063 = vst.msk [vmem:[#allocation2 + $0x468] sm:$0xff] %vm2921_vm3, %v7250_v51  ;;  %v3291_v25 = vpack.c.bf16 %v3228_v19, %v3227_v13  ;;  %v3834_v13 = vld [vmem:[#allocation2 + $0x228] sm:$0xff]  ;;  %v3835_v19 = vld [vmem:[#allocation2 + $0x230] sm:$0xff] }
 0x111   : > { %3064 = vst.msk [vmem:[#allocation2 + $0x470] sm:$0xff] %vm2921_vm3, %v7250_v51  ;;  %3065 = vst.msk [vmem:[#allocation2 + $0x478] sm:$0xff] %vm2921_vm3, %v7250_v51  ;;  %v3739_v51 = vld [vmem:[#allocation2 + $0x22f] sm:$0xff]  ;;  %v3883_v40 = vpack.c.bf16 %v3835_v19, %v3834_v13 }
 0x112   : > { %v7478_v28 = vpop.f32.mrb[20].mxu0  ;;  %4028 = vrot.lane.b32.xlu0 %v3291_v25, %s7252_s30  ;;  %v3787_v59 = vpack.c.bf16 %v3739_v51, %v3738_v50  ;;  %v7170_v51 = vld [vmem:[%s7305_s28 + $0x260] sm:$0xff]  }
 0x113   : > { %10045 = vst [vmem:[#allocation8_spill] sm:$0xff] %v7478_v28  ;;  %v7481_v30 = vpop.f32.mrb[21].mxu0  ;;  %v7189_v28 = vld [vmem:[%s7305_s28 + $0x2f8] sm:$0xff]  }
 0x114   : > { %10046 = vst [vmem:[#allocation9_spill] sm:$0xff] %v7481_v30  ;;  %v7485_v32 = vpop.f32.mrb[22].mxu0 }
 0x115   : > { %10047 = vst [vmem:[#allocation10_spill] sm:$0xff] %v7485_v32  ;;  %v7489_v34 = vpop.f32.mrb[23].mxu0  ;;  %v7188_v32 = vld [vmem:[%s7305_s28 + $0x2f0] sm:$0xff]  }
 0x116   : > { %10048 = vst [vmem:[#allocation11_spill] sm:$0xff] %v7489_v34  ;;  %4442 = vrot.lane.b32.xlu0 %v3787_v59, %s7251_s29 }
 0x117   : > { %6879 = vmatmul.mubr.msk.bf16.gmra.mrb[128].mxu0 %vm1145_vm2, %v7159_v31  ;;  %v7167_v31 = vld [vmem:[%s7305_s28 + $0x248] sm:$0xff]  }
 0x118   : > { %6882 = vmatprep.mubr.msk.bf16.mxu0 %vm1145_vm2, %v7160_v33  ;;  %v7221_v33 = vld [vmem:[%s7305_s28 + $0x3f8] sm:$0xff]  }
 0x11a   : > { %v7493_v35 = vpop.f32.mrb[24].mxu0  ;;  %4538 = vrot.lane.b32.xlu0 %v3883_v40, %s7253_s6  ;;  %v7171_v40 = vld [vmem:[%s7305_s28 + $0x268] sm:$0xff]  }
 0x11b   : > { %10049 = vst [vmem:[#allocation12_spill] sm:$0xff] %v7493_v35  ;;  %v7495_v36 = vpop.f32.mrb[25].mxu0  ;;  %v10007_v35 = vmov 0  }
 0x11c   : > { %10050 = vst [vmem:[#allocation13_spill] sm:$0xff] %v7495_v36  ;;  %v7498_v38 = vpop.f32.mrb[26].mxu0  ;;  %v7179_v36 = vld [vmem:[%s7305_s28 + $0x2a8] sm:$0xff]   ;;  %5326 = vmatprep.subr.bf16.mxu1 %v10007_v35 }
 0x11d   : > { %10051 = vst [vmem:[#allocation14_spill] sm:$0xff] %v7498_v38  ;;  %v7502_v41 = vpop.f32.mrb[27].mxu0 }
 0x11e   : > { %10052 = vst [vmem:[#allocation15_spill] sm:$0xff] %v7502_v41  ;;  %v7186_v41 = vld [vmem:[%s7305_s28 + $0x2e0] sm:$0xff]  }
 0x11f   : > { %6883 = vmatmul.mubr.msk.bf16.gmra.mrb[132].mxu0 %vm1145_vm2, %v7161_v37 }
 0x120   : > { %6886 = vmatprep.mubr.msk.bf16.mxu0 %vm1145_vm2, %v7162_v39  ;;  %v7168_v39 = vld [vmem:[%s7305_s28 + $0x250] sm:$0xff]  }
 0x122   : > { %v7509_v43 = vpop.f32.mrb[28].mxu0 }
 0x123   : > { %10053 = vst [vmem:[#allocation16_spill] sm:$0xff] %v7509_v43  ;;  %v7511_v44 = vpop.f32.mrb[29].mxu0 }
 0x124   : > { %10054 = vst [vmem:[#allocation17_spill] sm:$0xff] %v7511_v44  ;;  %v7514_v46 = vpop.f32.mrb[30].mxu0 }
 0x125   : > { %10055 = vst [vmem:[#allocation18_spill] sm:$0xff] %v7514_v46  ;;  %v7518_v49 = vpop.f32.mrb[31].mxu0 }
 0x126   : > { %10056 = vst [vmem:[#allocation19_spill] sm:$0xff] %v7518_v49  ;;  %v7184_v49 = vld [vmem:[%s7305_s28 + $0x2d0] sm:$0xff]  }
 0x127   : > { %6887 = vmatmul.mubr.msk.bf16.gmra.mrb[136].mxu0 %vm1145_vm2, %v7163_v45 }
 0x128   : > { %6890 = vmatprep.mubr.msk.bf16.mxu0 %vm1145_vm2, %v7164_v47 }
 0x12a   : > { %v7813_v52 = vpop.f32.mrb[32].mxu0 }
 0x12b   : > { %v7817_v54 = vpop.f32.mrb[33].mxu0 }
 0x12c   : > { %v7822_v57 = vpop.f32.mrb[34].mxu0 }
 0x12d   : > { %v7828_v63 = vpop.f32.mrb[35].mxu0 }
 0x12f   : > { %6891 = vmatmul.mubr.msk.bf16.gmra.mrb[140].mxu0 %vm1145_vm2, %v7165_v55  ;;  %v7173_v55 = vld [vmem:[%s7305_s28 + $0x278] sm:$0xff]  }
 0x130   : > { %6894 = vmatprep.mubr.msk.bf16.mxu0 %vm1145_vm2, %v7166_v58  ;;  %v3307_v58 = vpack.c.bf16 %v3260_v48, %v3259_v42  ;;  %v7169_v42 = vld [vmem:[%s7305_s28 + $0x258] sm:$0xff]   ;;  %v7217_v48 = vld [vmem:[%s7305_s28 + $0x3e8] sm:$0xff]  }
 0x132   : > { %v7837_v23 = vpop.f32.mrb[36].mxu0  ;;  %4060 = vrot.lane.b32.xlu1 %v3307_v58, %s7252_s30  ;;  %v7211_v58 = vld [vmem:[%s7305_s28 + $0x3d0] sm:$0xff]  }
 0x133   : > { %v7841_v29 = vpop.f32.mrb[37].mxu0  ;;  %6994 = vmatprep.mubr.msk.bf16.mxu1 %vm1145_vm2, %v7211_v58  ;;  %v7172_v58 = vld [vmem:[%s7305_s28 + $0x270] sm:$0xff]  }
 0x134   : > { %v7847_v37 = vpop.f32.mrb[38].mxu0  ;;  %6995 = vmatmul.mubr.msk.bf16.gmra.mrb[20].mxu1 %vm1145_vm2, %v7213_v7  ;;  %v7215_v7 = vld [vmem:[%s7305_s28 + $0x3e0] sm:$0xff]  }
 0x135   : > { %v7854_v47 = vpop.f32.mrb[39].mxu0  ;;  %6998 = vmatprep.mubr.msk.bf16.mxu1 %vm1145_vm2, %v7215_v7  ;;  %v7219_v7 = vld [vmem:[%s7305_s28 + $0x3f0] sm:$0xff]  }
 0x136   : > { %4156 = vrot.lane.b32.xlu1 %v3403_v17, %s7251_s29 }
 0x137   : > { %6895 = vmatmul.mubr.msk.bf16.gmra.mrb[144].mxu0 %vm1145_vm2, %v7167_v31 }
 0x138   : > { %6898 = vmatprep.mubr.msk.bf16.mxu0 %vm1145_vm2, %v7168_v39 }
 0x13a   : > { %v7865_v25 = vpop.f32.mrb[40].mxu0 }
 0x13b   : > { %v7869_v39 = vpop.f32.mrb[41].mxu0 }
 0x13c   : > { %v7874_v50 = vpop.f32.mrb[42].mxu0  ;;  %6999 = vmatmul.mubr.msk.bf16.gmra.mrb[24].mxu1 %vm1145_vm2, %v7217_v48 }
 0x13d   : > { %v7881_v1 = vpop.f32.mrb[43].mxu0  ;;  %7002 = vmatprep.mubr.msk.bf16.mxu1 %vm1145_vm2, %v7219_v7  ;;  %v7176_v7 = vld [vmem:[%s7305_s28 + $0x290] sm:$0xff]  }
 0x13f   : > { %6899 = vmatmul.mubr.msk.bf16.gmra.mrb[148].mxu0 %vm1145_vm2, %v7169_v42 }
 0x140   : > { %6902 = vmatprep.mubr.msk.bf16.mxu0 %vm1145_vm2, %v7170_v51 }
 0x142   : > { %v7891_v13 = vpop.f32.mrb[44].mxu0 }
 0x143   : > { %v7895_v19 = vpop.f32.mrb[45].mxu0 }
 0x144   : > { %v7900_v59 = vpop.f32.mrb[46].mxu0  ;;  %7003 = vmatmul.mubr.msk.bf16.gmra.mrb[28].mxu1 %vm1145_vm2, %v7221_v33 }
 0x145   : > { %v7905_v51 = vpop.f32.mrb[47].mxu0 }
 0x147   : > { %6903 = vmatmul.mubr.msk.bf16.gmra.mrb[152].mxu0 %vm1145_vm2, %v7171_v40  ;;  %v7174_v40 = vld [vmem:[%s7305_s28 + $0x280] sm:$0xff]  }
 0x148   : > { %6906 = vmatprep.mubr.msk.bf16.mxu0 %vm1145_vm2, %v7172_v58 }
 0x14a   : > { %v7915_v11 = vpop.f32.mrb[48].mxu0 }
 0x14b   : > { %10057 = vst [vmem:[#allocation20_spill] sm:$0xff] %v7915_v11  ;;  %v7919_v31 = vpop.f32.mrb[49].mxu0 }
 0x14c   : > { %10058 = vst [vmem:[#allocation21_spill] sm:$0xff] %v7919_v31  ;;  %v7924_v45 = vpop.f32.mrb[50].mxu0  ;;  %v7204_v31 = vld [vmem:[%s7305_s28 + $0x338] sm:$0xff]  }
 0x14d   : > { %10059 = vst [vmem:[#allocation22_spill] sm:$0xff] %v7924_v45  ;;  %v7929_v48 = vpop.f32.mrb[51].mxu0 }
 0x14e   : > { %10060 = vst [vmem:[#allocation23_spill] sm:$0xff] %v7929_v48 }
 0x14f   : > { %6907 = vmatmul.mubr.msk.bf16.gmra.mrb[156].mxu0 %vm1145_vm2, %v7173_v55 }
 0x150   : > { %6910 = vmatprep.mubr.msk.bf16.mxu0 %vm1145_vm2, %v7174_v40 }
 0x152   : > { %v7939_v17 = vpop.f32.mrb[52].mxu0 }
 0x153   : > { %10061 = vst [vmem:[#allocation24_spill] sm:$0xff] %v7939_v17  ;;  %v7943_v27 = vpop.f32.mrb[53].mxu0 }
 0x154   : > { %10062 = vst [vmem:[#allocation25_spill] sm:$0xff] %v7943_v27  ;;  %v7948_v55 = vpop.f32.mrb[54].mxu0  ;;  %v7222_v27 = vld [vmem:[%s9974_s3] sm:$0xff]  }
 0x155   : > { %10063 = vst [vmem:[#allocation26_spill] sm:$0xff] %v7948_v55  ;;  %v7953_v33 = vpop.f32.mrb[55].mxu0  ;;  %5327 = vmatpush1.bf16.msra.mxu1 %v7222_v27 }
 0x156   : > { %10064 = vst [vmem:[#allocation27_spill] sm:$0xff] %v7953_v33  ;;  %v7180_v33 = vld [vmem:[%s7305_s28 + $0x2b0] sm:$0xff]   ;;  %5328 = vmatprep.subr.bf16.mxu1 %v10007_v35 }
 0x157   : > { %6911 = vmatmul.mubr.msk.bf16.gmra.mrb[160].mxu0 %vm1145_vm2, %v7175_v5 }
 0x158   : > { %6914 = vmatprep.mubr.msk.bf16.mxu0 %vm1145_vm2, %v7176_v7 }
 0x15a   : > { %v7959_v58 = vpop.f32.mrb[56].mxu0 }
 0x15b   : > { %10065 = vst [vmem:[#allocation28_spill] sm:$0xff] %v7959_v58  ;;  %v7963_v56 = vpop.f32.mrb[57].mxu0 }
 0x15c   : > { %10066 = vst [vmem:[#allocation29_spill] sm:$0xff] %v7963_v56  ;;  %v7968_v55 = vpop.f32.mrb[58].mxu0 }
 0x15d   : > { %10067 = vst [vmem:[#allocation30_spill] sm:$0xff] %v7968_v55  ;;  %v7973_v7 = vpop.f32.mrb[59].mxu0 }
 0x15e   : > { %10068 = vst [vmem:[#allocation31_spill] sm:$0xff] %v7973_v7 }
 0x15f   : > { %6915 = vmatmul.mubr.msk.bf16.gmra.mrb[164].mxu0 %vm1145_vm2, %v7177_v53 }
 0x160   : > { %6918 = vmatprep.mubr.msk.bf16.mxu0 %vm1145_vm2, %v7178_v60 }
 0x162   : > { %v7979_v42 = vpop.f32.mrb[60].mxu0 }
 0x163   : > { %10069 = vst [vmem:[#allocation32_spill] sm:$0xff] %v7979_v42  ;;  %v7983_v56 = vpop.f32.mrb[61].mxu0  ;;  %v7182_v42 = vld [vmem:[%s7305_s28 + $0x2c0] sm:$0xff]  }
 0x164   : > { %10070 = vst [vmem:[#allocation33_spill] sm:$0xff] %v7983_v56  ;;  %v7988_v55 = vpop.f32.mrb[62].mxu0  ;;  %v7181_v56 = vld [vmem:[%s7305_s28 + $0x2b8] sm:$0xff]  }
 0x165   : > { %10071 = vst [vmem:[#allocation34_spill] sm:$0xff] %v7988_v55  ;;  %v7993_v60 = vpop.f32.mrb[63].mxu0 }
 0x166   : > { %10072 = vst [vmem:[#allocation35_spill] sm:$0xff] %v7993_v60 }
 0x167   : > { %6919 = vmatmul.mubr.msk.bf16.gmra.mrb[168].mxu0 %vm1145_vm2, %v7179_v36 }
 0x168   : > { %6922 = vmatprep.mubr.msk.bf16.mxu0 %vm1145_vm2, %v7180_v33  ;;  %v7183_v33 = vld [vmem:[%s7305_s28 + $0x2c8] sm:$0xff]  }
 0x16a   : > { %v7999_v40 = vpop.f32.mrb[64].mxu0 }
 0x16b   : > { %v8001_v5 = vpop.f32.mrb[65].mxu0 }
 0x16c   : > { %v8004_v44 = vpop.f32.mrb[66].mxu0 }
 0x16d   : > { %v8007_v53 = vpop.f32.mrb[67].mxu0 }
 0x16f   : > { %6923 = vmatmul.mubr.msk.bf16.gmra.mrb[172].mxu0 %vm1145_vm2, %v7181_v56 }
 0x170   : > { %6926 = vmatprep.mubr.msk.bf16.mxu0 %vm1145_vm2, %v7182_v42  ;;  %v7185_v42 = vld [vmem:[%s7305_s28 + $0x2d8] sm:$0xff]  }
 0x172   : > { %v8011_v7 = vpop.f32.mrb[68].mxu0 }
 0x173   : > { %v8013_v36 = vpop.f32.mrb[69].mxu0 }
 0x174   : > { %v8016_v60 = vpop.f32.mrb[70].mxu0 }
 0x175   : > { %v8019_v55 = vpop.f32.mrb[71].mxu0 }
 0x177   : > { %6927 = vmatmul.mubr.msk.bf16.gmra.mrb[176].mxu0 %vm1145_vm2, %v7183_v33 }
 0x178   : > { %6930 = vmatprep.mubr.msk.bf16.mxu0 %vm1145_vm2, %v7184_v49  ;;  %v7187_v49 = vld [vmem:[%s7305_s28 + $0x2e8] sm:$0xff]  }
 0x17a   : > { %v8023_v46 = vpop.f32.mrb[72].mxu0 }
 0x17b   : > { %v8025_v56 = vpop.f32.mrb[73].mxu0 }
 0x17c   : > { %v8028_v43 = vpop.f32.mrb[74].mxu0 }
 0x17d   : > { %v8031_v38 = vpop.f32.mrb[75].mxu0 }
 0x17f   : > { %6931 = vmatmul.mubr.msk.bf16.gmra.mrb[180].mxu0 %vm1145_vm2, %v7185_v42 }
 0x180   : > { %6934 = vmatprep.mubr.msk.bf16.mxu0 %vm1145_vm2, %v7186_v41  ;;  %v7223_v41 = vld [vmem:[%s9974_s3 + $0x8] sm:$0xff]  }
 0x181   : > { %5329 = vmatpush1.bf16.msra.mxu1 %v7223_v41  ;;  %v7225_v41 = vld [vmem:[%s9974_s3 + $0x18] sm:$0xff]  }
 0x182   : > { %v8035_v58 = vpop.f32.mrb[76].mxu0  ;;  %5330 = vmatprep.subr.bf16.mxu1 %v10007_v35 }
 0x183   : > { %v8037_v33 = vpop.f32.mrb[77].mxu0 }
 0x184   : > { %v8041_v34 = vpop.f32.mrb[78].mxu0 }
 0x185   : > { %v8047_v42 = vpop.f32.mrb[79].mxu0 }
 0x187   : > { %6935 = vmatmul.mubr.msk.bf16.gmra.mrb[184].mxu0 %vm1145_vm2, %v7187_v49  ;;  %v7192_v49 = vld [vmem:[%s7305_s28 + $0x300] sm:$0xff]  }
 0x188   : > { %6938 = vmatprep.mubr.msk.bf16.mxu0 %vm1145_vm2, %v7188_v32  ;;  %v7224_v32 = vld [vmem:[%s9974_s3 + $0x10] sm:$0xff]  }
 0x189   : > { %5331 = vmatpush1.bf16.msra.mxu1 %v7224_v32 }
 0x18a   : > { %v8055_v30 = vpop.f32.mrb[80].mxu0  ;;  %5332 = vmatprep.subr.bf16.mxu1 %v10007_v35 }
 0x18b   : > { %v8057_v17 = vpop.f32.mrb[81].mxu0 }
 0x18c   : > { %10073 = vst [vmem:[#allocation36_spill] sm:$0xff] %v8057_v17  ;;  %v8061_v27 = vpop.f32.mrb[82].mxu0 }
 0x18d   : > { %10074 = vst [vmem:[#allocation37_spill] sm:$0xff] %v8061_v27  ;;  %v8067_v48 = vpop.f32.mrb[83].mxu0  ;;  %5333 = vmatpush1.bf16.msra.mxu1 %v7225_v41  ;;  %v7227_v41 = vld [vmem:[%s9974_s3 + $0x28] sm:$0xff]   ;;  %v10089_v27 = vmax.f32 %v7419_v62, %v7817_v54  ;;  %v10092_v62 = vmax.f32 %v7425_v2, %v7828_v63 }
 0x18e   : > { %10075 = vst [vmem:[#allocation38_spill] sm:$0xff] %v8067_v48  ;;  %5334 = vmatprep.subr.bf16.mxu1 %v10007_v35  ;;  %v7208_v63 = vld [vmem:[%s7305_s28 + $0x348] sm:$0xff]  }
 0x18f   : > { %6939 = vmatmul.mubr.msk.bf16.gmra.mrb[188].mxu0 %vm1145_vm2, %v7189_v28  ;;  %v7194_v28 = vld [vmem:[%s7305_s28 + $0x310] sm:$0xff]  }
 0x190   : > { %6942 = vmatprep.mubr.msk.bf16.mxu0 %vm1145_vm2, %v7192_v49  ;;  %v7226_v49 = vld [vmem:[%s9974_s3 + $0x20] sm:$0xff]  }
 0x191   : > { %5335 = vmatpush1.bf16.msra.mxu1 %v7226_v49 }
 0x192   : > { %v8075_v26 = vpop.f32.mrb[84].mxu0  ;;  %5336 = vmatprep.subr.bf16.mxu1 %v10007_v35 }
 0x193   : > { %10076 = vst [vmem:[#allocation39_spill] sm:$0xff] %v8075_v26  ;;  %v8077_v45 = vpop.f32.mrb[85].mxu0  ;;  %v7196_v26 = vld [vmem:[%s7305_s28 + $0x318] sm:$0xff]  }
 0x194   : > { %10077 = vst [vmem:[#allocation40_spill] sm:$0xff] %v8077_v45  ;;  %v8081_v32 = vpop.f32.mrb[86].mxu0 }
 0x195   : > { %10078 = vst [vmem:[#allocation41_spill] sm:$0xff] %v8081_v32  ;;  %v8087_v48 = vpop.f32.mrb[87].mxu0  ;;  %5337 = vmatpush1.bf16.msra.mxu1 %v7227_v41  ;;  %v7229_v41 = vld [vmem:[%s9974_s3 + $0x38] sm:$0xff]  }
 0x196   : > { %10079 = vst [vmem:[#allocation42_spill] sm:$0xff] %v8087_v48  ;;  %5338 = vmatprep.subr.bf16.mxu1 %v10007_v35 }
 0x197   : > { %6943 = vmatmul.mubr.msk.bf16.gmra.mrb[192].mxu0 %vm1145_vm2, %v7193_v24  ;;  %v7198_v24 = vld [vmem:[%s7305_s28 + $0x320] sm:$0xff]  }
 0x198   : > { %6946 = vmatprep.mubr.msk.bf16.mxu0 %vm1145_vm2, %v7194_v28  ;;  %v7228_v28 = vld [vmem:[%s9974_s3 + $0x30] sm:$0xff]  }
 0x199   : > { %5339 = vmatpush1.bf16.msra.mxu1 %v7228_v28 }
 0x19a   : > { %v8095_v45 = vpop.f32.mrb[88].mxu0  ;;  %5340 = vmatprep.subr.bf16.mxu1 %v10007_v35 }
 0x19b   : > { %10080 = vst [vmem:[#allocation43_spill] sm:$0xff] %v8095_v45  ;;  %v8097_v32 = vpop.f32.mrb[89].mxu0  ;;  %v7200_v45 = vld [vmem:[%s7305_s28 + $0x328] sm:$0xff]  }
 0x19c   : > { %10081 = vst [vmem:[#allocation44_spill] sm:$0xff] %v8097_v32  ;;  %v8101_v49 = vpop.f32.mrb[90].mxu0 }
 0x19d   : > { %10082 = vst [vmem:[#allocation45_spill] sm:$0xff] %v8101_v49  ;;  %v8107_v48 = vpop.f32.mrb[91].mxu0  ;;  %5341 = vmatpush1.bf16.msra.mxu1 %v7229_v41  ;;  %v7231_v41 = vld [vmem:[%s9974_s3 + $0x48] sm:$0xff]  }
 0x19e   : > { %10083 = vst [vmem:[#allocation46_spill] sm:$0xff] %v8107_v48  ;;  %5342 = vmatprep.subr.bf16.mxu1 %v10007_v35 }
 0x19f   : > { %6947 = vmatmul.mubr.msk.bf16.gmra.mrb[196].mxu0 %vm1145_vm2, %v7196_v26  ;;  %v7202_v26 = vld [vmem:[%s7305_s28 + $0x330] sm:$0xff]  }
 0x1a0   : > { %6950 = vmatprep.mubr.msk.bf16.mxu0 %vm1145_vm2, %v7198_v24  ;;  %v7230_v24 = vld [vmem:[%s9974_s3 + $0x40] sm:$0xff]  }
 0x1a1   : > { %5343 = vmatpush1.bf16.msra.mxu1 %v7230_v24 }
 0x1a2   : > { %v8115_v32 = vpop.f32.mrb[92].mxu0  ;;  %5344 = vmatprep.subr.bf16.mxu1 %v10007_v35 }
 0x1a3   : > { %10084 = vst [vmem:[#allocation47_spill] sm:$0xff] %v8115_v32  ;;  %v8117_v49 = vpop.f32.mrb[93].mxu0 }
 0x1a4   : > { %10085 = vst [vmem:[#allocation48_spill] sm:$0xff] %v8117_v49  ;;  %v8121_v28 = vpop.f32.mrb[94].mxu0 }
 0x1a5   : > { %10086 = vst [vmem:[#allocation49_spill] sm:$0xff] %v8121_v28  ;;  %v8127_v48 = vpop.f32.mrb[95].mxu0  ;;  %5345 = vmatpush1.bf16.msra.mxu1 %v7231_v41 }
 0x1a6   : > { %10087 = vst [vmem:[#allocation50_spill] sm:$0xff] %v8127_v48  ;;  %5346 = vmatprep.subr.bf16.mxu1 %v10007_v35  ;;  %v7206_v48 = vld [vmem:[%s7305_s28 + $0x340] sm:$0xff]  }
 0x1a7   : > { %6951 = vmatmul.mubr.msk.bf16.gmra.mrb[200].mxu0 %vm1145_vm2, %v7200_v45  ;;  %v8141_v45 = vld [vmem:[%s9973_s2] ss:$0 sm:$0xff] }
 0x1a8   : > { %6954 = vmatprep.mubr.msk.bf16.mxu0 %vm1145_vm2, %v7202_v26 }
 0x1a9   : > { %5347 = vmatpush1.bf16.msra.mxu1 %v7232_v22  ;;  %v7233_v22 = vld [vmem:[%s9974_s3 + $0x58] sm:$0xff]  }
 0x1aa   : > { %v6848_v28 = vpop.f32.mrb[96].mxu0 }
 0x1ab   : > { %v2660_v49 = vmax.f32 %v7999_v40, %v6848_v28  ;;  %v1955_v32 = vpop.f32.mrb[97].mxu0  ;;  %v10088_v40 = vmax.f32 %v7417_v61, %v7813_v52  ;;  %v10091_v61 = vmov 0  }
 0x1ac   : > { %v2658_v24 = vmax.f32 %v8001_v5, %v1955_v32  ;;  %v6849_v26 = vpop.f32.mrb[98].mxu0  ;;  %v10090_v32 = vmax.f32 %v7422_v0, %v7822_v57  ;;  %5348 = vmatprep.subr.bf16.mxu1 %v10091_v61 }
 0x1ad   : > { %v2724_v28 = vmax.f32 %v10088_v40, %v2660_v49  ;;  %v2661_v41 = vmax.f32 %v8004_v44, %v6849_v26  ;;  %v1958_v35 = vpop.f32.mrb[99].mxu0  ;;  %5349 = vmatpush1.bf16.msra.mxu1 %v7233_v22  ;;  %v7234_v49 = vld [vmem:[%s9974_s3 + $0x60] sm:$0xff]   ;;  %v7212_v22 = vld [vmem:[%s7305_s28 + $0x358] sm:$0xff]  }
 0x1ae   : > { %v2722_v11 = vmax.f32 %v10089_v27, %v2658_v24  ;;  %v2659_v21 = vmax.f32 %v8007_v53, %v1958_v35  ;;  %5350 = vmatprep.subr.bf16.mxu1 %v10091_v61  ;;  %v7210_v27 = vld [vmem:[%s7305_s28 + $0x350] sm:$0xff]  }
 0x1af   : > { %v2795_v5 = vadd.f32 %v8141_v45, %v2724_v28  ;;  %v2725_v17 = vmax.f32 %v10090_v32, %v2661_v41  ;;  %6955 = vmatmul.mubr.msk.bf16.gmra.mrb[204].mxu0 %vm1145_vm2, %v7204_v31  ;;  %v10095_v32 = vmax.f32 %v7434_v6, %v7847_v37 }
 0x1b0   : > { %v2793_v44 = vadd.f32 %v8141_v45, %v2722_v11  ;;  %v2723_v52 = vmax.f32 %v10092_v62, %v2659_v21  ;;  %6958 = vmatprep.mubr.msk.bf16.mxu0 %vm1145_vm2, %v7206_v48 }
 0x1b1   : > { %v2859_v35 = vmax.f32 %v2795_v5, 0.0  ;;  %v2796_v0 = vadd.f32 %v8141_v45, %v2725_v17  ;;  %5351 = vmatpush1.bf16.msra.mxu1 %v7234_v49 }
 0x1b2   : > { %v2857_v54 = vmax.f32 %v2793_v44, 0.0  ;;  %v2794_v57 = vadd.f32 %v8141_v45, %v2723_v52  ;;  %v6852_v31 = vpop.f32.mrb[100].mxu0  ;;  %5352 = vmatprep.subr.bf16.mxu1 %v10091_v61 }
 0x1b3   : > { %3069 = vst.msk [vmem:[#allocation2 + $0x48] sm:$0xff] %vm2921_vm3, %v2859_v35  ;;  %v2860_v11 = vmax.f32 %v2796_v0, 0.0  ;;  %v2664_v2 = vmax.f32 %v8011_v7, %v6852_v31  ;;  %v1971_v21 = vpop.f32.mrb[101].mxu0  ;;  %v10093_v7 = vmax.f32 %v7429_v3, %v7837_v23  ;;  %v7214_v0 = vld [vmem:[%s7305_s28 + $0x360] sm:$0xff]  }
 0x1b4   : > { %3067 = vst.msk [vmem:[#allocation2 + $0x28] sm:$0xff] %vm2921_vm3, %v2857_v54  ;;  %v2858_v48 = vmax.f32 %v2794_v57, 0.0  ;;  %v2662_v53 = vmax.f32 %v8013_v36, %v1971_v21  ;;  %v6853_v17 = vpop.f32.mrb[102].mxu0  ;;  %v10094_v36 = vmax.f32 %v7431_v4, %v7841_v29  ;;  %v10096_v4 = vmax.f32 %v7437_v8, %v7854_v47  ;;  %v7235_v29 = vld [vmem:[%s9974_s3 + $0x68] sm:$0xff]  }
 0x1b5   : > { %3070 = vst.msk [vmem:[#allocation2 + $0x50] sm:$0xff] %vm2921_vm3, %v2860_v11  ;;  %v2728_v24 = vmax.f32 %v10093_v7, %v2664_v2  ;;  %v2665_v26 = vmax.f32 %v8016_v60, %v6853_v17  ;;  %v1974_v40 = vpop.f32.mrb[103].mxu0  ;;  %5353 = vmatpush1.bf16.msra.mxu1 %v7235_v29 }
 0x1b6   : > { %3068 = vst.msk [vmem:[#allocation2 + $0x30] sm:$0xff] %vm2921_vm3, %v2858_v48  ;;  %v2726_v28 = vmax.f32 %v10094_v36, %v2662_v53  ;;  %v2663_v41 = vmax.f32 %v8019_v55, %v1974_v40  ;;  %5354 = vmatprep.subr.bf16.mxu1 %v10091_v61 }
 0x1b7   : > { %v2799_v5 = vadd.f32 %v8141_v45, %v2728_v24  ;;  %v2729_v44 = vmax.f32 %v10095_v32, %v2665_v26  ;;  %6959 = vmatmul.mubr.msk.bf16.gmra.mrb[208].mxu0 %vm1145_vm2, %v7208_v63 }
 0x1b8   : > { %v2797_v3 = vadd.f32 %v8141_v45, %v2726_v28  ;;  %v2727_v23 = vmax.f32 %v10096_v4, %v2663_v41  ;;  %6962 = vmatprep.mubr.msk.bf16.mxu0 %vm1145_vm2, %v7210_v27  ;;  %v7237_v28 = vld [vmem:[%s9974_s3 + $0x78] sm:$0xff]  }
 0x1b9   : > { %v2863_v6 = vmax.f32 %v2799_v5, 0.0  ;;  %v2800_v37 = vadd.f32 %v8141_v45, %v2729_v44 }
 0x1ba   : > { %v2861_v55 = vmax.f32 %v2797_v3, 0.0  ;;  %v2798_v60 = vadd.f32 %v8141_v45, %v2727_v23  ;;  %v6856_v62 = vpop.f32.mrb[104].mxu0  ;;  %v3804_v35 = vld [vmem:[#allocation2 + $0x48] sm:$0xff] }
 0x1bb   : > { %3073 = vst.msk [vmem:[#allocation2 + $0x88] sm:$0xff] %vm2921_vm3, %v2863_v6  ;;  %v2864_v52 = vmax.f32 %v2800_v37, 0.0  ;;  %v2668_v8 = vmax.f32 %v8023_v46, %v6856_v62  ;;  %v1987_v47 = vpop.f32.mrb[105].mxu0  ;;  %v3708_v2 = vld [vmem:[#allocation2 + $0x47] sm:$0xff]  ;;  %v10097_v46 = vmax.f32 %v7441_v9, %v7865_v25  ;;  %v10099_v9 = vmax.f32 %v7446_v12, %v7874_v50 }
 0x1bc   : > { %3071 = vst.msk [vmem:[#allocation2 + $0x68] sm:$0xff] %vm2921_vm3, %v2861_v55  ;;  %v2862_v54 = vmax.f32 %v2798_v60, 0.0  ;;  %v2666_v57 = vmax.f32 %v8025_v56, %v1987_v47  ;;  %v6857_v31 = vpop.f32.mrb[106].mxu0  ;;  %v3805_v11 = vld [vmem:[#allocation2 + $0x50] sm:$0xff]  ;;  %v10098_v56 = vmax.f32 %v7443_v10, %v7869_v39  ;;  %v7216_v23 = vld [vmem:[%s7305_s28 + $0x368] sm:$0xff]  }
 0x1bd   : > { %v3709_v21 = vld [vmem:[#allocation2 + $0x4f] sm:$0xff]  ;;  %3074 = vst.msk [vmem:[#allocation2 + $0x90] sm:$0xff] %vm2921_vm3, %v2864_v52  ;;  %v2732_v63 = vmax.f32 %v10097_v46, %v2668_v8  ;;  %v2669_v48 = vmax.f32 %v8028_v43, %v6857_v31  ;;  %v1990_v53 = vpop.f32.mrb[107].mxu0  ;;  %v3868_v17 = vpack.c.bf16 %v3805_v11, %v3804_v35  ;;  %v10102_v8 = vmax.f32 %v7455_v16, %v7895_v19 }
 0x1be   : > { %v3772_v27 = vpack.c.bf16 %v3709_v21, %v3708_v2  ;;  %3072 = vst.msk [vmem:[#allocation2 + $0x70] sm:$0xff] %vm2921_vm3, %v2862_v54  ;;  %v2730_v49 = vmax.f32 %v10098_v56, %v2666_v57  ;;  %v2667_v7 = vmax.f32 %v8031_v38, %v1990_v53  ;;  %v3613_v24 = vld [vmem:[#allocation2 + $0x49] sm:$0xff]  ;;  %v3614_v26 = vld [vmem:[#allocation2 + $0x51] sm:$0xff]  ;;  %v10100_v38 = vmax.f32 %v7449_v14, %v7881_v1  ;;  %v10106_v56 = vld [vmem:[#allocation4_spill] sm:$0xff] }
 0x1bf   : > { %v2803_v40 = vadd.f32 %v8141_v45, %v2732_v63  ;;  %v2733_v25 = vmax.f32 %v10099_v9, %v2669_v48  ;;  %6963 = vmatmul.mubr.msk.bf16.gmra.mrb[212].mxu0 %vm1145_vm2, %v7212_v22  ;;  %4508 = vrot.lane.b32.xlu0 %v3868_v17, %s7253_s6  ;;  %v7236_v43 = vld [vmem:[%s9974_s3 + $0x70] sm:$0xff]   ;;  %v3676_v36 = vpack.c.bf16 %v3614_v26, %v3613_v24  ;;  %v7220_v21 = vld [vmem:[%s7305_s28 + $0x378] sm:$0xff]   ;;  %v10105_v48 = vld [vmem:[#allocation36_spill] sm:$0xff] }
 0x1c0   : > { %v2801_v10 = vadd.f32 %v8141_v45, %v2730_v49  ;;  %v2731_v39 = vmax.f32 %v10100_v38, %v2667_v7  ;;  %4412 = vrot.lane.b32.xlu1 %v3772_v27, %s7251_s29  ;;  %6966 = vmatprep.mubr.msk.bf16.mxu0 %vm1145_vm2, %v7214_v0  ;;  %v3611_v1 = vld [vmem:[#allocation2 + $0x29] sm:$0xff]  ;;  %v3612_v32 = vld [vmem:[#allocation2 + $0x31] sm:$0xff]  ;;  %v10104_v16 = vmax.f32 %v7461_v20, %v7905_v51  ;;  %v10107_v49 = vld [vmem:[#allocation20_spill] sm:$0xff] }
 0x1c1   : > { %v2867_v12 = vmax.f32 %v2803_v40, 0.0  ;;  %v2804_v50 = vadd.f32 %v8141_v45, %v2733_v25  ;;  %5355 = vmatpush1.bf16.msra.mxu1 %v7236_v43  ;;  %v7218_v55 = vld [vmem:[%s7305_s28 + $0x370] sm:$0xff]   ;;  %v8259_v52 = vpack.c.bf16 %v3612_v32, %v3611_v1  ;;  %v10109_v24 = vld [vmem:[#allocation37_spill] sm:$0xff] }
 0x1c2   : > { %v2865_v41 = vmax.f32 %v2801_v10, 0.0  ;;  %v2802_v5 = vadd.f32 %v8141_v45, %v2731_v39  ;;  %v6860_v14 = vpop.f32.mrb[108].mxu0  ;;  %5356 = vmatprep.subr.bf16.mxu1 %v10091_v61  ;;  %v10101_v61 = vmax.f32 %v7453_v15, %v7891_v13  ;;  %v10103_v15 = vmax.f32 %v7458_v18, %v7900_v59  ;;  %v3420_v46 = vld [vmem:[#allocation2 + $0x2f] sm:$0xff]  ;;  %v3419_v9 = vld [vmem:[#allocation2 + $0x27] sm:$0xff] }
 0x1c3   : > { %3077 = vst.msk [vmem:[#allocation2 + $0xc8] sm:$0xff] %vm2921_vm3, %v2867_v12  ;;  %v2868_v44 = vmax.f32 %v2804_v50, 0.0  ;;  %v2672_v3 = vmax.f32 %v8035_v58, %v6860_v14  ;;  %4318 = vrot.lane.b32.xlu0 %v3676_v36, %s7252_s30  ;;  %v2003_v4 = vpop.f32.mrb[109].mxu0  ;;  %v10110_v43 = vld [vmem:[#allocation5_spill] sm:$0xff]  ;;  %v10113_v12 = vld [vmem:[#allocation38_spill] sm:$0xff] }
 0x1c4   : > { %3075 = vst.msk [vmem:[#allocation2 + $0xa8] sm:$0xff] %vm2921_vm3, %v2865_v41  ;;  %v2866_v29 = vmax.f32 %v2802_v5, 0.0  ;;  %4222 = vrot.lane.b32.xlu1 %v3772_v27, %s7253_s6  ;;  %v2670_v6 = vmax.f32 %v8037_v33, %v2003_v4  ;;  %v6861_v37 = vpop.f32.mrb[110].mxu0  ;;  %v3713_v22 = vld [vmem:[#allocation2 + $0x8f] sm:$0xff] }
 0x1c5   : > { %3078 = vst.msk [vmem:[#allocation2 + $0xd0] sm:$0xff] %vm2921_vm3, %v2868_v44  ;;  %v2736_v60 = vmax.f32 %v10101_v61, %v2672_v3  ;;  %v2673_v58 = vmax.f32 %v8041_v34, %v6861_v37  ;;  %v2006_v62 = vpop.f32.mrb[111].mxu0  ;;  %5357 = vmatpush1.bf16.msra.mxu1 %v7237_v28  ;;  %v3809_v11 = vld [vmem:[#allocation2 + $0x90] sm:$0xff]  ;;  %v3808_v27 = vld [vmem:[#allocation2 + $0x88] sm:$0xff] }
 0x1c6   : > { %3076 = vst.msk [vmem:[#allocation2 + $0xb0] sm:$0xff] %vm2921_vm3, %v2866_v29  ;;  %v2734_v33 = vmax.f32 %v10102_v8, %v2670_v6  ;;  %v2671_v47 = vmax.f32 %v8047_v42, %v2006_v62  ;;  %v3712_v42 = vld [vmem:[#allocation2 + $0x87] sm:$0xff]  ;;  %v8296_v25 = vpack.c.bf16 %v3809_v11, %v3808_v27  ;;  %v3618_v41 = vld [vmem:[#allocation2 + $0x91] sm:$0xff] }
 0x1c7   : > { %v2807_v35 = vadd.f32 %v8141_v45, %v2736_v60  ;;  %v2737_v13 = vmax.f32 %v10103_v15, %v2673_v58  ;;  %6967 = vmatmul.mubr.msk.bf16.gmra.mrb[216].mxu0 %vm1145_vm2, %v7216_v23  ;;  %4316 = vrot.lane.b32.xlu0 %v8259_v52, %s7252_s30  ;;  %v8280_v59 = vpack.c.bf16 %v3713_v22, %v3712_v42  ;;  %v10111_v10 = vld [vmem:[#allocation21_spill] sm:$0xff]  ;;  %v10114_v14 = vld [vmem:[#allocation6_spill] sm:$0xff]  ;;  %v10117_v23 = vld [vmem:[#allocation7_spill] sm:$0xff] }
 0x1c8   : > { %v2805_v34 = vadd.f32 %v8141_v45, %v2734_v33  ;;  %v2735_v19 = vmax.f32 %v10104_v16, %v2671_v47  ;;  %4032 = vrot.lane.b32.xlu1 %v3868_v17, %s7252_s30  ;;  %6970 = vmatprep.mubr.msk.bf16.mxu0 %vm1145_vm2, %v7218_v55  ;;  %v10112_v38 = vmax.f32 %v10110_v43, %v10111_v10  ;;  %v3617_v28 = vld [vmem:[#allocation2 + $0x89] sm:$0xff]  ;;  %v10118_v29 = vld [vmem:[#allocation23_spill] sm:$0xff] }
 0x1c9   : > { %v2871_v0 = vmax.f32 %v2807_v35, 0.0  ;;  %v2808_v18 = vadd.f32 %v8141_v45, %v2737_v13  ;;  %v10115_v1 = vld [vmem:[#allocation22_spill] sm:$0xff]  ;;  %v10119_v6 = vmax.f32 %v10117_v23, %v10118_v29  ;;  %v3229_v60 = vld [vmem:[#allocation2 + $0x28] sm:$0xff]  ;;  %v8319_v58 = vpack.c.bf16 %v3618_v41, %v3617_v28  ;;  %v10120_v15 = vld [vmem:[#allocation39_spill] sm:$0xff] }
 0x1ca   : > { %v2869_v54 = vmax.f32 %v2805_v34, 0.0  ;;  %v2806_v57 = vadd.f32 %v8141_v45, %v2735_v19  ;;  %v6864_v31 = vpop.f32.mrb[112].mxu0  ;;  %v10116_v32 = vmax.f32 %v10114_v14, %v10115_v1  ;;  %v3230_v3 = vld [vmem:[#allocation2 + $0x30] sm:$0xff]  ;;  %v10121_v19 = vld [vmem:[#allocation40_spill] sm:$0xff]  ;;  %v10134_v43 = vld [vmem:[#allocation27_spill] sm:$0xff] }
 0x1cb   : > { %3081 = vst.msk [vmem:[#allocation2 + $0x108] sm:$0xff] %vm2921_vm3, %v2871_v0  ;;  %v2872_v20 = vmax.f32 %v2808_v18, 0.0  ;;  %v2676_v51 = vmax.f32 %v8055_v30, %v6864_v31  ;;  %4416 = vrot.lane.b32.xlu0 %v8280_v59, %s7251_s29  ;;  %v2019_v2 = vpop.f32.mrb[113].mxu0  ;;  %v10108_v30 = vmax.f32 %v10106_v56, %v10107_v49  ;;  %v8322_v47 = vpack.c.bf16 %v3230_v3, %v3229_v60  ;;  %v3711_v22 = vld [vmem:[#allocation2 + $0x6f] sm:$0xff]  ;;  %v3710_v18 = vld [vmem:[#allocation2 + $0x67] sm:$0xff]  ;;  %v10136_v3 = vld [vmem:[#allocation43_spill] sm:$0xff] }
 0x1cc   : > { %3079 = vst.msk [vmem:[#allocation2 + $0xe8] sm:$0xff] %vm2921_vm3, %v2869_v54  ;;  %v2870_v63 = vmax.f32 %v2806_v57, 0.0  ;;  %4128 = vrot.lane.b32.xlu1 %v3676_v36, %s7251_s29  ;;  %v2674_v53 = vmax.f32 %v10105_v48, %v2019_v2  ;;  %v6865_v17 = vpop.f32.mrb[114].mxu0  ;;  %v8303_v36 = vpack.c.bf16 %v3420_v46, %v3419_v9  ;;  %v10122_v54 = vld [vmem:[#allocation8_spill] sm:$0xff]  ;;  %v10126_v46 = vld [vmem:[#allocation9_spill] sm:$0xff]  ;;  %v3807_v56 = vld [vmem:[#allocation2 + $0x70] sm:$0xff] }
 0x1cd   : > { %3082 = vst.msk [vmem:[#allocation2 + $0x110] sm:$0xff] %vm2921_vm3, %v2872_v20  ;;  %v2740_v7 = vmax.f32 %v10108_v30, %v2676_v51  ;;  %v2677_v26 = vmax.f32 %v10109_v24, %v6865_v17  ;;  %v2022_v40 = vpop.f32.mrb[115].mxu0  ;;  %v10123_v57 = vld [vmem:[#allocation24_spill] sm:$0xff]  ;;  %v10125_v20 = vld [vmem:[#allocation41_spill] sm:$0xff]  ;;  %v10129_v17 = vld [vmem:[#allocation42_spill] sm:$0xff] }
 0x1ce   : > { %3080 = vst.msk [vmem:[#allocation2 + $0xf0] sm:$0xff] %vm2921_vm3, %v2870_v63  ;;  %v2738_v39 = vmax.f32 %v10112_v38, %v2674_v53  ;;  %v2675_v50 = vmax.f32 %v10113_v12, %v2022_v40  ;;  %v10124_v31 = vmax.f32 %v10122_v54, %v10123_v57  ;;  %v10127_v63 = vld [vmem:[#allocation25_spill] sm:$0xff]  ;;  %v10130_v30 = vld [vmem:[#allocation10_spill] sm:$0xff]  ;;  %v10133_v9 = vld [vmem:[#allocation11_spill] sm:$0xff] }
 0x1cf   : > { %v2811_v5 = vadd.f32 %v8141_v45, %v2740_v7  ;;  %v2741_v44 = vmax.f32 %v10116_v32, %v2677_v26  ;;  %6971 = vmatmul.mubr.msk.bf16.gmra.mrb[220].mxu0 %vm1145_vm2, %v7220_v21  ;;  %4512 = vrot.lane.b32.xlu0 %v8296_v25, %s7253_s6  ;;  %v8337_v21 = vpack.c.bf16 %v3711_v22, %v3710_v18  ;;  %v10131_v7 = vld [vmem:[#allocation26_spill] sm:$0xff]  ;;  %v10137_v29 = vld [vmem:[#allocation44_spill] sm:$0xff] }
 0x1d0   : > { %v2809_v4 = vadd.f32 %v8141_v45, %v2738_v39  ;;  %v2739_v37 = vmax.f32 %v10119_v6, %v2675_v50  ;;  %4220 = vrot.lane.b32.xlu1 %v8303_v36, %s7253_s6  ;;  %v10128_v48 = vmax.f32 %v10126_v46, %v10127_v63  ;;  %v10132_v24 = vmax.f32 %v10130_v30, %v10131_v7  ;;  %v3806_v39 = vld [vmem:[#allocation2 + $0x68] sm:$0xff]  ;;  %v3616_v32 = vld [vmem:[#allocation2 + $0x71] sm:$0xff] }
 0x1d1   : > { %v2875_v55 = vmax.f32 %v2811_v5, 0.0  ;;  %v2812_v61 = vadd.f32 %v8141_v45, %v2741_v44  ;;  %v10135_v10 = vmax.f32 %v10133_v9, %v10134_v43  ;;  %v8357_v28 = vpack.c.bf16 %v3807_v56, %v3806_v39  ;;  %v3615_v1 = vld [vmem:[#allocation2 + $0x69] sm:$0xff]  ;;  %v10153_v43 = vld [vmem:[#allocation48_spill] sm:$0xff] }
 0x1d2   : > { %v2873_v62 = vmax.f32 %v2809_v4, 0.0  ;;  %v2810_v8 = vadd.f32 %v8141_v45, %v2739_v37  ;;  %v6868_v33 = vpop.f32.mrb[116].mxu0  ;;  %v10146_v18 = vld [vmem:[#allocation14_spill] sm:$0xff]  ;;  %v3716_v63 = vld [vmem:[#allocation2 + $0xc7] sm:$0xff] }
 0x1d3   : > { %3085 = vst.msk [vmem:[#allocation2 + $0x148] sm:$0xff] %vm2921_vm3, %v2875_v55  ;;  %v2876_v35 = vmax.f32 %v2812_v61, 0.0  ;;  %v2680_v13 = vmax.f32 %v10120_v15, %v6868_v33  ;;  %4322 = vrot.lane.b32.xlu0 %v8319_v58, %s7252_s30  ;;  %v2035_v34 = vpop.f32.mrb[117].mxu0  ;;  %v10138_v55 = vld [vmem:[#allocation12_spill] sm:$0xff]  ;;  %v10142_v15 = vld [vmem:[#allocation13_spill] sm:$0xff]  ;;  %v10147_v54 = vld [vmem:[#allocation30_spill] sm:$0xff] }
 0x1d4   : > { %3083 = vst.msk [vmem:[#allocation2 + $0x128] sm:$0xff] %vm2921_vm3, %v2873_v62  ;;  %v2874_v16 = vmax.f32 %v2810_v8, 0.0  ;;  %4030 = vrot.lane.b32.xlu1 %v8322_v47, %s7252_s30  ;;  %v2678_v42 = vmax.f32 %v10121_v19, %v2035_v34  ;;  %v6869_v0 = vpop.f32.mrb[118].mxu0  ;;  %v10139_v61 = vld [vmem:[#allocation28_spill] sm:$0xff]  ;;  %v10141_v8 = vld [vmem:[#allocation45_spill] sm:$0xff]  ;;  %v10148_v57 = vmax.f32 %v10146_v18, %v10147_v54  ;;  %v3813_v30 = vld [vmem:[#allocation2 + $0xd0] sm:$0xff] }
 0x1d5   : > { %3086 = vst.msk [vmem:[#allocation2 + $0x150] sm:$0xff] %vm2921_vm3, %v2876_v35  ;;  %v2744_v11 = vmax.f32 %v10124_v31, %v2680_v13  ;;  %v2681_v51 = vmax.f32 %v10125_v20, %v6869_v0  ;;  %v2038_v2 = vpop.f32.mrb[119].mxu0  ;;  %v10140_v60 = vmax.f32 %v10138_v55, %v10139_v61  ;;  %v8373_v35 = vpack.c.bf16 %v3616_v32, %v3615_v1  ;;  %v10143_v13 = vld [vmem:[#allocation29_spill] sm:$0xff]  ;;  %v10149_v20 = vld [vmem:[#allocation15_spill] sm:$0xff]  ;;  %v10163_v61 = vld [vmem:[#allocation18_spill] sm:$0xff] }
 0x1d6   : > { %3084 = vst.msk [vmem:[#allocation2 + $0x130] sm:$0xff] %vm2921_vm3, %v2874_v16  ;;  %v2742_v53 = vmax.f32 %v10128_v48, %v2678_v42  ;;  %v2679_v27 = vmax.f32 %v10129_v17, %v2038_v2  ;;  %v10144_v34 = vmax.f32 %v10142_v15, %v10143_v13  ;;  %v10145_v16 = vld [vmem:[#allocation46_spill] sm:$0xff]  ;;  %v3812_v39 = vld [vmem:[#allocation2 + $0xc8] sm:$0xff]  ;;  %v10166_v15 = vld [vmem:[#allocation19_spill] sm:$0xff] }
 0x1d7   : > { %v2815_v49 = vadd.f32 %v8141_v45, %v2744_v11  ;;  %v2745_v26 = vmax.f32 %v10132_v24, %v2681_v51  ;;  %4414 = vrot.lane.b32.xlu0 %v8337_v21, %s7251_s29  ;;  %v3717_v42 = vld [vmem:[#allocation2 + $0xcf] sm:$0xff]  ;;  %v10150_v51 = vld [vmem:[#allocation31_spill] sm:$0xff] }
 0x1d8   : > { %v2813_v40 = vadd.f32 %v8141_v45, %v2742_v53  ;;  %v2743_v38 = vmax.f32 %v10135_v10, %v2679_v27  ;;  %4126 = vrot.lane.b32.xlu1 %v8259_v52, %s7251_s29  ;;  %v10151_v2 = vmax.f32 %v10149_v20, %v10150_v51  ;;  %v8393_v17 = vpack.c.bf16 %v3717_v42, %v3716_v63  ;;  %v10152_v24 = vld [vmem:[#allocation47_spill] sm:$0xff] }
 0x1d9   : > { %v2879_v12 = vmax.f32 %v2815_v49, 0.0  ;;  %v2816_v50 = vadd.f32 %v8141_v45, %v2745_v26  ;;  %v10167_v13 = vld [vmem:[#allocation35_spill] sm:$0xff] }
 0x1da   : > { %v2877_v41 = vmax.f32 %v2813_v40, 0.0  ;;  %v2814_v5 = vadd.f32 %v8141_v45, %v2743_v38  ;;  %v6872_v14 = vpop.f32.mrb[120].mxu0 }
 0x1db   : > { %3089 = vst.msk [vmem:[#allocation2 + $0x188] sm:$0xff] %vm2921_vm3, %v2879_v12  ;;  %v2880_v44 = vmax.f32 %v2816_v50, 0.0  ;;  %v2684_v4 = vmax.f32 %v10136_v3, %v6872_v14  ;;  %4510 = vrot.lane.b32.xlu0 %v8357_v28, %s7253_s6  ;;  %v2051_v52 = vpop.f32.mrb[121].mxu0  ;;  %v10154_v12 = vld [vmem:[#allocation16_spill] sm:$0xff]  ;;  %v10157_v14 = vld [vmem:[#allocation49_spill] sm:$0xff] }
 0x1dc   : > { %3087 = vst.msk [vmem:[#allocation2 + $0x168] sm:$0xff] %vm2921_vm3, %v2877_v41  ;;  %v2878_v23 = vmax.f32 %v2814_v5, 0.0  ;;  %4226 = vrot.lane.b32.xlu1 %v8280_v59, %s7253_s6  ;;  %v2682_v6 = vmax.f32 %v10137_v29, %v2051_v52  ;;  %v6873_v37 = vpop.f32.mrb[122].mxu0  ;;  %v10155_v50 = vld [vmem:[#allocation32_spill] sm:$0xff]  ;;  %v10159_v3 = vld [vmem:[#allocation17_spill] sm:$0xff] }
 0x1dd   : > { %3090 = vst.msk [vmem:[#allocation2 + $0x190] sm:$0xff] %vm2921_vm3, %v2880_v44  ;;  %v2748_v62 = vmax.f32 %v10140_v60, %v2684_v4  ;;  %v2685_v33 = vmax.f32 %v10141_v8, %v6873_v37  ;;  %v2054_v22 = vpop.f32.mrb[123].mxu0  ;;  %v10156_v41 = vmax.f32 %v10154_v12, %v10155_v50  ;;  %v8409_v44 = vpack.c.bf16 %v3813_v30, %v3812_v39  ;;  %v10160_v4 = vld [vmem:[#allocation33_spill] sm:$0xff]  ;;  %v3622_v37 = vld [vmem:[#allocation2 + $0xd1] sm:$0xff] }
 0x1de   : > { %3088 = vst.msk [vmem:[#allocation2 + $0x170] sm:$0xff] %vm2921_vm3, %v2878_v23  ;;  %v2746_v59 = vmax.f32 %v10144_v34, %v2682_v6  ;;  %v2683_v19 = vmax.f32 %v10145_v16, %v2054_v22  ;;  %v10162_v23 = vld [vmem:[#allocation50_spill] sm:$0xff]  ;;  %v10168_v34 = vmax.f32 %v10166_v15, %v10167_v13 }
 0x1df   : > { %v2819_v0 = vadd.f32 %v8141_v45, %v2748_v62  ;;  %v2749_v31 = vmax.f32 %v10148_v57, %v2685_v33  ;;  %4320 = vrot.lane.b32.xlu0 %v8373_v35, %s7252_s30  ;;  %10158 = vst [vmem:[#allocation36_spill] sm:$0xff] %v8409_v44  ;;  %v3621_v6 = vld [vmem:[#allocation2 + $0xc9] sm:$0xff]  ;;  %v8422_v33 = vpop.f32.mrb[0].mxu1 }
 0x1e0   : > { %v2817_v11 = vadd.f32 %v8141_v45, %v2746_v59  ;;  %v2747_v46 = vmax.f32 %v10151_v2, %v2683_v19  ;;  %4036 = vrot.lane.b32.xlu1 %v8296_v25, %s7252_s30  ;;  %v10164_v60 = vld [vmem:[#allocation34_spill] sm:$0xff]  ;;  %v8430_v16 = vpop.f32.mrb[1].mxu1 }
 0x1e1   : > { %v2883_v48 = vmax.f32 %v2819_v0, 0.0  ;;  %v2820_v53 = vadd.f32 %v8141_v45, %v2749_v31  ;;  %v10165_v62 = vmax.f32 %v10163_v61, %v10164_v60  ;;  %v3680_v0 = vpack.c.bf16 %v3622_v37, %v3621_v6  ;;  %v8433_v18 = vpop.f32.mrb[2].mxu1  ;;  %v3619_v30 = vld [vmem:[#allocation2 + $0xa9] sm:$0xff] }
 0x1e2   : > { %v2881_v27 = vmax.f32 %v2817_v11, 0.0  ;;  %v2818_v56 = vadd.f32 %v8141_v45, %v2747_v46  ;;  %v6876_v49 = vpop.f32.mrb[124].mxu0  ;;  %v3715_v11 = vld [vmem:[#allocation2 + $0xaf] sm:$0xff]  ;;  %v3714_v46 = vld [vmem:[#allocation2 + $0xa7] sm:$0xff] }
 0x1e3   : > { %3093 = vst.msk [vmem:[#allocation2 + $0x1c8] sm:$0xff] %vm2921_vm3, %v2883_v48  ;;  %v2884_v7 = vmax.f32 %v2820_v53, 0.0  ;;  %v2688_v26 = vmax.f32 %v10152_v24, %v6876_v49  ;;  %4420 = vrot.lane.b32.xlu0 %v8393_v17, %s7251_s29  ;;  %v2067_v40 = vpop.f32.mrb[125].mxu0  ;;  %v3775_v63 = vpack.c.bf16 %v3715_v11, %v3714_v46  ;;  %v3811_v48 = vld [vmem:[#allocation2 + $0xb0] sm:$0xff]  ;;  %v8451_v53 = vpop.f32.mrb[3].mxu1 }
 0x1e4   : > { %3091 = vst.msk [vmem:[#allocation2 + $0x1a8] sm:$0xff] %vm2921_vm3, %v2881_v27  ;;  %v2882_v9 = vmax.f32 %v2818_v56, 0.0  ;;  %4132 = vrot.lane.b32.xlu1 %v8319_v58, %s7251_s29  ;;  %v2686_v10 = vmax.f32 %v10153_v43, %v2067_v40  ;;  %v6877_v38 = vpop.f32.mrb[126].mxu0  ;;  %v10161_v58 = vmax.f32 %v10159_v3, %v10160_v4  ;;  %v3810_v27 = vld [vmem:[#allocation2 + $0xa8] sm:$0xff]  ;;  %v3815_v13 = vld [vmem:[#allocation2 + $0xf0] sm:$0xff] }
 0x1e5   : > { %3094 = vst.msk [vmem:[#allocation2 + $0x1d0] sm:$0xff] %vm2921_vm3, %v2884_v7  ;;  %v2752_v5 = vmax.f32 %v10156_v41, %v2688_v26  ;;  %v2689_v1 = vmax.f32 %v10157_v14, %v6877_v38  ;;  %v2070_v32 = vpop.f32.mrb[127].mxu0  ;;  %v3871_v56 = vpack.c.bf16 %v3811_v48, %v3810_v27  ;;  %v3620_v7 = vld [vmem:[#allocation2 + $0xb1] sm:$0xff]  ;;  %v3720_v38 = vld [vmem:[#allocation2 + $0x107] sm:$0xff] }
 0x1e6   : > { %3092 = vst.msk [vmem:[#allocation2 + $0x1b0] sm:$0xff] %vm2921_vm3, %v2882_v9  ;;  %v2750_v52 = vmax.f32 %v10161_v58, %v2686_v10  ;;  %v2687_v29 = vmax.f32 %v10162_v23, %v2070_v32  ;;  %v3679_v9 = vpack.c.bf16 %v3620_v7, %v3619_v30  ;;  %v3721_v43 = vld [vmem:[#allocation2 + $0x10f] sm:$0xff]  ;;  %v3724_v7 = vld [vmem:[#allocation2 + $0x147] sm:$0xff] }
 0x1e7   : > { %v2823_v55 = vadd.f32 %v8141_v45, %v2752_v5  ;;  %v2753_v8 = vmax.f32 %v10165_v62, %v2689_v1  ;;  %4516 = vrot.lane.b32.xlu0 %v8409_v44, %s7253_s6  ;;  %v3778_v12 = vpack.c.bf16 %v3721_v43, %v3720_v38  ;;  %v3817_v41 = vld [vmem:[#allocation2 + $0x110] sm:$0xff]  ;;  %v3816_v1 = vld [vmem:[#allocation2 + $0x108] sm:$0xff] }
 0x1e8   : > { %v2821_v22 = vadd.f32 %v8141_v45, %v2750_v52  ;;  %v2751_v59 = vmax.f32 %v10168_v34, %v2687_v29  ;;  %4224 = vrot.lane.b32.xlu1 %v8337_v21, %s7253_s6  ;;  %v3874_v3 = vpack.c.bf16 %v3817_v41, %v3816_v1  ;;  %v3625_v4 = vld [vmem:[#allocation2 + $0x109] sm:$0xff]  ;;  %v3626_v58 = vld [vmem:[#allocation2 + $0x111] sm:$0xff] }
 0x1e9   : > { %v2887_v19 = vmax.f32 %v2823_v55, 0.0  ;;  %v2824_v42 = vadd.f32 %v8141_v45, %v2753_v8  ;;  %v3682_v6 = vpack.c.bf16 %v3626_v58, %v3625_v4  ;;  %v3719_v61 = vld [vmem:[#allocation2 + $0xef] sm:$0xff]  ;;  %v3718_v8 = vld [vmem:[#allocation2 + $0xe7] sm:$0xff] }
 0x1ea   : > { %v2885_v54 = vmax.f32 %v2821_v22, 0.0  ;;  %v2822_v57 = vadd.f32 %v8141_v45, %v2751_v59  ;;  %v8436_v31 = vpop.f32.mrb[128].mxu0  ;;  %v3777_v15 = vpack.c.bf16 %v3719_v61, %v3718_v8  ;;  %v3623_v11 = vld [vmem:[#allocation2 + $0xe9] sm:$0xff] }
 0x1eb   : > { %3097 = vst.msk [vmem:[#allocation2 + $0x208] sm:$0xff] %vm2921_vm3, %v2887_v19  ;;  %v2888_v20 = vmax.f32 %v2824_v42, 0.0  ;;  %4326 = vrot.lane.b32.xlu0 %v3680_v0, %s7252_s30  ;;  %v8440_v21 = vpop.f32.mrb[129].mxu0  ;;  %v3814_v19 = vld [vmem:[#allocation2 + $0xe8] sm:$0xff]  ;;  %v3821_v41 = vld [vmem:[#allocation2 + $0x150] sm:$0xff] }
 0x1ec   : > { %3095 = vst.msk [vmem:[#allocation2 + $0x1e8] sm:$0xff] %vm2921_vm3, %v2885_v54  ;;  %v2886_v51 = vmax.f32 %v2822_v57, 0.0  ;;  %4034 = vrot.lane.b32.xlu1 %v8357_v28, %s7252_s30  ;;  %v8445_v2 = vpop.f32.mrb[130].mxu0  ;;  %v3725_v27 = vld [vmem:[#allocation2 + $0x14f] sm:$0xff] }
 0x1ed   : > { %3098 = vst.msk [vmem:[#allocation2 + $0x210] sm:$0xff] %vm2921_vm3, %v2888_v20  ;;  %v8448_v45 = vpop.f32.mrb[131].mxu0  ;;  %v3624_v20 = vld [vmem:[#allocation2 + $0xf1] sm:$0xff]  ;;  %v3780_v43 = vpack.c.bf16 %v3725_v27, %v3724_v7  ;;  %v3820_v58 = vld [vmem:[#allocation2 + $0x148] sm:$0xff] }
 0x1ee   : > { %3096 = vst.msk [vmem:[#allocation2 + $0x1f0] sm:$0xff] %vm2921_vm3, %v2886_v51  ;;  %v3681_v48 = vpack.c.bf16 %v3624_v20, %v3623_v11  ;;  %v3629_v8 = vld [vmem:[#allocation2 + $0x149] sm:$0xff] }
 0x1ef   : > { %4418 = vrot.lane.b32.xlu0 %v3775_v63, %s7251_s29  ;;  %v3723_v7 = vld [vmem:[#allocation2 + $0x12f] sm:$0xff] }
 0x1f0   : > { %4130 = vrot.lane.b32.xlu1 %v8373_v35, %s7251_s29  ;;  %v8467_v35 = vpop.f32.mrb[4].mxu1 }
 0x1f1   : > { %10173 = vst [vmem:[#allocation21_spill] sm:$0xff] %v8467_v35  ;;  %v8470_v10 = vpop.f32.mrb[5].mxu1 }
 0x1f2   : > { %v8456_v49 = vpop.f32.mrb[132].mxu0  ;;  %10174 = vst [vmem:[#allocation38_spill] sm:$0xff] %v8470_v10  ;;  %v8474_v39 = vpop.f32.mrb[6].mxu1 }
 0x1f3   : > { %10169 = vst [vmem:[#allocation4_spill] sm:$0xff] %v8456_v49  ;;  %4514 = vrot.lane.b32.xlu0 %v3871_v56, %s7253_s6  ;;  %v8459_v24 = vpop.f32.mrb[133].mxu0  ;;  %10175 = vst [vmem:[#allocation6_spill] sm:$0xff] %v8474_v39  ;;  %v3727_v39 = vld [vmem:[#allocation2 + $0x16f] sm:$0xff] }
 0x1f4   : > { %10170 = vst [vmem:[#allocation20_spill] sm:$0xff] %v8459_v24  ;;  %4230 = vrot.lane.b32.xlu1 %v8393_v17, %s7253_s6  ;;  %v8463_v26 = vpop.f32.mrb[134].mxu0  ;;  %v8476_v17 = vpop.f32.mrb[7].mxu1  ;;  %v3823_v49 = vld [vmem:[#allocation2 + $0x170] sm:$0xff] }
 0x1f5   : > { %10171 = vst [vmem:[#allocation37_spill] sm:$0xff] %v8463_v26  ;;  %v8465_v40 = vpop.f32.mrb[135].mxu0  ;;  %10176 = vst [vmem:[#allocation22_spill] sm:$0xff] %v8476_v17  ;;  %v8488_v52 = vpop.f32.mrb[8].mxu1  ;;  %v3822_v26 = vld [vmem:[#allocation2 + $0x168] sm:$0xff]  ;;  %v3632_v24 = vld [vmem:[#allocation2 + $0x171] sm:$0xff] }
 0x1f6   : > { %10172 = vst [vmem:[#allocation5_spill] sm:$0xff] %v8465_v40  ;;  %10178 = vst [vmem:[#allocation23_spill] sm:$0xff] %v8488_v52  ;;  %v8491_v23 = vpop.f32.mrb[9].mxu1  ;;  %v3634_v52 = vld [vmem:[#allocation2 + $0x191] sm:$0xff] }
 0x1f7   : > { %4324 = vrot.lane.b32.xlu0 %v3679_v9, %s7252_s30  ;;  %10179 = vst [vmem:[#allocation39_spill] sm:$0xff] %v8491_v23  ;;  %v8494_v29 = vpop.f32.mrb[10].mxu1 }
 0x1f8   : > { %4040 = vrot.lane.b32.xlu1 %v8409_v44, %s7252_s30  ;;  %10180 = vst [vmem:[#allocation40_spill] sm:$0xff] %v8494_v29  ;;  %v8496_v37 = vpop.f32.mrb[11].mxu1 }
 0x1f9   : > { %10181 = vst [vmem:[#allocation8_spill] sm:$0xff] %v8496_v37  ;;  %v8508_v34 = vpop.f32.mrb[12].mxu1 }
 0x1fa   : > { %v8478_v50 = vpop.f32.mrb[136].mxu0  ;;  %10184 = vst [vmem:[#allocation9_spill] sm:$0xff] %v8508_v34  ;;  %v8511_v59 = vpop.f32.mrb[13].mxu1 }
 0x1fb   : > { %10177 = vst [vmem:[#allocation7_spill] sm:$0xff] %v8478_v50  ;;  %4424 = vrot.lane.b32.xlu0 %v3778_v12, %s7251_s29  ;;  %v8481_v5 = vpop.f32.mrb[137].mxu0  ;;  %10185 = vst [vmem:[#allocation25_spill] sm:$0xff] %v8511_v59  ;;  %v8514_v42 = vpop.f32.mrb[14].mxu1 }
 0x1fc   : > { %4136 = vrot.lane.b32.xlu1 %v3680_v0, %s7251_s29  ;;  %v8484_v14 = vpop.f32.mrb[138].mxu0  ;;  %10186 = vst [vmem:[#allocation42_spill] sm:$0xff] %v8514_v42  ;;  %v3873_v0 = vpack.c.bf16 %v3815_v13, %v3814_v19  ;;  %v8516_v54 = vpop.f32.mrb[15].mxu1  ;;  %v3630_v13 = vld [vmem:[#allocation2 + $0x151] sm:$0xff] }
 0x1fd   : > { %v8486_v32 = vpop.f32.mrb[139].mxu0  ;;  %10187 = vst [vmem:[#allocation10_spill] sm:$0xff] %v8516_v54  ;;  %v3684_v20 = vpack.c.bf16 %v3630_v13, %v3629_v8  ;;  %v3819_v8 = vld [vmem:[#allocation2 + $0x130] sm:$0xff] }
 0x1ff   : > { %4520 = vrot.lane.b32.xlu0 %v3874_v3, %s7253_s6 }
 0x200   : > { %4228 = vrot.lane.b32.xlu1 %v3775_v63, %s7253_s6 }
 0x202   : > { %v8498_v55 = vpop.f32.mrb[140].mxu0 }
 0x203   : > { %4330 = vrot.lane.b32.xlu0 %v3682_v6, %s7252_s30  ;;  %v8501_v60 = vpop.f32.mrb[141].mxu0 }
 0x204   : > { %4038 = vrot.lane.b32.xlu1 %v3871_v56, %s7252_s30  ;;  %v8504_v62 = vpop.f32.mrb[142].mxu0  ;;  %v8528_v56 = vpop.f32.mrb[16].mxu1 }
 0x205   : > { %10182 = vst [vmem:[#allocation24_spill] sm:$0xff] %v8504_v62  ;;  %v8506_v22 = vpop.f32.mrb[143].mxu0  ;;  %10188 = vst [vmem:[#allocation26_spill] sm:$0xff] %v8528_v56  ;;  %v8531_v30 = vpop.f32.mrb[17].mxu1 }
 0x206   : > { %10183 = vst [vmem:[#allocation41_spill] sm:$0xff] %v8506_v22  ;;  %10189 = vst [vmem:[#allocation11_spill] sm:$0xff] %v8531_v30 }
 0x207   : > { %4422 = vrot.lane.b32.xlu0 %v3777_v15, %s7251_s29 }
 0x208   : > { %4134 = vrot.lane.b32.xlu1 %v3679_v9, %s7251_s29  ;;  %v8534_v9 = vpop.f32.mrb[18].mxu1 }
 0x209   : > { %10190 = vst [vmem:[#allocation27_spill] sm:$0xff] %v8534_v9  ;;  %v8536_v38 = vpop.f32.mrb[19].mxu1  ;;  %v8574_v9 = vpop.permute.xlu1 %4124 }
 0x20a   : > { %v8518_v57 = vpop.f32.mrb[144].mxu0  ;;  %10191 = vst [vmem:[#allocation43_spill] sm:$0xff] %v8536_v38  ;;  %v8548_v19 = vpop.f32.mrb[20].mxu1 }
 0x20b   : > { %4518 = vrot.lane.b32.xlu0 %v3873_v0, %s7253_s6  ;;  %v8521_v51 = vpop.f32.mrb[145].mxu0  ;;  %10193 = vst [vmem:[#allocation12_spill] sm:$0xff] %v8548_v19  ;;  %v8552_v11 = vpop.f32.mrb[21].mxu1  ;;  %v3722_v19 = vld [vmem:[#allocation2 + $0x127] sm:$0xff] }
 0x20c   : > { %4234 = vrot.lane.b32.xlu1 %v3778_v12, %s7253_s6  ;;  %v8524_v46 = vpop.f32.mrb[146].mxu0  ;;  %10194 = vst [vmem:[#allocation28_spill] sm:$0xff] %v8552_v11  ;;  %v8554_v27 = vpop.f32.mrb[22].mxu1  ;;  %v3779_v11 = vpack.c.bf16 %v3723_v7, %v3722_v19  ;;  %v3627_v19 = vld [vmem:[#allocation2 + $0x129] sm:$0xff]  ;;  %v3628_v7 = vld [vmem:[#allocation2 + $0x131] sm:$0xff] }
 0x20d   : > { %v8526_v63 = vpop.f32.mrb[147].mxu0  ;;  %10195 = vst [vmem:[#allocation45_spill] sm:$0xff] %v8554_v27  ;;  %v8558_v38 = vpop.f32.mrb[23].mxu1 }
 0x20e   : > { %10197 = vst [vmem:[#allocation29_spill] sm:$0xff] %v8558_v38  ;;  %v8571_v27 = vpop.permute.xlu0 %4028  ;;  %v3818_v38 = vld [vmem:[#allocation2 + $0x128] sm:$0xff] }
 0x20f   : > { %4328 = vrot.lane.b32.xlu0 %v3681_v48, %s7252_s30  ;;  %v8568_v13 = vpop.f32.mrb[24].mxu1 }
 0x210   : > { %4044 = vrot.lane.b32.xlu1 %v3874_v3, %s7252_s30  ;;  %v3876_v3 = vpack.c.bf16 %v3821_v41, %v3820_v58  ;;  %10200 = vst [vmem:[#allocation30_spill] sm:$0xff] %v8568_v13  ;;  %v8576_v30 = vpop.f32.mrb[25].mxu1 }
 0x211   : > { %10201 = vst [vmem:[#allocation15_spill] sm:$0xff] %v8576_v30  ;;  %v8578_v56 = vpop.f32.mrb[26].mxu1  ;;  %v3683_v30 = vpack.c.bf16 %v3628_v7, %v3627_v19  ;;  %v3825_v19 = vld [vmem:[#allocation2 + $0x190] sm:$0xff] }
 0x212   : > { %v8538_v12 = vpop.f32.mrb[148].mxu0  ;;  %10202 = vst [vmem:[#allocation31_spill] sm:$0xff] %v8578_v56  ;;  %v8582_v42 = vpop.f32.mrb[27].mxu1  ;;  %v3729_v56 = vld [vmem:[#allocation2 + $0x18f] sm:$0xff] }
 0x213   : > { %4428 = vrot.lane.b32.xlu0 %v3780_v43, %s7251_s29  ;;  %v8541_v1 = vpop.f32.mrb[149].mxu0  ;;  %10203 = vst [vmem:[#allocation47_spill] sm:$0xff] %v8582_v42  ;;  %v3728_v42 = vld [vmem:[#allocation2 + $0x187] sm:$0xff] }
 0x214   : > { %10192 = vst [vmem:[#allocation44_spill] sm:$0xff] %v8541_v1  ;;  %4140 = vrot.lane.b32.xlu1 %v3682_v6, %s7251_s29  ;;  %v8544_v4 = vpop.f32.mrb[150].mxu0 }
 0x215   : > { %v8546_v61 = vpop.f32.mrb[151].mxu0 }
 0x217   : > { %4524 = vrot.lane.b32.xlu0 %v3876_v3, %s7253_s6  ;;  %v8596_v34 = vpop.f32.mrb[28].mxu1 }
 0x218   : > { %4232 = vrot.lane.b32.xlu1 %v3777_v15, %s7253_s6  ;;  %10206 = vst [vmem:[#allocation32_spill] sm:$0xff] %v8596_v34  ;;  %v8600_v37 = vpop.f32.mrb[29].mxu1 }
 0x219   : > { %10207 = vst [vmem:[#allocation49_spill] sm:$0xff] %v8600_v37  ;;  %v8604_v29 = vpop.f32.mrb[30].mxu1 }
 0x21a   : > { %v8556_v6 = vpop.f32.mrb[152].mxu0  ;;  %10208 = vst [vmem:[#allocation17_spill] sm:$0xff] %v8604_v29  ;;  %v8608_v7 = vpop.f32.mrb[31].mxu1 }
 0x21b   : > { %10196 = vst [vmem:[#allocation13_spill] sm:$0xff] %v8556_v6  ;;  %4334 = vrot.lane.b32.xlu0 %v3684_v20, %s7252_s30  ;;  %v8561_v41 = vpop.f32.mrb[153].mxu0  ;;  %10209 = vst [vmem:[#allocation33_spill] sm:$0xff] %v8608_v7  ;;  %v3824_v7 = vld [vmem:[#allocation2 + $0x188] sm:$0xff]  ;;  %v3642_v6 = vld [vmem:[#allocation2 + $0x211] sm:$0xff] }
 0x21c   : > { %10198 = vst [vmem:[#allocation46_spill] sm:$0xff] %v8561_v41  ;;  %4042 = vrot.lane.b32.xlu1 %v3873_v0, %s7252_s30  ;;  %v8564_v58 = vpop.f32.mrb[154].mxu0  ;;  %v3875_v0 = vpack.c.bf16 %v3819_v8, %v3818_v38  ;;  %v8592_v38 = vpop.permute.xlu0 %4442  ;;  %v3878_v34 = vpack.c.bf16 %v3825_v19, %v3824_v7 }
 0x21d   : > { %10199 = vst [vmem:[#allocation14_spill] sm:$0xff] %v8564_v58  ;;  %v8566_v15 = vpop.f32.mrb[155].mxu0  ;;  %10204 = vst [vmem:[#allocation48_spill] sm:$0xff] %v8592_v38  ;;  %v8594_v8 = vpop.permute.xlu1 %4060 }
 0x21e   : > { %10205 = vst [vmem:[#allocation16_spill] sm:$0xff] %v8594_v8 }
 0x21f   : > { %4426 = vrot.lane.b32.xlu0 %v3779_v11, %s7251_s29 }
 0x220   : > { %4138 = vrot.lane.b32.xlu1 %v3681_v48, %s7251_s29 }
 0x221   : > { %v8623_v29 = vpop.permute.xlu1 %4156 }
 0x222   : > { %v8580_v54 = vpop.f32.mrb[156].mxu0  ;;  %10211 = vst [vmem:[#allocation18_spill] sm:$0xff] %v8623_v29 }
 0x223   : > { %4522 = vrot.lane.b32.xlu0 %v3875_v0, %s7253_s6  ;;  %v8585_v13 = vpop.f32.mrb[157].mxu0 }
 0x224   : > { %4238 = vrot.lane.b32.xlu1 %v3780_v43, %s7253_s6  ;;  %v8588_v48 = vpop.f32.mrb[158].mxu0  ;;  %v8602_v43 = vpack.c.bf16 %v3729_v56, %v3728_v42 }
 0x225   : > { %v8590_v59 = vpop.f32.mrb[159].mxu0 }
 0x227   : > { %4332 = vrot.lane.b32.xlu0 %v3683_v30, %s7252_s30 }
 0x228   : > { %4048 = vrot.lane.b32.xlu1 %v3876_v3, %s7252_s30  ;;  %v8616_v3 = vpop.permute.xlu0 %4538 }
 0x229   : > { %10210 = vst [vmem:[#allocation50_spill] sm:$0xff] %v8616_v3  ;;  %v3633_v3 = vld [vmem:[#allocation2 + $0x189] sm:$0xff] }
 0x22a   : > { %v8606_v23 = vpop.f32.mrb[160].mxu0  ;;  %v8633_v42 = vpack.c.bf16 %v3634_v52, %v3633_v3  ;;  %v3726_v52 = vld [vmem:[#allocation2 + $0x167] sm:$0xff] }
 0x22b   : > { %4432 = vrot.lane.b32.xlu0 %v8602_v43, %s7251_s29  ;;  %v8614_v38 = vpop.f32.mrb[161].mxu0  ;;  %v8654_v8 = vpack.c.bf16 %v3727_v39, %v3726_v52  ;;  %v3131_v3 = vld [vmem:[#allocation2 + $0x7] sm:$0xff]  ;;  %v8666_v52 = vpack.c.bf16 %v3823_v49, %v3822_v26 }
 0x22c   : > { %4144 = vrot.lane.b32.xlu1 %v3684_v20, %s7251_s29  ;;  %v8621_v56 = vpop.f32.mrb[162].mxu0 }
 0x22d   : > { %v8627_v37 = vpop.f32.mrb[163].mxu0 }
 0x22f   : > { %4528 = vrot.lane.b32.xlu0 %v3878_v34, %s7253_s6 }
 0x230   : > { %4236 = vrot.lane.b32.xlu1 %v3779_v11, %s7253_s6  ;;  %v7238_v11 = vld [vmem:[%s9974_s3 + $0x80] sm:$0xff]  }
 0x231   : > { %v4509_v20 = vpop.permute.xlu0 %4508  ;;  %7006 = vmatprep.subr.bf16.mxu1 %v7238_v11 }
 0x232   : > { %v4413_v29 = vpop.permute.xlu1 %4412  ;;  %v8635_v17 = vpop.f32.mrb[164].mxu0 }
 0x233   : > { %10212 = vst [vmem:[#allocation34_spill] sm:$0xff] %v8635_v17  ;;  %4338 = vrot.lane.b32.xlu0 %v8633_v42, %s7252_s30  ;;  %v8641_v19 = vpop.f32.mrb[165].mxu0 }
 0x234   : > { %10213 = vst [vmem:[#allocation19_spill] sm:$0xff] %v8641_v19  ;;  %4046 = vrot.lane.b32.xlu1 %v3875_v0, %s7252_s30  ;;  %v8646_v7 = vpop.f32.mrb[166].mxu0  ;;  %v3631_v19 = vld [vmem:[#allocation2 + $0x169] sm:$0xff] }
 0x235   : > { %10214 = vst [vmem:[#allocation35_spill] sm:$0xff] %v8646_v7  ;;  %v8650_v44 = vpop.permute.xlu0 %4318  ;;  %v8652_v10 = vpop.f32.mrb[167].mxu0  ;;  %v3132_v7 = vld [vmem:[#allocation2 + $0xf] sm:$0xff]  ;;  %v8694_v50 = vpack.c.bf16 %v3632_v24, %v3631_v19 }
 0x236   : > { %10215 = vst [vmem:[#allocation51_spill] sm:$0xff] %v8652_v10  ;;  %v8656_v17 = vpop.permute.xlu1 %4222  ;;  %v3195_v35 = vpack.c.bf16 %v3132_v7, %v3131_v3 }
 0x237   : > { %4430 = vrot.lane.b32.xlu0 %v8654_v8, %s7251_s29 }
 0x238   : > { %4142 = vrot.lane.b32.xlu1 %v3683_v30, %s7251_s29 }
 0x239   : > { %v4317_v39 = vpop.permute.xlu0 %4316 }
 0x23a   : > { %v8668_v0 = vpop.permute.xlu1 %4032  ;;  %v4832_v10 = vsel %vm2921_vm3, %v8322_v47, %v4317_v39  ;;  %v8672_v40 = vpop.f32.mrb[168].mxu0  ;;  %v4574_v47 = vsel %vm2921_vm3, %v3195_v35, %v8571_v27  ;;  %v3637_v35 = vld [vmem:[#allocation2 + $0x1c9] sm:$0xff] }
 0x23b   : > { %10216 = vst [vmem:[#allocation52_spill] sm:$0xff] %v8672_v40  ;;  %4526 = vrot.lane.b32.xlu0 %v8666_v52, %s7253_s6  ;;  %v8678_v49 = vpop.f32.mrb[169].mxu0  ;;  %v4927_v26 = vsel %vm4668_vm5, %v4832_v10, %v4413_v29  ;;  %v4670_v24 = vsel %vm4668_vm5, %v4574_v47, %v8574_v9  ;;  %v3829_v29 = vld [vmem:[#allocation2 + $0x1d0] sm:$0xff]  ;;  %v3828_v47 = vld [vmem:[#allocation2 + $0x1c8] sm:$0xff] }
 0x23c   : > { %4242 = vrot.lane.b32.xlu1 %v8602_v43, %s7253_s6  ;;  %v8685_v39 = vpop.f32.mrb[170].mxu0  ;;  %v4991_v7 = vsel %vm4733_vm4, %v4927_v26, %v4509_v20  ;;  %v3733_v43 = vld [vmem:[#allocation2 + $0x1cf] sm:$0xff]  ;;  %v3732_v20 = vld [vmem:[#allocation2 + $0x1c7] sm:$0xff] }
 0x23d   : > { %5358 = vmatprep.mubr.bf16.mxu1 %v4991_v7  ;;  %v8690_v30 = vpop.permute.xlu0 %4416  ;;  %v8692_v40 = vpop.f32.mrb[171].mxu0  ;;  %v8707_v7 = vpack.c.bf16 %v3733_v43, %v3732_v20  ;;  %v3518_v9 = vld [vmem:[#allocation2 + $0x50] sm:$0xff]  ;;  %v3517_v43 = vld [vmem:[#allocation2 + $0x48] sm:$0xff] }
 0x23e   : > { %10217 = vst [vmem:[#allocation53_spill] sm:$0xff] %v8692_v40  ;;  %v8696_v10 = vpop.permute.xlu1 %4128 }
 0x23f   : > { %4336 = vrot.lane.b32.xlu0 %v8694_v50, %s7252_s30 }
 0x240   : > { %4052 = vrot.lane.b32.xlu1 %v3878_v34, %s7252_s30 }
 0x241   : > { %v8705_v26 = vpop.permute.xlu0 %4512 }
 0x242   : > { %v4221_v19 = vpop.permute.xlu1 %4220  ;;  %v8711_v3 = vpop.f32.mrb[172].mxu0 }
 0x243   : > { %10218 = vst [vmem:[#allocation54_spill] sm:$0xff] %v8711_v3  ;;  %v4735_v40 = vsel %vm4733_vm4, %v4670_v24, %v4221_v19  ;;  %4436 = vrot.lane.b32.xlu0 %v8707_v7, %s7251_s29  ;;  %v8718_v34 = vpop.f32.mrb[173].mxu0  ;;  %v8732_v19 = vpack.c.bf16 %v3829_v29, %v3828_v47  ;;  %v3638_v3 = vld [vmem:[#allocation2 + $0x1d1] sm:$0xff]  ;;  %v3580_v29 = vpack.c.bf16 %v3518_v9, %v3517_v43  ;;  %v3730_v9 = vld [vmem:[#allocation2 + $0x1a7] sm:$0xff] }
 0x244   : > { %10219 = vst [vmem:[#allocation55_spill] sm:$0xff] %v8718_v34  ;;  %5359 = vmatmul.mubr.bf16.vlgmr.msra.gmra.mrb[32].mxu1 %v4735_v40  ;;  %4148 = vrot.lane.b32.xlu1 %v8633_v42, %s7251_s29  ;;  %v8724_v27 = vpop.f32.mrb[174].mxu0  ;;  %v8740_v62 = vpack.c.bf16 %v3638_v3, %v3637_v35  ;;  %v3731_v34 = vld [vmem:[#allocation2 + $0x1af] sm:$0xff] }
 0x245   : > { %10220 = vst [vmem:[#allocation56_spill] sm:$0xff] %v8724_v27  ;;  %v8728_v20 = vpop.permute.xlu0 %4322  ;;  %v8730_v24 = vpop.f32.mrb[175].mxu0  ;;  %7007 = vmatpush3.bf16.msra.mxu1 %v7238_v11 }
 0x246   : > { %10221 = vst [vmem:[#allocation57_spill] sm:$0xff] %v8730_v24  ;;  %v4031_v40 = vpop.permute.xlu1 %4030 }
 0x247   : > { %4532 = vrot.lane.b32.xlu0 %v8732_v19, %s7253_s6  ;;  %v4577_v42 = vsel %vm2921_vm3, %v8303_v36, %v4031_v40 }
 0x248   : > { %4240 = vrot.lane.b32.xlu1 %v8654_v8, %s7253_s6  ;;  %v4835_v8 = vsel %vm2921_vm3, %v3580_v29, %v8650_v44  ;;  %v8766_v44 = vpack.c.bf16 %v3731_v34, %v3730_v9  ;;  %v3826_v34 = vld [vmem:[#allocation2 + $0x1a8] sm:$0xff] }
 0x249   : > { %v4415_v27 = vpop.permute.xlu0 %4414 }
 0x24a   : > { %v4127_v47 = vpop.permute.xlu1 %4126  ;;  %v8742_v11 = vpop.f32.mrb[176].mxu0  ;;  %v4929_v43 = vsel %vm4668_vm5, %v4835_v8, %v4415_v27 }
 0x24b   : > { %10222 = vst [vmem:[#allocation58_spill] sm:$0xff] %v8742_v11  ;;  %4342 = vrot.lane.b32.xlu0 %v8740_v62, %s7252_s30  ;;  %v8750_v22 = vpop.f32.mrb[177].mxu0  ;;  %v4672_v3 = vsel %vm4668_vm5, %v4577_v42, %v4127_v47  ;;  %v3827_v47 = vld [vmem:[#allocation2 + $0x1b0] sm:$0xff] }
 0x24c   : > { %4050 = vrot.lane.b32.xlu1 %v8666_v52, %s7252_s30  ;;  %v8759_v36 = vpop.f32.mrb[178].mxu0  ;;  %v4738_v27 = vsel %vm4733_vm4, %v4672_v3, %v8656_v17  ;;  %v8779_v9 = vpack.c.bf16 %v3827_v47, %v3826_v34  ;;  %v3636_v52 = vld [vmem:[#allocation2 + $0x1b1] sm:$0xff] }
 0x24d   : > { %v4511_v24 = vpop.permute.xlu0 %4510  ;;  %v8764_v11 = vpop.f32.mrb[179].mxu0  ;;  %v3136_v47 = vld [vmem:[#allocation2 + $0x4f] sm:$0xff] }
 0x24e   : > { %v8768_v42 = vpop.permute.xlu1 %4226  ;;  %v4994_v29 = vsel %vm4733_vm4, %v4929_v43, %v4511_v24 }
 0x24f   : > { %5366 = vmatprep.mubr.bf16.mxu1 %v4994_v29  ;;  %4434 = vrot.lane.b32.xlu0 %v8766_v44, %s7251_s29  ;;  %v3635_v29 = vld [vmem:[#allocation2 + $0x1a9] sm:$0xff] }
 0x250   : > { %4146 = vrot.lane.b32.xlu1 %v8694_v50, %s7251_s29  ;;  %5367 = vmatmul.mubr.bf16.gmra.mrb[36].mxu1 %v4738_v27 }
 0x251   : > { %v4321_v8 = vpop.permute.xlu0 %4320 }
 0x252   : > { %v8781_v40 = vpop.permute.xlu1 %4036  ;;  %v4838_v24 = vsel %vm2921_vm3, %v8357_v28, %v4321_v8  ;;  %v8785_v43 = vpop.f32.mrb[180].mxu0 }
 0x253   : > { %4530 = vrot.lane.b32.xlu0 %v8779_v9, %s7253_s6  ;;  %v8791_v50 = vpop.f32.mrb[181].mxu0  ;;  %v4931_v3 = vsel %vm4668_vm5, %v4838_v24, %v8690_v30  ;;  %v8809_v30 = vpack.c.bf16 %v3636_v52, %v3635_v29  ;;  %v3135_v24 = vld [vmem:[#allocation2 + $0x47] sm:$0xff] }
 0x254   : > { %10223 = vst [vmem:[#allocation59_spill] sm:$0xff] %v8791_v50  ;;  %4246 = vrot.lane.b32.xlu1 %v8707_v7, %s7253_s6  ;;  %v8799_v27 = vpop.f32.mrb[182].mxu0  ;;  %v4997_v34 = vsel %vm4733_vm4, %v4931_v3, %v8705_v26  ;;  %v3737_v50 = vld [vmem:[#allocation2 + $0x20f] sm:$0xff]  ;;  %v3197_v1 = vpack.c.bf16 %v3136_v47, %v3135_v24  ;;  %v3736_v26 = vld [vmem:[#allocation2 + $0x207] sm:$0xff] }
 0x255   : > { %5374 = vmatprep.mubr.bf16.mxu1 %v4997_v34  ;;  %v8805_v17 = vpop.permute.xlu0 %4420  ;;  %v8807_v35 = vpop.f32.mrb[183].mxu0  ;;  %v8823_v29 = vpack.c.bf16 %v3737_v50, %v3736_v26  ;;  %v3833_v47 = vld [vmem:[#allocation2 + $0x210] sm:$0xff]  ;;  %v3832_v50 = vld [vmem:[#allocation2 + $0x208] sm:$0xff] }
 0x256   : > { %v8811_v7 = vpop.permute.xlu1 %4132  ;;  %v4580_v3 = vsel %vm2921_vm3, %v3197_v1, %v8668_v0  ;;  %v3137_v0 = vld [vmem:[#allocation2 + $0x67] sm:$0xff] }
 0x257   : > { %4340 = vrot.lane.b32.xlu0 %v8809_v30, %s7252_s30  ;;  %v4674_v34 = vsel %vm4668_vm5, %v4580_v3, %v8696_v10 }
 0x258   : > { %4056 = vrot.lane.b32.xlu1 %v8732_v19, %s7252_s30 }
 0x259   : > { %v8821_v52 = vpop.permute.xlu0 %4516 }
 0x25a   : > { %v4225_v28 = vpop.permute.xlu1 %4224  ;;  %v8827_v8 = vpop.f32.mrb[184].mxu0 }
 0x25b   : > { %10224 = vst [vmem:[#allocation60_spill] sm:$0xff] %v8827_v8  ;;  %v4741_v19 = vsel %vm4733_vm4, %v4674_v34, %v4225_v28  ;;  %4440 = vrot.lane.b32.xlu0 %v8823_v29, %s7251_s29  ;;  %v8834_v1 = vpop.f32.mrb[185].mxu0  ;;  %v3882_v34 = vpack.c.bf16 %v3833_v47, %v3832_v50  ;;  %v3138_v8 = vld [vmem:[#allocation2 + $0x6f] sm:$0xff] }
 0x25c   : > { %10225 = vst [vmem:[#allocation61_spill] sm:$0xff] %v8834_v1  ;;  %5375 = vmatmul.mubr.bf16.gmra.mrb[40].mxu1 %v4741_v19  ;;  %4152 = vrot.lane.b32.xlu1 %v8740_v62, %s7251_s29  ;;  %v8840_v10 = vpop.f32.mrb[186].mxu0  ;;  %v3641_v62 = vld [vmem:[#allocation2 + $0x209] sm:$0xff]  ;;  %v3198_v1 = vpack.c.bf16 %v3138_v8, %v3137_v0 }
 0x25d   : > { %10226 = vst [vmem:[#allocation62_spill] sm:$0xff] %v8840_v10  ;;  %v8844_v3 = vpop.permute.xlu0 %4326  ;;  %v8846_v28 = vpop.f32.mrb[187].mxu0  ;;  %v3690_v10 = vpack.c.bf16 %v3642_v6, %v3641_v62  ;;  %v3735_v47 = vld [vmem:[#allocation2 + $0x1ef] sm:$0xff] }
 0x25e   : > { %10227 = vst [vmem:[#allocation63_spill] sm:$0xff] %v8846_v28  ;;  %v4035_v24 = vpop.permute.xlu1 %4034  ;;  %v3831_v6 = vld [vmem:[#allocation2 + $0x1f0] sm:$0xff] }
 0x25f   : > { %4536 = vrot.lane.b32.xlu0 %v3882_v34, %s7253_s6  ;;  %v4583_v50 = vsel %vm2921_vm3, %v3198_v1, %v4035_v24  ;;  %v3734_v1 = vld [vmem:[#allocation2 + $0x1e7] sm:$0xff] }
 0x260   : > { %4244 = vrot.lane.b32.xlu1 %v8766_v44, %s7253_s6  ;;  %v4841_v44 = vsel %vm2921_vm3, %v8296_v25, %v8728_v20  ;;  %v3785_v25 = vpack.c.bf16 %v3735_v47, %v3734_v1  ;;  %v3524_v20 = vld [vmem:[#allocation2 + $0xb0] sm:$0xff]  ;;  %v3830_v1 = vld [vmem:[#allocation2 + $0x1e8] sm:$0xff] }
 0x261   : > { %v4419_v26 = vpop.permute.xlu0 %4418  ;;  %v3881_v19 = vpack.c.bf16 %v3831_v6, %v3830_v1 }
 0x262   : > { %v4131_v58 = vpop.permute.xlu1 %4130  ;;  %v8853_v41 = vpop.f32.mrb[188].mxu0  ;;  %v4933_v0 = vsel %vm4668_vm5, %v4841_v44, %v4419_v26  ;;  %v3523_v44 = vld [vmem:[#allocation2 + $0xa8] sm:$0xff] }
 0x263   : > { %4346 = vrot.lane.b32.xlu0 %v3690_v10, %s7252_s30  ;;  %v8859_v28 = vpop.f32.mrb[189].mxu0  ;;  %v4676_v8 = vsel %vm4668_vm5, %v4583_v50, %v4131_v58  ;;  %v3583_v47 = vpack.c.bf16 %v3524_v20, %v3523_v44 }
 0x264   : > { %4054 = vrot.lane.b32.xlu1 %v8779_v9, %s7252_s30  ;;  %v8869_v24 = vpop.f32.mrb[190].mxu0  ;;  %v4744_v26 = vsel %vm4733_vm4, %v4676_v8, %v8768_v42  ;;  %v3640_v9 = vld [vmem:[#allocation2 + $0x1f1] sm:$0xff] }
 0x265   : > { %10228 = vst [vmem:[#allocation64_spill] sm:$0xff] %v8869_v24  ;;  %v4515_v34 = vpop.permute.xlu0 %4514  ;;  %v8874_v62 = vpop.f32.mrb[191].mxu0  ;;  %v3140_v8 = vld [vmem:[#allocation2 + $0x8f] sm:$0xff] }
 0x266   : > { %10229 = vst [vmem:[#allocation65_spill] sm:$0xff] %v8874_v62  ;;  %v8876_v58 = vpop.permute.xlu1 %4230  ;;  %v5000_v50 = vsel %vm4733_vm4, %v4933_v0, %v4515_v34 }
 0x267   : > { %5382 = vmatprep.mubr.bf16.mxu1 %v5000_v50  ;;  %4438 = vrot.lane.b32.xlu0 %v3785_v25, %s7251_s29  ;;  %v3639_v50 = vld [vmem:[#allocation2 + $0x1e9] sm:$0xff] }
 0x268   : > { %4150 = vrot.lane.b32.xlu1 %v8809_v30, %s7251_s29  ;;  %5383 = vmatmul.mubr.bf16.gmra.mrb[44].mxu1 %v4744_v26  ;;  %v10230_v26 = vmax.f32 %v8436_v31, %v8606_v23  ;;  %v3689_v1 = vpack.c.bf16 %v3640_v9, %v3639_v50  ;;  %v8913_v31 = vld [vmem:[%s9973_s2] ss:$0 sm:$0xff]  ;;  %v10232_v23 = vmax.f32 %v8445_v2, %v8621_v56 }
 0x269   : > { %v4325_v10 = vpop.permute.xlu0 %4324 }
 0x26a   : > { %v8886_v24 = vpop.permute.xlu1 %4040  ;;  %v4844_v0 = vsel %vm2921_vm3, %v3583_v47, %v4325_v10  ;;  %v6944_v34 = vpop.f32.mrb[192].mxu0 }
 0x26b   : > { %v2692_v62 = vmax.f32 %v6944_v34, %v8422_v33  ;;  %4534 = vrot.lane.b32.xlu0 %v3881_v19, %s7253_s6  ;;  %v2339_v42 = vpop.f32.mrb[193].mxu0  ;;  %v4935_v30 = vsel %vm4668_vm5, %v4844_v0, %v8805_v17  ;;  %v3139_v0 = vld [vmem:[#allocation2 + $0x87] sm:$0xff] }
 0x26c   : > { %4250 = vrot.lane.b32.xlu1 %v8823_v29, %s7253_s6  ;;  %v2690_v6 = vmax.f32 %v2339_v42, %v8430_v16  ;;  %v6945_v20 = vpop.f32.mrb[194].mxu0  ;;  %v5003_v10 = vsel %vm4733_vm4, %v4935_v30, %v8821_v52  ;;  %v10231_v29 = vmax.f32 %v8440_v21, %v8614_v38  ;;  %v3199_v42 = vpack.c.bf16 %v3140_v8, %v3139_v0  ;;  %v10236_v0 = vld [vmem:[#allocation4_spill] sm:$0xff] }
 0x26d   : > { %v2756_v33 = vmax.f32 %v10230_v26, %v2692_v62  ;;  %v2693_v44 = vmax.f32 %v6945_v20, %v8433_v18  ;;  %5390 = vmatprep.mubr.bf16.mxu1 %v5003_v10  ;;  %v8902_v47 = vpop.permute.xlu0 %4424  ;;  %v2342_v17 = vpop.f32.mrb[195].mxu0  ;;  %v10233_v38 = vmax.f32 %v8448_v45, %v8627_v37  ;;  %v10234_v37 = vld [vmem:[#allocation21_spill] sm:$0xff] }
 0x26e   : > { %v2754_v16 = vmax.f32 %v10231_v29, %v2690_v6  ;;  %v8907_v34 = vpop.permute.xlu1 %4136  ;;  %v2691_v52 = vmax.f32 %v2342_v17, %v8451_v53  ;;  %v4586_v9 = vsel %vm2921_vm3, %v3199_v42, %v8781_v40  ;;  %v10237_v29 = vld [vmem:[#allocation34_spill] sm:$0xff] }
 0x26f   : > { %v2827_v18 = vadd.f32 %v8913_v31, %v2756_v33  ;;  %v2757_v62 = vmax.f32 %v10232_v23, %v2693_v44  ;;  %4344 = vrot.lane.b32.xlu0 %v3689_v1, %s7252_s30  ;;  %v4678_v2 = vsel %vm4668_vm5, %v4586_v9, %v8811_v7  ;;  %v10235_v7 = vld [vmem:[#allocation38_spill] sm:$0xff] }
 0x270   : > { %v2825_v21 = vadd.f32 %v8913_v31, %v2754_v16  ;;  %v2755_v53 = vmax.f32 %v10233_v38, %v2691_v52  ;;  %4248 = vrot.lane.b32.xlu1 %v3785_v25, %s7253_s6  ;;  %v10238_v16 = vmax.f32 %v10236_v0, %v10237_v29  ;;  %v10239_v42 = vld [vmem:[#allocation6_spill] sm:$0xff]  ;;  %v10241_v38 = vld [vmem:[#allocation19_spill] sm:$0xff] }
 0x271   : > { %v2891_v50 = vmax.f32 %v2827_v18, 0.0  ;;  %v2828_v30 = vadd.f32 %v8913_v31, %v2757_v62  ;;  %v8928_v8 = vpop.permute.xlu0 %4520 }
 0x272   : > { %v2889_v56 = vmax.f32 %v2825_v21, 0.0  ;;  %v2826_v6 = vadd.f32 %v8913_v31, %v2755_v53  ;;  %v4229_v20 = vpop.permute.xlu1 %4228  ;;  %v6948_v10 = vpop.f32.mrb[196].mxu0  ;;  %v10240_v21 = vld [vmem:[#allocation20_spill] sm:$0xff] }
 0x273   : > { %3101 = vst.msk [vmem:[#allocation2 + $0x288] sm:$0xff] %vm2921_vm3, %v2891_v50  ;;  %v2892_v45 = vmax.f32 %v2828_v30, 0.0  ;;  %v2696_v25 = vmax.f32 %v6948_v10, %v10234_v37  ;;  %v4747_v40 = vsel %vm4733_vm4, %v4678_v2, %v4229_v20  ;;  %v2355_v26 = vpop.f32.mrb[197].mxu0  ;;  %v10242_v53 = vmax.f32 %v10240_v21, %v10241_v38  ;;  %v3142_v50 = vld [vmem:[#allocation2 + $0xaf] sm:$0xff]  ;;  %v10245_v20 = vld [vmem:[#allocation35_spill] sm:$0xff] }
 0x274   : > { %3099 = vst.msk [vmem:[#allocation2 + $0x268] sm:$0xff] %vm2921_vm3, %v2889_v56  ;;  %v2890_v33 = vmax.f32 %v2826_v6, 0.0  ;;  %5391 = vmatmul.mubr.bf16.gmra.mrb[48].mxu1 %v4747_v40  ;;  %4058 = vrot.lane.b32.xlu1 %v3881_v19, %s7252_s30  ;;  %v2694_v44 = vmax.f32 %v2355_v26, %v10235_v7  ;;  %v6949_v17 = vpop.f32.mrb[198].mxu0  ;;  %v10243_v30 = vld [vmem:[#allocation22_spill] sm:$0xff]  ;;  %v10244_v6 = vld [vmem:[#allocation37_spill] sm:$0xff]  ;;  %v10248_v26 = vld [vmem:[#allocation51_spill] sm:$0xff] }
 0x275   : > { %3102 = vst.msk [vmem:[#allocation2 + $0x290] sm:$0xff] %vm2921_vm3, %v2892_v45  ;;  %v2760_v52 = vmax.f32 %v10238_v16, %v2696_v25  ;;  %v2697_v18 = vmax.f32 %v6949_v17, %v10239_v42  ;;  %v8944_v23 = vpop.permute.xlu0 %4330  ;;  %v2358_v62 = vpop.f32.mrb[199].mxu0  ;;  %v10246_v10 = vmax.f32 %v10244_v6, %v10245_v20  ;;  %v3141_v25 = vld [vmem:[#allocation2 + $0xa7] sm:$0xff]  ;;  %v10250_v38 = vld [vmem:[#allocation23_spill] sm:$0xff] }
 0x276   : > { %3100 = vst.msk [vmem:[#allocation2 + $0x270] sm:$0xff] %vm2921_vm3, %v2890_v33  ;;  %v2758_v19 = vmax.f32 %v10242_v53, %v2694_v44  ;;  %v4039_v9 = vpop.permute.xlu1 %4038  ;;  %v2695_v2 = vmax.f32 %v2358_v62, %v10243_v30  ;;  %v10247_v40 = vld [vmem:[#allocation5_spill] sm:$0xff]  ;;  %v3200_v0 = vpack.c.bf16 %v3142_v50, %v3141_v25  ;;  %v10254_v25 = vld [vmem:[#allocation52_spill] sm:$0xff] }
 0x277   : > { %v2831_v56 = vadd.f32 %v8913_v31, %v2760_v52  ;;  %v2761_v45 = vmax.f32 %v10246_v10, %v2697_v18  ;;  %v10249_v33 = vmax.f32 %v10247_v40, %v10248_v26 }
 0x278   : > { %v2829_v37 = vadd.f32 %v8913_v31, %v2758_v19  ;;  %4154 = vrot.lane.b32.xlu1 %v3689_v1, %s7251_s29  ;;  %v4589_v21 = vsel %vm2921_vm3, %v3200_v0, %v4039_v9  ;;  %v10251_v1 = vld [vmem:[#allocation36_spill] sm:$0xff]  ;;  %v3528_v0 = vld [vmem:[#allocation2 + $0xf0] sm:$0xff] }
 0x279   : > { %v2759_v7 = vmax.f32 %v10249_v33, %v2695_v2  ;;  %v2895_v44 = vmax.f32 %v2831_v56, 0.0  ;;  %v2832_v17 = vadd.f32 %v8913_v31, %v2761_v45  ;;  %v4423_v29 = vpop.permute.xlu0 %4422  ;;  %v4847_v30 = vsel %vm2921_vm3, %v10251_v1, %v8844_v3  ;;  %v10252_v56 = vld [vmem:[#allocation39_spill] sm:$0xff]  ;;  %v10256_v33 = vld [vmem:[#allocation40_spill] sm:$0xff] }
 0x27a   : > { %v2893_v16 = vmax.f32 %v2829_v37, 0.0  ;;  %v4135_v42 = vpop.permute.xlu1 %4134  ;;  %v6952_v62 = vpop.f32.mrb[200].mxu0  ;;  %v3740_v10 = vld [vmem:[#allocation2 + $0x287] sm:$0xff]  ;;  %v4937_v9 = vsel %vm4668_vm5, %v4847_v30, %v4423_v29  ;;  %v10253_v37 = vld [vmem:[#allocation7_spill] sm:$0xff] }
 0x27b   : > { %v2830_v52 = vadd.f32 %v8913_v31, %v2759_v7  ;;  %3105 = vst.msk [vmem:[#allocation2 + $0x2c8] sm:$0xff] %vm2921_vm3, %v2895_v44  ;;  %v2896_v18 = vmax.f32 %v2832_v17, 0.0  ;;  %v2700_v53 = vmax.f32 %v6952_v62, %v10250_v38  ;;  %v2371_v19 = vpop.f32.mrb[201].mxu0  ;;  %v4680_v2 = vsel %vm4668_vm5, %v4589_v21, %v4135_v42  ;;  %v10258_v62 = vld [vmem:[#allocation8_spill] sm:$0xff]  ;;  %v10260_v30 = vld [vmem:[#allocation53_spill] sm:$0xff] }
 0x27c   : > { %3103 = vst.msk [vmem:[#allocation2 + $0x2a8] sm:$0xff] %vm2921_vm3, %v2893_v16  ;;  %v2698_v6 = vmax.f32 %v2371_v19, %v10252_v56  ;;  %v6953_v20 = vpop.f32.mrb[202].mxu0  ;;  %v3741_v45 = vld [vmem:[#allocation2 + $0x28f] sm:$0xff]  ;;  %v10255_v40 = vmax.f32 %v10253_v37, %v10254_v25  ;;  %v10257_v16 = vmax.f32 %v8481_v5, %v8678_v49  ;;  %v4750_v5 = vsel %vm4733_vm4, %v4680_v2, %v8876_v58 }
 0x27d   : > { %v2894_v50 = vmax.f32 %v2830_v52, 0.0  ;;  %3106 = vst.msk [vmem:[#allocation2 + $0x2d0] sm:$0xff] %vm2921_vm3, %v2896_v18  ;;  %v2701_v3 = vmax.f32 %v6953_v20, %v10256_v33  ;;  %v4519_v7 = vpop.permute.xlu0 %4518  ;;  %v2374_v44 = vpop.f32.mrb[203].mxu0  ;;  %v3788_v17 = vpack.c.bf16 %v3741_v45, %v3740_v10  ;;  %v3837_v21 = vld [vmem:[#allocation2 + $0x290] sm:$0xff]  ;;  %v3527_v49 = vld [vmem:[#allocation2 + $0xe8] sm:$0xff] }
 0x27e   : > { %v2764_v26 = vmax.f32 %v10255_v40, %v2700_v53  ;;  %v2762_v52 = vmax.f32 %v10257_v16, %v2698_v6  ;;  %v8981_v42 = vpop.permute.xlu1 %4234  ;;  %v2699_v29 = vmax.f32 %v2374_v44, %v10258_v62  ;;  %v5006_v18 = vsel %vm4733_vm4, %v4937_v9, %v4519_v7  ;;  %v3836_v20 = vld [vmem:[#allocation2 + $0x288] sm:$0xff]  ;;  %v3646_v40 = vld [vmem:[#allocation2 + $0x291] sm:$0xff] }
 0x27f   : > { %3104 = vst.msk [vmem:[#allocation2 + $0x2b0] sm:$0xff] %vm2921_vm3, %v2894_v50  ;;  %v10259_v53 = vmax.f32 %v8484_v14, %v8685_v39  ;;  %5398 = vmatprep.mubr.bf16.mxu1 %v5006_v18  ;;  %4444 = vrot.lane.b32.xlu0 %v3788_v17, %s7251_s29  ;;  %v10261_v50 = vmax.f32 %v8486_v32, %v10260_v30  ;;  %v3645_v32 = vld [vmem:[#allocation2 + $0x289] sm:$0xff]  ;;  %v10267_v30 = vld [vmem:[#allocation55_spill] sm:$0xff] }
 0x280   : > { %v2835_v38 = vadd.f32 %v8913_v31, %v2764_v26  ;;  %v2833_v1 = vadd.f32 %v8913_v31, %v2762_v52  ;;  %4254 = vrot.lane.b32.xlu1 %v3788_v17, %s7253_s6  ;;  %5399 = vmatmul.mubr.bf16.gmra.mrb[52].mxu1 %v4750_v5  ;;  %v3585_v6 = vpack.c.bf16 %v3528_v0, %v3527_v49  ;;  %v10262_v33 = vld [vmem:[#allocation9_spill] sm:$0xff]  ;;  %v10264_v18 = vld [vmem:[#allocation54_spill] sm:$0xff] }
 0x281   : > { %v2765_v19 = vmax.f32 %v10259_v53, %v2701_v3  ;;  %v2763_v56 = vmax.f32 %v10261_v50, %v2699_v29  ;;  %v4329_v10 = vpop.permute.xlu0 %4328  ;;  %v3884_v45 = vpack.c.bf16 %v3837_v21, %v3836_v20  ;;  %v3144_v17 = vld [vmem:[#allocation2 + $0xcf] sm:$0xff]  ;;  %v10265_v21 = vmax.f32 %v8498_v55, %v10264_v18 }
 0x282   : > { %v2899_v14 = vmax.f32 %v2835_v38, 0.0  ;;  %v2897_v9 = vmax.f32 %v2833_v1, 0.0  ;;  %v8999_v2 = vpop.permute.xlu1 %4044  ;;  %v4850_v37 = vsel %vm2921_vm3, %v3585_v6, %v4329_v10  ;;  %v6956_v25 = vpop.f32.mrb[204].mxu0  ;;  %v10263_v16 = vld [vmem:[#allocation25_spill] sm:$0xff]  ;;  %v10266_v53 = vld [vmem:[#allocation42_spill] sm:$0xff]  ;;  %v3692_v49 = vpack.c.bf16 %v3646_v40, %v3645_v32 }
 0x283   : > { %v2836_v39 = vadd.f32 %v8913_v31, %v2765_v19  ;;  %v2834_v58 = vadd.f32 %v8913_v31, %v2763_v56  ;;  %v2704_v3 = vmax.f32 %v6956_v25, %v10262_v33  ;;  %4540 = vrot.lane.b32.xlu0 %v3884_v45, %s7253_s6  ;;  %v2387_v7 = vpop.f32.mrb[205].mxu0  ;;  %v4939_v44 = vsel %vm4668_vm5, %v4850_v37, %v8902_v47  ;;  %v3143_v1 = vld [vmem:[#allocation2 + $0xc7] sm:$0xff]  ;;  %v10269_v6 = vld [vmem:[#allocation10_spill] sm:$0xff] }
 0x284   : > { %3109 = vst.msk [vmem:[#allocation2 + $0x308] sm:$0xff] %vm2921_vm3, %v2899_v14  ;;  %3107 = vst.msk [vmem:[#allocation2 + $0x2e8] sm:$0xff] %vm2921_vm3, %v2897_v9  ;;  %4064 = vrot.lane.b32.xlu1 %v3884_v45, %s7252_s30  ;;  %v2702_v52 = vmax.f32 %v2387_v7, %v10263_v16  ;;  %v6957_v62 = vpop.f32.mrb[206].mxu0  ;;  %v5009_v29 = vsel %vm4733_vm4, %v4939_v44, %v8928_v8  ;;  %v10268_v50 = vmax.f32 %v8501_v60, %v10267_v30  ;;  %v3643_v55 = vld [vmem:[#allocation2 + $0x269] sm:$0xff]  ;;  %v3644_v14 = vld [vmem:[#allocation2 + $0x271] sm:$0xff] }
 0x285   : > { %v2900_v26 = vmax.f32 %v2836_v39, 0.0  ;;  %v2898_v0 = vmax.f32 %v2834_v58, 0.0  ;;  %v2768_v38 = vmax.f32 %v10265_v21, %v2704_v3  ;;  %v2705_v47 = vmax.f32 %v6957_v62, %v10266_v53  ;;  %5406 = vmatprep.mubr.bf16.mxu1 %v5009_v29  ;;  %v9017_v19 = vpop.permute.xlu0 %4428  ;;  %v2390_v5 = vpop.f32.mrb[207].mxu0  ;;  %v10270_v45 = vld [vmem:[#allocation24_spill] sm:$0xff]  ;;  %v3452_v25 = vld [vmem:[#allocation2 + $0x26f] sm:$0xff] }
 0x286   : > { %v2766_v8 = vmax.f32 %v10268_v50, %v2702_v52  ;;  %v9023_v56 = vpop.permute.xlu1 %4140  ;;  %v2703_v20 = vmax.f32 %v2390_v5, %v10269_v6  ;;  %v3201_v39 = vpack.c.bf16 %v3144_v17, %v3143_v1  ;;  %v10271_v9 = vld [vmem:[#allocation56_spill] sm:$0xff]  ;;  %v10273_v60 = vld [vmem:[#allocation41_spill] sm:$0xff]  ;;  %v3262_v30 = vld [vmem:[#allocation2 + $0x270] sm:$0xff] }
 0x287   : > { %3110 = vst.msk [vmem:[#allocation2 + $0x310] sm:$0xff] %vm2921_vm3, %v2900_v26  ;;  %3108 = vst.msk [vmem:[#allocation2 + $0x2f0] sm:$0xff] %vm2921_vm3, %v2898_v0  ;;  %v2839_v10 = vadd.f32 %v8913_v31, %v2768_v38  ;;  %v10272_v58 = vmax.f32 %v10270_v45, %v10271_v9  ;;  %4350 = vrot.lane.b32.xlu0 %v3692_v49, %s7252_s30  ;;  %v10274_v40 = vld [vmem:[#allocation57_spill] sm:$0xff]  ;;  %v9041_v0 = vpack.c.bf16 %v3644_v14, %v3643_v55  ;;  %v10277_v50 = vld [vmem:[#allocation11_spill] sm:$0xff] }
 0x288   : > { %v2837_v32 = vadd.f32 %v8913_v31, %v2766_v8  ;;  %v10275_v26 = vmax.f32 %v10273_v60, %v10274_v40  ;;  %4160 = vrot.lane.b32.xlu1 %v3692_v49, %s7251_s29  ;;  %v4592_v3 = vsel %vm2921_vm3, %v3201_v39, %v8886_v24  ;;  %v3451_v16 = vld [vmem:[#allocation2 + $0x267] sm:$0xff]  ;;  %v3745_v53 = vld [vmem:[#allocation2 + $0x2cf] sm:$0xff] }
 0x289   : > { %v2769_v37 = vmax.f32 %v10272_v58, %v2705_v47  ;;  %v2903_v7 = vmax.f32 %v2839_v10, 0.0  ;;  %v9039_v17 = vpop.permute.xlu0 %4524  ;;  %v4682_v52 = vsel %vm4668_vm5, %v4592_v3, %v8907_v34  ;;  %v3499_v38 = vpack.c.bf16 %v3452_v25, %v3451_v16  ;;  %v10276_v47 = vld [vmem:[#allocation26_spill] sm:$0xff]  ;;  %v10280_v10 = vld [vmem:[#allocation27_spill] sm:$0xff] }
 0x28a   : > { %v2767_v33 = vmax.f32 %v10275_v26, %v2703_v20  ;;  %v2901_v62 = vmax.f32 %v2837_v32, 0.0  ;;  %v4233_v18 = vpop.permute.xlu1 %4232  ;;  %v6960_v21 = vpop.f32.mrb[208].mxu0  ;;  %v3744_v20 = vld [vmem:[#allocation2 + $0x2c7] sm:$0xff]  ;;  %v10278_v55 = vld [vmem:[#allocation58_spill] sm:$0xff]  ;;  %v10281_v32 = vmax.f32 %v8521_v51, %v8750_v22 }
 0x28b   : > { %v2840_v44 = vadd.f32 %v8913_v31, %v2769_v37  ;;  %3113 = vst.msk [vmem:[#allocation2 + $0x348] sm:$0xff] %vm2921_vm3, %v2903_v7  ;;  %v2708_v5 = vmax.f32 %v6960_v21, %v10276_v47  ;;  %v4753_v49 = vsel %vm4733_vm4, %v4682_v52, %v4233_v18  ;;  %4348 = vrot.lane.b32.xlu0 %v9041_v0, %s7252_s30  ;;  %v2403_v1 = vpop.f32.mrb[209].mxu0  ;;  %v3261_v37 = vld [vmem:[#allocation2 + $0x268] sm:$0xff]  ;;  %v3841_v7 = vld [vmem:[#allocation2 + $0x2d0] sm:$0xff] }
 0x28c   : > { %v2838_v29 = vadd.f32 %v8913_v31, %v2767_v33  ;;  %3111 = vst.msk [vmem:[#allocation2 + $0x328] sm:$0xff] %vm2921_vm3, %v2901_v62  ;;  %5407 = vmatmul.mubr.bf16.gmra.mrb[56].mxu1 %v4753_v49  ;;  %4252 = vrot.lane.b32.xlu1 %v3499_v38, %s7253_s6  ;;  %v2706_v8 = vmax.f32 %v2403_v1, %v10277_v50  ;;  %v6961_v6 = vpop.f32.mrb[210].mxu0  ;;  %v3146_v26 = vld [vmem:[#allocation2 + $0xef] sm:$0xff]  ;;  %v10282_v33 = vld [vmem:[#allocation43_spill] sm:$0xff]  ;;  %v3145_v51 = vld [vmem:[#allocation2 + $0xe7] sm:$0xff] }
 0x28d   : > { %v2904_v24 = vmax.f32 %v2840_v44, 0.0  ;;  %v10279_v14 = vmax.f32 %v8518_v57, %v10278_v55  ;;  %v2709_v45 = vmax.f32 %v6961_v6, %v10280_v10  ;;  %v9059_v9 = vpop.permute.xlu0 %4334  ;;  %v2406_v58 = vpop.f32.mrb[211].mxu0  ;;  %v9061_v25 = vpack.c.bf16 %v3745_v53, %v3744_v20  ;;  %v3530_v44 = vld [vmem:[#allocation2 + $0x110] sm:$0xff]  ;;  %v3840_v21 = vld [vmem:[#allocation2 + $0x2c8] sm:$0xff]  ;;  %v10285_v6 = vld [vmem:[#allocation12_spill] sm:$0xff] }
 0x28e   : > { %v2902_v34 = vmax.f32 %v2838_v29, 0.0  ;;  %v2770_v60 = vmax.f32 %v10281_v32, %v2706_v8  ;;  %v4043_v40 = vpop.permute.xlu1 %4042  ;;  %v2707_v3 = vmax.f32 %v2406_v58, %v10282_v33  ;;  %v9068_v57 = vpack.c.bf16 %v3262_v30, %v3261_v37  ;;  %v3529_v38 = vld [vmem:[#allocation2 + $0x108] sm:$0xff] }
 0x28f   : > { %3114 = vst.msk [vmem:[#allocation2 + $0x350] sm:$0xff] %vm2921_vm3, %v2904_v24  ;;  %v2772_v39 = vmax.f32 %v10279_v14, %v2708_v5  ;;  %v10283_v52 = vmax.f32 %v8524_v46, %v8759_v36  ;;  %4448 = vrot.lane.b32.xlu0 %v9061_v25, %s7251_s29  ;;  %v10284_v29 = vmax.f32 %v8526_v63, %v8764_v11  ;;  %v3649_v63 = vld [vmem:[#allocation2 + $0x2c9] sm:$0xff]  ;;  %v3650_v11 = vld [vmem:[#allocation2 + $0x2d1] sm:$0xff] }
 0x290   : > { %3112 = vst.msk [vmem:[#allocation2 + $0x330] sm:$0xff] %vm2921_vm3, %v2902_v34  ;;  %v2841_v22 = vadd.f32 %v8913_v31, %v2770_v60  ;;  %4062 = vrot.lane.b32.xlu1 %v9068_v57, %s7252_s30  ;;  %v3202_v46 = vpack.c.bf16 %v3146_v26, %v3145_v51  ;;  %v9083_v47 = vpack.c.bf16 %v3841_v7, %v3840_v21  ;;  %v10292_v51 = vld [vmem:[#allocation29_spill] sm:$0xff] }
 0x291   : > { %v2843_v16 = vadd.f32 %v8913_v31, %v2772_v39  ;;  %v2773_v62 = vmax.f32 %v10283_v52, %v2709_v45  ;;  %v2771_v18 = vmax.f32 %v10284_v29, %v2707_v3  ;;  %v4427_v36 = vpop.permute.xlu0 %4426  ;;  %v3586_v5 = vpack.c.bf16 %v3530_v44, %v3529_v38  ;;  %v10286_v45 = vld [vmem:[#allocation28_spill] sm:$0xff]  ;;  %v3532_v44 = vld [vmem:[#allocation2 + $0x130] sm:$0xff] }
 0x292   : > { %v2905_v49 = vmax.f32 %v2841_v22, 0.0  ;;  %v4139_v30 = vpop.permute.xlu1 %4138  ;;  %v6964_v34 = vpop.f32.mrb[212].mxu0  ;;  %v4595_v8 = vsel %vm2921_vm3, %v3202_v46, %v4043_v40  ;;  %v10287_v60 = vmax.f32 %v8538_v12, %v8785_v43  ;;  %v9104_v7 = vpack.c.bf16 %v3650_v11, %v3649_v63  ;;  %v3743_v43 = vld [vmem:[#allocation2 + $0x2af] sm:$0xff] }
 0x293   : > { %v2907_v53 = vmax.f32 %v2843_v16, 0.0  ;;  %v2844_v24 = vadd.f32 %v8913_v31, %v2773_v62  ;;  %v2842_v1 = vadd.f32 %v8913_v31, %v2771_v18  ;;  %v2712_v20 = vmax.f32 %v6964_v34, %v10285_v6  ;;  %4544 = vrot.lane.b32.xlu0 %v9083_v47, %s7253_s6  ;;  %v2419_v55 = vpop.f32.mrb[213].mxu0  ;;  %v10290_v16 = vld [vmem:[#allocation59_spill] sm:$0xff] }
 0x294   : > { %v4853_v14 = vsel %vm2921_vm3, %v3586_v5, %v8944_v23  ;;  %3115 = vst.msk [vmem:[#allocation2 + $0x368] sm:$0xff] %vm2921_vm3, %v2905_v49  ;;  %v4684_v10 = vsel %vm4668_vm5, %v4595_v8, %v4139_v30  ;;  %4158 = vrot.lane.b32.xlu1 %v9041_v0, %s7251_s29  ;;  %v2710_v58 = vmax.f32 %v2419_v55, %v10286_v45  ;;  %v6965_v37 = vpop.f32.mrb[214].mxu0  ;;  %v10288_v23 = vld [vmem:[#allocation45_spill] sm:$0xff]  ;;  %v10289_v0 = vld [vmem:[#allocation44_spill] sm:$0xff]  ;;  %v10295_v8 = vld [vmem:[#allocation30_spill] sm:$0xff] }
 0x295   : > { %3117 = vst.msk [vmem:[#allocation2 + $0x388] sm:$0xff] %vm2921_vm3, %v2907_v53  ;;  %v2908_v50 = vmax.f32 %v2844_v24, 0.0  ;;  %v2906_v39 = vmax.f32 %v2842_v1, 0.0  ;;  %v4941_v32 = vsel %vm4668_vm5, %v4853_v14, %v4427_v36  ;;  %v2776_v40 = vmax.f32 %v10287_v60, %v2712_v20  ;;  %v4523_v33 = vpop.permute.xlu0 %4522  ;;  %v2422_v3 = vpop.f32.mrb[215].mxu0  ;;  %v3531_v24 = vld [vmem:[#allocation2 + $0x128] sm:$0xff] }
 0x296   : > { %v2713_v26 = vmax.f32 %v6965_v37, %v10288_v23  ;;  %v10291_v52 = vmax.f32 %v10289_v0, %v10290_v16  ;;  %v9110_v22 = vpop.permute.xlu1 %4238  ;;  %v2711_v29 = vmax.f32 %v2422_v3, %v10292_v51  ;;  %v5012_v12 = vsel %vm4733_vm4, %v4941_v32, %v4523_v33  ;;  %v3148_v14 = vld [vmem:[#allocation2 + $0x10f] sm:$0xff]  ;;  %v3147_v16 = vld [vmem:[#allocation2 + $0x107] sm:$0xff] }
 0x297   : > { %3118 = vst.msk [vmem:[#allocation2 + $0x390] sm:$0xff] %vm2921_vm3, %v2908_v50  ;;  %3116 = vst.msk [vmem:[#allocation2 + $0x370] sm:$0xff] %vm2921_vm3, %v2906_v39  ;;  %v2847_v18 = vadd.f32 %v8913_v31, %v2776_v40  ;;  %v10293_v21 = vmax.f32 %v8544_v4, %v8799_v27  ;;  %5414 = vmatprep.mubr.bf16.mxu1 %v5012_v12  ;;  %4354 = vrot.lane.b32.xlu0 %v9104_v7, %s7252_s30  ;;  %v3742_v27 = vld [vmem:[#allocation2 + $0x2a7] sm:$0xff]  ;;  %v3839_v50 = vld [vmem:[#allocation2 + $0x2b0] sm:$0xff] }
 0x298   : > { %v2774_v62 = vmax.f32 %v10291_v52, %v2710_v58  ;;  %v4756_v53 = vsel %vm4733_vm4, %v4684_v10, %v8981_v42  ;;  %v10294_v36 = vmax.f32 %v8546_v61, %v8807_v35  ;;  %4258 = vrot.lane.b32.xlu1 %v9061_v25, %s7253_s6  ;;  %v3587_v4 = vpack.c.bf16 %v3532_v44, %v3531_v24  ;;  %v10296_v10 = vld [vmem:[#allocation15_spill] sm:$0xff]  ;;  %v3838_v32 = vld [vmem:[#allocation2 + $0x2a8] sm:$0xff]  ;;  %v10298_v40 = vld [vmem:[#allocation60_spill] sm:$0xff] }
 0x299   : > { %v2777_v38 = vmax.f32 %v10293_v21, %v2713_v26  ;;  %5415 = vmatmul.mubr.bf16.gmra.mrb[60].mxu1 %v4756_v53  ;;  %v2911_v49 = vmax.f32 %v2847_v18, 0.0  ;;  %v4333_v30 = vpop.permute.xlu0 %4332  ;;  %v9129_v34 = vpack.c.bf16 %v3743_v43, %v3742_v27  ;;  %v10297_v60 = vld [vmem:[#allocation13_spill] sm:$0xff]  ;;  %v10300_v26 = vld [vmem:[#allocation31_spill] sm:$0xff]  ;;  %v9154_v0 = vpack.c.bf16 %v3839_v50, %v3838_v32  ;;  %v10301_v52 = vld [vmem:[#allocation46_spill] sm:$0xff] }
 0x29a   : > { %v2845_v46 = vadd.f32 %v8913_v31, %v2774_v62  ;;  %v2775_v5 = vmax.f32 %v10294_v36, %v2711_v29  ;;  %v9132_v11 = vpop.permute.xlu1 %4048  ;;  %v4856_v61 = vsel %vm2921_vm3, %v3587_v4, %v4333_v30  ;;  %v6968_v35 = vpop.f32.mrb[216].mxu0  ;;  %v10299_v23 = vmax.f32 %v10297_v60, %v10298_v40  ;;  %v10304_v12 = vld [vmem:[#allocation47_spill] sm:$0xff]  ;;  %v3647_v18 = vld [vmem:[#allocation2 + $0x2a9] sm:$0xff] }
 0x29b   : > { %v2848_v1 = vadd.f32 %v8913_v31, %v2777_v38  ;;  %3121 = vst.msk [vmem:[#allocation2 + $0x3c8] sm:$0xff] %vm2921_vm3, %v2911_v49  ;;  %v2716_v6 = vmax.f32 %v6968_v35, %v10295_v8  ;;  %4446 = vrot.lane.b32.xlu0 %v9129_v34, %s7251_s29  ;;  %v2435_v20 = vpop.f32.mrb[217].mxu0  ;;  %v4943_v55 = vsel %vm4668_vm5, %v4856_v61, %v9017_v19  ;;  %v3648_v21 = vld [vmem:[#allocation2 + $0x2b1] sm:$0xff]  ;;  %v10313_v40 = vld [vmem:[#allocation17_spill] sm:$0xff] }
 0x29c   : > { %v2909_v42 = vmax.f32 %v2845_v46, 0.0  ;;  %v2846_v63 = vadd.f32 %v8913_v31, %v2775_v5  ;;  %4068 = vrot.lane.b32.xlu1 %v9083_v47, %s7252_s30  ;;  %v2714_v45 = vmax.f32 %v2435_v20, %v10296_v10  ;;  %v6969_v58 = vpop.f32.mrb[218].mxu0  ;;  %v5015_v37 = vsel %vm4733_vm4, %v4943_v55, %v9039_v17  ;;  %v10302_v17 = vld [vmem:[#allocation61_spill] sm:$0xff]  ;;  %v10305_v24 = vld [vmem:[#allocation14_spill] sm:$0xff]  ;;  %v10308_v27 = vld [vmem:[#allocation63_spill] sm:$0xff] }
 0x29d   : > { %v2912_v25 = vmax.f32 %v2848_v1, 0.0  ;;  %v2780_v19 = vmax.f32 %v10299_v23, %v2716_v6  ;;  %v2717_v33 = vmax.f32 %v6969_v58, %v10300_v26  ;;  %5422 = vmatprep.mubr.bf16.mxu1 %v5015_v37  ;;  %v9152_v3 = vpop.permute.xlu0 %4432  ;;  %v2438_v44 = vpop.f32.mrb[219].mxu0  ;;  %v10303_v62 = vmax.f32 %v10301_v52, %v10302_v17  ;;  %v10306_v46 = vld [vmem:[#allocation62_spill] sm:$0xff]  ;;  %v10310_v55 = vld [vmem:[#allocation32_spill] sm:$0xff] }
 0x29e   : > { %3119 = vst.msk [vmem:[#allocation2 + $0x3a8] sm:$0xff] %vm2921_vm3, %v2909_v42  ;;  %v2910_v39 = vmax.f32 %v2846_v63, 0.0  ;;  %v9160_v29 = vpop.permute.xlu1 %4144  ;;  %v2715_v43 = vmax.f32 %v2438_v44, %v10304_v12  ;;  %v3203_v38 = vpack.c.bf16 %v3148_v14, %v3147_v16  ;;  %v10307_v36 = vmax.f32 %v10305_v24, %v10306_v46  ;;  %v3749_v20 = vld [vmem:[#allocation2 + $0x30f] sm:$0xff]  ;;  %v3748_v37 = vld [vmem:[#allocation2 + $0x307] sm:$0xff] }
 0x29f   : > { %3122 = vst.msk [vmem:[#allocation2 + $0x3d0] sm:$0xff] %vm2921_vm3, %v2912_v25  ;;  %v2778_v51 = vmax.f32 %v10303_v62, %v2714_v45  ;;  %v2851_v53 = vadd.f32 %v8913_v31, %v2780_v19  ;;  %4542 = vrot.lane.b32.xlu0 %v9154_v0, %s7253_s6  ;;  %v10309_v49 = vmax.f32 %v8566_v15, %v10308_v27  ;;  %v3150_v17 = vld [vmem:[#allocation2 + $0x12f] sm:$0xff] }
 0x2a0   : > { %3120 = vst.msk [vmem:[#allocation2 + $0x3b0] sm:$0xff] %vm2921_vm3, %v2910_v39  ;;  %v2781_v5 = vmax.f32 %v10307_v36, %v2717_v33  ;;  %4164 = vrot.lane.b32.xlu1 %v9104_v7, %s7251_s29  ;;  %v4598_v30 = vsel %vm2921_vm3, %v3203_v38, %v8999_v2  ;;  %v3693_v35 = vpack.c.bf16 %v3648_v21, %v3647_v18  ;;  %v10315_v62 = vld [vmem:[#allocation33_spill] sm:$0xff]  ;;  %v3845_v12 = vld [vmem:[#allocation2 + $0x310] sm:$0xff] }
 0x2a1   : > { %v2849_v4 = vadd.f32 %v8913_v31, %v2778_v51  ;;  %v2779_v1 = vmax.f32 %v10309_v49, %v2715_v43  ;;  %v2915_v42 = vmax.f32 %v2851_v53, 0.0  ;;  %v9178_v61 = vpop.permute.xlu0 %4528  ;;  %v4686_v50 = vsel %vm4668_vm5, %v4598_v30, %v9023_v56  ;;  %v10311_v56 = vld [vmem:[#allocation49_spill] sm:$0xff]  ;;  %v10316_v43 = vld [vmem:[#allocation64_spill] sm:$0xff] }
 0x2a2   : > { %v2852_v63 = vadd.f32 %v8913_v31, %v2781_v5  ;;  %v4237_v15 = vpop.permute.xlu1 %4236  ;;  %v6972_v6 = vpop.f32.mrb[220].mxu0  ;;  %v10312_v32 = vmax.f32 %v8580_v54, %v8853_v41  ;;  %v9198_v33 = vpack.c.bf16 %v3749_v20, %v3748_v37  ;;  %v10314_v44 = vmax.f32 %v8585_v13, %v8859_v28  ;;  %v3534_v54 = vld [vmem:[#allocation2 + $0x150] sm:$0xff]  ;;  %v3149_v53 = vld [vmem:[#allocation2 + $0x127] sm:$0xff] }
 0x2a3   : > { %v2913_v25 = vmax.f32 %v2849_v4, 0.0  ;;  %v2850_v8 = vadd.f32 %v8913_v31, %v2779_v1  ;;  %3125 = vst.msk [vmem:[#allocation2 + $0x408] sm:$0xff] %vm2921_vm3, %v2915_v42  ;;  %v2720_v2 = vmax.f32 %v6972_v6, %v10310_v55  ;;  %v4759_v14 = vsel %vm4733_vm4, %v4686_v50, %v4237_v15  ;;  %4352 = vrot.lane.b32.xlu0 %v3693_v35, %s7252_s30  ;;  %v2451_v39 = vpop.f32.mrb[221].mxu0  ;;  %v10318_v13 = vld [vmem:[#allocation65_spill] sm:$0xff] }
 0x2a4   : > { %v2916_v7 = vmax.f32 %v2852_v63, 0.0  ;;  %5423 = vmatmul.mubr.bf16.gmra.mrb[64].mxu1 %v4759_v14  ;;  %4256 = vrot.lane.b32.xlu1 %v9129_v34, %s7253_s6  ;;  %v2718_v45 = vmax.f32 %v2451_v39, %v10311_v56  ;;  %v6973_v58 = vpop.f32.mrb[222].mxu0  ;;  %v10317_v18 = vmax.f32 %v8588_v48, %v10316_v43  ;;  %v10319_v28 = vmax.f32 %v8590_v59, %v10318_v13  ;;  %v3844_v46 = vld [vmem:[#allocation2 + $0x308] sm:$0xff]  ;;  %v3654_v59 = vld [vmem:[#allocation2 + $0x311] sm:$0xff] }
 0x2a5   : > { %3123 = vst.msk [vmem:[#allocation2 + $0x3e8] sm:$0xff] %vm2921_vm3, %v2913_v25  ;;  %v2914_v10 = vmax.f32 %v2850_v8, 0.0  ;;  %v2784_v60 = vmax.f32 %v10312_v32, %v2720_v2  ;;  %v2721_v23 = vmax.f32 %v6973_v58, %v10313_v40  ;;  %v9196_v19 = vpop.permute.xlu0 %4338  ;;  %v2454_v26 = vpop.f32.mrb[223].mxu0  ;;  %v3533_v36 = vld [vmem:[#allocation2 + $0x148] sm:$0xff]  ;;  %v3204_v48 = vpack.c.bf16 %v3150_v17, %v3149_v53  ;;  %v3536_v2 = vld [vmem:[#allocation2 + $0x170] sm:$0xff] }
 0x2a6   : > { %3126 = vst.msk [vmem:[#allocation2 + $0x410] sm:$0xff] %vm2921_vm3, %v2916_v7  ;;  %v2782_v16 = vmax.f32 %v10314_v44, %v2718_v45  ;;  %v4047_v52 = vpop.permute.xlu1 %4046  ;;  %v2719_v51 = vmax.f32 %v2454_v26, %v10315_v62  ;;  %v9218_v49 = vpack.c.bf16 %v3845_v12, %v3844_v46  ;;  %v3588_v1 = vpack.c.bf16 %v3534_v54, %v3533_v36  ;;  %v3653_v50 = vld [vmem:[#allocation2 + $0x309] sm:$0xff]  ;;  %v3652_v12 = vld [vmem:[#allocation2 + $0x2f1] sm:$0xff] }
 0x2a7   : > { %3124 = vst.msk [vmem:[#allocation2 + $0x3f0] sm:$0xff] %vm2921_vm3, %v2914_v10  ;;  %v2855_v41 = vadd.f32 %v8913_v31, %v2784_v60  ;;  %v2785_v21 = vmax.f32 %v10317_v18, %v2721_v23  ;;  %4452 = vrot.lane.b32.xlu0 %v9198_v33, %s7251_s29  ;;  %v4601_v8 = vsel %vm2921_vm3, %v3204_v48, %v4047_v52  ;;  %v3747_v39 = vld [vmem:[#allocation2 + $0x2ef] sm:$0xff]  ;;  %v3746_v45 = vld [vmem:[#allocation2 + $0x2e7] sm:$0xff] }
 0x2a8   : > { %v2853_v38 = vadd.f32 %v8913_v31, %v2782_v16  ;;  %v2783_v24 = vmax.f32 %v10319_v28, %v2719_v51  ;;  %4066 = vrot.lane.b32.xlu1 %v9154_v0, %s7252_s30  ;;  %v4859_v15 = vsel %vm2921_vm3, %v3588_v1, %v9059_v9  ;;  %v3696_v55 = vpack.c.bf16 %v3654_v59, %v3653_v50  ;;  %v3535_v10 = vld [vmem:[#allocation2 + $0x168] sm:$0xff]  ;;  %v3843_v40 = vld [vmem:[#allocation2 + $0x2f0] sm:$0xff] }
 0x2a9   : > { %v2919_v5 = vmax.f32 %v2855_v41, 0.0  ;;  %v2856_v4 = vadd.f32 %v8913_v31, %v2785_v21  ;;  %v4431_v27 = vpop.permute.xlu0 %4430  ;;  %v3589_v56 = vpack.c.bf16 %v3536_v2, %v3535_v10  ;;  %v9241_v37 = vpack.c.bf16 %v3747_v39, %v3746_v45  ;;  %v3152_v23 = vld [vmem:[#allocation2 + $0x14f] sm:$0xff]  ;;  %v3151_v17 = vld [vmem:[#allocation2 + $0x147] sm:$0xff] }
 0x2aa   : > { %v2917_v30 = vmax.f32 %v2853_v38, 0.0  ;;  %v2854_v42 = vadd.f32 %v8913_v31, %v2783_v24  ;;  %v4143_v63 = vpop.permute.xlu1 %4142  ;;  %v4945_v31 = vsel %vm4668_vm5, %v4859_v15, %v4431_v27  ;;  %v3842_v44 = vld [vmem:[#allocation2 + $0x2e8] sm:$0xff]  ;;  %v3205_v54 = vpack.c.bf16 %v3152_v23, %v3151_v17  ;;  %v3849_v36 = vld [vmem:[#allocation2 + $0x350] sm:$0xff] }
 0x2ab   : > { %3129 = vst.msk [vmem:[#allocation2 + $0x448] sm:$0xff] %vm2921_vm3, %v2919_v5  ;;  %v2920_v25 = vmax.f32 %v2856_v4, 0.0  ;;  %4548 = vrot.lane.b32.xlu0 %v9218_v49, %s7253_s6  ;;  %v4688_v20 = vsel %vm4668_vm5, %v4601_v8, %v4143_v63  ;;  %v9256_v52 = vpack.c.bf16 %v3843_v40, %v3842_v44  ;;  %v3651_v51 = vld [vmem:[#allocation2 + $0x2e9] sm:$0xff]  ;;  %v3658_v59 = vld [vmem:[#allocation2 + $0x351] sm:$0xff] }
 0x2ac   : > { %3127 = vst.msk [vmem:[#allocation2 + $0x428] sm:$0xff] %vm2921_vm3, %v2917_v30  ;;  %v2918_v6 = vmax.f32 %v2854_v42, 0.0  ;;  %4162 = vrot.lane.b32.xlu1 %v3693_v35, %s7251_s29  ;;  %v4762_v35 = vsel %vm4733_vm4, %v4688_v20, %v9110_v22  ;;  %v3695_v43 = vpack.c.bf16 %v3652_v12, %v3651_v51  ;;  %v3753_v38 = vld [vmem:[#allocation2 + $0x34f] sm:$0xff]  ;;  %v3752_v13 = vld [vmem:[#allocation2 + $0x347] sm:$0xff] }
 0x2ad   : > { %3130 = vst.msk [vmem:[#allocation2 + $0x450] sm:$0xff] %vm2921_vm3, %v2920_v25  ;;  %v4527_v7 = vpop.permute.xlu0 %4526  ;;  %v3154_v46 = vld [vmem:[#allocation2 + $0x16f] sm:$0xff]  ;;  %v3153_v5 = vld [vmem:[#allocation2 + $0x167] sm:$0xff] }
 0x2ae   : > { %3128 = vst.msk [vmem:[#allocation2 + $0x430] sm:$0xff] %vm2921_vm3, %v2918_v6  ;;  %v9233_v14 = vpop.permute.xlu1 %4242  ;;  %v5018_v9 = vsel %vm4733_vm4, %v4945_v31, %v4527_v7  ;;  %v3848_v4 = vld [vmem:[#allocation2 + $0x348] sm:$0xff]  ;;  %v3206_v27 = vpack.c.bf16 %v3154_v46, %v3153_v5  ;;  %v3540_v7 = vld [vmem:[#allocation2 + $0x1b0] sm:$0xff] }
 0x2af   : > { %5430 = vmatprep.mubr.bf16.mxu1 %v5018_v9  ;;  %4358 = vrot.lane.b32.xlu0 %v3696_v55, %s7252_s30  ;;  %v3537_v48 = vld [vmem:[#allocation2 + $0x188] sm:$0xff]  ;;  %v9282_v30 = vpack.c.bf16 %v3849_v36, %v3848_v4  ;;  %v3847_v40 = vld [vmem:[#allocation2 + $0x330] sm:$0xff] }
 0x2b0   : > { %4262 = vrot.lane.b32.xlu1 %v9198_v33, %s7253_s6  ;;  %5431 = vmatmul.mubr.bf16.gmra.mrb[68].mxu1 %v4762_v35  ;;  %v3657_v50 = vld [vmem:[#allocation2 + $0x349] sm:$0xff] }
 0x2b1   : > { %v4337_v58 = vpop.permute.xlu0 %4336  ;;  %v3698_v31 = vpack.c.bf16 %v3658_v59, %v3657_v50  ;;  %v3751_v9 = vld [vmem:[#allocation2 + $0x32f] sm:$0xff]  ;;  %v3750_v10 = vld [vmem:[#allocation2 + $0x327] sm:$0xff] }
 0x2b2   : > { %v9243_v32 = vpop.permute.xlu1 %4052  ;;  %v4862_v60 = vsel %vm2921_vm3, %v3589_v56, %v4337_v58  ;;  %v3539_v39 = vld [vmem:[#allocation2 + $0x1a8] sm:$0xff]  ;;  %v9300_v45 = vpack.c.bf16 %v3751_v9, %v3750_v10  ;;  %v3542_v5 = vld [vmem:[#allocation2 + $0x1d0] sm:$0xff] }
 0x2b3   : > { %4450 = vrot.lane.b32.xlu0 %v9241_v37, %s7251_s29  ;;  %v4947_v22 = vsel %vm4668_vm5, %v4862_v60, %v9152_v3  ;;  %v7239_v3 = vld [vmem:[%s9974_s3 + $0x88] sm:$0xff]   ;;  %v3591_v35 = vpack.c.bf16 %v3540_v7, %v3539_v39  ;;  %v3544_v9 = vld [vmem:[#allocation2 + $0x1f0] sm:$0xff] }
 0x2b4   : > { %4072 = vrot.lane.b32.xlu1 %v9218_v49, %s7252_s30  ;;  %v5021_v26 = vsel %vm4733_vm4, %v4947_v22, %v9178_v61  ;;  %v4604_v61 = vsel %vm2921_vm3, %v3205_v54, %v9132_v11  ;;  %7008 = vmatprep.subr.bf16.mxu1 %v7239_v3  ;;  %v9276_v11 = vpack.c.bf16 %v3753_v38, %v3752_v13  ;;  %v3156_v22 = vld [vmem:[#allocation2 + $0x18f] sm:$0xff]  ;;  %v3155_v51 = vld [vmem:[#allocation2 + $0x187] sm:$0xff] }
 0x2b5   : > { %5438 = vmatprep.mubr.bf16.mxu1 %v5021_v26  ;;  %v9254_v16 = vpop.permute.xlu0 %4436  ;;  %v4690_v18 = vsel %vm4668_vm5, %v4604_v61, %v9160_v29  ;;  %7009 = vmatpush3.bf16.msra.mxu1 %v7239_v3  ;;  %v3538_v29 = vld [vmem:[#allocation2 + $0x190] sm:$0xff]  ;;  %v3846_v26 = vld [vmem:[#allocation2 + $0x328] sm:$0xff]  ;;  %v3207_v61 = vpack.c.bf16 %v3156_v22, %v3155_v51 }
 0x2b6   : > { %v9258_v62 = vpop.permute.xlu1 %4148  ;;  %v3590_v42 = vpack.c.bf16 %v3538_v29, %v3537_v48  ;;  %v9314_v17 = vpack.c.bf16 %v3847_v40, %v3846_v26  ;;  %v3655_v54 = vld [vmem:[#allocation2 + $0x329] sm:$0xff]  ;;  %v3656_v3 = vld [vmem:[#allocation2 + $0x331] sm:$0xff] }
 0x2b7   : > { %4546 = vrot.lane.b32.xlu0 %v9256_v52, %s7253_s6  ;;  %v3757_v38 = vld [vmem:[#allocation2 + $0x38f] sm:$0xff]  ;;  %v3756_v13 = vld [vmem:[#allocation2 + $0x387] sm:$0xff] }
 0x2b8   : > { %4168 = vrot.lane.b32.xlu1 %v3696_v55, %s7251_s29  ;;  %v4865_v8 = vsel %vm2921_vm3, %v3590_v42, %v9196_v19  ;;  %v9331_v46 = vpack.c.bf16 %v3757_v38, %v3756_v13  ;;  %v3158_v36 = vld [vmem:[#allocation2 + $0x1af] sm:$0xff]  ;;  %v3754_v22 = vld [vmem:[#allocation2 + $0x367] sm:$0xff] }
 0x2b9   : > { %v4533_v41 = vpop.permute.xlu0 %4532  ;;  %v3853_v29 = vld [vmem:[#allocation2 + $0x390] sm:$0xff]  ;;  %v3852_v4 = vld [vmem:[#allocation2 + $0x388] sm:$0xff]  ;;  %v10320_v13 = vld [vmem:[#allocation48_spill] sm:$0xff] }
 0x2ba   : > { %v4241_v21 = vpop.permute.xlu1 %4240  ;;  %v3541_v48 = vld [vmem:[#allocation2 + $0x1c8] sm:$0xff]  ;;  %v9337_v42 = vpack.c.bf16 %v3853_v29, %v3852_v4 }
 0x2bb   : > { %v4765_v53 = vsel %vm4733_vm4, %v4690_v18, %v4241_v21  ;;  %4356 = vrot.lane.b32.xlu0 %v3695_v43, %s7252_s30  ;;  %v3661_v59 = vld [vmem:[#allocation2 + $0x389] sm:$0xff] }
 0x2bc   : > { %5439 = vmatmul.mubr.bf16.gmra.mrb[72].mxu1 %v4765_v53  ;;  %4260 = vrot.lane.b32.xlu1 %v9241_v37, %s7253_s6  ;;  %v3545_v10 = vld [vmem:[#allocation2 + $0x208] sm:$0xff] }
 0x2bd   : > { %v9274_v28 = vpop.permute.xlu0 %4342  ;;  %v3159_v51 = vld [vmem:[#allocation2 + $0x1c7] sm:$0xff] }
 0x2be   : > { %v4051_v24 = vpop.permute.xlu1 %4050  ;;  %v3659_v29 = vld [vmem:[#allocation2 + $0x369] sm:$0xff] }
 0x2bf   : > { %4456 = vrot.lane.b32.xlu0 %v9276_v11, %s7251_s29  ;;  %v4607_v25 = vsel %vm2921_vm3, %v3206_v27, %v4051_v24 }
 0x2c0   : > { %4070 = vrot.lane.b32.xlu1 %v9256_v52, %s7252_s30 }
 0x2c1   : > { %v4435_v1 = vpop.permute.xlu0 %4434 }
 0x2c2   : > { %v4147_v63 = vpop.permute.xlu1 %4146  ;;  %v4949_v6 = vsel %vm4668_vm5, %v4865_v8, %v4435_v1 }
 0x2c3   : > { %4552 = vrot.lane.b32.xlu0 %v9282_v30, %s7253_s6  ;;  %v4692_v15 = vsel %vm4668_vm5, %v4607_v25, %v4147_v63  ;;  %v3592_v63 = vpack.c.bf16 %v3542_v5, %v3541_v48  ;;  %v3662_v25 = vld [vmem:[#allocation2 + $0x391] sm:$0xff] }
 0x2c4   : > { %4166 = vrot.lane.b32.xlu1 %v3695_v43, %s7251_s29  ;;  %v4768_v19 = vsel %vm4733_vm4, %v4692_v15, %v9233_v14  ;;  %v3697_v43 = vpack.c.bf16 %v3656_v3, %v3655_v54  ;;  %v3660_v5 = vld [vmem:[#allocation2 + $0x371] sm:$0xff] }
 0x2c5   : > { %v4531_v20 = vpop.permute.xlu0 %4530  ;;  %v4871_v15 = vsel %vm2921_vm3, %v3592_v63, %v9274_v28 }
 0x2c6   : > { %v9292_v55 = vpop.permute.xlu1 %4246  ;;  %v5024_v2 = vsel %vm4733_vm4, %v4949_v6, %v4531_v20  ;;  %v3546_v20 = vld [vmem:[#allocation2 + $0x210] sm:$0xff] }
 0x2c7   : > { %5446 = vmatprep.mubr.bf16.mxu1 %v5024_v2  ;;  %4362 = vrot.lane.b32.xlu0 %v3698_v31, %s7252_s30  ;;  %v3700_v2 = vpack.c.bf16 %v3662_v25, %v3661_v59  ;;  %v3594_v40 = vpack.c.bf16 %v3546_v20, %v3545_v10  ;;  %v3760_v59 = vld [vmem:[#allocation2 + $0x3c7] sm:$0xff]  ;;  %v3164_v10 = vld [vmem:[#allocation2 + $0x24f] sm:$0xff] }
 0x2c8   : > { %4266 = vrot.lane.b32.xlu1 %v9276_v11, %s7253_s6  ;;  %5447 = vmatmul.mubr.bf16.gmra.mrb[76].mxu1 %v4768_v19 }
 0x2c9   : > { %v4341_v56 = vpop.permute.xlu0 %4340 }
 0x2ca   : > { %v9302_v58 = vpop.permute.xlu1 %4056  ;;  %v4868_v60 = vsel %vm2921_vm3, %v3591_v35, %v4341_v56  ;;  %v3755_v35 = vld [vmem:[#allocation2 + $0x36f] sm:$0xff] }
 0x2cb   : > { %4454 = vrot.lane.b32.xlu0 %v9300_v45, %s7251_s29  ;;  %v4951_v14 = vsel %vm4668_vm5, %v4868_v60, %v9254_v16  ;;  %v4610_v16 = vsel %vm2921_vm3, %v3207_v61, %v9243_v32  ;;  %v3543_v56 = vld [vmem:[#allocation2 + $0x1e8] sm:$0xff]  ;;  %v9353_v26 = vpack.c.bf16 %v3755_v35, %v3754_v22 }
 0x2cc   : > { %4076 = vrot.lane.b32.xlu1 %v9282_v30, %s7252_s30  ;;  %v5027_v23 = vsel %vm4733_vm4, %v4951_v14, %v4533_v41  ;;  %v4694_v18 = vsel %vm4668_vm5, %v4610_v16, %v9258_v62  ;;  %v3157_v62 = vld [vmem:[#allocation2 + $0x1a7] sm:$0xff]  ;;  %v3160_v60 = vld [vmem:[#allocation2 + $0x1cf] sm:$0xff]  ;;  %v3593_v14 = vpack.c.bf16 %v3544_v9, %v3543_v56 }
 0x2cd   : > { %5454 = vmatprep.mubr.bf16.mxu1 %v5027_v23  ;;  %v9312_v44 = vpop.permute.xlu0 %4440  ;;  %v3208_v27 = vpack.c.bf16 %v3158_v36, %v3157_v62  ;;  %v3851_v16 = vld [vmem:[#allocation2 + $0x370] sm:$0xff]  ;;  %v3161_v62 = vld [vmem:[#allocation2 + $0x1e7] sm:$0xff] }
 0x2ce   : > { %v9316_v12 = vpop.permute.xlu1 %4152  ;;  %v3162_v36 = vld [vmem:[#allocation2 + $0x1ef] sm:$0xff] }
 0x2cf   : > { %4550 = vrot.lane.b32.xlu0 %v9314_v17, %s7253_s6  ;;  %v3210_v48 = vpack.c.bf16 %v3162_v36, %v3161_v62  ;;  %v3666_v9 = vld [vmem:[#allocation2 + $0x3d1] sm:$0xff]  ;;  %v3764_v62 = vld [vmem:[#allocation2 + $0x407] sm:$0xff] }
 0x2d0   : > { %4172 = vrot.lane.b32.xlu1 %v3698_v31, %s7251_s29  ;;  %v3759_v56 = vld [vmem:[#allocation2 + $0x3af] sm:$0xff] }
 0x2d1   : > { %v9323_v41 = vpop.permute.xlu0 %4536 }
 0x2d2   : > { %v4245_v21 = vpop.permute.xlu1 %4244 }
 0x2d3   : > { %v4771_v53 = vsel %vm4733_vm4, %v4694_v18, %v4245_v21  ;;  %4360 = vrot.lane.b32.xlu0 %v3697_v43, %s7252_s30  ;;  %v3850_v21 = vld [vmem:[#allocation2 + $0x368] sm:$0xff] }
 0x2d4   : > { %5455 = vmatmul.mubr.bf16.gmra.mrb[80].mxu1 %v4771_v53  ;;  %4264 = vrot.lane.b32.xlu1 %v9300_v45, %s7253_s6  ;;  %v9367_v53 = vpack.c.bf16 %v3851_v16, %v3850_v21  ;;  %v3663_v21 = vld [vmem:[#allocation2 + $0x3a9] sm:$0xff] }
 0x2d5   : > { %v4347_v24 = vpop.permute.xlu0 %4346 }
 0x2d6   : > { %v4055_v32 = vpop.permute.xlu1 %4054  ;;  %v4877_v54 = vsel %vm2921_vm3, %v3594_v40, %v4347_v24 }
 0x2d7   : > { %4460 = vrot.lane.b32.xlu0 %v9331_v46, %s7251_s29  ;;  %v4613_v8 = vsel %vm2921_vm3, %v3208_v27, %v4055_v32  ;;  %v4957_v24 = vsel %vm4668_vm5, %v4877_v54, %v10320_v13  ;;  %v3699_v27 = vpack.c.bf16 %v3660_v5, %v3659_v29  ;;  %v3854_v54 = vld [vmem:[#allocation2 + $0x3a8] sm:$0xff] }
 0x2d8   : > { %4074 = vrot.lane.b32.xlu1 %v9314_v17, %s7252_s30 }
 0x2d9   : > { %v4439_v1 = vpop.permute.xlu0 %4438 }
 0x2da   : > { %v4151_v50 = vpop.permute.xlu1 %4150  ;;  %v4953_v31 = vsel %vm4668_vm5, %v4871_v15, %v4439_v1  ;;  %v3761_v1 = vld [vmem:[#allocation2 + $0x3cf] sm:$0xff] }
 0x2db   : > { %4556 = vrot.lane.b32.xlu0 %v9337_v42, %s7253_s6  ;;  %v4696_v6 = vsel %vm4668_vm5, %v4613_v8, %v4151_v50  ;;  %v9384_v25 = vpack.c.bf16 %v3761_v1, %v3760_v59  ;;  %v3857_v8 = vld [vmem:[#allocation2 + $0x3d0] sm:$0xff] }
 0x2dc   : > { %4170 = vrot.lane.b32.xlu1 %v3697_v43, %s7251_s29  ;;  %v4774_v28 = vsel %vm4733_vm4, %v4696_v6, %v9292_v55  ;;  %v3209_v55 = vpack.c.bf16 %v3160_v60, %v3159_v51  ;;  %v3856_v6 = vld [vmem:[#allocation2 + $0x3c8] sm:$0xff]  ;;  %v3855_v51 = vld [vmem:[#allocation2 + $0x3b0] sm:$0xff] }
 0x2dd   : > { %v4535_v7 = vpop.permute.xlu0 %4534  ;;  %v3758_v60 = vld [vmem:[#allocation2 + $0x3a7] sm:$0xff] }
 0x2de   : > { %v4251_v19 = vpop.permute.xlu1 %4250  ;;  %v5030_v39 = vsel %vm4733_vm4, %v4953_v31, %v4535_v7  ;;  %v4616_v38 = vsel %vm2921_vm3, %v3209_v55, %v9302_v58  ;;  %v10321_v58 = vld [vmem:[#allocation50_spill] sm:$0xff]  ;;  %v9391_v31 = vpack.c.bf16 %v3857_v8, %v3856_v6  ;;  %v9403_v22 = vpack.c.bf16 %v3759_v56, %v3758_v60 }
 0x2df   : > { %5462 = vmatprep.mubr.bf16.mxu1 %v5030_v39  ;;  %4366 = vrot.lane.b32.xlu0 %v3700_v2, %s7252_s30  ;;  %v4698_v32 = vsel %vm4668_vm5, %v4616_v38, %v9316_v12  ;;  %v5036_v4 = vsel %vm4733_vm4, %v4957_v24, %v10321_v58  ;;  %v9413_v55 = vpack.c.bf16 %v3855_v51, %v3854_v54  ;;  %v3664_v38 = vld [vmem:[#allocation2 + $0x3b1] sm:$0xff]  ;;  %v3669_v8 = vld [vmem:[#allocation2 + $0x409] sm:$0xff] }
 0x2e0   : > { %4270 = vrot.lane.b32.xlu1 %v9331_v46, %s7253_s6  ;;  %5463 = vmatmul.mubr.bf16.gmra.mrb[84].mxu1 %v4774_v28  ;;  %v10323_v24 = vld [vmem:[#allocation18_spill] sm:$0xff]  ;;  %v3701_v29 = vpack.c.bf16 %v3664_v38, %v3663_v21  ;;  %v3762_v54 = vld [vmem:[#allocation2 + $0x3e7] sm:$0xff] }
 0x2e1   : > { %v4345_v23 = vpop.permute.xlu0 %4344  ;;  %v3550_v6 = vld [vmem:[#allocation2 + $0x290] sm:$0xff] }
 0x2e2   : > { %v4874_v3 = vsel %vm2921_vm3, %v3593_v14, %v4345_v23  ;;  %v4249_v61 = vpop.permute.xlu1 %4248  ;;  %v3763_v56 = vld [vmem:[#allocation2 + $0x3ef] sm:$0xff] }
 0x2e3   : > { %4458 = vrot.lane.b32.xlu0 %v9353_v26, %s7251_s29  ;;  %v4955_v43 = vsel %vm4668_vm5, %v4874_v3, %v9312_v44  ;;  %v10322_v3 = vld [vmem:[#allocation16_spill] sm:$0xff]  ;;  %v3859_v21 = vld [vmem:[#allocation2 + $0x3f0] sm:$0xff] }
 0x2e4   : > { %4080 = vrot.lane.b32.xlu1 %v9337_v42, %s7252_s30  ;;  %v5033_v18 = vsel %vm4733_vm4, %v4955_v43, %v9323_v41  ;;  %v4777_v41 = vsel %vm4733_vm4, %v4698_v32, %v4249_v61  ;;  %v3168_v38 = vld [vmem:[#allocation2 + $0x28f] sm:$0xff] }
 0x2e5   : > { %5470 = vmatprep.mubr.bf16.mxu1 %v5033_v18 }
 0x2e6   : > { %v4059_v44 = vpop.permute.xlu1 %4058 }
 0x2e7   : > { %4554 = vrot.lane.b32.xlu0 %v9367_v53, %s7253_s6  ;;  %v4619_v63 = vsel %vm2921_vm3, %v3210_v48, %v4059_v44 }
 0x2e8   : > { %4176 = vrot.lane.b32.xlu1 %v3700_v2, %s7251_s29  ;;  %5471 = vmatmul.mubr.bf16.gmra.mrb[88].mxu1 %v4777_v41  ;;  %v3665_v2 = vld [vmem:[#allocation2 + $0x3c9] sm:$0xff] }
 0x2e9   : > { %5478 = vmatprep.mubr.bf16.mxu1 %v5036_v4  ;;  %v3702_v35 = vpack.c.bf16 %v3666_v9, %v3665_v2  ;;  %v3765_v41 = vld [vmem:[#allocation2 + $0x40f] sm:$0xff] }
 0x2ea   : > { %v4155_v12 = vpop.permute.xlu1 %4154  ;;  %v9430_v4 = vpack.c.bf16 %v3765_v41, %v3764_v62  ;;  %v3549_v2 = vld [vmem:[#allocation2 + $0x288] sm:$0xff]  ;;  %v3668_v41 = vld [vmem:[#allocation2 + $0x3f1] sm:$0xff] }
 0x2eb   : > { %4364 = vrot.lane.b32.xlu0 %v3699_v27, %s7252_s30  ;;  %v4700_v50 = vsel %vm4668_vm5, %v4619_v63, %v4155_v12  ;;  %v3860_v12 = vld [vmem:[#allocation2 + $0x408] sm:$0xff] }
 0x2ec   : > { %4268 = vrot.lane.b32.xlu1 %v9353_v26, %s7253_s6  ;;  %v4780_v15 = vsel %vm4733_vm4, %v4700_v50, %v4251_v19  ;;  %v3163_v19 = vld [vmem:[#allocation2 + $0x247] sm:$0xff]  ;;  %v3166_v50 = vld [vmem:[#allocation2 + $0x26f] sm:$0xff] }
 0x2ed   : > { %v3211_v40 = vpack.c.bf16 %v3164_v10, %v3163_v19  ;;  %v3596_v19 = vpack.c.bf16 %v3550_v6, %v3549_v2  ;;  %v3769_v2 = vld [vmem:[#allocation2 + $0x44f] sm:$0xff] }
 0x2ef   : > { %4464 = vrot.lane.b32.xlu0 %v9384_v25, %s7251_s29  ;;  %v4622_v61 = vsel %vm2921_vm3, %v3211_v40, %v10322_v3 }
 0x2f0   : > { %4078 = vrot.lane.b32.xlu1 %v9367_v53, %s7252_s30  ;;  %5479 = vmatmul.mubr.bf16.gmra.mrb[92].mxu1 %v4780_v15  ;;  %v4702_v32 = vsel %vm4668_vm5, %v4622_v61, %v10323_v24  ;;  %v3670_v15 = vld [vmem:[#allocation2 + $0x411] sm:$0xff] }
 0x2f1   : > { %v4445_v20 = vpop.permute.xlu0 %4444 }
 0x2f2   : > { %v9393_v7 = vpop.permute.xlu1 %4254 }
 0x2f3   : > { %4560 = vrot.lane.b32.xlu0 %v9391_v31, %s7253_s6 }
 0x2f4   : > { %4174 = vrot.lane.b32.xlu1 %v3699_v27, %s7251_s29  ;;  %v3861_v27 = vld [vmem:[#allocation2 + $0x410] sm:$0xff] }
 0x2f5   : > { %v4541_v39 = vpop.permute.xlu0 %4540  ;;  %v9438_v63 = vpack.c.bf16 %v3861_v27, %v3860_v12 }
 0x2f6   : > { %v9398_v28 = vpop.permute.xlu1 %4064 }
 0x2f7   : > { %4370 = vrot.lane.b32.xlu0 %v3702_v35, %s7252_s30 }
 0x2f8   : > { %4274 = vrot.lane.b32.xlu1 %v9384_v25, %s7253_s6 }
 0x2f9   : > { %v4351_v14 = vpop.permute.xlu0 %4350 }
 0x2fa   : > { %v9405_v23 = vpop.permute.xlu1 %4160  ;;  %v4883_v40 = vsel %vm2921_vm3, %v3596_v19, %v4351_v14 }
 0x2fb   : > { %4462 = vrot.lane.b32.xlu0 %v9403_v22, %s7251_s29 }
 0x2fc   : > { %4084 = vrot.lane.b32.xlu1 %v9391_v31, %s7252_s30 }
 0x2fd   : > { %v4349_v16 = vpop.permute.xlu0 %4348 }
 0x2fe   : > { %v4880_v43 = vsel %vm2921_vm3, %v9068_v57, %v4349_v16  ;;  %v4253_v18 = vpop.permute.xlu1 %4252  ;;  %v9457_v16 = vpack.c.bf16 %v3763_v56, %v3762_v54  ;;  %v3865_v56 = vld [vmem:[#allocation2 + $0x450] sm:$0xff] }
 0x2ff   : > { %4558 = vrot.lane.b32.xlu0 %v9413_v55, %s7253_s6  ;;  %v4959_v13 = vsel %vm4668_vm5, %v4880_v43, %v4445_v20  ;;  %v4783_v57 = vsel %vm4733_vm4, %v4702_v32, %v4253_v18  ;;  %v3165_v20 = vld [vmem:[#allocation2 + $0x267] sm:$0xff]  ;;  %v3767_v54 = vld [vmem:[#allocation2 + $0x42f] sm:$0xff] }
 0x300   : > { %4180 = vrot.lane.b32.xlu1 %v3702_v35, %s7251_s29  ;;  %v5039_v44 = vsel %vm4733_vm4, %v4959_v13, %v4541_v39  ;;  %v3212_v9 = vpack.c.bf16 %v3166_v50, %v3165_v20  ;;  %v9445_v35 = vpack.c.bf16 %v3670_v15, %v3669_v8  ;;  %v3858_v13 = vld [vmem:[#allocation2 + $0x3e8] sm:$0xff] }
 0x301   : > { %5486 = vmatprep.mubr.bf16.mxu1 %v5039_v44  ;;  %v9424_v36 = vpop.permute.xlu0 %4448  ;;  %v9468_v32 = vpack.c.bf16 %v3859_v21, %v3858_v13  ;;  %v3167_v44 = vld [vmem:[#allocation2 + $0x287] sm:$0xff] }
 0x302   : > { %v4063_v5 = vpop.permute.xlu1 %4062  ;;  %5487 = vmatmul.mubr.bf16.gmra.mrb[96].mxu1 %v4783_v57  ;;  %v3213_v62 = vpack.c.bf16 %v3168_v38, %v3167_v44  ;;  %v3863_v44 = vld [vmem:[#allocation2 + $0x430] sm:$0xff] }
 0x303   : > { %4368 = vrot.lane.b32.xlu0 %v3701_v29, %s7252_s30  ;;  %v4625_v60 = vsel %vm2921_vm3, %v3212_v9, %v4063_v5  ;;  %v3667_v5 = vld [vmem:[#allocation2 + $0x3e9] sm:$0xff] }
 0x304   : > { %4272 = vrot.lane.b32.xlu1 %v9403_v22, %s7253_s6  ;;  %v9487_v15 = vpack.c.bf16 %v3668_v41, %v3667_v5  ;;  %v3862_v5 = vld [vmem:[#allocation2 + $0x428] sm:$0xff] }
 0x305   : > { %v4545_v58 = vpop.permute.xlu0 %4544 }
 0x306   : > { %v4159_v48 = vpop.permute.xlu1 %4158 }
 0x307   : > { %4468 = vrot.lane.b32.xlu0 %v9430_v4, %s7251_s29  ;;  %v4704_v51 = vsel %vm4668_vm5, %v4625_v60, %v4159_v48 }
 0x308   : > { %4082 = vrot.lane.b32.xlu1 %v9413_v55, %s7252_s30  ;;  %v4786_v14 = vsel %vm4733_vm4, %v4704_v51, %v9393_v7 }
 0x309   : > { %v9436_v1 = vpop.permute.xlu0 %4354 }
 0x30a   : > { %v9440_v59 = vpop.permute.xlu1 %4258 }
 0x30b   : > { %4564 = vrot.lane.b32.xlu0 %v9438_v63, %s7253_s6 }
 0x30c   : > { %4178 = vrot.lane.b32.xlu1 %v3701_v29, %s7251_s29 }
 0x30d   : > { %v4447_v39 = vpop.permute.xlu0 %4446 }
 0x30e   : > { %v9447_v10 = vpop.permute.xlu1 %4068  ;;  %v4961_v3 = vsel %vm4668_vm5, %v4883_v40, %v4447_v39 }
 0x30f   : > { %4374 = vrot.lane.b32.xlu0 %v9445_v35, %s7252_s30 }
 0x310   : > { %4278 = vrot.lane.b32.xlu1 %v9430_v4, %s7253_s6 }
 0x311   : > { %v4543_v61 = vpop.permute.xlu0 %4542 }
 0x312   : > { %v9459_v43 = vpop.permute.xlu1 %4164  ;;  %v5042_v18 = vsel %vm4733_vm4, %v4961_v3, %v4543_v61 }
 0x313   : > { %5494 = vmatprep.mubr.bf16.mxu1 %v5042_v18  ;;  %4466 = vrot.lane.b32.xlu0 %v9457_v16, %s7251_s29  ;;  %v3766_v18 = vld [vmem:[#allocation2 + $0x427] sm:$0xff] }
 0x314   : > { %4088 = vrot.lane.b32.xlu1 %v9438_v63, %s7252_s30  ;;  %5495 = vmatmul.mubr.bf16.gmra.mrb[100].mxu1 %v4786_v14  ;;  %v9516_v38 = vpack.c.bf16 %v3767_v54, %v3766_v18  ;;  %v3770_v18 = vld [vmem:[#allocation2 + $0x467] sm:$0xff] }
 0x315   : > { %v4353_v24 = vpop.permute.xlu0 %4352 }
 0x316   : > { %v4886_v57 = vsel %vm2921_vm3, %v9154_v0, %v4353_v24  ;;  %v4257_v29 = vpop.permute.xlu1 %4256  ;;  %v4628_v0 = vsel %vm2921_vm3, %v3213_v62, %v9398_v28  ;;  %v3768_v28 = vld [vmem:[#allocation2 + $0x447] sm:$0xff] }
 0x317   : > { %v9472_v48 = vpop.f32.mrb[32].mxu1  ;;  %4562 = vrot.lane.b32.xlu0 %v9468_v32, %s7253_s6  ;;  %v4963_v7 = vsel %vm4668_vm5, %v4886_v57, %v9424_v36  ;;  %v4706_v6 = vsel %vm4668_vm5, %v4628_v0, %v9405_v23  ;;  %v9496_v39 = vpack.c.bf16 %v3769_v2, %v3768_v28  ;;  %v3864_v23 = vld [vmem:[#allocation2 + $0x448] sm:$0xff]  ;;  %v3672_v0 = vld [vmem:[#allocation2 + $0x431] sm:$0xff] }
 0x318   : > { %v5362_v27 = vpop.f32.mrb[33].mxu1  ;;  %4276 = vrot.lane.b32.xlu1 %v9457_v16, %s7253_s6  ;;  %v5045_v12 = vsel %vm4733_vm4, %v4963_v7, %v4545_v58  ;;  %v4789_v58 = vsel %vm4733_vm4, %v4706_v6, %v4257_v29  ;;  %v9504_v40 = vpack.c.bf16 %v3865_v56, %v3864_v23  ;;  %v9531_v7 = vpack.c.bf16 %v3863_v44, %v3862_v5  ;;  %v3673_v28 = vld [vmem:[#allocation2 + $0x449] sm:$0xff] }
 0x319   : > { %v9483_v50 = vpop.f32.mrb[34].mxu1  ;;  %5502 = vmatprep.mubr.bf16.mxu1 %v5045_v12  ;;  %v9485_v8 = vpop.permute.xlu0 %4452  ;;  %v3671_v12 = vld [vmem:[#allocation2 + $0x429] sm:$0xff] }
 0x31a   : > { %v5365_v36 = vpop.f32.mrb[35].mxu1  ;;  %v4067_v20 = vpop.permute.xlu1 %4066 }
 0x31b   : > { %4372 = vrot.lane.b32.xlu0 %v9487_v15, %s7252_s30  ;;  %v4631_v57 = vsel %vm2921_vm3, %v9129_v34, %v4067_v20  ;;  %v9542_v36 = vpack.c.bf16 %v3672_v0, %v3671_v12  ;;  %v3171_v20 = vld [vmem:[#allocation2 + $0x2c7] sm:$0xff] }
 0x31c   : > { %4086 = vrot.lane.b32.xlu1 %v9468_v32, %s7252_s30  ;;  %5503 = vmatmul.mubr.bf16.gmra.mrb[104].mxu1 %v4789_v58 }
 0x31d   : > { %v4549_v9 = vpop.permute.xlu0 %4548 }
 0x31e   : > { %v4163_v19 = vpop.permute.xlu1 %4162 }
 0x31f   : > { %4472 = vrot.lane.b32.xlu0 %v9496_v39, %s7251_s29  ;;  %v4708_v29 = vsel %vm4668_vm5, %v4631_v57, %v4163_v19  ;;  %v3674_v19 = vld [vmem:[#allocation2 + $0x451] sm:$0xff] }
 0x320   : > { %4182 = vrot.lane.b32.xlu1 %v9487_v15, %s7251_s29  ;;  %v9559_v57 = vpack.c.bf16 %v3674_v19, %v3673_v28 }
 0x321   : > { %v9502_v60 = vpop.permute.xlu0 %4358 }
 0x322   : > { %v9506_v51 = vpop.permute.xlu1 %4262  ;;  %v4895_v28 = vsel %vm2921_vm3, %v9218_v49, %v9502_v60 }
 0x323   : > { %v9508_v3 = vpop.f32.mrb[36].mxu1  ;;  %4568 = vrot.lane.b32.xlu0 %v9504_v40, %s7253_s6 }
 0x324   : > { %4184 = vrot.lane.b32.xlu1 %v9445_v35, %s7251_s29  ;;  %v5370_v61 = vpop.f32.mrb[37].mxu1  ;;  %v4889_v35 = vsel %vm2921_vm3, %v9083_v47, %v9436_v1  ;;  %v4792_v47 = vsel %vm4733_vm4, %v4708_v29, %v9440_v59  ;;  %v3172_v1 = vld [vmem:[#allocation2 + $0x2cf] sm:$0xff] }
 0x325   : > { %v9514_v21 = vpop.f32.mrb[38].mxu1  ;;  %v4451_v14 = vpop.permute.xlu0 %4450  ;;  %v3215_v56 = vpack.c.bf16 %v3172_v1, %v3171_v20 }
 0x326   : > { %v9518_v13 = vpop.permute.xlu1 %4072  ;;  %v5373_v24 = vpop.f32.mrb[39].mxu1  ;;  %v4965_v41 = vsel %vm4668_vm5, %v4889_v35, %v4451_v14 }
 0x327   : > { %4470 = vrot.lane.b32.xlu0 %v9516_v38, %s7251_s29  ;;  %v4634_v14 = vsel %vm2921_vm3, %v3215_v56, %v9447_v10  ;;  %v3866_v10 = vld [vmem:[#allocation2 + $0x468] sm:$0xff] }
 0x328   : > { %4280 = vrot.lane.b32.xlu1 %v9516_v38, %s7253_s6 }
 0x329   : > { %v4547_v62 = vpop.permute.xlu0 %4546 }
 0x32a   : > { %v9533_v27 = vpop.permute.xlu1 %4168  ;;  %v5048_v34 = vsel %vm4733_vm4, %v4965_v41, %v4547_v62  ;;  %v3867_v41 = vld [vmem:[#allocation2 + $0x470] sm:$0xff] }
 0x32b   : > { %5510 = vmatprep.mubr.bf16.mxu1 %v5048_v34  ;;  %4566 = vrot.lane.b32.xlu0 %v9531_v7, %s7253_s6  ;;  %v3899_v12 = vpack.c.bf16 %v3867_v41, %v3866_v10 }
 0x32c   : > { %4090 = vrot.lane.b32.xlu1 %v9531_v7, %s7252_s30  ;;  %5511 = vmatmul.mubr.bf16.gmra.mrb[108].mxu1 %v4792_v47 }
 0x32d   : > { %v4357_v6 = vpop.permute.xlu0 %4356 }
 0x32e   : > { %v4892_v2 = vsel %vm2921_vm3, %v9256_v52, %v4357_v6  ;;  %v4261_v58 = vpop.permute.xlu1 %4260  ;;  %v3771_v52 = vld [vmem:[#allocation2 + $0x46f] sm:$0xff] }
 0x32f   : > { %v9546_v23 = vpop.f32.mrb[40].mxu1  ;;  %4376 = vrot.lane.b32.xlu0 %v9542_v36, %s7252_s30  ;;  %v4967_v59 = vsel %vm4668_vm5, %v4892_v2, %v9485_v8  ;;  %v4710_v8 = vsel %vm4668_vm5, %v4634_v14, %v9459_v43  ;;  %v3803_v5 = vpack.c.bf16 %v3771_v52, %v3770_v18 }
 0x330   : > { %v5378_v54 = vpop.f32.mrb[41].mxu1  ;;  %4186 = vrot.lane.b32.xlu1 %v9542_v36, %s7251_s29  ;;  %v5051_v61 = vsel %vm4733_vm4, %v4967_v59, %v4549_v9  ;;  %v4795_v9 = vsel %vm4733_vm4, %v4710_v8, %v4261_v58 }
 0x331   : > { %v9557_v24 = vpop.f32.mrb[42].mxu1  ;;  %5518 = vmatprep.mubr.bf16.mxu1 %v5051_v61  ;;  %v4457_v44 = vpop.permute.xlu0 %4456 }
 0x332   : > { %v5381_v35 = vpop.f32.mrb[43].mxu1  ;;  %v4071_v29 = vpop.permute.xlu1 %4070 }
 0x333   : > { %4378 = vrot.lane.b32.xlu0 %v9559_v57, %s7252_s30  ;;  %v4637_v58 = vsel %vm2921_vm3, %v9241_v37, %v4071_v29  ;;  %v4640_v29 = vsel %vm2921_vm3, %v9198_v33, %v9518_v13 }
 0x334   : > { %4282 = vrot.lane.b32.xlu1 %v9496_v39, %s7253_s6  ;;  %5519 = vmatmul.mubr.bf16.gmra.mrb[112].mxu1 %v4795_v9 }
 0x335   : > { %v4553_v62 = vpop.permute.xlu0 %4552 }
 0x336   : > { %v4167_v34 = vpop.permute.xlu1 %4166 }
 0x337   : > { %4474 = vrot.lane.b32.xlu0 %v3803_v5, %s7251_s29  ;;  %v4712_v19 = vsel %vm4668_vm5, %v4637_v58, %v4167_v34  ;;  %v4714_v5 = vsel %vm4668_vm5, %v4640_v29, %v9533_v27 }
 0x338   : > { %v4798_v18 = vsel %vm4733_vm4, %v4712_v19, %v9506_v51 }
 0x339   : > { %v4363_v43 = vpop.permute.xlu0 %4362 }
 0x33a   : > { %v4267_v0 = vpop.permute.xlu1 %4266 }
 0x33b   : > { %v9569_v47 = vpop.f32.mrb[44].mxu1  ;;  %4570 = vrot.lane.b32.xlu0 %v3899_v12, %s7253_s6  ;;  %s6565_s6 = sshll.u32 %s10351_s24, 5 }
 0x33c   : > { %v5386_v1 = vpop.f32.mrb[45].mxu1  ;;  %s9839_s10 = scalar_lea.vmem %s9976_s5, %s6565_s6 }
 0x33d   : > { %v9572_v6 = vpop.f32.mrb[46].mxu1  ;;  %v4455_v20 = vpop.permute.xlu0 %4454 }
 0x33e   : > { %v4077_v2 = vpop.permute.xlu1 %4076  ;;  %v5389_v39 = vpop.f32.mrb[47].mxu1  ;;  %v4969_v56 = vsel %vm4668_vm5, %v4895_v28, %v4455_v20  ;;  %v4901_v28 = vsel %vm2921_vm3, %v9282_v30, %v4363_v43 }
 0x341   : > { %v4551_v59 = vpop.permute.xlu0 %4550 }
 0x342   : > { %v4173_v54 = vpop.permute.xlu1 %4172  ;;  %v5054_v61 = vsel %vm4733_vm4, %v4969_v56, %v4551_v59 }
 0x343   : > { %5526 = vmatprep.mubr.bf16.mxu1 %v5054_v61 }
 0x344   : > { %5527 = vmatmul.mubr.bf16.gmra.mrb[116].mxu1 %v4798_v18 }
 0x345   : > { %v4361_v52 = vpop.permute.xlu0 %4360 }
 0x346   : > { %v4898_v37 = vsel %vm2921_vm3, %v9314_v17, %v4361_v52  ;;  %v4265_v14 = vpop.permute.xlu1 %4264 }
 0x347   : > { %v9586_v8 = vpop.f32.mrb[48].mxu1  ;;  %v4971_v49 = vsel %vm4668_vm5, %v4898_v37, %v4457_v44  ;;  %v4801_v41 = vsel %vm4733_vm4, %v4714_v5, %v4265_v14 }
 0x348   : > { %v5394_v60 = vpop.f32.mrb[49].mxu1  ;;  %v5057_v35 = vsel %vm4733_vm4, %v4971_v49, %v4553_v62 }
 0x349   : > { %v9593_v9 = vpop.f32.mrb[50].mxu1  ;;  %5534 = vmatprep.mubr.bf16.mxu1 %v5057_v35  ;;  %v4461_v51 = vpop.permute.xlu0 %4460  ;;  %v4646_v35 = vsel %vm2921_vm3, %v9276_v11, %v4077_v2 }
 0x34a   : > { %v5397_v17 = vpop.f32.mrb[51].mxu1  ;;  %v4075_v10 = vpop.permute.xlu1 %4074  ;;  %v4718_v5 = vsel %vm4668_vm5, %v4646_v35, %v4173_v54 }
 0x34b   : > { %v4643_v27 = vsel %vm2921_vm3, %v9300_v45, %v4075_v10 }
 0x34c   : > { %5535 = vmatmul.mubr.bf16.gmra.mrb[120].mxu1 %v4801_v41 }
 0x34d   : > { %v4557_v44 = vpop.permute.xlu0 %4556 }
 0x34e   : > { %v4171_v34 = vpop.permute.xlu1 %4170 }
 0x34f   : > { %v4716_v19 = vsel %vm4668_vm5, %v4643_v27, %v4171_v34 }
 0x350   : > { %v4804_v52 = vsel %vm4733_vm4, %v4716_v19, %v4267_v0 }
 0x351   : > { %v4367_v12 = vpop.permute.xlu0 %4366 }
 0x352   : > { %v4271_v62 = vpop.permute.xlu1 %4270 }
 0x353   : > { %v9598_v1 = vpop.f32.mrb[52].mxu1 }
 0x354   : > { %v5402_v20 = vpop.f32.mrb[53].mxu1 }
 0x355   : > { %v9600_v33 = vpop.f32.mrb[54].mxu1  ;;  %v4459_v13 = vpop.permute.xlu0 %4458 }
 0x356   : > { %v4081_v39 = vpop.permute.xlu1 %4080  ;;  %v5405_v58 = vpop.f32.mrb[55].mxu1  ;;  %v4973_v56 = vsel %vm4668_vm5, %v4901_v28, %v4459_v13  ;;  %v4907_v28 = vsel %vm2921_vm3, %v9337_v42, %v4367_v12 }
 0x359   : > { %v4555_v59 = vpop.permute.xlu0 %4554 }
 0x35a   : > { %v4177_v61 = vpop.permute.xlu1 %4176  ;;  %v5060_v18 = vsel %vm4733_vm4, %v4973_v56, %v4555_v59 }
 0x35b   : > { %5542 = vmatprep.mubr.bf16.mxu1 %v5060_v18 }
 0x35c   : > { %5543 = vmatmul.mubr.bf16.gmra.mrb[124].mxu1 %v4804_v52 }
 0x35d   : > { %v4365_v37 = vpop.permute.xlu0 %4364 }
 0x35e   : > { %v4904_v14 = vsel %vm2921_vm3, %v9367_v53, %v4365_v37  ;;  %v4269_v45 = vpop.permute.xlu1 %4268 }
 0x35f   : > { %v9612_v49 = vpop.f32.mrb[56].mxu1  ;;  %v4975_v30 = vsel %vm4668_vm5, %v4904_v14, %v4461_v51  ;;  %v4807_v53 = vsel %vm4733_vm4, %v4718_v5, %v4269_v45 }
 0x360   : > { %v5410_v43 = vpop.f32.mrb[57].mxu1  ;;  %v5063_v60 = vsel %vm4733_vm4, %v4975_v30, %v4557_v44 }
 0x361   : > { %v9618_v29 = vpop.f32.mrb[58].mxu1  ;;  %5550 = vmatprep.mubr.bf16.mxu1 %v5063_v60  ;;  %v4465_v0 = vpop.permute.xlu0 %4464  ;;  %v4652_v60 = vsel %vm2921_vm3, %v9331_v46, %v4081_v39 }
 0x362   : > { %v5413_v17 = vpop.f32.mrb[59].mxu1  ;;  %v4079_v10 = vpop.permute.xlu1 %4078  ;;  %v4722_v5 = vsel %vm4668_vm5, %v4652_v60, %v4177_v61 }
 0x363   : > { %v4649_v54 = vsel %vm2921_vm3, %v9353_v26, %v4079_v10 }
 0x364   : > { %5551 = vmatmul.mubr.bf16.gmra.mrb[128].mxu1 %v4807_v53 }
 0x365   : > { %v4561_v41 = vpop.permute.xlu0 %4560 }
 0x366   : > { %v4175_v34 = vpop.permute.xlu1 %4174 }
 0x367   : > { %v4720_v19 = vsel %vm4668_vm5, %v4649_v54, %v4175_v34 }
 0x368   : > { %v4810_v37 = vsel %vm4733_vm4, %v4720_v19, %v4271_v62 }
 0x369   : > { %v4371_v51 = vpop.permute.xlu0 %4370 }
 0x36a   : > { %v4275_v20 = vpop.permute.xlu1 %4274 }
 0x36c   : > { %v9622_v13 = vpop.f32.mrb[60].mxu1 }
 0x36d   : > { %v5418_v44 = vpop.f32.mrb[61].mxu1  ;;  %v4463_v11 = vpop.permute.xlu0 %4462 }
 0x36e   : > { %v9624_v58 = vpop.f32.mrb[62].mxu1  ;;  %v4085_v2 = vpop.permute.xlu1 %4084  ;;  %v4977_v56 = vsel %vm4668_vm5, %v4907_v28, %v4463_v11  ;;  %v4913_v28 = vsel %vm2921_vm3, %v9391_v31, %v4371_v51 }
 0x36f   : > { %v5421_v27 = vpop.f32.mrb[63].mxu1 }
 0x371   : > { %v4559_v59 = vpop.permute.xlu0 %4558 }
 0x372   : > { %v4181_v18 = vpop.permute.xlu1 %4180  ;;  %v5066_v52 = vsel %vm4733_vm4, %v4977_v56, %v4559_v59 }
 0x373   : > { %5558 = vmatprep.mubr.bf16.mxu1 %v5066_v52 }
 0x374   : > { %5559 = vmatmul.mubr.bf16.gmra.mrb[132].mxu1 %v4810_v37 }
 0x375   : > { %v4369_v14 = vpop.permute.xlu0 %4368 }
 0x376   : > { %v4910_v45 = vsel %vm2921_vm3, %v9413_v55, %v4369_v14  ;;  %v4273_v26 = vpop.permute.xlu1 %4272 }
 0x377   : > { %v9636_v30 = vpop.f32.mrb[64].mxu1  ;;  %v4979_v42 = vsel %vm4668_vm5, %v4910_v45, %v4465_v0  ;;  %v4813_v55 = vsel %vm4733_vm4, %v4722_v5, %v4273_v26 }
 0x378   : > { %v5426_v12 = vpop.f32.mrb[65].mxu1  ;;  %v5069_v43 = vsel %vm4733_vm4, %v4979_v42, %v4561_v41 }
 0x379   : > { %v9642_v35 = vpop.f32.mrb[66].mxu1  ;;  %5566 = vmatprep.mubr.bf16.mxu1 %v5069_v43  ;;  %v4469_v62 = vpop.permute.xlu0 %4468  ;;  %v4658_v43 = vsel %vm2921_vm3, %v9384_v25, %v4085_v2 }
 0x37a   : > { %v5429_v17 = vpop.f32.mrb[67].mxu1  ;;  %v4083_v10 = vpop.permute.xlu1 %4082  ;;  %v4726_v5 = vsel %vm4668_vm5, %v4658_v43, %v4181_v18 }
 0x37b   : > { %v4655_v61 = vsel %vm2921_vm3, %v9403_v22, %v4083_v10 }
 0x37c   : > { %5567 = vmatmul.mubr.bf16.gmra.mrb[136].mxu1 %v4813_v55 }
 0x37d   : > { %v4565_v53 = vpop.permute.xlu0 %4564 }
 0x37e   : > { %v4179_v34 = vpop.permute.xlu1 %4178 }
 0x37f   : > { %v4724_v19 = vsel %vm4668_vm5, %v4655_v61, %v4179_v34 }
 0x380   : > { %v4816_v14 = vsel %vm4733_vm4, %v4724_v19, %v4275_v20 }
 0x381   : > { %v4375_v0 = vpop.permute.xlu0 %4374 }
 0x382   : > { %v4279_v44 = vpop.permute.xlu1 %4278  ;;  %v4919_v25 = vsel %vm2921_vm3, %v9438_v63, %v4375_v0 }
 0x383   : > { %v9646_v11 = vpop.f32.mrb[68].mxu1 }
 0x384   : > { %v5434_v41 = vpop.f32.mrb[69].mxu1 }
 0x385   : > { %v9648_v27 = vpop.f32.mrb[70].mxu1  ;;  %v4467_v46 = vpop.permute.xlu0 %4466 }
 0x386   : > { %v4089_v39 = vpop.permute.xlu1 %4088  ;;  %v5437_v54 = vpop.f32.mrb[71].mxu1  ;;  %v4981_v56 = vsel %vm4668_vm5, %v4913_v28, %v4467_v46 }
 0x389   : > { %v4563_v59 = vpop.permute.xlu0 %4562 }
 0x38a   : > { %v4277_v52 = vpop.permute.xlu1 %4276  ;;  %v5072_v37 = vsel %vm4733_vm4, %v4981_v56, %v4563_v59 }
 0x38b   : > { %5574 = vmatprep.mubr.bf16.mxu1 %v5072_v37 }
 0x38c   : > { %5575 = vmatmul.mubr.bf16.gmra.mrb[140].mxu1 %v4816_v14  ;;  %v4664_v14 = vsel %vm2921_vm3, %v9430_v4, %v4089_v39  ;;  %v3900_v4 = vld [vmem:[#allocation2 + $0x49] sm:$0xff]  ;;  %v3901_v39 = vld [vmem:[#allocation2 + $0x51] sm:$0xff] }
 0x38d   : > { %v4373_v45 = vpop.permute.xlu0 %4372 }
 0x38e   : > { %v4916_v26 = vsel %vm2921_vm3, %v9468_v32, %v4373_v45  ;;  %v4087_v22 = vpop.permute.xlu1 %4086  ;;  %v4819_v32 = vsel %vm4733_vm4, %v4726_v5, %v4277_v52 }
 0x38f   : > { %v9660_v42 = vpop.f32.mrb[72].mxu1  ;;  %v4983_v31 = vsel %vm4668_vm5, %v4916_v26, %v4469_v62 }
 0x390   : > { %v5442_v51 = vpop.f32.mrb[73].mxu1  ;;  %v5075_v12 = vsel %vm4733_vm4, %v4983_v31, %v4565_v53  ;;  %v4661_v53 = vsel %vm2921_vm3, %v9457_v16, %v4087_v22 }
 0x391   : > { %v9666_v60 = vpop.f32.mrb[74].mxu1  ;;  %5582 = vmatprep.mubr.bf16.mxu1 %v5075_v12  ;;  %v4473_v20 = vpop.permute.xlu0 %4472 }
 0x392   : > { %v5445_v17 = vpop.f32.mrb[75].mxu1  ;;  %v4183_v10 = vpop.permute.xlu1 %4182 }
 0x393   : > { %v4728_v2 = vsel %vm4668_vm5, %v4661_v53, %v4183_v10  ;;  %v3902_v53 = vld [vmem:[#allocation2 + $0x69] sm:$0xff] }
 0x394   : > { %5583 = vmatmul.mubr.bf16.gmra.mrb[144].mxu1 %v4819_v32  ;;  %v4822_v59 = vsel %vm4733_vm4, %v4728_v2, %v4279_v44 }
 0x395   : > { %v4569_v55 = vpop.permute.xlu0 %4568 }
 0x396   : > { %v4185_v34 = vpop.permute.xlu1 %4184 }
 0x397   : > { %v4730_v26 = vsel %vm4668_vm5, %v4664_v14, %v4185_v34 }
 0x399   : > { %v4471_v62 = vpop.permute.xlu0 %4470 }
 0x39a   : > { %v4281_v41 = vpop.permute.xlu1 %4280  ;;  %v4985_v54 = vsel %vm4668_vm5, %v4919_v25, %v4471_v62  ;;  %v3903_v25 = vld [vmem:[#allocation2 + $0x71] sm:$0xff] }
 0x39b   : > { %v9672_v46 = vpop.f32.mrb[76].mxu1  ;;  %v4825_v44 = vsel %vm4733_vm4, %v4730_v26, %v4281_v41  ;;  %v3964_v41 = vpack.c.bf16 %v3901_v39, %v3900_v4 }
 0x39c   : > { %v5450_v18 = vpop.f32.mrb[77].mxu1 }
 0x39d   : > { %v9678_v61 = vpop.f32.mrb[78].mxu1  ;;  %v4567_v28 = vpop.permute.xlu0 %4566  ;;  %v3905_v18 = vld [vmem:[#allocation2 + $0x91] sm:$0xff] }
 0x39e   : > { %v5453_v19 = vpop.f32.mrb[79].mxu1  ;;  %v5078_v56 = vsel %vm4733_vm4, %v4985_v54, %v4567_v28  ;;  %v4091_v16 = vpop.permute.xlu1 %4090 }
 0x39f   : > { %5590 = vmatprep.mubr.bf16.mxu1 %v5078_v56  ;;  %v4667_v17 = vsel %vm2921_vm3, %v9516_v38, %v4091_v16  ;;  %v3904_v38 = vld [vmem:[#allocation2 + $0x89] sm:$0xff]  ;;  %v3965_v19 = vpack.c.bf16 %v3903_v25, %v3902_v53 }
 0x3a0   : > { %5591 = vmatmul.mubr.bf16.gmra.mrb[148].mxu1 %v4822_v59  ;;  %v3966_v56 = vpack.c.bf16 %v3905_v18, %v3904_v38  ;;  %v3906_v16 = vld [vmem:[#allocation2 + $0xa9] sm:$0xff]  ;;  %v3921_v18 = vld [vmem:[#allocation2 + $0x191] sm:$0xff] }
 0x3a1   : > { %v4377_v52 = vpop.permute.xlu0 %4376  ;;  %v3918_v25 = vld [vmem:[#allocation2 + $0x169] sm:$0xff] }
 0x3a2   : > { %v4922_v63 = vsel %vm2921_vm3, %v9531_v7, %v4377_v52  ;;  %v4187_v22 = vpop.permute.xlu1 %4186  ;;  %v3907_v52 = vld [vmem:[#allocation2 + $0xb1] sm:$0xff]  ;;  %v3920_v38 = vld [vmem:[#allocation2 + $0x189] sm:$0xff] }
 0x3a3   : > { %v4987_v0 = vsel %vm4668_vm5, %v4922_v63, %v4473_v20  ;;  %v3967_v26 = vpack.c.bf16 %v3907_v52, %v3906_v16  ;;  %v3974_v52 = vpack.c.bf16 %v3921_v18, %v3920_v38 }
 0x3a4   : > { %v5081_v37 = vsel %vm4733_vm4, %v4987_v0, %v4569_v55  ;;  %v4732_v55 = vsel %vm4668_vm5, %v4667_v17, %v4187_v22  ;;  %v3908_v0 = vld [vmem:[#allocation2 + $0xc9] sm:$0xff] }
 0x3a5   : > { %v4379_v45 = vpop.permute.xlu0 %4378  ;;  %5598 = vmatprep.mubr.bf16.mxu1 %v5081_v37  ;;  %v3909_v37 = vld [vmem:[#allocation2 + $0xd1] sm:$0xff] }
 0x3a6   : > { %v4925_v20 = vsel %vm2921_vm3, %v9504_v40, %v4379_v45  ;;  %v4283_v5 = vpop.permute.xlu1 %4282  ;;  %v3968_v22 = vpack.c.bf16 %v3909_v37, %v3908_v0  ;;  %v3922_v0 = vld [vmem:[#allocation2 + $0x1a9] sm:$0xff]  ;;  %v3923_v37 = vld [vmem:[#allocation2 + $0x1b1] sm:$0xff] }
 0x3a7   : > { %v9689_v31 = vpop.f32.mrb[80].mxu1  ;;  %v4828_v62 = vsel %vm4733_vm4, %v4732_v55, %v4283_v5  ;;  %v3913_v5 = vld [vmem:[#allocation2 + $0x111] sm:$0xff] }
 0x3a8   : > { %v5458_v51 = vpop.f32.mrb[81].mxu1  ;;  %5599 = vmatmul.mubr.bf16.gmra.mrb[152].mxu1 %v4825_v44  ;;  %v3915_v55 = vld [vmem:[#allocation2 + $0x131] sm:$0xff] }
 0x3a9   : > { %v9692_v12 = vpop.f32.mrb[82].mxu1  ;;  %v4475_v7 = vpop.permute.xlu0 %4474  ;;  %v3910_v51 = vld [vmem:[#allocation2 + $0xe9] sm:$0xff] }
 0x3aa   : > { %v5461_v43 = vpop.f32.mrb[83].mxu1  ;;  %v4989_v10 = vsel %vm4668_vm5, %v4925_v20, %v4475_v7  ;;  %v3911_v7 = vld [vmem:[#allocation2 + $0xf1] sm:$0xff]  ;;  %v3912_v20 = vld [vmem:[#allocation2 + $0x109] sm:$0xff] }
 0x3ab   : > { %v3969_v17 = vpack.c.bf16 %v3911_v7, %v3910_v51  ;;  %v3926_v7 = vld [vmem:[#allocation2 + $0x1e9] sm:$0xff] }
 0x3ad   : > { %v4571_v32 = vpop.permute.xlu0 %4570 }
 0x3ae   : > { %v5084_v34 = vsel %vm4733_vm4, %v4989_v10, %v4571_v32  ;;  %v3970_v10 = vpack.c.bf16 %v3913_v5, %v3912_v20  ;;  %v3914_v32 = vld [vmem:[#allocation2 + $0x129] sm:$0xff]  ;;  %v3929_v5 = vld [vmem:[#allocation2 + $0x211] sm:$0xff] }
 0x3af   : > { %5606 = vmatprep.mubr.bf16.mxu1 %v5084_v34  ;;  %v3916_v34 = vld [vmem:[#allocation2 + $0x149] sm:$0xff] }
 0x3b0   : > { %5607 = vmatmul.mubr.bf16.gmra.mrb[156].mxu1 %v4828_v62  ;;  %v3917_v62 = vld [vmem:[#allocation2 + $0x151] sm:$0xff]  ;;  %v3928_v20 = vld [vmem:[#allocation2 + $0x209] sm:$0xff] }
 0x3b1   : > { %7010 = vmatprep.mubr.msk.bf16.mxu1 %vm2921_vm3, %v3964_v41  ;;  %v3971_v41 = vpack.c.bf16 %v3915_v55, %v3914_v32  ;;  %v3972_v53 = vpack.c.bf16 %v3917_v62, %v3916_v34  ;;  %v3930_v34 = vld [vmem:[#allocation2 + $0x229] sm:$0xff]  ;;  %v3931_v62 = vld [vmem:[#allocation2 + $0x231] sm:$0xff] }
 0x3b3   : > { %v9703_v40 = vpop.f32.mrb[84].mxu1 }
 0x3b4   : > { %v5466_v2 = vpop.f32.mrb[85].mxu1 }
 0x3b5   : > { %v9705_v54 = vpop.f32.mrb[86].mxu1  ;;  %v3919_v2 = vld [vmem:[#allocation2 + $0x171] sm:$0xff] }
 0x3b6   : > { %v5469_v28 = vpop.f32.mrb[87].mxu1 }
 0x3b8   : > { %7011 = vmatmul.mubr.msk.bf16.vlgmr.msra.gmra.mrb[160].mxu1 %vm2921_vm3, %v3965_v19 }
 0x3b9   : > { %7014 = vmatprep.mubr.msk.bf16.mxu1 %vm2921_vm3, %v3966_v56  ;;  %v3973_v56 = vpack.c.bf16 %v3919_v2, %v3918_v25  ;;  %v3932_v25 = vld [vmem:[#allocation2 + $0x289] sm:$0xff]  ;;  %v3933_v2 = vld [vmem:[#allocation2 + $0x291] sm:$0xff] }
 0x3ba   : > { %v3980_v18 = vpack.c.bf16 %v3933_v2, %v3932_v25  ;;  %v3944_v25 = vld [vmem:[#allocation2 + $0x349] sm:$0xff]  ;;  %v3945_v2 = vld [vmem:[#allocation2 + $0x351] sm:$0xff] }
 0x3bb   : > { %v9709_v59 = vpop.f32.mrb[88].mxu1 }
 0x3bc   : > { %v5474_v63 = vpop.f32.mrb[89].mxu1 }
 0x3bd   : > { %v9711_v14 = vpop.f32.mrb[90].mxu1 }
 0x3be   : > { %v5477_v45 = vpop.f32.mrb[91].mxu1 }
 0x3bf   : > { %v3924_v45 = vld [vmem:[#allocation2 + $0x1c9] sm:$0xff] }
 0x3c0   : > { %7015 = vmatmul.mubr.msk.bf16.gmra.mrb[164].mxu1 %vm2921_vm3, %v3967_v26  ;;  %v3925_v26 = vld [vmem:[#allocation2 + $0x1d1] sm:$0xff] }
 0x3c1   : > { %7018 = vmatprep.mubr.msk.bf16.mxu1 %vm2921_vm3, %v3968_v22  ;;  %v3975_v22 = vpack.c.bf16 %v3923_v37, %v3922_v0  ;;  %v3976_v51 = vpack.c.bf16 %v3925_v26, %v3924_v45  ;;  %v3935_v0 = vld [vmem:[#allocation2 + $0x2b1] sm:$0xff]  ;;  %v3936_v37 = vld [vmem:[#allocation2 + $0x2c9] sm:$0xff] }
 0x3c2   : > { %v3937_v45 = vld [vmem:[#allocation2 + $0x2d1] sm:$0xff] }
 0x3c3   : > { %v9715_v44 = vpop.f32.mrb[92].mxu1 }
 0x3c4   : > { %v5482_v43 = vpop.f32.mrb[93].mxu1 }
 0x3c5   : > { %v9717_v4 = vpop.f32.mrb[94].mxu1  ;;  %v3927_v43 = vld [vmem:[#allocation2 + $0x1f1] sm:$0xff] }
 0x3c6   : > { %v5485_v39 = vpop.f32.mrb[95].mxu1 }
 0x3c7   : > { %v3977_v39 = vpack.c.bf16 %v3927_v43, %v3926_v7  ;;  %v3939_v7 = vld [vmem:[#allocation2 + $0x2f1] sm:$0xff]  ;;  %v3940_v43 = vld [vmem:[#allocation2 + $0x309] sm:$0xff] }
 0x3c8   : > { %7019 = vmatmul.mubr.msk.bf16.gmra.mrb[168].mxu1 %vm2921_vm3, %v3969_v17 }
 0x3c9   : > { %7022 = vmatprep.mubr.msk.bf16.mxu1 %vm2921_vm3, %v3970_v10  ;;  %v3978_v10 = vpack.c.bf16 %v3929_v5, %v3928_v20  ;;  %v3941_v20 = vld [vmem:[#allocation2 + $0x311] sm:$0xff] }
 0x3d0   : > { %7023 = vmatmul.mubr.msk.bf16.gmra.mrb[172].mxu1 %vm2921_vm3, %v3971_v41 }
 0x3d1   : > { %7026 = vmatprep.mubr.msk.bf16.mxu1 %vm2921_vm3, %v3972_v53  ;;  %v3979_v53 = vpack.c.bf16 %v3931_v62, %v3930_v34 }
 0x3d5   : > { %v9723_v28 = vpop.f32.mrb[96].mxu1 }
 0x3d6   : > { %v5490_v19 = vpop.f32.mrb[97].mxu1 }
 0x3d7   : > { %v9725_v16 = vpop.f32.mrb[98].mxu1 }
 0x3d8   : > { %v5493_v63 = vpop.f32.mrb[99].mxu1  ;;  %7027 = vmatmul.mubr.msk.bf16.gmra.mrb[176].mxu1 %vm2921_vm3, %v3973_v56 }
 0x3d9   : > { %7030 = vmatprep.mubr.msk.bf16.mxu1 %vm2921_vm3, %v3974_v52  ;;  %v3934_v63 = vld [vmem:[#allocation2 + $0x2a9] sm:$0xff] }
 0x3da   : > { %v3981_v26 = vpack.c.bf16 %v3935_v0, %v3934_v63 }
 0x3e0   : > { %7031 = vmatmul.mubr.msk.bf16.gmra.mrb[180].mxu1 %vm2921_vm3, %v3975_v22  ;;  %v3982_v22 = vpack.c.bf16 %v3937_v45, %v3936_v37  ;;  %v3946_v45 = vld [vmem:[#allocation2 + $0x369] sm:$0xff] }
 0x3e1   : > { %7034 = vmatprep.mubr.msk.bf16.mxu1 %vm2921_vm3, %v3976_v51  ;;  %v3938_v51 = vld [vmem:[#allocation2 + $0x2e9] sm:$0xff] }
 0x3e2   : > { %v3983_v5 = vpack.c.bf16 %v3939_v7, %v3938_v51  ;;  %v3949_v51 = vld [vmem:[#allocation2 + $0x391] sm:$0xff] }
 0x3e7   : > { %v9731_v17 = vpop.f32.mrb[100].mxu1 }
 0x3e8   : > { %v5498_v32 = vpop.f32.mrb[101].mxu1  ;;  %7035 = vmatmul.mubr.msk.bf16.gmra.mrb[184].mxu1 %vm2921_vm3, %v3977_v39 }
 0x3e9   : > { %v9734_v55 = vpop.f32.mrb[102].mxu1  ;;  %7038 = vmatprep.mubr.msk.bf16.mxu1 %vm2921_vm3, %v3978_v10  ;;  %v3984_v10 = vpack.c.bf16 %v3941_v20, %v3940_v43  ;;  %v3950_v20 = vld [vmem:[#allocation2 + $0x3a9] sm:$0xff] }
 0x3ea   : > { %v5501_v41 = vpop.f32.mrb[103].mxu1 }
 0x3eb   : > { %v3942_v41 = vld [vmem:[#allocation2 + $0x329] sm:$0xff] }
 0x3ef   : > { %v9737_v38 = vpop.f32.mrb[104].mxu1 }
 0x3f0   : > { %v5506_v19 = vpop.f32.mrb[105].mxu1  ;;  %7039 = vmatmul.mubr.msk.bf16.gmra.mrb[188].mxu1 %vm2921_vm3, %v3979_v53  ;;  %v3943_v53 = vld [vmem:[#allocation2 + $0x331] sm:$0xff] }
 0x3f1   : > { %v9740_v56 = vpop.f32.mrb[106].mxu1  ;;  %7042 = vmatprep.mubr.msk.bf16.mxu1 %vm2921_vm3, %v3980_v18  ;;  %v3985_v18 = vpack.c.bf16 %v3943_v53, %v3942_v41 }
 0x3f2   : > { %v5509_v52 = vpop.f32.mrb[107].mxu1 }
 0x3f3   : > { %v3986_v52 = vpack.c.bf16 %v3945_v2, %v3944_v25 }
 0x3f8   : > { %7043 = vmatmul.mubr.msk.bf16.gmra.mrb[192].mxu1 %vm2921_vm3, %v3981_v26  ;;  %v3947_v26 = vld [vmem:[#allocation2 + $0x371] sm:$0xff] }
 0x3f9   : > { %7046 = vmatprep.mubr.msk.bf16.mxu1 %vm2921_vm3, %v3982_v22  ;;  %v3948_v22 = vld [vmem:[#allocation2 + $0x389] sm:$0xff]  ;;  %v3987_v7 = vpack.c.bf16 %v3947_v26, %v3946_v45 }
 0x3fa   : > { %v3988_v43 = vpack.c.bf16 %v3949_v51, %v3948_v22 }
 0x3ff   : > { %v9745_v39 = vpop.f32.mrb[108].mxu1 }
 0x400   : > { %v5514_v32 = vpop.f32.mrb[109].mxu1  ;;  %7047 = vmatmul.mubr.msk.bf16.gmra.mrb[196].mxu1 %vm2921_vm3, %v3983_v5  ;;  %v3951_v5 = vld [vmem:[#allocation2 + $0x3b1] sm:$0xff] }
 0x401   : > { %v9748_v34 = vpop.f32.mrb[110].mxu1  ;;  %7050 = vmatprep.mubr.msk.bf16.mxu1 %vm2921_vm3, %v3984_v10  ;;  %v3952_v10 = vld [vmem:[#allocation2 + $0x3c9] sm:$0xff]  ;;  %v3953_v32 = vld [vmem:[#allocation2 + $0x3d1] sm:$0xff] }
 0x402   : > { %v5517_v62 = vpop.f32.mrb[111].mxu1  ;;  %v3990_v53 = vpack.c.bf16 %v3953_v32, %v3952_v10 }
 0x403   : > { %v3989_v62 = vpack.c.bf16 %v3951_v5, %v3950_v20 }
 0x407   : > { %v9751_v19 = vpop.f32.mrb[112].mxu1 }
 0x408   : > { %v5522_v63 = vpop.f32.mrb[113].mxu1  ;;  %7051 = vmatmul.mubr.msk.bf16.gmra.mrb[200].mxu1 %vm2921_vm3, %v3985_v18 }
 0x409   : > { %v9754_v0 = vpop.f32.mrb[114].mxu1  ;;  %7054 = vmatprep.mubr.msk.bf16.mxu1 %vm2921_vm3, %v3986_v52  ;;  %v3956_v52 = vld [vmem:[#allocation2 + $0x409] sm:$0xff]  ;;  %v3957_v63 = vld [vmem:[#allocation2 + $0x411] sm:$0xff] }
 0x40a   : > { %v5525_v37 = vpop.f32.mrb[115].mxu1  ;;  %v3992_v45 = vpack.c.bf16 %v3957_v63, %v3956_v52 }
 0x410   : > { %7055 = vmatmul.mubr.msk.bf16.gmra.mrb[204].mxu1 %vm2921_vm3, %v3987_v7  ;;  %v3962_v7 = vld [vmem:[#allocation2 + $0x469] sm:$0xff] }
 0x411   : > { %7058 = vmatprep.mubr.msk.bf16.mxu1 %vm2921_vm3, %v3988_v43  ;;  %v3963_v43 = vld [vmem:[#allocation2 + $0x471] sm:$0xff] }
 0x412   : > { %v3995_v20 = vpack.c.bf16 %v3963_v43, %v3962_v7 }
 0x417   : > { %v9759_v41 = vpop.f32.mrb[116].mxu1 }
 0x418   : > { %v5530_v25 = vpop.f32.mrb[117].mxu1  ;;  %7059 = vmatmul.mubr.msk.bf16.gmra.mrb[208].mxu1 %vm2921_vm3, %v3989_v62 }
 0x419   : > { %v9762_v2 = vpop.f32.mrb[118].mxu1  ;;  %7062 = vmatprep.mubr.msk.bf16.mxu1 %vm2921_vm3, %v3990_v53 }
 0x41a   : > { %v5533_v18 = vpop.f32.mrb[119].mxu1 }
 0x41f   : > { %v9765_v37 = vpop.f32.mrb[120].mxu1 }
 0x420   : > { %v5538_v26 = vpop.f32.mrb[121].mxu1  ;;  %7063 = vmatmul.mubr.msk.bf16.gmra.mrb[212].mxu1 %vm2921_vm3, %v9487_v15 }
 0x421   : > { %v9769_v22 = vpop.f32.mrb[122].mxu1  ;;  %7066 = vmatprep.mubr.msk.bf16.mxu1 %vm2921_vm3, %v3992_v45 }
 0x422   : > { %v5541_v51 = vpop.f32.mrb[123].mxu1 }
 0x428   : > { %7067 = vmatmul.mubr.msk.bf16.gmra.mrb[216].mxu1 %vm2921_vm3, %v9542_v36 }
 0x429   : > { %7070 = vmatprep.mubr.msk.bf16.mxu1 %vm2921_vm3, %v9559_v57 }
 0x42f   : > { %v9776_v5 = vpop.f32.mrb[124].mxu1 }
 0x430   : > { %v5546_v10 = vpop.f32.mrb[125].mxu1  ;;  %7071 = vmatmul.mubr.msk.bf16.gmra.mrb[220].mxu1 %vm2921_vm3, %v3995_v20 }
 0x431   : > { %v9779_v15 = vpop.f32.mrb[126].mxu1 }
 0x432   : > { %v5549_v32 = vpop.f32.mrb[127].mxu1 }
 0x437   : > { %v9781_v62 = vpop.f32.mrb[128].mxu1 }
 0x438   : > { %v5554_v53 = vpop.f32.mrb[129].mxu1 }
 0x439   : > { %v9783_v25 = vpop.f32.mrb[130].mxu1 }
 0x43a   : > { %10324 = vst [vmem:[#allocation21_spill] sm:$0xff] %v9783_v25  ;;  %v5557_v36 = vpop.f32.mrb[131].mxu1 }
 0x447   : > { %v9785_v18 = vpop.f32.mrb[132].mxu1 }
 0x448   : > { %v5562_v57 = vpop.f32.mrb[133].mxu1 }
 0x449   : > { %v9787_v52 = vpop.f32.mrb[134].mxu1 }
 0x44a   : > { %10325 = vst [vmem:[#allocation38_spill] sm:$0xff] %v9787_v52  ;;  %v5565_v63 = vpop.f32.mrb[135].mxu1 }
 0x44f   : > { %v9789_v45 = vpop.f32.mrb[136].mxu1 }
 0x450   : > { %10326 = vst [vmem:[#allocation4_spill] sm:$0xff] %v9789_v45  ;;  %v5570_v26 = vpop.f32.mrb[137].mxu1 }
 0x451   : > { %v9791_v51 = vpop.f32.mrb[138].mxu1 }
 0x452   : > { %10327 = vst [vmem:[#allocation34_spill] sm:$0xff] %v9791_v51  ;;  %v5573_v7 = vpop.f32.mrb[139].mxu1 }
 0x45f   : > { %v9793_v43 = vpop.f32.mrb[140].mxu1 }
 0x460   : > { %10328 = vst [vmem:[#allocation6_spill] sm:$0xff] %v9793_v43  ;;  %v5578_v20 = vpop.f32.mrb[141].mxu1 }
 0x461   : > { %v9795_v10 = vpop.f32.mrb[142].mxu1 }
 0x462   : > { %10329 = vst [vmem:[#allocation20_spill] sm:$0xff] %v9795_v10  ;;  %v5581_v32 = vpop.f32.mrb[143].mxu1 }
 0x467   : > { %v9797_v53 = vpop.f32.mrb[144].mxu1 }
 0x468   : > { %10330 = vst [vmem:[#allocation19_spill] sm:$0xff] %v9797_v53  ;;  %v5586_v36 = vpop.f32.mrb[145].mxu1 }
 0x469   : > { %v9799_v25 = vpop.f32.mrb[146].mxu1 }
 0x46a   : > { %10331 = vst [vmem:[#allocation22_spill] sm:$0xff] %v9799_v25  ;;  %v5589_v57 = vpop.f32.mrb[147].mxu1 }
 0x473   : > { %v9801_v52 = vpop.f32.mrb[148].mxu1 }
 0x474   : > { %10332 = vst [vmem:[#allocation37_spill] sm:$0xff] %v9801_v52  ;;  %v5594_v63 = vpop.f32.mrb[149].mxu1 }
 0x475   : > { %v9803_v45 = vpop.f32.mrb[150].mxu1 }
 0x476   : > { %10333 = vst [vmem:[#allocation35_spill] sm:$0xff] %v9803_v45  ;;  %v5597_v26 = vpop.f32.mrb[151].mxu1 }
 0x47b   : > { %v9805_v51 = vpop.f32.mrb[152].mxu1 }
 0x47c   : > { %10334 = vst [vmem:[#allocation5_spill] sm:$0xff] %v9805_v51  ;;  %v5602_v7 = vpop.f32.mrb[153].mxu1 }
 0x47d   : > { %v9807_v43 = vpop.f32.mrb[154].mxu1 }
 0x47e   : > { %10335 = vst [vmem:[#allocation51_spill] sm:$0xff] %v9807_v43  ;;  %v5605_v20 = vpop.f32.mrb[155].mxu1 }
 0x483   : > { %v9809_v10 = vpop.f32.mrb[156].mxu1 }
 0x484   : > { %v5610_v32 = vpop.f32.mrb[157].mxu1 }
 0x485   : > { %v9811_v53 = vpop.f32.mrb[158].mxu1 }
 0x486   : > { %10336 = vst [vmem:[#allocation23_spill] sm:$0xff] %v9811_v53  ;;  %v5613_v36 = vpop.f32.mrb[159].mxu1 }
 0x48b   : > { %v7012_v25 = vpop.f32.mrb[160].mxu1 }
 0x48c   : > { %v5658_v57 = vadd.f32 %v7012_v25, %v9508_v3  ;;  %v5649_v52 = vpop.f32.mrb[161].mxu1 }
 0x48d   : > { %v5650_v63 = vadd.f32 %v5649_v52, %v9472_v48  ;;  %v7013_v45 = vpop.f32.mrb[162].mxu1 }
 0x48e   : > { %v5661_v26 = vadd.f32 %v7013_v45, %v9514_v21  ;;  %v5652_v51 = vpop.f32.mrb[163].mxu1 }
 0x48f   : > { %v5904_v7 = vmax.f32 %v5650_v63, %v5658_v57  ;;  %v5653_v43 = vadd.f32 %v5652_v51, %v9483_v50 }
 0x491   : > { %5936 = vst.msk [vmem:[#allocation3] sm:$0xff] %vm4668_vm5, %v5904_v7  ;;  %v5905_v20 = vmax.f32 %v5653_v43, %v5661_v26 }
 0x493   : > { %5937 = vst.msk [vmem:[#allocation3 + $0x8] sm:$0xff] %vm4668_vm5, %v5905_v20  ;;  %v7016_v32 = vpop.f32.mrb[164].mxu1 }
 0x494   : > { %v5674_v36 = vadd.f32 %v7016_v32, %v9569_v47  ;;  %v5665_v53 = vpop.f32.mrb[165].mxu1  ;;  %v9827_v47 = vld [vmem:[%s9975_s4] ss:$0 sm:$0xff] }
 0x495   : > { %v5666_v3 = vadd.f32 %v5665_v53, %v9546_v23  ;;  %v7017_v48 = vpop.f32.mrb[166].mxu1 }
 0x496   : > { %v5677_v25 = vadd.f32 %v7017_v48, %v9572_v6  ;;  %v5668_v21 = vpop.f32.mrb[167].mxu1 }
 0x497   : > { %v5906_v52 = vmax.f32 %v5666_v3, %v5674_v36  ;;  %v5669_v45 = vadd.f32 %v5668_v21, %v9557_v24 }
 0x499   : > { %5938 = vst.msk [vmem:[#allocation3 + $0x10] sm:$0xff] %vm4668_vm5, %v5906_v52  ;;  %v5907_v50 = vmax.f32 %v5669_v45, %v5677_v25 }
 0x49a   : > { %v5968_v51 = vld [vmem:[#allocation3] ss:$2 sm:$0xff]  ;;  %v6000_v43 = vld [vmem:[#allocation3 + $0x1] ss:$2 sm:$0xff] }
 0x49b   : > { %v6031_v57 = vmax.f32 %v5968_v51, %v6000_v43  ;;  %5939 = vst.msk [vmem:[#allocation3 + $0x18] sm:$0xff] %vm4668_vm5, %v5907_v50  ;;  %v7020_v23 = vpop.f32.mrb[168].mxu1 }
 0x49c   : > { %v5690_v6 = vadd.f32 %v7020_v23, %v9598_v1  ;;  %v5681_v53 = vpop.f32.mrb[169].mxu1 }
 0x49d   : > { %v6054_v24 = vadd.f32 %v9827_v47, %v6031_v57  ;;  %v5682_v63 = vadd.f32 %v5681_v53, %v9586_v8  ;;  %v7021_v26 = vpop.f32.mrb[170].mxu1 }
 0x49e   : > { %v5693_v7 = vadd.f32 %v7021_v26, %v9600_v33  ;;  %v5684_v20 = vpop.f32.mrb[171].mxu1 }
 0x49f   : > { %v6070_v32 = vmax.f32 %v6054_v24, 0.0  ;;  %v5908_v36 = vmax.f32 %v5682_v63, %v5690_v6  ;;  %v5685_v3 = vadd.f32 %v5684_v20, %v9593_v9 }
 0x4a1   : > { %v6566_v1 = vpack.c.bf16 %v6070_v32, %v6070_v32  ;;  %5940 = vst.msk [vmem:[#allocation3 + $0x20] sm:$0xff] %vm4668_vm5, %v5908_v36  ;;  %v5909_v48 = vmax.f32 %v5685_v3, %v5693_v7 }
 0x4a2   : > { %v5970_v8 = vld [vmem:[#allocation3 + $0x10] ss:$2 sm:$0xff]  ;;  %v6002_v25 = vld [vmem:[#allocation3 + $0x11] ss:$2 sm:$0xff] }
 0x4a3   : > { %6151 = vst.msk [vmem:[%s9839_s10] sm:$0xf] %vm6150_vm6, %v6566_v1  ;;  %v6032_v33 = vmax.f32 %v5970_v8, %v6002_v25  ;;  %v7024_v21 = vpop.f32.mrb[172].mxu1 }
 0x4a4   : > { %5941 = vst.msk [vmem:[#allocation3 + $0x28] sm:$0xff] %vm4668_vm5, %v5909_v48  ;;  %v5706_v9 = vadd.f32 %v7024_v21, %v9622_v13  ;;  %v5697_v52 = vpop.f32.mrb[173].mxu1 }
 0x4a5   : > { %v6055_v45 = vadd.f32 %v9827_v47, %v6032_v33  ;;  %v5698_v50 = vadd.f32 %v5697_v52, %v9612_v49  ;;  %v7025_v51 = vpop.f32.mrb[174].mxu1 }
 0x4a6   : > { %v5709_v43 = vadd.f32 %v7025_v51, %v9624_v58  ;;  %v5700_v57 = vpop.f32.mrb[175].mxu1 }
 0x4a7   : > { %v6071_v23 = vmax.f32 %v6055_v45, 0.0  ;;  %v5910_v6 = vmax.f32 %v5698_v50, %v5706_v9  ;;  %v5701_v53 = vadd.f32 %v5700_v57, %v9618_v29 }
 0x4a9   : > { %v6567_v24 = vpack.c.bf16 %v6071_v23, %v6071_v23  ;;  %5942 = vst.msk [vmem:[#allocation3 + $0x30] sm:$0xff] %vm4668_vm5, %v5910_v6  ;;  %v5911_v63 = vmax.f32 %v5701_v53, %v5709_v43 }
 0x4ab   : > { %v5972_v26 = vld [vmem:[#allocation3 + $0x20] ss:$2 sm:$0xff]  ;;  %v6004_v7 = vld [vmem:[#allocation3 + $0x21] ss:$2 sm:$0xff]  ;;  %6152 = vst.msk [vmem:[%s9839_s10 + $0x4] sm:$0xf] %vm6150_vm6, %v6567_v24 }
 0x4ac   : > { %v6033_v13 = vmax.f32 %v5972_v26, %v6004_v7  ;;  %5943 = vst.msk [vmem:[#allocation3 + $0x38] sm:$0xff] %vm4668_vm5, %v5911_v63  ;;  %v7028_v49 = vpop.f32.mrb[176].mxu1 }
 0x4ad   : > { %v5722_v58 = vadd.f32 %v7028_v49, %v9646_v11  ;;  %v5713_v20 = vpop.f32.mrb[177].mxu1 }
 0x4ae   : > { %v6056_v32 = vadd.f32 %v9827_v47, %v6033_v13  ;;  %v5714_v29 = vadd.f32 %v5713_v20, %v9636_v30  ;;  %v7029_v36 = vpop.f32.mrb[178].mxu1 }
 0x4af   : > { %v5725_v3 = vadd.f32 %v7029_v36, %v9648_v27  ;;  %v5716_v1 = vpop.f32.mrb[179].mxu1 }
 0x4b0   : > { %v6072_v48 = vmax.f32 %v6056_v32, 0.0  ;;  %v5912_v8 = vmax.f32 %v5714_v29, %v5722_v58  ;;  %v5717_v25 = vadd.f32 %v5716_v1, %v9642_v35 }
 0x4b2   : > { %v6568_v33 = vpack.c.bf16 %v6072_v48, %v6072_v48  ;;  %5944 = vst.msk [vmem:[#allocation3 + $0x40] sm:$0xff] %vm4668_vm5, %v5912_v8  ;;  %v5913_v21 = vmax.f32 %v5717_v25, %v5725_v3 }
 0x4b3   : > { %v5974_v9 = vld [vmem:[#allocation3 + $0x30] ss:$2 sm:$0xff]  ;;  %v6006_v52 = vld [vmem:[#allocation3 + $0x31] ss:$2 sm:$0xff]  ;;  %v7032_v30 = vpop.f32.mrb[180].mxu1 }
 0x4b4   : > { %6153 = vst.msk [vmem:[%s9839_s10 + $0x8] sm:$0xf] %vm6150_vm6, %v6568_v33  ;;  %v6034_v11 = vmax.f32 %v5974_v9, %v6006_v52  ;;  %v5738_v27 = vadd.f32 %v7032_v30, %v9672_v46  ;;  %v5729_v45 = vpop.f32.mrb[181].mxu1 }
 0x4b5   : > { %5945 = vst.msk [vmem:[#allocation3 + $0x48] sm:$0xff] %vm4668_vm5, %v5913_v21  ;;  %v5730_v35 = vadd.f32 %v5729_v45, %v9660_v42  ;;  %v7033_v51 = vpop.f32.mrb[182].mxu1 }
 0x4b6   : > { %v6057_v50 = vadd.f32 %v9827_v47, %v6034_v11  ;;  %v5741_v43 = vadd.f32 %v7033_v51, %v9678_v61  ;;  %v5732_v57 = vpop.f32.mrb[183].mxu1 }
 0x4b7   : > { %v5914_v6 = vmax.f32 %v5730_v35, %v5738_v27  ;;  %v5733_v53 = vadd.f32 %v5732_v57, %v9666_v60 }
 0x4b8   : > { %v6073_v23 = vmax.f32 %v6057_v50, 0.0 }
 0x4b9   : > { %5946 = vst.msk [vmem:[#allocation3 + $0x50] sm:$0xff] %vm4668_vm5, %v5914_v6  ;;  %v5915_v63 = vmax.f32 %v5733_v53, %v5741_v43 }
 0x4ba   : > { %v6569_v24 = vpack.c.bf16 %v6073_v23, %v6073_v23 }
 0x4bb   : > { %5947 = vst.msk [vmem:[#allocation3 + $0x58] sm:$0xff] %vm4668_vm5, %v5915_v63  ;;  %v7036_v42 = vpop.f32.mrb[184].mxu1 }
 0x4bc   : > { %v5976_v26 = vld [vmem:[#allocation3 + $0x40] ss:$2 sm:$0xff]  ;;  %v6008_v7 = vld [vmem:[#allocation3 + $0x41] ss:$2 sm:$0xff]  ;;  %6154 = vst.msk [vmem:[%s9839_s10 + $0xc] sm:$0xf] %vm6150_vm6, %v6569_v24  ;;  %v5754_v61 = vadd.f32 %v7036_v42, %v9703_v40 }
 0x4bd   : > { %v6035_v46 = vmax.f32 %v5976_v26, %v6008_v7  ;;  %v5745_v13 = vpop.f32.mrb[185].mxu1 }
 0x4be   : > { %v5746_v60 = vadd.f32 %v5745_v13, %v9689_v31  ;;  %v7037_v58 = vpop.f32.mrb[186].mxu1 }
 0x4bf   : > { %v6058_v49 = vadd.f32 %v9827_v47, %v6035_v46  ;;  %v5757_v20 = vadd.f32 %v7037_v58, %v9705_v54  ;;  %v5748_v32 = vpop.f32.mrb[187].mxu1 }
 0x4c0   : > { %v5916_v36 = vmax.f32 %v5746_v60, %v5754_v61  ;;  %v5749_v3 = vadd.f32 %v5748_v32, %v9692_v12 }
 0x4c1   : > { %v6074_v29 = vmax.f32 %v6058_v49, 0.0 }
 0x4c2   : > { %5948 = vst.msk [vmem:[#allocation3 + $0x60] sm:$0xff] %vm4668_vm5, %v5916_v36  ;;  %v5917_v48 = vmax.f32 %v5749_v3, %v5757_v20  ;;  %v5978_v8 = vld [vmem:[#allocation3 + $0x50] ss:$2 sm:$0xff]  ;;  %v6010_v25 = vld [vmem:[#allocation3 + $0x51] ss:$2 sm:$0xff] }
 0x4c3   : > { %v6570_v1 = vpack.c.bf16 %v6074_v29, %v6074_v29  ;;  %v6036_v40 = vmax.f32 %v5978_v8, %v6010_v25  ;;  %v7040_v31 = vpop.f32.mrb[188].mxu1 }
 0x4c4   : > { %5949 = vst.msk [vmem:[#allocation3 + $0x68] sm:$0xff] %vm4668_vm5, %v5917_v48  ;;  %v5770_v54 = vadd.f32 %v7040_v31, %v9715_v44  ;;  %v5761_v33 = vpop.f32.mrb[189].mxu1 }
 0x4c5   : > { %6155 = vst.msk [vmem:[%s9839_s10 + $0x10] sm:$0xf] %vm6150_vm6, %v6570_v1  ;;  %v6059_v21 = vadd.f32 %v9827_v47, %v6036_v40  ;;  %v5762_v12 = vadd.f32 %v5761_v33, %v9709_v59  ;;  %v7041_v9 = vpop.f32.mrb[190].mxu1 }
 0x4c6   : > { %v5773_v52 = vadd.f32 %v7041_v9, %v9717_v4  ;;  %v5764_v11 = vpop.f32.mrb[191].mxu1 }
 0x4c7   : > { %v6075_v30 = vmax.f32 %v6059_v21, 0.0  ;;  %v5918_v27 = vmax.f32 %v5762_v12, %v5770_v54  ;;  %v5765_v45 = vadd.f32 %v5764_v11, %v9711_v14 }
 0x4c9   : > { %v6571_v50 = vpack.c.bf16 %v6075_v30, %v6075_v30  ;;  %5950 = vst.msk [vmem:[#allocation3 + $0x70] sm:$0xff] %vm4668_vm5, %v5918_v27  ;;  %v5919_v35 = vmax.f32 %v5765_v45, %v5773_v52 }
 0x4cb   : > { %v5980_v51 = vld [vmem:[#allocation3 + $0x60] ss:$2 sm:$0xff]  ;;  %v6012_v43 = vld [vmem:[#allocation3 + $0x61] ss:$2 sm:$0xff]  ;;  %6156 = vst.msk [vmem:[%s9839_s10 + $0x14] sm:$0xf] %vm6150_vm6, %v6571_v50 }
 0x4cc   : > { %v6037_v44 = vmax.f32 %v5980_v51, %v6012_v43  ;;  %5951 = vst.msk [vmem:[#allocation3 + $0x78] sm:$0xff] %vm4668_vm5, %v5919_v35  ;;  %v7044_v59 = vpop.f32.mrb[192].mxu1 }
 0x4cd   : > { %v5786_v4 = vadd.f32 %v7044_v59, %v9731_v17  ;;  %v5777_v57 = vpop.f32.mrb[193].mxu1 }
 0x4ce   : > { %v6060_v23 = vadd.f32 %v9827_v47, %v6037_v44  ;;  %v5778_v14 = vadd.f32 %v5777_v57, %v9723_v28  ;;  %v7045_v6 = vpop.f32.mrb[194].mxu1 }
 0x4cf   : > { %v5789_v53 = vadd.f32 %v7045_v6, %v9734_v55  ;;  %v5780_v24 = vpop.f32.mrb[195].mxu1 }
 0x4d0   : > { %v6076_v63 = vmax.f32 %v6060_v23, 0.0  ;;  %v5920_v26 = vmax.f32 %v5778_v14, %v5786_v4  ;;  %v5781_v7 = vadd.f32 %v5780_v24, %v9725_v16 }
 0x4d2   : > { %v6572_v46 = vpack.c.bf16 %v6076_v63, %v6076_v63  ;;  %5952 = vst.msk [vmem:[#allocation3 + $0x80] sm:$0xff] %vm4668_vm5, %v5920_v26  ;;  %v5921_v42 = vmax.f32 %v5781_v7, %v5789_v53  ;;  %v10337_v7 = vld [vmem:[#allocation38_spill] sm:$0xff] }
 0x4d3   : > { %v5982_v61 = vld [vmem:[#allocation3 + $0x70] ss:$2 sm:$0xff]  ;;  %v6014_v13 = vld [vmem:[#allocation3 + $0x71] ss:$2 sm:$0xff]  ;;  %v7048_v28 = vpop.f32.mrb[196].mxu1 }
 0x4d4   : > { %6157 = vst.msk [vmem:[%s9839_s10 + $0x18] sm:$0xf] %vm6150_vm6, %v6572_v46  ;;  %v6038_v17 = vmax.f32 %v5982_v61, %v6014_v13  ;;  %v5802_v55 = vadd.f32 %v7048_v28, %v9745_v39  ;;  %v5793_v49 = vpop.f32.mrb[197].mxu1 }
 0x4d5   : > { %5953 = vst.msk [vmem:[#allocation3 + $0x88] sm:$0xff] %vm4668_vm5, %v5921_v42  ;;  %v5794_v16 = vadd.f32 %v5793_v49, %v9737_v38  ;;  %v7049_v58 = vpop.f32.mrb[198].mxu1 }
 0x4d6   : > { %v6061_v60 = vadd.f32 %v9827_v47, %v6038_v17  ;;  %v5805_v20 = vadd.f32 %v7049_v58, %v9748_v34  ;;  %v5796_v32 = vpop.f32.mrb[199].mxu1  ;;  %v10338_v17 = vld [vmem:[#allocation21_spill] sm:$0xff]  ;;  %v10339_v58 = vld [vmem:[#allocation6_spill] sm:$0xff] }
 0x4d7   : > { %v5922_v36 = vmax.f32 %v5794_v16, %v5802_v55  ;;  %v5797_v3 = vadd.f32 %v5796_v32, %v9740_v56 }
 0x4d8   : > { %v6077_v29 = vmax.f32 %v6061_v60, 0.0 }
 0x4d9   : > { %5954 = vst.msk [vmem:[#allocation3 + $0x90] sm:$0xff] %vm4668_vm5, %v5922_v36  ;;  %v5923_v48 = vmax.f32 %v5797_v3, %v5805_v20  ;;  %v10340_v36 = vld [vmem:[#allocation4_spill] sm:$0xff] }
 0x4da   : > { %v6573_v1 = vpack.c.bf16 %v6077_v29, %v6077_v29 }
 0x4db   : > { %5955 = vst.msk [vmem:[#allocation3 + $0x98] sm:$0xff] %vm4668_vm5, %v5923_v48  ;;  %v7052_v38 = vpop.f32.mrb[200].mxu1  ;;  %v10341_v48 = vld [vmem:[#allocation20_spill] sm:$0xff] }
 0x4dc   : > { %v5984_v8 = vld [vmem:[#allocation3 + $0x80] ss:$2 sm:$0xff]  ;;  %v6016_v25 = vld [vmem:[#allocation3 + $0x81] ss:$2 sm:$0xff]  ;;  %6158 = vst.msk [vmem:[%s9839_s10 + $0x1c] sm:$0xf] %vm6150_vm6, %v6573_v1  ;;  %v5818_v34 = vadd.f32 %v7052_v38, %v9759_v41 }
 0x4dd   : > { %v6039_v39 = vmax.f32 %v5984_v8, %v6016_v25  ;;  %v5809_v40 = vpop.f32.mrb[201].mxu1 }
 0x4de   : > { %v5810_v56 = vadd.f32 %v5809_v40, %v9751_v19  ;;  %v7053_v54 = vpop.f32.mrb[202].mxu1 }
 0x4df   : > { %v6062_v31 = vadd.f32 %v9827_v47, %v6039_v39  ;;  %v5821_v33 = vadd.f32 %v7053_v54, %v9762_v2  ;;  %v5812_v21 = vpop.f32.mrb[203].mxu1 }
 0x4e0   : > { %v5924_v9 = vmax.f32 %v5810_v56, %v5818_v34  ;;  %v5813_v52 = vadd.f32 %v5812_v21, %v9754_v0  ;;  %v10342_v34 = vld [vmem:[#allocation34_spill] sm:$0xff] }
 0x4e1   : > { %v6078_v12 = vmax.f32 %v6062_v31, 0.0 }
 0x4e2   : > { %5956 = vst.msk [vmem:[#allocation3 + $0xa0] sm:$0xff] %vm4668_vm5, %v5924_v9  ;;  %v5925_v30 = vmax.f32 %v5813_v52, %v5821_v33  ;;  %v5986_v27 = vld [vmem:[#allocation3 + $0x90] ss:$2 sm:$0xff]  ;;  %v6018_v45 = vld [vmem:[#allocation3 + $0x91] ss:$2 sm:$0xff]  ;;  %v10343_v9 = vld [vmem:[#allocation37_spill] sm:$0xff] }
 0x4e3   : > { %v6574_v11 = vpack.c.bf16 %v6078_v12, %v6078_v12  ;;  %v6040_v41 = vmax.f32 %v5986_v27, %v6018_v45  ;;  %v7056_v19 = vpop.f32.mrb[204].mxu1  ;;  %v10344_v27 = vld [vmem:[#allocation19_spill] sm:$0xff] }
 0x4e4   : > { %5957 = vst.msk [vmem:[#allocation3 + $0xa8] sm:$0xff] %vm4668_vm5, %v5925_v30  ;;  %v5834_v2 = vadd.f32 %v7056_v19, %v9776_v5  ;;  %v5825_v50 = vpop.f32.mrb[205].mxu1  ;;  %v10345_v19 = vld [vmem:[#allocation35_spill] sm:$0xff] }
 0x4e5   : > { %6159 = vst.msk [vmem:[%s9839_s10 + $0x20] sm:$0xf] %vm6150_vm6, %v6574_v11  ;;  %v6063_v35 = vadd.f32 %v9827_v47, %v6040_v41  ;;  %v5826_v0 = vadd.f32 %v5825_v50, %v9765_v37  ;;  %v7057_v51 = vpop.f32.mrb[206].mxu1 }
 0x4e6   : > { %v5837_v43 = vadd.f32 %v7057_v51, %v9779_v15  ;;  %v5828_v44 = vpop.f32.mrb[207].mxu1  ;;  %v10346_v51 = vld [vmem:[#allocation22_spill] sm:$0xff] }
 0x4e7   : > { %v6079_v59 = vmax.f32 %v6063_v35, 0.0  ;;  %v5926_v4 = vmax.f32 %v5826_v0, %v5834_v2  ;;  %v5829_v57 = vadd.f32 %v5828_v44, %v9769_v22 }
 0x4e9   : > { %v6575_v23 = vpack.c.bf16 %v6079_v59, %v6079_v59  ;;  %5958 = vst.msk [vmem:[#allocation3 + $0xb0] sm:$0xff] %vm4668_vm5, %v5926_v4  ;;  %v5927_v14 = vmax.f32 %v5829_v57, %v5837_v43 }
 0x4eb   : > { %v5988_v6 = vld [vmem:[#allocation3 + $0xa0] ss:$2 sm:$0xff]  ;;  %v6020_v53 = vld [vmem:[#allocation3 + $0xa1] ss:$2 sm:$0xff]  ;;  %6160 = vst.msk [vmem:[%s9839_s10 + $0x24] sm:$0xf] %vm6150_vm6, %v6575_v23 }
 0x4ec   : > { %v6041_v5 = vmax.f32 %v5988_v6, %v6020_v53  ;;  %5959 = vst.msk [vmem:[#allocation3 + $0xb8] sm:$0xff] %vm4668_vm5, %v5927_v14  ;;  %v7060_v37 = vpop.f32.mrb[208].mxu1 }
 0x4ed   : > { %v5850_v15 = vadd.f32 %v7060_v37, %v9785_v18  ;;  %v5841_v24 = vpop.f32.mrb[209].mxu1  ;;  %v10347_v37 = vld [vmem:[#allocation5_spill] sm:$0xff] }
 0x4ee   : > { %v6064_v63 = vadd.f32 %v9827_v47, %v6041_v5  ;;  %v5842_v22 = vadd.f32 %v5841_v24, %v9781_v62  ;;  %v7061_v26 = vpop.f32.mrb[210].mxu1 }
 0x4ef   : > { %v5853_v46 = vadd.f32 %v7061_v26, %v10337_v7  ;;  %v5844_v42 = vpop.f32.mrb[211].mxu1 }
 0x4f0   : > { %v6080_v61 = vmax.f32 %v6064_v63, 0.0  ;;  %v5928_v13 = vmax.f32 %v5842_v22, %v5850_v15  ;;  %v5845_v28 = vadd.f32 %v5844_v42, %v10338_v17  ;;  %v10348_v63 = vld [vmem:[#allocation23_spill] sm:$0xff] }
 0x4f1   : > { %v10349_v42 = vld [vmem:[#allocation51_spill] sm:$0xff] }
 0x4f2   : > { %v6576_v55 = vpack.c.bf16 %v6080_v61, %v6080_v61  ;;  %5960 = vst.msk [vmem:[#allocation3 + $0xc0] sm:$0xff] %vm4668_vm5, %v5928_v13  ;;  %v5929_v49 = vmax.f32 %v5845_v28, %v5853_v46 }
 0x4f3   : > { %v5990_v60 = vld [vmem:[#allocation3 + $0xb0] ss:$2 sm:$0xff]  ;;  %v6022_v16 = vld [vmem:[#allocation3 + $0xb1] ss:$2 sm:$0xff]  ;;  %v7064_v62 = vpop.f32.mrb[212].mxu1 }
 0x4f4   : > { %6161 = vst.msk [vmem:[%s9839_s10 + $0x28] sm:$0xf] %vm6150_vm6, %v6576_v55  ;;  %v6042_v18 = vmax.f32 %v5990_v60, %v6022_v16  ;;  %v5866_v20 = vadd.f32 %v7064_v62, %v10339_v58  ;;  %v5857_v32 = vpop.f32.mrb[213].mxu1 }
 0x4f5   : > { %5961 = vst.msk [vmem:[#allocation3 + $0xc8] sm:$0xff] %vm4668_vm5, %v5929_v49  ;;  %v5858_v3 = vadd.f32 %v5857_v32, %v10340_v36  ;;  %v7065_v1 = vpop.f32.mrb[214].mxu1 }
 0x4f6   : > { %v6065_v29 = vadd.f32 %v9827_v47, %v6042_v18  ;;  %v5869_v8 = vadd.f32 %v7065_v1, %v10341_v48  ;;  %v5860_v25 = vpop.f32.mrb[215].mxu1 }
 0x4f7   : > { %v5930_v38 = vmax.f32 %v5858_v3, %v5866_v20  ;;  %v5861_v40 = vadd.f32 %v5860_v25, %v10342_v34 }
 0x4f8   : > { %v6081_v39 = vmax.f32 %v6065_v29, 0.0 }
 0x4f9   : > { %5962 = vst.msk [vmem:[#allocation3 + $0xd0] sm:$0xff] %vm4668_vm5, %v5930_v38  ;;  %v5931_v56 = vmax.f32 %v5861_v40, %v5869_v8 }
 0x4fa   : > { %v6577_v31 = vpack.c.bf16 %v6081_v39, %v6081_v39 }
 0x4fb   : > { %5963 = vst.msk [vmem:[#allocation3 + $0xd8] sm:$0xff] %vm4668_vm5, %v5931_v56  ;;  %v7068_v12 = vpop.f32.mrb[216].mxu1 }
 0x4fc   : > { %v5992_v54 = vld [vmem:[#allocation3 + $0xc0] ss:$2 sm:$0xff]  ;;  %v6024_v33 = vld [vmem:[#allocation3 + $0xc1] ss:$2 sm:$0xff]  ;;  %6162 = vst.msk [vmem:[%s9839_s10 + $0x2c] sm:$0xf] %vm6150_vm6, %v6577_v31  ;;  %v5882_v52 = vadd.f32 %v7068_v12, %v10343_v9 }
 0x4fd   : > { %v6043_v21 = vmax.f32 %v5992_v54, %v6024_v33  ;;  %v5873_v11 = vpop.f32.mrb[217].mxu1 }
 0x4fe   : > { %v5874_v45 = vadd.f32 %v5873_v11, %v10344_v27  ;;  %v7069_v41 = vpop.f32.mrb[218].mxu1 }
 0x4ff   : > { %v6066_v30 = vadd.f32 %v9827_v47, %v6043_v21  ;;  %v5885_v2 = vadd.f32 %v7069_v41, %v10345_v19  ;;  %v5876_v50 = vpop.f32.mrb[219].mxu1 }
 0x500   : > { %v5932_v0 = vmax.f32 %v5874_v45, %v5882_v52  ;;  %v5877_v43 = vadd.f32 %v5876_v50, %v10346_v51 }
 0x501   : > { %v6082_v35 = vmax.f32 %v6066_v30, 0.0 }
 0x502   : > { %5964 = vst.msk [vmem:[#allocation3 + $0xe0] sm:$0xff] %vm4668_vm5, %v5932_v0  ;;  %v5933_v59 = vmax.f32 %v5877_v43, %v5885_v2  ;;  %v5994_v4 = vld [vmem:[#allocation3 + $0xd0] ss:$2 sm:$0xff]  ;;  %v6026_v57 = vld [vmem:[#allocation3 + $0xd1] ss:$2 sm:$0xff] }
 0x503   : > { %v6578_v44 = vpack.c.bf16 %v6082_v35, %v6082_v35  ;;  %v6044_v23 = vmax.f32 %v5994_v4, %v6026_v57  ;;  %v7072_v14 = vpop.f32.mrb[220].mxu1 }
 0x504   : > { %5965 = vst.msk [vmem:[#allocation3 + $0xe8] sm:$0xff] %vm4668_vm5, %v5933_v59  ;;  %v5898_v6 = vadd.f32 %v7072_v14, %v9809_v10  ;;  %v5889_v53 = vpop.f32.mrb[221].mxu1 }
 0x505   : > { %6163 = vst.msk [vmem:[%s9839_s10 + $0x30] sm:$0xf] %vm6150_vm6, %v6578_v44  ;;  %v6067_v5 = vadd.f32 %v9827_v47, %v6044_v23  ;;  %v5890_v15 = vadd.f32 %v5889_v53, %v10347_v37  ;;  %v7073_v24 = vpop.f32.mrb[222].mxu1 }
 0x506   : > { %v5901_v22 = vadd.f32 %v7073_v24, %v10348_v63  ;;  %v5892_v26 = vpop.f32.mrb[223].mxu1 }
 0x507   : > { %v6083_v7 = vmax.f32 %v6067_v5, 0.0  ;;  %v5934_v46 = vmax.f32 %v5890_v15, %v5898_v6  ;;  %v5893_v61 = vadd.f32 %v5892_v26, %v10349_v42 }
 0x509   : > { %v6579_v13 = vpack.c.bf16 %v6083_v7, %v6083_v7  ;;  %5966 = vst.msk [vmem:[#allocation3 + $0xf0] sm:$0xff] %vm4668_vm5, %v5934_v46  ;;  %v5935_v17 = vmax.f32 %v5893_v61, %v5901_v22 }
 0x50b   : > { %v5996_v10 = vld [vmem:[#allocation3 + $0xe0] ss:$2 sm:$0xff]  ;;  %v6028_v28 = vld [vmem:[#allocation3 + $0xe1] ss:$2 sm:$0xff]  ;;  %6164 = vst.msk [vmem:[%s9839_s10 + $0x34] sm:$0xf] %vm6150_vm6, %v6579_v13 }
 0x50c   : > { %v6045_v55 = vmax.f32 %v5996_v10, %v6028_v28  ;;  %5967 = vst.msk [vmem:[#allocation3 + $0xf8] sm:$0xff] %vm4668_vm5, %v5935_v17 }
 0x50e   : > { %v6068_v49 = vadd.f32 %v9827_v47, %v6045_v55 }
 0x510   : > { %v6084_v60 = vmax.f32 %v6068_v49, 0.0 }
 0x512   : > { %v6580_v16 = vpack.c.bf16 %v6084_v60, %v6084_v60 }
 0x513   : > { %v5998_v18 = vld [vmem:[#allocation3 + $0xf0] ss:$2 sm:$0xff]  ;;  %v6030_v62 = vld [vmem:[#allocation3 + $0xf1] ss:$2 sm:$0xff] }
 0x514   : > { %6165 = vst.msk [vmem:[%s9839_s10 + $0x38] sm:$0xf] %vm6150_vm6, %v6580_v16  ;;  %v6046_v58 = vmax.f32 %v5998_v18, %v6030_v62 }
 0x516   : > { %v6069_v20 = vadd.f32 %v9827_v47, %v6046_v58 }
 0x518   : > { %v6085_v32 = vmax.f32 %v6069_v20, 0.0 }
 0x51a   : > { %v6581_v29 = vpack.c.bf16 %v6085_v32, %v6085_v32 }
 0x51c   : > { %6166 = vst.msk [vmem:[%s9839_s10 + $0x3c] sm:$0xf] %vm6150_vm6, %v6581_v29 }
 0x51d PF: > { %s15_s18 = sadd.s32 1, %s7247_s18  }
 0x51e   : > { %p12_p4 = scmp.ge.s32.totalorder %s15_s18, 4  }
 0x520   :  { %14 = sbr.rel (!%p12_p4) target bundleno = 1 (0x1), region = 103 }

</bundles_post_ra>
